<compile_context>
chip_gen: v7x
topology: tpu7x:2x2x1
jax: 0.10.0
libtpu: 0.0.40
codegen_flags: <defaults>
</compile_context>

<pallas_src>
import jax
import jax.numpy as jnp
from jax import lax
from jax.experimental import pallas as pl
from jax.experimental.pallas import tpu as pltpu

CP = 128  # channel padding -> lane-dense tiles and full-K/N MXU matmuls


def _make_kernel(RP, WP, GUARD, TR, nchunks):
    """Build the fused 6-application conv kernel for the given static sizes."""

    def kernel(x_ref, w_ref, b_ref, mask_ref, o_ref, buf_a, buf_b):
        # x_ref:    (GUARD + RP + GUARD, CP)  guard+spatially padded input rows
        # w_ref:    (9, CP, CP)  tap-major weights, w_ref[k][ci, co]
        # b_ref:    (1, CP)
        # mask_ref: (RP, CP)  1.0 on real pixels, 0.0 on the padding ring
        # o_ref:    (RP, CP)
        # buf_a/b:  (GUARD + RP + GUARD, CP)  ping-pong activation buffers

        # Guard rows are never written by the layer stores below; zero the
        # scratch once so every shifted tap read is a well-defined zero.
        buf_a[...] = jnp.zeros_like(buf_a)
        buf_b[...] = jnp.zeros_like(buf_b)

        bias = b_ref[...]  # (1, CP) -- hoisted out of all loops

        def conv_layer(src, dst, dst_guard, relu, use_mask):
            def chunk(c, carry):
                row0 = pl.multiple_of(c * TR, 8)
                acc = jnp.zeros((TR, CP), jnp.float32)
                for kh in range(3):
                    for kw in range(3):
                        shift = (kh - 1) * WP + (kw - 1)
                        xs = src[pl.ds(GUARD + row0 + shift, TR), :]
                        acc = acc + jnp.dot(
                            xs, w_ref[kh * 3 + kw],
                            preferred_element_type=jnp.float32)
                y = acc + bias
                if relu:
                    y = jnp.maximum(y, 0.0)
                if use_mask:
                    # Re-zero the padding ring so it acts as zero padding for
                    # the next conv application.
                    y = y * mask_ref[pl.ds(row0, TR), :]
                dst[pl.ds(dst_guard + row0, TR), :] = y
                return carry

            lax.fori_loop(0, nchunks, chunk, 0)

        # for _ in range(3): out = ReLU(conv1(out)); out = conv1(out)
        conv_layer(x_ref, buf_a, GUARD, relu=True,  use_mask=True)
        conv_layer(buf_a, buf_b, GUARD, relu=False, use_mask=True)
        conv_layer(buf_b, buf_a, GUARD, relu=True,  use_mask=True)
        conv_layer(buf_a, buf_b, GUARD, relu=False, use_mask=True)
        conv_layer(buf_b, buf_a, GUARD, relu=True,  use_mask=True)
        conv_layer(buf_a, o_ref, 0,     relu=False, use_mask=False)

    return kernel


@jax.jit
def recursive_net_forward(x, w, b):
    """RecursiveNet forward.

    x: (N, C, H, W) float32 (NCHW, PyTorch layout)
    w: (C, C, 3, 3) float32 (OIHW, PyTorch Conv2d weight)
    b: (C,) float32
    """
    N, C, H, W = x.shape
    assert w.shape == (C, C, 3, 3) and b.shape == (C,)
    assert C <= CP
    HP, WP = H + 2, W + 2
    RP = N * HP * WP                         # rows of the padded slab
    GUARD = ((WP + 1 + 7) // 8) * 8          # >= max tap shift, sublane-aligned
    RTOT = GUARD + RP + GUARD
    # Largest row chunk that divides RP, stays sublane-aligned and <= 128 rows.
    TR = max(t for t in range(8, 129, 8) if RP % t == 0)
    nchunks = RP // TR

    # ---- one-time wrapper-side data plumbing -------------------------------
    # Activations: NCHW -> NHWC -> zero-pad H/W by 1 and channels to CP ->
    # flatten to rows -> add zero guard rows for the shifted tap reads.
    x_rows = jnp.transpose(x, (0, 2, 3, 1))
    x_rows = jnp.pad(x_rows, ((0, 0), (1, 1), (1, 1), (0, CP - C)))
    x_rows = x_rows.reshape(RP, CP)
    x_rows = jnp.pad(x_rows, ((GUARD, GUARD), (0, 0)))

    # Weights: OIHW (co, ci, kh, kw) -> (kh, kw, ci, co) -> (9, ci, co), padded.
    wk = jnp.transpose(w, (2, 3, 1, 0)).reshape(9, C, C)
    wk = jnp.pad(wk, ((0, 0), (0, CP - C), (0, CP - C)))
    bk = jnp.pad(b, (0, CP - C)).reshape(1, CP)

    # 1.0 on real pixels, 0.0 on the spatial padding ring.
    hp = jnp.arange(HP)
    wp = jnp.arange(WP)
    interior = (((hp >= 1) & (hp <= H))[:, None]
                & ((wp >= 1) & (wp <= W))[None, :])
    mask = jnp.broadcast_to(interior[None, :, :, None], (N, HP, WP, CP))
    mask = mask.reshape(RP, CP).astype(jnp.float32)

    kernel = _make_kernel(RP, WP, GUARD, TR, nchunks)
    out_rows = pl.pallas_call(
        kernel,
        out_shape=jax.ShapeDtypeStruct((RP, CP), jnp.float32),
        in_specs=[pl.BlockSpec(memory_space=pltpu.MemorySpace.VMEM)] * 4,
        out_specs=pl.BlockSpec(memory_space=pltpu.MemorySpace.VMEM),
        scratch_shapes=[
            pltpu.VMEM((RTOT, CP), jnp.float32),
            pltpu.VMEM((RTOT, CP), jnp.float32),
        ],
    )(x_rows, wk, bk, mask)

    out = out_rows.reshape(N, HP, WP, CP)[:, 1:H + 1, 1:W + 1, :C]
    return jnp.transpose(out, (0, 3, 1, 2))  # back to NCHW


def _reference(x, w, b):
    """Pure-XLA reference matching the PyTorch module."""
    dn = lax.conv_dimension_numbers(x.shape, w.shape, ("NCHW", "OIHW", "NCHW"))
    bias = b.reshape(1, -1, 1, 1)

    def conv(t):
        return lax.conv_general_dilated(
            t, w, window_strides=(1, 1), padding=((1, 1), (1, 1)),
            dimension_numbers=dn, precision=lax.Precision.HIGHEST) + bias

    out = x
    for _ in range(3):
        out = jnp.maximum(conv(out), 0.0)   # self.activation(self.conv1(out))
        out = conv(out)                     # self.conv1(out)
    return out


if __name__ == "__main__":
    key = jax.random.PRNGKey(0)
    k_x, k_w, k_b = jax.random.split(key, 3)

    # Channels are fixed at 64 by the module; small batch/spatial for the demo.
    N, C, H, W = 2, 64, 16, 16
    x = jax.random.normal(k_x, (N, C, H, W), dtype=jnp.float32)
    w = jax.random.normal(k_w, (C, C, 3, 3), dtype=jnp.float32) * 0.05
    b = jax.random.normal(k_b, (C,), dtype=jnp.float32) * 0.05

    out = recursive_net_forward(x, w, b)
    out = jax.block_until_ready(out)

    ref = _reference(x, w, b)
    assert out.shape == (N, C, H, W), out.shape
    # Tolerance accommodates MXU accumulation-order / pass differences across
    # 6 stacked convs; structural errors would be O(1) and fail immediately.
    assert jnp.allclose(out, ref, atol=5e-2, rtol=5e-2), (
        "max abs err = %f" % float(jnp.max(jnp.abs(out - ref))))

    print("KERNEL_OK")
</pallas_src>

<mosaic_0001>
module attributes {stable_mosaic.version = 11 : i64} {
  func.func @kernel(%arg0: memref<696x128xf32, #tpu.memory_space<vmem>>, %arg1: memref<9x128x128xf32, #tpu.memory_space<vmem>>, %arg2: memref<1x128xf32, #tpu.memory_space<vmem>>, %arg3: memref<648x128xf32, #tpu.memory_space<vmem>>, %arg4: memref<648x128xf32, #tpu.memory_space<vmem>>, %arg5: memref<696x128xf32, #tpu.memory_space<vmem>>, %arg6: memref<696x128xf32, #tpu.memory_space<vmem>>) attributes {dimension_semantics = [], scalar_prefetch = 0 : i64, scratch_operands = 2 : i64, tpu.core_type = #tpu.core_type<tc>} {
    %cst = arith.constant 0.000000e+00 : f32
    %0 = vector.broadcast %cst : f32 to vector<696x128xf32>
    %c0 = arith.constant 0 : index
    %c0_0 = arith.constant 0 : index
    %1 = vector.load %arg5[%c0, %c0_0] : memref<696x128xf32, #tpu.memory_space<vmem>>, vector<696x128xf32>
    tpu.vector_store %arg5[%c0, %c0_0], %0 {strides = array<i32>} : memref<696x128xf32, #tpu.memory_space<vmem>>, vector<696x128xf32>,
    %cst_1 = arith.constant 0.000000e+00 : f32
    %2 = vector.broadcast %cst_1 : f32 to vector<696x128xf32>
    %c0_2 = arith.constant 0 : index
    %c0_3 = arith.constant 0 : index
    %3 = vector.load %arg6[%c0_2, %c0_3] : memref<696x128xf32, #tpu.memory_space<vmem>>, vector<696x128xf32>
    tpu.vector_store %arg6[%c0_2, %c0_3], %2 {strides = array<i32>} : memref<696x128xf32, #tpu.memory_space<vmem>>, vector<696x128xf32>,
    %c0_4 = arith.constant 0 : index
    %c0_5 = arith.constant 0 : index
    %4 = vector.load %arg2[%c0_4, %c0_5] : memref<1x128xf32, #tpu.memory_space<vmem>>, vector<1x128xf32>
    %c0_i32 = arith.constant 0 : i32
    %c9_i32 = arith.constant 9 : i32
    %5 = arith.addi %c0_i32, %c9_i32 : i32
    %c1_i32 = arith.constant 1 : i32
    scf.for %arg7 = %c0_i32 to %5 step %c1_i32  : i32 {
      %c72_i32 = arith.constant 72 : i32
      %11 = arith.muli %arg7, %c72_i32 : i32
      %12 = tpu.assume_multiple %11, 8 : i32
      %cst_27 = arith.constant 0.000000e+00 : f32
      %13 = vector.broadcast %cst_27 : f32 to vector<72x128xf32>
      %c24_i32 = arith.constant 24 : i32
      %14 = arith.addi %c24_i32, %12 : i32
      %c-19_i32 = arith.constant -19 : i32
      %15 = arith.addi %14, %c-19_i32 : i32
      %16 = arith.index_cast %15 : i32 to index
      %c0_28 = arith.constant 0 : index
      %17 = vector.load %arg0[%16, %c0_28] : memref<696x128xf32, #tpu.memory_space<vmem>>, vector<72x128xf32>
      %c0_29 = arith.constant 0 : index
      %c0_30 = arith.constant 0 : index
      %c0_31 = arith.constant 0 : index
      %18 = vector.load %arg1[%c0_29, %c0_30, %c0_31] : memref<9x128x128xf32, #tpu.memory_space<vmem>>, vector<1x128x128xf32>
      %19 = vector.shape_cast %18 : vector<1x128x128xf32> to vector<128x128xf32>
      %cst_32 = arith.constant dense<0.000000e+00> : vector<72x128xf32>
      %20 = tpu.matmul %17, %19, %cst_32 {dimension_numbers = #tpu.dot_dimension_numbers<[1], [0], [0], [1], [0, 0, 1, 1], [], []>} : vector<72x128xf32>, vector<128x128xf32>, vector<72x128xf32> -> vector<72x128xf32>
      %21 = arith.addf %13, %20 : vector<72x128xf32>
      %c24_i32_33 = arith.constant 24 : i32
      %22 = arith.addi %c24_i32_33, %12 : i32
      %c-18_i32 = arith.constant -18 : i32
      %23 = arith.addi %22, %c-18_i32 : i32
      %24 = arith.index_cast %23 : i32 to index
      %c0_34 = arith.constant 0 : index
      %25 = vector.load %arg0[%24, %c0_34] : memref<696x128xf32, #tpu.memory_space<vmem>>, vector<72x128xf32>
      %c1 = arith.constant 1 : index
      %c0_35 = arith.constant 0 : index
      %c0_36 = arith.constant 0 : index
      %26 = vector.load %arg1[%c1, %c0_35, %c0_36] : memref<9x128x128xf32, #tpu.memory_space<vmem>>, vector<1x128x128xf32>
      %27 = vector.shape_cast %26 : vector<1x128x128xf32> to vector<128x128xf32>
      %cst_37 = arith.constant dense<0.000000e+00> : vector<72x128xf32>
      %28 = tpu.matmul %25, %27, %cst_37 {dimension_numbers = #tpu.dot_dimension_numbers<[1], [0], [0], [1], [0, 0, 1, 1], [], []>} : vector<72x128xf32>, vector<128x128xf32>, vector<72x128xf32> -> vector<72x128xf32>
      %29 = arith.addf %21, %28 : vector<72x128xf32>
      %c24_i32_38 = arith.constant 24 : i32
      %30 = arith.addi %c24_i32_38, %12 : i32
      %c-17_i32 = arith.constant -17 : i32
      %31 = arith.addi %30, %c-17_i32 : i32
      %32 = arith.index_cast %31 : i32 to index
      %c0_39 = arith.constant 0 : index
      %33 = vector.load %arg0[%32, %c0_39] : memref<696x128xf32, #tpu.memory_space<vmem>>, vector<72x128xf32>
      %c2 = arith.constant 2 : index
      %c0_40 = arith.constant 0 : index
      %c0_41 = arith.constant 0 : index
      %34 = vector.load %arg1[%c2, %c0_40, %c0_41] : memref<9x128x128xf32, #tpu.memory_space<vmem>>, vector<1x128x128xf32>
      %35 = vector.shape_cast %34 : vector<1x128x128xf32> to vector<128x128xf32>
      %cst_42 = arith.constant dense<0.000000e+00> : vector<72x128xf32>
      %36 = tpu.matmul %33, %35, %cst_42 {dimension_numbers = #tpu.dot_dimension_numbers<[1], [0], [0], [1], [0, 0, 1, 1], [], []>} : vector<72x128xf32>, vector<128x128xf32>, vector<72x128xf32> -> vector<72x128xf32>
      %37 = arith.addf %29, %36 : vector<72x128xf32>
      %c24_i32_43 = arith.constant 24 : i32
      %38 = arith.addi %c24_i32_43, %12 : i32
      %c-1_i32 = arith.constant -1 : i32
      %39 = arith.addi %38, %c-1_i32 : i32
      %40 = arith.index_cast %39 : i32 to index
      %c0_44 = arith.constant 0 : index
      %41 = vector.load %arg0[%40, %c0_44] : memref<696x128xf32, #tpu.memory_space<vmem>>, vector<72x128xf32>
      %c3 = arith.constant 3 : index
      %c0_45 = arith.constant 0 : index
      %c0_46 = arith.constant 0 : index
      %42 = vector.load %arg1[%c3, %c0_45, %c0_46] : memref<9x128x128xf32, #tpu.memory_space<vmem>>, vector<1x128x128xf32>
      %43 = vector.shape_cast %42 : vector<1x128x128xf32> to vector<128x128xf32>
      %cst_47 = arith.constant dense<0.000000e+00> : vector<72x128xf32>
      %44 = tpu.matmul %41, %43, %cst_47 {dimension_numbers = #tpu.dot_dimension_numbers<[1], [0], [0], [1], [0, 0, 1, 1], [], []>} : vector<72x128xf32>, vector<128x128xf32>, vector<72x128xf32> -> vector<72x128xf32>
      %45 = arith.addf %37, %44 : vector<72x128xf32>
      %c24_i32_48 = arith.constant 24 : i32
      %46 = arith.addi %c24_i32_48, %12 : i32
      %c0_i32_49 = arith.constant 0 : i32
      %47 = arith.addi %46, %c0_i32_49 : i32
      %48 = arith.index_cast %47 : i32 to index
      %c0_50 = arith.constant 0 : index
      %49 = vector.load %arg0[%48, %c0_50] : memref<696x128xf32, #tpu.memory_space<vmem>>, vector<72x128xf32>
      %c4 = arith.constant 4 : index
      %c0_51 = arith.constant 0 : index
      %c0_52 = arith.constant 0 : index
      %50 = vector.load %arg1[%c4, %c0_51, %c0_52] : memref<9x128x128xf32, #tpu.memory_space<vmem>>, vector<1x128x128xf32>
      %51 = vector.shape_cast %50 : vector<1x128x128xf32> to vector<128x128xf32>
      %cst_53 = arith.constant dense<0.000000e+00> : vector<72x128xf32>
      %52 = tpu.matmul %49, %51, %cst_53 {dimension_numbers = #tpu.dot_dimension_numbers<[1], [0], [0], [1], [0, 0, 1, 1], [], []>} : vector<72x128xf32>, vector<128x128xf32>, vector<72x128xf32> -> vector<72x128xf32>
      %53 = arith.addf %45, %52 : vector<72x128xf32>
      %c24_i32_54 = arith.constant 24 : i32
      %54 = arith.addi %c24_i32_54, %12 : i32
      %c1_i32_55 = arith.constant 1 : i32
      %55 = arith.addi %54, %c1_i32_55 : i32
      %56 = arith.index_cast %55 : i32 to index
      %c0_56 = arith.constant 0 : index
      %57 = vector.load %arg0[%56, %c0_56] : memref<696x128xf32, #tpu.memory_space<vmem>>, vector<72x128xf32>
      %c5 = arith.constant 5 : index
      %c0_57 = arith.constant 0 : index
      %c0_58 = arith.constant 0 : index
      %58 = vector.load %arg1[%c5, %c0_57, %c0_58] : memref<9x128x128xf32, #tpu.memory_space<vmem>>, vector<1x128x128xf32>
      %59 = vector.shape_cast %58 : vector<1x128x128xf32> to vector<128x128xf32>
      %cst_59 = arith.constant dense<0.000000e+00> : vector<72x128xf32>
      %60 = tpu.matmul %57, %59, %cst_59 {dimension_numbers = #tpu.dot_dimension_numbers<[1], [0], [0], [1], [0, 0, 1, 1], [], []>} : vector<72x128xf32>, vector<128x128xf32>, vector<72x128xf32> -> vector<72x128xf32>
      %61 = arith.addf %53, %60 : vector<72x128xf32>
      %c24_i32_60 = arith.constant 24 : i32
      %62 = arith.addi %c24_i32_60, %12 : i32
      %c17_i32 = arith.constant 17 : i32
      %63 = arith.addi %62, %c17_i32 : i32
      %64 = arith.index_cast %63 : i32 to index
      %c0_61 = arith.constant 0 : index
      %65 = vector.load %arg0[%64, %c0_61] : memref<696x128xf32, #tpu.memory_space<vmem>>, vector<72x128xf32>
      %c6 = arith.constant 6 : index
      %c0_62 = arith.constant 0 : index
      %c0_63 = arith.constant 0 : index
      %66 = vector.load %arg1[%c6, %c0_62, %c0_63] : memref<9x128x128xf32, #tpu.memory_space<vmem>>, vector<1x128x128xf32>
      %67 = vector.shape_cast %66 : vector<1x128x128xf32> to vector<128x128xf32>
      %cst_64 = arith.constant dense<0.000000e+00> : vector<72x128xf32>
      %68 = tpu.matmul %65, %67, %cst_64 {dimension_numbers = #tpu.dot_dimension_numbers<[1], [0], [0], [1], [0, 0, 1, 1], [], []>} : vector<72x128xf32>, vector<128x128xf32>, vector<72x128xf32> -> vector<72x128xf32>
      %69 = arith.addf %61, %68 : vector<72x128xf32>
      %c24_i32_65 = arith.constant 24 : i32
      %70 = arith.addi %c24_i32_65, %12 : i32
      %c18_i32 = arith.constant 18 : i32
      %71 = arith.addi %70, %c18_i32 : i32
      %72 = arith.index_cast %71 : i32 to index
      %c0_66 = arith.constant 0 : index
      %73 = vector.load %arg0[%72, %c0_66] : memref<696x128xf32, #tpu.memory_space<vmem>>, vector<72x128xf32>
      %c7 = arith.constant 7 : index
      %c0_67 = arith.constant 0 : index
      %c0_68 = arith.constant 0 : index
      %74 = vector.load %arg1[%c7, %c0_67, %c0_68] : memref<9x128x128xf32, #tpu.memory_space<vmem>>, vector<1x128x128xf32>
      %75 = vector.shape_cast %74 : vector<1x128x128xf32> to vector<128x128xf32>
      %cst_69 = arith.constant dense<0.000000e+00> : vector<72x128xf32>
      %76 = tpu.matmul %73, %75, %cst_69 {dimension_numbers = #tpu.dot_dimension_numbers<[1], [0], [0], [1], [0, 0, 1, 1], [], []>} : vector<72x128xf32>, vector<128x128xf32>, vector<72x128xf32> -> vector<72x128xf32>
      %77 = arith.addf %69, %76 : vector<72x128xf32>
      %c24_i32_70 = arith.constant 24 : i32
      %78 = arith.addi %c24_i32_70, %12 : i32
      %c19_i32 = arith.constant 19 : i32
      %79 = arith.addi %78, %c19_i32 : i32
      %80 = arith.index_cast %79 : i32 to index
      %c0_71 = arith.constant 0 : index
      %81 = vector.load %arg0[%80, %c0_71] : memref<696x128xf32, #tpu.memory_space<vmem>>, vector<72x128xf32>
      %c8 = arith.constant 8 : index
      %c0_72 = arith.constant 0 : index
      %c0_73 = arith.constant 0 : index
      %82 = vector.load %arg1[%c8, %c0_72, %c0_73] : memref<9x128x128xf32, #tpu.memory_space<vmem>>, vector<1x128x128xf32>
      %83 = vector.shape_cast %82 : vector<1x128x128xf32> to vector<128x128xf32>
      %cst_74 = arith.constant dense<0.000000e+00> : vector<72x128xf32>
      %84 = tpu.matmul %81, %83, %cst_74 {dimension_numbers = #tpu.dot_dimension_numbers<[1], [0], [0], [1], [0, 0, 1, 1], [], []>} : vector<72x128xf32>, vector<128x128xf32>, vector<72x128xf32> -> vector<72x128xf32>
      %85 = arith.addf %77, %84 : vector<72x128xf32>
      %86 = vector.broadcast %4 : vector<1x128xf32> to vector<72x128xf32>
      %87 = arith.addf %85, %86 : vector<72x128xf32>
      %cst_75 = arith.constant 0.000000e+00 : f32
      %88 = vector.broadcast %cst_75 : f32 to vector<72x128xf32>
      %89 = arith.maximumf %87, %88 : vector<72x128xf32>
      %90 = arith.index_cast %12 : i32 to index
      %c0_76 = arith.constant 0 : index
      %91 = vector.load %arg3[%90, %c0_76] : memref<648x128xf32, #tpu.memory_space<vmem>>, vector<72x128xf32>
      %92 = arith.mulf %89, %91 : vector<72x128xf32>
      %c24_i32_77 = arith.constant 24 : i32
      %93 = arith.addi %c24_i32_77, %12 : i32
      %94 = arith.index_cast %93 : i32 to index
      %c0_78 = arith.constant 0 : index
      %95 = vector.load %arg5[%94, %c0_78] : memref<696x128xf32, #tpu.memory_space<vmem>>, vector<72x128xf32>
      tpu.vector_store %arg5[%94, %c0_78], %92 {strides = array<i32>} : memref<696x128xf32, #tpu.memory_space<vmem>>, vector<72x128xf32>,
    }
    %c9_i32_6 = arith.constant 9 : i32
    %c0_i32_7 = arith.constant 0 : i32
    %c9_i32_8 = arith.constant 9 : i32
    %6 = arith.addi %c0_i32_7, %c9_i32_8 : i32
    %c1_i32_9 = arith.constant 1 : i32
    scf.for %arg7 = %c0_i32_7 to %6 step %c1_i32_9  : i32 {
      %c72_i32 = arith.constant 72 : i32
      %11 = arith.muli %arg7, %c72_i32 : i32
      %12 = tpu.assume_multiple %11, 8 : i32
      %cst_27 = arith.constant 0.000000e+00 : f32
      %13 = vector.broadcast %cst_27 : f32 to vector<72x128xf32>
      %c24_i32 = arith.constant 24 : i32
      %14 = arith.addi %c24_i32, %12 : i32
      %c-19_i32 = arith.constant -19 : i32
      %15 = arith.addi %14, %c-19_i32 : i32
      %16 = arith.index_cast %15 : i32 to index
      %c0_28 = arith.constant 0 : index
      %17 = vector.load %arg5[%16, %c0_28] : memref<696x128xf32, #tpu.memory_space<vmem>>, vector<72x128xf32>
      %c0_29 = arith.constant 0 : index
      %c0_30 = arith.constant 0 : index
      %c0_31 = arith.constant 0 : index
      %18 = vector.load %arg1[%c0_29, %c0_30, %c0_31] : memref<9x128x128xf32, #tpu.memory_space<vmem>>, vector<1x128x128xf32>
      %19 = vector.shape_cast %18 : vector<1x128x128xf32> to vector<128x128xf32>
      %cst_32 = arith.constant dense<0.000000e+00> : vector<72x128xf32>
      %20 = tpu.matmul %17, %19, %cst_32 {dimension_numbers = #tpu.dot_dimension_numbers<[1], [0], [0], [1], [0, 0, 1, 1], [], []>} : vector<72x128xf32>, vector<128x128xf32>, vector<72x128xf32> -> vector<72x128xf32>
      %21 = arith.addf %13, %20 : vector<72x128xf32>
      %c24_i32_33 = arith.constant 24 : i32
      %22 = arith.addi %c24_i32_33, %12 : i32
      %c-18_i32 = arith.constant -18 : i32
      %23 = arith.addi %22, %c-18_i32 : i32
      %24 = arith.index_cast %23 : i32 to index
      %c0_34 = arith.constant 0 : index
      %25 = vector.load %arg5[%24, %c0_34] : memref<696x128xf32, #tpu.memory_space<vmem>>, vector<72x128xf32>
      %c1 = arith.constant 1 : index
      %c0_35 = arith.constant 0 : index
      %c0_36 = arith.constant 0 : index
      %26 = vector.load %arg1[%c1, %c0_35, %c0_36] : memref<9x128x128xf32, #tpu.memory_space<vmem>>, vector<1x128x128xf32>
      %27 = vector.shape_cast %26 : vector<1x128x128xf32> to vector<128x128xf32>
      %cst_37 = arith.constant dense<0.000000e+00> : vector<72x128xf32>
      %28 = tpu.matmul %25, %27, %cst_37 {dimension_numbers = #tpu.dot_dimension_numbers<[1], [0], [0], [1], [0, 0, 1, 1], [], []>} : vector<72x128xf32>, vector<128x128xf32>, vector<72x128xf32> -> vector<72x128xf32>
      %29 = arith.addf %21, %28 : vector<72x128xf32>
      %c24_i32_38 = arith.constant 24 : i32
      %30 = arith.addi %c24_i32_38, %12 : i32
      %c-17_i32 = arith.constant -17 : i32
      %31 = arith.addi %30, %c-17_i32 : i32
      %32 = arith.index_cast %31 : i32 to index
      %c0_39 = arith.constant 0 : index
      %33 = vector.load %arg5[%32, %c0_39] : memref<696x128xf32, #tpu.memory_space<vmem>>, vector<72x128xf32>
      %c2 = arith.constant 2 : index
      %c0_40 = arith.constant 0 : index
      %c0_41 = arith.constant 0 : index
      %34 = vector.load %arg1[%c2, %c0_40, %c0_41] : memref<9x128x128xf32, #tpu.memory_space<vmem>>, vector<1x128x128xf32>
      %35 = vector.shape_cast %34 : vector<1x128x128xf32> to vector<128x128xf32>
      %cst_42 = arith.constant dense<0.000000e+00> : vector<72x128xf32>
      %36 = tpu.matmul %33, %35, %cst_42 {dimension_numbers = #tpu.dot_dimension_numbers<[1], [0], [0], [1], [0, 0, 1, 1], [], []>} : vector<72x128xf32>, vector<128x128xf32>, vector<72x128xf32> -> vector<72x128xf32>
      %37 = arith.addf %29, %36 : vector<72x128xf32>
      %c24_i32_43 = arith.constant 24 : i32
      %38 = arith.addi %c24_i32_43, %12 : i32
      %c-1_i32 = arith.constant -1 : i32
      %39 = arith.addi %38, %c-1_i32 : i32
      %40 = arith.index_cast %39 : i32 to index
      %c0_44 = arith.constant 0 : index
      %41 = vector.load %arg5[%40, %c0_44] : memref<696x128xf32, #tpu.memory_space<vmem>>, vector<72x128xf32>
      %c3 = arith.constant 3 : index
      %c0_45 = arith.constant 0 : index
      %c0_46 = arith.constant 0 : index
      %42 = vector.load %arg1[%c3, %c0_45, %c0_46] : memref<9x128x128xf32, #tpu.memory_space<vmem>>, vector<1x128x128xf32>
      %43 = vector.shape_cast %42 : vector<1x128x128xf32> to vector<128x128xf32>
      %cst_47 = arith.constant dense<0.000000e+00> : vector<72x128xf32>
      %44 = tpu.matmul %41, %43, %cst_47 {dimension_numbers = #tpu.dot_dimension_numbers<[1], [0], [0], [1], [0, 0, 1, 1], [], []>} : vector<72x128xf32>, vector<128x128xf32>, vector<72x128xf32> -> vector<72x128xf32>
      %45 = arith.addf %37, %44 : vector<72x128xf32>
      %c24_i32_48 = arith.constant 24 : i32
      %46 = arith.addi %c24_i32_48, %12 : i32
      %c0_i32_49 = arith.constant 0 : i32
      %47 = arith.addi %46, %c0_i32_49 : i32
      %48 = arith.index_cast %47 : i32 to index
      %c0_50 = arith.constant 0 : index
      %49 = vector.load %arg5[%48, %c0_50] : memref<696x128xf32, #tpu.memory_space<vmem>>, vector<72x128xf32>
      %c4 = arith.constant 4 : index
      %c0_51 = arith.constant 0 : index
      %c0_52 = arith.constant 0 : index
      %50 = vector.load %arg1[%c4, %c0_51, %c0_52] : memref<9x128x128xf32, #tpu.memory_space<vmem>>, vector<1x128x128xf32>
      %51 = vector.shape_cast %50 : vector<1x128x128xf32> to vector<128x128xf32>
      %cst_53 = arith.constant dense<0.000000e+00> : vector<72x128xf32>
      %52 = tpu.matmul %49, %51, %cst_53 {dimension_numbers = #tpu.dot_dimension_numbers<[1], [0], [0], [1], [0, 0, 1, 1], [], []>} : vector<72x128xf32>, vector<128x128xf32>, vector<72x128xf32> -> vector<72x128xf32>
      %53 = arith.addf %45, %52 : vector<72x128xf32>
      %c24_i32_54 = arith.constant 24 : i32
      %54 = arith.addi %c24_i32_54, %12 : i32
      %c1_i32_55 = arith.constant 1 : i32
      %55 = arith.addi %54, %c1_i32_55 : i32
      %56 = arith.index_cast %55 : i32 to index
      %c0_56 = arith.constant 0 : index
      %57 = vector.load %arg5[%56, %c0_56] : memref<696x128xf32, #tpu.memory_space<vmem>>, vector<72x128xf32>
      %c5 = arith.constant 5 : index
      %c0_57 = arith.constant 0 : index
      %c0_58 = arith.constant 0 : index
      %58 = vector.load %arg1[%c5, %c0_57, %c0_58] : memref<9x128x128xf32, #tpu.memory_space<vmem>>, vector<1x128x128xf32>
      %59 = vector.shape_cast %58 : vector<1x128x128xf32> to vector<128x128xf32>
      %cst_59 = arith.constant dense<0.000000e+00> : vector<72x128xf32>
      %60 = tpu.matmul %57, %59, %cst_59 {dimension_numbers = #tpu.dot_dimension_numbers<[1], [0], [0], [1], [0, 0, 1, 1], [], []>} : vector<72x128xf32>, vector<128x128xf32>, vector<72x128xf32> -> vector<72x128xf32>
      %61 = arith.addf %53, %60 : vector<72x128xf32>
      %c24_i32_60 = arith.constant 24 : i32
      %62 = arith.addi %c24_i32_60, %12 : i32
      %c17_i32 = arith.constant 17 : i32
      %63 = arith.addi %62, %c17_i32 : i32
      %64 = arith.index_cast %63 : i32 to index
      %c0_61 = arith.constant 0 : index
      %65 = vector.load %arg5[%64, %c0_61] : memref<696x128xf32, #tpu.memory_space<vmem>>, vector<72x128xf32>
      %c6 = arith.constant 6 : index
      %c0_62 = arith.constant 0 : index
      %c0_63 = arith.constant 0 : index
      %66 = vector.load %arg1[%c6, %c0_62, %c0_63] : memref<9x128x128xf32, #tpu.memory_space<vmem>>, vector<1x128x128xf32>
      %67 = vector.shape_cast %66 : vector<1x128x128xf32> to vector<128x128xf32>
      %cst_64 = arith.constant dense<0.000000e+00> : vector<72x128xf32>
      %68 = tpu.matmul %65, %67, %cst_64 {dimension_numbers = #tpu.dot_dimension_numbers<[1], [0], [0], [1], [0, 0, 1, 1], [], []>} : vector<72x128xf32>, vector<128x128xf32>, vector<72x128xf32> -> vector<72x128xf32>
      %69 = arith.addf %61, %68 : vector<72x128xf32>
      %c24_i32_65 = arith.constant 24 : i32
      %70 = arith.addi %c24_i32_65, %12 : i32
      %c18_i32 = arith.constant 18 : i32
      %71 = arith.addi %70, %c18_i32 : i32
      %72 = arith.index_cast %71 : i32 to index
      %c0_66 = arith.constant 0 : index
      %73 = vector.load %arg5[%72, %c0_66] : memref<696x128xf32, #tpu.memory_space<vmem>>, vector<72x128xf32>
      %c7 = arith.constant 7 : index
      %c0_67 = arith.constant 0 : index
      %c0_68 = arith.constant 0 : index
      %74 = vector.load %arg1[%c7, %c0_67, %c0_68] : memref<9x128x128xf32, #tpu.memory_space<vmem>>, vector<1x128x128xf32>
      %75 = vector.shape_cast %74 : vector<1x128x128xf32> to vector<128x128xf32>
      %cst_69 = arith.constant dense<0.000000e+00> : vector<72x128xf32>
      %76 = tpu.matmul %73, %75, %cst_69 {dimension_numbers = #tpu.dot_dimension_numbers<[1], [0], [0], [1], [0, 0, 1, 1], [], []>} : vector<72x128xf32>, vector<128x128xf32>, vector<72x128xf32> -> vector<72x128xf32>
      %77 = arith.addf %69, %76 : vector<72x128xf32>
      %c24_i32_70 = arith.constant 24 : i32
      %78 = arith.addi %c24_i32_70, %12 : i32
      %c19_i32 = arith.constant 19 : i32
      %79 = arith.addi %78, %c19_i32 : i32
      %80 = arith.index_cast %79 : i32 to index
      %c0_71 = arith.constant 0 : index
      %81 = vector.load %arg5[%80, %c0_71] : memref<696x128xf32, #tpu.memory_space<vmem>>, vector<72x128xf32>
      %c8 = arith.constant 8 : index
      %c0_72 = arith.constant 0 : index
      %c0_73 = arith.constant 0 : index
      %82 = vector.load %arg1[%c8, %c0_72, %c0_73] : memref<9x128x128xf32, #tpu.memory_space<vmem>>, vector<1x128x128xf32>
      %83 = vector.shape_cast %82 : vector<1x128x128xf32> to vector<128x128xf32>
      %cst_74 = arith.constant dense<0.000000e+00> : vector<72x128xf32>
      %84 = tpu.matmul %81, %83, %cst_74 {dimension_numbers = #tpu.dot_dimension_numbers<[1], [0], [0], [1], [0, 0, 1, 1], [], []>} : vector<72x128xf32>, vector<128x128xf32>, vector<72x128xf32> -> vector<72x128xf32>
      %85 = arith.addf %77, %84 : vector<72x128xf32>
      %86 = vector.broadcast %4 : vector<1x128xf32> to vector<72x128xf32>
      %87 = arith.addf %85, %86 : vector<72x128xf32>
      %88 = arith.index_cast %12 : i32 to index
      %c0_75 = arith.constant 0 : index
      %89 = vector.load %arg3[%88, %c0_75] : memref<648x128xf32, #tpu.memory_space<vmem>>, vector<72x128xf32>
      %90 = arith.mulf %87, %89 : vector<72x128xf32>
      %c24_i32_76 = arith.constant 24 : i32
      %91 = arith.addi %c24_i32_76, %12 : i32
      %92 = arith.index_cast %91 : i32 to index
      %c0_77 = arith.constant 0 : index
      %93 = vector.load %arg6[%92, %c0_77] : memref<696x128xf32, #tpu.memory_space<vmem>>, vector<72x128xf32>
      tpu.vector_store %arg6[%92, %c0_77], %90 {strides = array<i32>} : memref<696x128xf32, #tpu.memory_space<vmem>>, vector<72x128xf32>,
    }
    %c9_i32_10 = arith.constant 9 : i32
    %c0_i32_11 = arith.constant 0 : i32
    %c9_i32_12 = arith.constant 9 : i32
    %7 = arith.addi %c0_i32_11, %c9_i32_12 : i32
    %c1_i32_13 = arith.constant 1 : i32
    scf.for %arg7 = %c0_i32_11 to %7 step %c1_i32_13  : i32 {
      %c72_i32 = arith.constant 72 : i32
      %11 = arith.muli %arg7, %c72_i32 : i32
      %12 = tpu.assume_multiple %11, 8 : i32
      %cst_27 = arith.constant 0.000000e+00 : f32
      %13 = vector.broadcast %cst_27 : f32 to vector<72x128xf32>
      %c24_i32 = arith.constant 24 : i32
      %14 = arith.addi %c24_i32, %12 : i32
      %c-19_i32 = arith.constant -19 : i32
      %15 = arith.addi %14, %c-19_i32 : i32
      %16 = arith.index_cast %15 : i32 to index
      %c0_28 = arith.constant 0 : index
      %17 = vector.load %arg6[%16, %c0_28] : memref<696x128xf32, #tpu.memory_space<vmem>>, vector<72x128xf32>
      %c0_29 = arith.constant 0 : index
      %c0_30 = arith.constant 0 : index
      %c0_31 = arith.constant 0 : index
      %18 = vector.load %arg1[%c0_29, %c0_30, %c0_31] : memref<9x128x128xf32, #tpu.memory_space<vmem>>, vector<1x128x128xf32>
      %19 = vector.shape_cast %18 : vector<1x128x128xf32> to vector<128x128xf32>
      %cst_32 = arith.constant dense<0.000000e+00> : vector<72x128xf32>
      %20 = tpu.matmul %17, %19, %cst_32 {dimension_numbers = #tpu.dot_dimension_numbers<[1], [0], [0], [1], [0, 0, 1, 1], [], []>} : vector<72x128xf32>, vector<128x128xf32>, vector<72x128xf32> -> vector<72x128xf32>
      %21 = arith.addf %13, %20 : vector<72x128xf32>
      %c24_i32_33 = arith.constant 24 : i32
      %22 = arith.addi %c24_i32_33, %12 : i32
      %c-18_i32 = arith.constant -18 : i32
      %23 = arith.addi %22, %c-18_i32 : i32
      %24 = arith.index_cast %23 : i32 to index
      %c0_34 = arith.constant 0 : index
      %25 = vector.load %arg6[%24, %c0_34] : memref<696x128xf32, #tpu.memory_space<vmem>>, vector<72x128xf32>
      %c1 = arith.constant 1 : index
      %c0_35 = arith.constant 0 : index
      %c0_36 = arith.constant 0 : index
      %26 = vector.load %arg1[%c1, %c0_35, %c0_36] : memref<9x128x128xf32, #tpu.memory_space<vmem>>, vector<1x128x128xf32>
      %27 = vector.shape_cast %26 : vector<1x128x128xf32> to vector<128x128xf32>
      %cst_37 = arith.constant dense<0.000000e+00> : vector<72x128xf32>
      %28 = tpu.matmul %25, %27, %cst_37 {dimension_numbers = #tpu.dot_dimension_numbers<[1], [0], [0], [1], [0, 0, 1, 1], [], []>} : vector<72x128xf32>, vector<128x128xf32>, vector<72x128xf32> -> vector<72x128xf32>
      %29 = arith.addf %21, %28 : vector<72x128xf32>
      %c24_i32_38 = arith.constant 24 : i32
      %30 = arith.addi %c24_i32_38, %12 : i32
      %c-17_i32 = arith.constant -17 : i32
      %31 = arith.addi %30, %c-17_i32 : i32
      %32 = arith.index_cast %31 : i32 to index
      %c0_39 = arith.constant 0 : index
      %33 = vector.load %arg6[%32, %c0_39] : memref<696x128xf32, #tpu.memory_space<vmem>>, vector<72x128xf32>
      %c2 = arith.constant 2 : index
      %c0_40 = arith.constant 0 : index
      %c0_41 = arith.constant 0 : index
      %34 = vector.load %arg1[%c2, %c0_40, %c0_41] : memref<9x128x128xf32, #tpu.memory_space<vmem>>, vector<1x128x128xf32>
      %35 = vector.shape_cast %34 : vector<1x128x128xf32> to vector<128x128xf32>
      %cst_42 = arith.constant dense<0.000000e+00> : vector<72x128xf32>
      %36 = tpu.matmul %33, %35, %cst_42 {dimension_numbers = #tpu.dot_dimension_numbers<[1], [0], [0], [1], [0, 0, 1, 1], [], []>} : vector<72x128xf32>, vector<128x128xf32>, vector<72x128xf32> -> vector<72x128xf32>
      %37 = arith.addf %29, %36 : vector<72x128xf32>
      %c24_i32_43 = arith.constant 24 : i32
      %38 = arith.addi %c24_i32_43, %12 : i32
      %c-1_i32 = arith.constant -1 : i32
      %39 = arith.addi %38, %c-1_i32 : i32
      %40 = arith.index_cast %39 : i32 to index
      %c0_44 = arith.constant 0 : index
      %41 = vector.load %arg6[%40, %c0_44] : memref<696x128xf32, #tpu.memory_space<vmem>>, vector<72x128xf32>
      %c3 = arith.constant 3 : index
      %c0_45 = arith.constant 0 : index
      %c0_46 = arith.constant 0 : index
      %42 = vector.load %arg1[%c3, %c0_45, %c0_46] : memref<9x128x128xf32, #tpu.memory_space<vmem>>, vector<1x128x128xf32>
      %43 = vector.shape_cast %42 : vector<1x128x128xf32> to vector<128x128xf32>
      %cst_47 = arith.constant dense<0.000000e+00> : vector<72x128xf32>
      %44 = tpu.matmul %41, %43, %cst_47 {dimension_numbers = #tpu.dot_dimension_numbers<[1], [0], [0], [1], [0, 0, 1, 1], [], []>} : vector<72x128xf32>, vector<128x128xf32>, vector<72x128xf32> -> vector<72x128xf32>
      %45 = arith.addf %37, %44 : vector<72x128xf32>
      %c24_i32_48 = arith.constant 24 : i32
      %46 = arith.addi %c24_i32_48, %12 : i32
      %c0_i32_49 = arith.constant 0 : i32
      %47 = arith.addi %46, %c0_i32_49 : i32
      %48 = arith.index_cast %47 : i32 to index
      %c0_50 = arith.constant 0 : index
      %49 = vector.load %arg6[%48, %c0_50] : memref<696x128xf32, #tpu.memory_space<vmem>>, vector<72x128xf32>
      %c4 = arith.constant 4 : index
      %c0_51 = arith.constant 0 : index
      %c0_52 = arith.constant 0 : index
      %50 = vector.load %arg1[%c4, %c0_51, %c0_52] : memref<9x128x128xf32, #tpu.memory_space<vmem>>, vector<1x128x128xf32>
      %51 = vector.shape_cast %50 : vector<1x128x128xf32> to vector<128x128xf32>
      %cst_53 = arith.constant dense<0.000000e+00> : vector<72x128xf32>
      %52 = tpu.matmul %49, %51, %cst_53 {dimension_numbers = #tpu.dot_dimension_numbers<[1], [0], [0], [1], [0, 0, 1, 1], [], []>} : vector<72x128xf32>, vector<128x128xf32>, vector<72x128xf32> -> vector<72x128xf32>
      %53 = arith.addf %45, %52 : vector<72x128xf32>
      %c24_i32_54 = arith.constant 24 : i32
      %54 = arith.addi %c24_i32_54, %12 : i32
      %c1_i32_55 = arith.constant 1 : i32
      %55 = arith.addi %54, %c1_i32_55 : i32
      %56 = arith.index_cast %55 : i32 to index
      %c0_56 = arith.constant 0 : index
      %57 = vector.load %arg6[%56, %c0_56] : memref<696x128xf32, #tpu.memory_space<vmem>>, vector<72x128xf32>
      %c5 = arith.constant 5 : index
      %c0_57 = arith.constant 0 : index
      %c0_58 = arith.constant 0 : index
      %58 = vector.load %arg1[%c5, %c0_57, %c0_58] : memref<9x128x128xf32, #tpu.memory_space<vmem>>, vector<1x128x128xf32>
      %59 = vector.shape_cast %58 : vector<1x128x128xf32> to vector<128x128xf32>
      %cst_59 = arith.constant dense<0.000000e+00> : vector<72x128xf32>
      %60 = tpu.matmul %57, %59, %cst_59 {dimension_numbers = #tpu.dot_dimension_numbers<[1], [0], [0], [1], [0, 0, 1, 1], [], []>} : vector<72x128xf32>, vector<128x128xf32>, vector<72x128xf32> -> vector<72x128xf32>
      %61 = arith.addf %53, %60 : vector<72x128xf32>
      %c24_i32_60 = arith.constant 24 : i32
      %62 = arith.addi %c24_i32_60, %12 : i32
      %c17_i32 = arith.constant 17 : i32
      %63 = arith.addi %62, %c17_i32 : i32
      %64 = arith.index_cast %63 : i32 to index
      %c0_61 = arith.constant 0 : index
      %65 = vector.load %arg6[%64, %c0_61] : memref<696x128xf32, #tpu.memory_space<vmem>>, vector<72x128xf32>
      %c6 = arith.constant 6 : index
      %c0_62 = arith.constant 0 : index
      %c0_63 = arith.constant 0 : index
      %66 = vector.load %arg1[%c6, %c0_62, %c0_63] : memref<9x128x128xf32, #tpu.memory_space<vmem>>, vector<1x128x128xf32>
      %67 = vector.shape_cast %66 : vector<1x128x128xf32> to vector<128x128xf32>
      %cst_64 = arith.constant dense<0.000000e+00> : vector<72x128xf32>
      %68 = tpu.matmul %65, %67, %cst_64 {dimension_numbers = #tpu.dot_dimension_numbers<[1], [0], [0], [1], [0, 0, 1, 1], [], []>} : vector<72x128xf32>, vector<128x128xf32>, vector<72x128xf32> -> vector<72x128xf32>
      %69 = arith.addf %61, %68 : vector<72x128xf32>
      %c24_i32_65 = arith.constant 24 : i32
      %70 = arith.addi %c24_i32_65, %12 : i32
      %c18_i32 = arith.constant 18 : i32
      %71 = arith.addi %70, %c18_i32 : i32
      %72 = arith.index_cast %71 : i32 to index
      %c0_66 = arith.constant 0 : index
      %73 = vector.load %arg6[%72, %c0_66] : memref<696x128xf32, #tpu.memory_space<vmem>>, vector<72x128xf32>
      %c7 = arith.constant 7 : index
      %c0_67 = arith.constant 0 : index
      %c0_68 = arith.constant 0 : index
      %74 = vector.load %arg1[%c7, %c0_67, %c0_68] : memref<9x128x128xf32, #tpu.memory_space<vmem>>, vector<1x128x128xf32>
      %75 = vector.shape_cast %74 : vector<1x128x128xf32> to vector<128x128xf32>
      %cst_69 = arith.constant dense<0.000000e+00> : vector<72x128xf32>
      %76 = tpu.matmul %73, %75, %cst_69 {dimension_numbers = #tpu.dot_dimension_numbers<[1], [0], [0], [1], [0, 0, 1, 1], [], []>} : vector<72x128xf32>, vector<128x128xf32>, vector<72x128xf32> -> vector<72x128xf32>
      %77 = arith.addf %69, %76 : vector<72x128xf32>
      %c24_i32_70 = arith.constant 24 : i32
      %78 = arith.addi %c24_i32_70, %12 : i32
      %c19_i32 = arith.constant 19 : i32
      %79 = arith.addi %78, %c19_i32 : i32
      %80 = arith.index_cast %79 : i32 to index
      %c0_71 = arith.constant 0 : index
      %81 = vector.load %arg6[%80, %c0_71] : memref<696x128xf32, #tpu.memory_space<vmem>>, vector<72x128xf32>
      %c8 = arith.constant 8 : index
      %c0_72 = arith.constant 0 : index
      %c0_73 = arith.constant 0 : index
      %82 = vector.load %arg1[%c8, %c0_72, %c0_73] : memref<9x128x128xf32, #tpu.memory_space<vmem>>, vector<1x128x128xf32>
      %83 = vector.shape_cast %82 : vector<1x128x128xf32> to vector<128x128xf32>
      %cst_74 = arith.constant dense<0.000000e+00> : vector<72x128xf32>
      %84 = tpu.matmul %81, %83, %cst_74 {dimension_numbers = #tpu.dot_dimension_numbers<[1], [0], [0], [1], [0, 0, 1, 1], [], []>} : vector<72x128xf32>, vector<128x128xf32>, vector<72x128xf32> -> vector<72x128xf32>
      %85 = arith.addf %77, %84 : vector<72x128xf32>
      %86 = vector.broadcast %4 : vector<1x128xf32> to vector<72x128xf32>
      %87 = arith.addf %85, %86 : vector<72x128xf32>
      %cst_75 = arith.constant 0.000000e+00 : f32
      %88 = vector.broadcast %cst_75 : f32 to vector<72x128xf32>
      %89 = arith.maximumf %87, %88 : vector<72x128xf32>
      %90 = arith.index_cast %12 : i32 to index
      %c0_76 = arith.constant 0 : index
      %91 = vector.load %arg3[%90, %c0_76] : memref<648x128xf32, #tpu.memory_space<vmem>>, vector<72x128xf32>
      %92 = arith.mulf %89, %91 : vector<72x128xf32>
      %c24_i32_77 = arith.constant 24 : i32
      %93 = arith.addi %c24_i32_77, %12 : i32
      %94 = arith.index_cast %93 : i32 to index
      %c0_78 = arith.constant 0 : index
      %95 = vector.load %arg5[%94, %c0_78] : memref<696x128xf32, #tpu.memory_space<vmem>>, vector<72x128xf32>
      tpu.vector_store %arg5[%94, %c0_78], %92 {strides = array<i32>} : memref<696x128xf32, #tpu.memory_space<vmem>>, vector<72x128xf32>,
    }
    %c9_i32_14 = arith.constant 9 : i32
    %c0_i32_15 = arith.constant 0 : i32
    %c9_i32_16 = arith.constant 9 : i32
    %8 = arith.addi %c0_i32_15, %c9_i32_16 : i32
    %c1_i32_17 = arith.constant 1 : i32
    scf.for %arg7 = %c0_i32_15 to %8 step %c1_i32_17  : i32 {
      %c72_i32 = arith.constant 72 : i32
      %11 = arith.muli %arg7, %c72_i32 : i32
      %12 = tpu.assume_multiple %11, 8 : i32
      %cst_27 = arith.constant 0.000000e+00 : f32
      %13 = vector.broadcast %cst_27 : f32 to vector<72x128xf32>
      %c24_i32 = arith.constant 24 : i32
      %14 = arith.addi %c24_i32, %12 : i32
      %c-19_i32 = arith.constant -19 : i32
      %15 = arith.addi %14, %c-19_i32 : i32
      %16 = arith.index_cast %15 : i32 to index
      %c0_28 = arith.constant 0 : index
      %17 = vector.load %arg5[%16, %c0_28] : memref<696x128xf32, #tpu.memory_space<vmem>>, vector<72x128xf32>
      %c0_29 = arith.constant 0 : index
      %c0_30 = arith.constant 0 : index
      %c0_31 = arith.constant 0 : index
      %18 = vector.load %arg1[%c0_29, %c0_30, %c0_31] : memref<9x128x128xf32, #tpu.memory_space<vmem>>, vector<1x128x128xf32>
      %19 = vector.shape_cast %18 : vector<1x128x128xf32> to vector<128x128xf32>
      %cst_32 = arith.constant dense<0.000000e+00> : vector<72x128xf32>
      %20 = tpu.matmul %17, %19, %cst_32 {dimension_numbers = #tpu.dot_dimension_numbers<[1], [0], [0], [1], [0, 0, 1, 1], [], []>} : vector<72x128xf32>, vector<128x128xf32>, vector<72x128xf32> -> vector<72x128xf32>
      %21 = arith.addf %13, %20 : vector<72x128xf32>
      %c24_i32_33 = arith.constant 24 : i32
      %22 = arith.addi %c24_i32_33, %12 : i32
      %c-18_i32 = arith.constant -18 : i32
      %23 = arith.addi %22, %c-18_i32 : i32
      %24 = arith.index_cast %23 : i32 to index
      %c0_34 = arith.constant 0 : index
      %25 = vector.load %arg5[%24, %c0_34] : memref<696x128xf32, #tpu.memory_space<vmem>>, vector<72x128xf32>
      %c1 = arith.constant 1 : index
      %c0_35 = arith.constant 0 : index
      %c0_36 = arith.constant 0 : index
      %26 = vector.load %arg1[%c1, %c0_35, %c0_36] : memref<9x128x128xf32, #tpu.memory_space<vmem>>, vector<1x128x128xf32>
      %27 = vector.shape_cast %26 : vector<1x128x128xf32> to vector<128x128xf32>
      %cst_37 = arith.constant dense<0.000000e+00> : vector<72x128xf32>
      %28 = tpu.matmul %25, %27, %cst_37 {dimension_numbers = #tpu.dot_dimension_numbers<[1], [0], [0], [1], [0, 0, 1, 1], [], []>} : vector<72x128xf32>, vector<128x128xf32>, vector<72x128xf32> -> vector<72x128xf32>
      %29 = arith.addf %21, %28 : vector<72x128xf32>
      %c24_i32_38 = arith.constant 24 : i32
      %30 = arith.addi %c24_i32_38, %12 : i32
      %c-17_i32 = arith.constant -17 : i32
      %31 = arith.addi %30, %c-17_i32 : i32
      %32 = arith.index_cast %31 : i32 to index
      %c0_39 = arith.constant 0 : index
      %33 = vector.load %arg5[%32, %c0_39] : memref<696x128xf32, #tpu.memory_space<vmem>>, vector<72x128xf32>
      %c2 = arith.constant 2 : index
      %c0_40 = arith.constant 0 : index
      %c0_41 = arith.constant 0 : index
      %34 = vector.load %arg1[%c2, %c0_40, %c0_41] : memref<9x128x128xf32, #tpu.memory_space<vmem>>, vector<1x128x128xf32>
      %35 = vector.shape_cast %34 : vector<1x128x128xf32> to vector<128x128xf32>
      %cst_42 = arith.constant dense<0.000000e+00> : vector<72x128xf32>
      %36 = tpu.matmul %33, %35, %cst_42 {dimension_numbers = #tpu.dot_dimension_numbers<[1], [0], [0], [1], [0, 0, 1, 1], [], []>} : vector<72x128xf32>, vector<128x128xf32>, vector<72x128xf32> -> vector<72x128xf32>
      %37 = arith.addf %29, %36 : vector<72x128xf32>
      %c24_i32_43 = arith.constant 24 : i32
      %38 = arith.addi %c24_i32_43, %12 : i32
      %c-1_i32 = arith.constant -1 : i32
      %39 = arith.addi %38, %c-1_i32 : i32
      %40 = arith.index_cast %39 : i32 to index
      %c0_44 = arith.constant 0 : index
      %41 = vector.load %arg5[%40, %c0_44] : memref<696x128xf32, #tpu.memory_space<vmem>>, vector<72x128xf32>
      %c3 = arith.constant 3 : index
      %c0_45 = arith.constant 0 : index
      %c0_46 = arith.constant 0 : index
      %42 = vector.load %arg1[%c3, %c0_45, %c0_46] : memref<9x128x128xf32, #tpu.memory_space<vmem>>, vector<1x128x128xf32>
      %43 = vector.shape_cast %42 : vector<1x128x128xf32> to vector<128x128xf32>
      %cst_47 = arith.constant dense<0.000000e+00> : vector<72x128xf32>
      %44 = tpu.matmul %41, %43, %cst_47 {dimension_numbers = #tpu.dot_dimension_numbers<[1], [0], [0], [1], [0, 0, 1, 1], [], []>} : vector<72x128xf32>, vector<128x128xf32>, vector<72x128xf32> -> vector<72x128xf32>
      %45 = arith.addf %37, %44 : vector<72x128xf32>
      %c24_i32_48 = arith.constant 24 : i32
      %46 = arith.addi %c24_i32_48, %12 : i32
      %c0_i32_49 = arith.constant 0 : i32
      %47 = arith.addi %46, %c0_i32_49 : i32
      %48 = arith.index_cast %47 : i32 to index
      %c0_50 = arith.constant 0 : index
      %49 = vector.load %arg5[%48, %c0_50] : memref<696x128xf32, #tpu.memory_space<vmem>>, vector<72x128xf32>
      %c4 = arith.constant 4 : index
      %c0_51 = arith.constant 0 : index
      %c0_52 = arith.constant 0 : index
      %50 = vector.load %arg1[%c4, %c0_51, %c0_52] : memref<9x128x128xf32, #tpu.memory_space<vmem>>, vector<1x128x128xf32>
      %51 = vector.shape_cast %50 : vector<1x128x128xf32> to vector<128x128xf32>
      %cst_53 = arith.constant dense<0.000000e+00> : vector<72x128xf32>
      %52 = tpu.matmul %49, %51, %cst_53 {dimension_numbers = #tpu.dot_dimension_numbers<[1], [0], [0], [1], [0, 0, 1, 1], [], []>} : vector<72x128xf32>, vector<128x128xf32>, vector<72x128xf32> -> vector<72x128xf32>
      %53 = arith.addf %45, %52 : vector<72x128xf32>
      %c24_i32_54 = arith.constant 24 : i32
      %54 = arith.addi %c24_i32_54, %12 : i32
      %c1_i32_55 = arith.constant 1 : i32
      %55 = arith.addi %54, %c1_i32_55 : i32
      %56 = arith.index_cast %55 : i32 to index
      %c0_56 = arith.constant 0 : index
      %57 = vector.load %arg5[%56, %c0_56] : memref<696x128xf32, #tpu.memory_space<vmem>>, vector<72x128xf32>
      %c5 = arith.constant 5 : index
      %c0_57 = arith.constant 0 : index
      %c0_58 = arith.constant 0 : index
      %58 = vector.load %arg1[%c5, %c0_57, %c0_58] : memref<9x128x128xf32, #tpu.memory_space<vmem>>, vector<1x128x128xf32>
      %59 = vector.shape_cast %58 : vector<1x128x128xf32> to vector<128x128xf32>
      %cst_59 = arith.constant dense<0.000000e+00> : vector<72x128xf32>
      %60 = tpu.matmul %57, %59, %cst_59 {dimension_numbers = #tpu.dot_dimension_numbers<[1], [0], [0], [1], [0, 0, 1, 1], [], []>} : vector<72x128xf32>, vector<128x128xf32>, vector<72x128xf32> -> vector<72x128xf32>
      %61 = arith.addf %53, %60 : vector<72x128xf32>
      %c24_i32_60 = arith.constant 24 : i32
      %62 = arith.addi %c24_i32_60, %12 : i32
      %c17_i32 = arith.constant 17 : i32
      %63 = arith.addi %62, %c17_i32 : i32
      %64 = arith.index_cast %63 : i32 to index
      %c0_61 = arith.constant 0 : index
      %65 = vector.load %arg5[%64, %c0_61] : memref<696x128xf32, #tpu.memory_space<vmem>>, vector<72x128xf32>
      %c6 = arith.constant 6 : index
      %c0_62 = arith.constant 0 : index
      %c0_63 = arith.constant 0 : index
      %66 = vector.load %arg1[%c6, %c0_62, %c0_63] : memref<9x128x128xf32, #tpu.memory_space<vmem>>, vector<1x128x128xf32>
      %67 = vector.shape_cast %66 : vector<1x128x128xf32> to vector<128x128xf32>
      %cst_64 = arith.constant dense<0.000000e+00> : vector<72x128xf32>
      %68 = tpu.matmul %65, %67, %cst_64 {dimension_numbers = #tpu.dot_dimension_numbers<[1], [0], [0], [1], [0, 0, 1, 1], [], []>} : vector<72x128xf32>, vector<128x128xf32>, vector<72x128xf32> -> vector<72x128xf32>
      %69 = arith.addf %61, %68 : vector<72x128xf32>
      %c24_i32_65 = arith.constant 24 : i32
      %70 = arith.addi %c24_i32_65, %12 : i32
      %c18_i32 = arith.constant 18 : i32
      %71 = arith.addi %70, %c18_i32 : i32
      %72 = arith.index_cast %71 : i32 to index
      %c0_66 = arith.constant 0 : index
      %73 = vector.load %arg5[%72, %c0_66] : memref<696x128xf32, #tpu.memory_space<vmem>>, vector<72x128xf32>
      %c7 = arith.constant 7 : index
      %c0_67 = arith.constant 0 : index
      %c0_68 = arith.constant 0 : index
      %74 = vector.load %arg1[%c7, %c0_67, %c0_68] : memref<9x128x128xf32, #tpu.memory_space<vmem>>, vector<1x128x128xf32>
      %75 = vector.shape_cast %74 : vector<1x128x128xf32> to vector<128x128xf32>
      %cst_69 = arith.constant dense<0.000000e+00> : vector<72x128xf32>
      %76 = tpu.matmul %73, %75, %cst_69 {dimension_numbers = #tpu.dot_dimension_numbers<[1], [0], [0], [1], [0, 0, 1, 1], [], []>} : vector<72x128xf32>, vector<128x128xf32>, vector<72x128xf32> -> vector<72x128xf32>
      %77 = arith.addf %69, %76 : vector<72x128xf32>
      %c24_i32_70 = arith.constant 24 : i32
      %78 = arith.addi %c24_i32_70, %12 : i32
      %c19_i32 = arith.constant 19 : i32
      %79 = arith.addi %78, %c19_i32 : i32
      %80 = arith.index_cast %79 : i32 to index
      %c0_71 = arith.constant 0 : index
      %81 = vector.load %arg5[%80, %c0_71] : memref<696x128xf32, #tpu.memory_space<vmem>>, vector<72x128xf32>
      %c8 = arith.constant 8 : index
      %c0_72 = arith.constant 0 : index
      %c0_73 = arith.constant 0 : index
      %82 = vector.load %arg1[%c8, %c0_72, %c0_73] : memref<9x128x128xf32, #tpu.memory_space<vmem>>, vector<1x128x128xf32>
      %83 = vector.shape_cast %82 : vector<1x128x128xf32> to vector<128x128xf32>
      %cst_74 = arith.constant dense<0.000000e+00> : vector<72x128xf32>
      %84 = tpu.matmul %81, %83, %cst_74 {dimension_numbers = #tpu.dot_dimension_numbers<[1], [0], [0], [1], [0, 0, 1, 1], [], []>} : vector<72x128xf32>, vector<128x128xf32>, vector<72x128xf32> -> vector<72x128xf32>
      %85 = arith.addf %77, %84 : vector<72x128xf32>
      %86 = vector.broadcast %4 : vector<1x128xf32> to vector<72x128xf32>
      %87 = arith.addf %85, %86 : vector<72x128xf32>
      %88 = arith.index_cast %12 : i32 to index
      %c0_75 = arith.constant 0 : index
      %89 = vector.load %arg3[%88, %c0_75] : memref<648x128xf32, #tpu.memory_space<vmem>>, vector<72x128xf32>
      %90 = arith.mulf %87, %89 : vector<72x128xf32>
      %c24_i32_76 = arith.constant 24 : i32
      %91 = arith.addi %c24_i32_76, %12 : i32
      %92 = arith.index_cast %91 : i32 to index
      %c0_77 = arith.constant 0 : index
      %93 = vector.load %arg6[%92, %c0_77] : memref<696x128xf32, #tpu.memory_space<vmem>>, vector<72x128xf32>
      tpu.vector_store %arg6[%92, %c0_77], %90 {strides = array<i32>} : memref<696x128xf32, #tpu.memory_space<vmem>>, vector<72x128xf32>,
    }
    %c9_i32_18 = arith.constant 9 : i32
    %c0_i32_19 = arith.constant 0 : i32
    %c9_i32_20 = arith.constant 9 : i32
    %9 = arith.addi %c0_i32_19, %c9_i32_20 : i32
    %c1_i32_21 = arith.constant 1 : i32
    scf.for %arg7 = %c0_i32_19 to %9 step %c1_i32_21  : i32 {
      %c72_i32 = arith.constant 72 : i32
      %11 = arith.muli %arg7, %c72_i32 : i32
      %12 = tpu.assume_multiple %11, 8 : i32
      %cst_27 = arith.constant 0.000000e+00 : f32
      %13 = vector.broadcast %cst_27 : f32 to vector<72x128xf32>
      %c24_i32 = arith.constant 24 : i32
      %14 = arith.addi %c24_i32, %12 : i32
      %c-19_i32 = arith.constant -19 : i32
      %15 = arith.addi %14, %c-19_i32 : i32
      %16 = arith.index_cast %15 : i32 to index
      %c0_28 = arith.constant 0 : index
      %17 = vector.load %arg6[%16, %c0_28] : memref<696x128xf32, #tpu.memory_space<vmem>>, vector<72x128xf32>
      %c0_29 = arith.constant 0 : index
      %c0_30 = arith.constant 0 : index
      %c0_31 = arith.constant 0 : index
      %18 = vector.load %arg1[%c0_29, %c0_30, %c0_31] : memref<9x128x128xf32, #tpu.memory_space<vmem>>, vector<1x128x128xf32>
      %19 = vector.shape_cast %18 : vector<1x128x128xf32> to vector<128x128xf32>
      %cst_32 = arith.constant dense<0.000000e+00> : vector<72x128xf32>
      %20 = tpu.matmul %17, %19, %cst_32 {dimension_numbers = #tpu.dot_dimension_numbers<[1], [0], [0], [1], [0, 0, 1, 1], [], []>} : vector<72x128xf32>, vector<128x128xf32>, vector<72x128xf32> -> vector<72x128xf32>
      %21 = arith.addf %13, %20 : vector<72x128xf32>
      %c24_i32_33 = arith.constant 24 : i32
      %22 = arith.addi %c24_i32_33, %12 : i32
      %c-18_i32 = arith.constant -18 : i32
      %23 = arith.addi %22, %c-18_i32 : i32
      %24 = arith.index_cast %23 : i32 to index
      %c0_34 = arith.constant 0 : index
      %25 = vector.load %arg6[%24, %c0_34] : memref<696x128xf32, #tpu.memory_space<vmem>>, vector<72x128xf32>
      %c1 = arith.constant 1 : index
      %c0_35 = arith.constant 0 : index
      %c0_36 = arith.constant 0 : index
      %26 = vector.load %arg1[%c1, %c0_35, %c0_36] : memref<9x128x128xf32, #tpu.memory_space<vmem>>, vector<1x128x128xf32>
      %27 = vector.shape_cast %26 : vector<1x128x128xf32> to vector<128x128xf32>
      %cst_37 = arith.constant dense<0.000000e+00> : vector<72x128xf32>
      %28 = tpu.matmul %25, %27, %cst_37 {dimension_numbers = #tpu.dot_dimension_numbers<[1], [0], [0], [1], [0, 0, 1, 1], [], []>} : vector<72x128xf32>, vector<128x128xf32>, vector<72x128xf32> -> vector<72x128xf32>
      %29 = arith.addf %21, %28 : vector<72x128xf32>
      %c24_i32_38 = arith.constant 24 : i32
      %30 = arith.addi %c24_i32_38, %12 : i32
      %c-17_i32 = arith.constant -17 : i32
      %31 = arith.addi %30, %c-17_i32 : i32
      %32 = arith.index_cast %31 : i32 to index
      %c0_39 = arith.constant 0 : index
      %33 = vector.load %arg6[%32, %c0_39] : memref<696x128xf32, #tpu.memory_space<vmem>>, vector<72x128xf32>
      %c2 = arith.constant 2 : index
      %c0_40 = arith.constant 0 : index
      %c0_41 = arith.constant 0 : index
      %34 = vector.load %arg1[%c2, %c0_40, %c0_41] : memref<9x128x128xf32, #tpu.memory_space<vmem>>, vector<1x128x128xf32>
      %35 = vector.shape_cast %34 : vector<1x128x128xf32> to vector<128x128xf32>
      %cst_42 = arith.constant dense<0.000000e+00> : vector<72x128xf32>
      %36 = tpu.matmul %33, %35, %cst_42 {dimension_numbers = #tpu.dot_dimension_numbers<[1], [0], [0], [1], [0, 0, 1, 1], [], []>} : vector<72x128xf32>, vector<128x128xf32>, vector<72x128xf32> -> vector<72x128xf32>
      %37 = arith.addf %29, %36 : vector<72x128xf32>
      %c24_i32_43 = arith.constant 24 : i32
      %38 = arith.addi %c24_i32_43, %12 : i32
      %c-1_i32 = arith.constant -1 : i32
      %39 = arith.addi %38, %c-1_i32 : i32
      %40 = arith.index_cast %39 : i32 to index
      %c0_44 = arith.constant 0 : index
      %41 = vector.load %arg6[%40, %c0_44] : memref<696x128xf32, #tpu.memory_space<vmem>>, vector<72x128xf32>
      %c3 = arith.constant 3 : index
      %c0_45 = arith.constant 0 : index
      %c0_46 = arith.constant 0 : index
      %42 = vector.load %arg1[%c3, %c0_45, %c0_46] : memref<9x128x128xf32, #tpu.memory_space<vmem>>, vector<1x128x128xf32>
      %43 = vector.shape_cast %42 : vector<1x128x128xf32> to vector<128x128xf32>
      %cst_47 = arith.constant dense<0.000000e+00> : vector<72x128xf32>
      %44 = tpu.matmul %41, %43, %cst_47 {dimension_numbers = #tpu.dot_dimension_numbers<[1], [0], [0], [1], [0, 0, 1, 1], [], []>} : vector<72x128xf32>, vector<128x128xf32>, vector<72x128xf32> -> vector<72x128xf32>
      %45 = arith.addf %37, %44 : vector<72x128xf32>
      %c24_i32_48 = arith.constant 24 : i32
      %46 = arith.addi %c24_i32_48, %12 : i32
      %c0_i32_49 = arith.constant 0 : i32
      %47 = arith.addi %46, %c0_i32_49 : i32
      %48 = arith.index_cast %47 : i32 to index
      %c0_50 = arith.constant 0 : index
      %49 = vector.load %arg6[%48, %c0_50] : memref<696x128xf32, #tpu.memory_space<vmem>>, vector<72x128xf32>
      %c4 = arith.constant 4 : index
      %c0_51 = arith.constant 0 : index
      %c0_52 = arith.constant 0 : index
      %50 = vector.load %arg1[%c4, %c0_51, %c0_52] : memref<9x128x128xf32, #tpu.memory_space<vmem>>, vector<1x128x128xf32>
      %51 = vector.shape_cast %50 : vector<1x128x128xf32> to vector<128x128xf32>
      %cst_53 = arith.constant dense<0.000000e+00> : vector<72x128xf32>
      %52 = tpu.matmul %49, %51, %cst_53 {dimension_numbers = #tpu.dot_dimension_numbers<[1], [0], [0], [1], [0, 0, 1, 1], [], []>} : vector<72x128xf32>, vector<128x128xf32>, vector<72x128xf32> -> vector<72x128xf32>
      %53 = arith.addf %45, %52 : vector<72x128xf32>
      %c24_i32_54 = arith.constant 24 : i32
      %54 = arith.addi %c24_i32_54, %12 : i32
      %c1_i32_55 = arith.constant 1 : i32
      %55 = arith.addi %54, %c1_i32_55 : i32
      %56 = arith.index_cast %55 : i32 to index
      %c0_56 = arith.constant 0 : index
      %57 = vector.load %arg6[%56, %c0_56] : memref<696x128xf32, #tpu.memory_space<vmem>>, vector<72x128xf32>
      %c5 = arith.constant 5 : index
      %c0_57 = arith.constant 0 : index
      %c0_58 = arith.constant 0 : index
      %58 = vector.load %arg1[%c5, %c0_57, %c0_58] : memref<9x128x128xf32, #tpu.memory_space<vmem>>, vector<1x128x128xf32>
      %59 = vector.shape_cast %58 : vector<1x128x128xf32> to vector<128x128xf32>
      %cst_59 = arith.constant dense<0.000000e+00> : vector<72x128xf32>
      %60 = tpu.matmul %57, %59, %cst_59 {dimension_numbers = #tpu.dot_dimension_numbers<[1], [0], [0], [1], [0, 0, 1, 1], [], []>} : vector<72x128xf32>, vector<128x128xf32>, vector<72x128xf32> -> vector<72x128xf32>
      %61 = arith.addf %53, %60 : vector<72x128xf32>
      %c24_i32_60 = arith.constant 24 : i32
      %62 = arith.addi %c24_i32_60, %12 : i32
      %c17_i32 = arith.constant 17 : i32
      %63 = arith.addi %62, %c17_i32 : i32
      %64 = arith.index_cast %63 : i32 to index
      %c0_61 = arith.constant 0 : index
      %65 = vector.load %arg6[%64, %c0_61] : memref<696x128xf32, #tpu.memory_space<vmem>>, vector<72x128xf32>
      %c6 = arith.constant 6 : index
      %c0_62 = arith.constant 0 : index
      %c0_63 = arith.constant 0 : index
      %66 = vector.load %arg1[%c6, %c0_62, %c0_63] : memref<9x128x128xf32, #tpu.memory_space<vmem>>, vector<1x128x128xf32>
      %67 = vector.shape_cast %66 : vector<1x128x128xf32> to vector<128x128xf32>
      %cst_64 = arith.constant dense<0.000000e+00> : vector<72x128xf32>
      %68 = tpu.matmul %65, %67, %cst_64 {dimension_numbers = #tpu.dot_dimension_numbers<[1], [0], [0], [1], [0, 0, 1, 1], [], []>} : vector<72x128xf32>, vector<128x128xf32>, vector<72x128xf32> -> vector<72x128xf32>
      %69 = arith.addf %61, %68 : vector<72x128xf32>
      %c24_i32_65 = arith.constant 24 : i32
      %70 = arith.addi %c24_i32_65, %12 : i32
      %c18_i32 = arith.constant 18 : i32
      %71 = arith.addi %70, %c18_i32 : i32
      %72 = arith.index_cast %71 : i32 to index
      %c0_66 = arith.constant 0 : index
      %73 = vector.load %arg6[%72, %c0_66] : memref<696x128xf32, #tpu.memory_space<vmem>>, vector<72x128xf32>
      %c7 = arith.constant 7 : index
      %c0_67 = arith.constant 0 : index
      %c0_68 = arith.constant 0 : index
      %74 = vector.load %arg1[%c7, %c0_67, %c0_68] : memref<9x128x128xf32, #tpu.memory_space<vmem>>, vector<1x128x128xf32>
      %75 = vector.shape_cast %74 : vector<1x128x128xf32> to vector<128x128xf32>
      %cst_69 = arith.constant dense<0.000000e+00> : vector<72x128xf32>
      %76 = tpu.matmul %73, %75, %cst_69 {dimension_numbers = #tpu.dot_dimension_numbers<[1], [0], [0], [1], [0, 0, 1, 1], [], []>} : vector<72x128xf32>, vector<128x128xf32>, vector<72x128xf32> -> vector<72x128xf32>
      %77 = arith.addf %69, %76 : vector<72x128xf32>
      %c24_i32_70 = arith.constant 24 : i32
      %78 = arith.addi %c24_i32_70, %12 : i32
      %c19_i32 = arith.constant 19 : i32
      %79 = arith.addi %78, %c19_i32 : i32
      %80 = arith.index_cast %79 : i32 to index
      %c0_71 = arith.constant 0 : index
      %81 = vector.load %arg6[%80, %c0_71] : memref<696x128xf32, #tpu.memory_space<vmem>>, vector<72x128xf32>
      %c8 = arith.constant 8 : index
      %c0_72 = arith.constant 0 : index
      %c0_73 = arith.constant 0 : index
      %82 = vector.load %arg1[%c8, %c0_72, %c0_73] : memref<9x128x128xf32, #tpu.memory_space<vmem>>, vector<1x128x128xf32>
      %83 = vector.shape_cast %82 : vector<1x128x128xf32> to vector<128x128xf32>
      %cst_74 = arith.constant dense<0.000000e+00> : vector<72x128xf32>
      %84 = tpu.matmul %81, %83, %cst_74 {dimension_numbers = #tpu.dot_dimension_numbers<[1], [0], [0], [1], [0, 0, 1, 1], [], []>} : vector<72x128xf32>, vector<128x128xf32>, vector<72x128xf32> -> vector<72x128xf32>
      %85 = arith.addf %77, %84 : vector<72x128xf32>
      %86 = vector.broadcast %4 : vector<1x128xf32> to vector<72x128xf32>
      %87 = arith.addf %85, %86 : vector<72x128xf32>
      %cst_75 = arith.constant 0.000000e+00 : f32
      %88 = vector.broadcast %cst_75 : f32 to vector<72x128xf32>
      %89 = arith.maximumf %87, %88 : vector<72x128xf32>
      %90 = arith.index_cast %12 : i32 to index
      %c0_76 = arith.constant 0 : index
      %91 = vector.load %arg3[%90, %c0_76] : memref<648x128xf32, #tpu.memory_space<vmem>>, vector<72x128xf32>
      %92 = arith.mulf %89, %91 : vector<72x128xf32>
      %c24_i32_77 = arith.constant 24 : i32
      %93 = arith.addi %c24_i32_77, %12 : i32
      %94 = arith.index_cast %93 : i32 to index
      %c0_78 = arith.constant 0 : index
      %95 = vector.load %arg5[%94, %c0_78] : memref<696x128xf32, #tpu.memory_space<vmem>>, vector<72x128xf32>
      tpu.vector_store %arg5[%94, %c0_78], %92 {strides = array<i32>} : memref<696x128xf32, #tpu.memory_space<vmem>>, vector<72x128xf32>,
    }
    %c9_i32_22 = arith.constant 9 : i32
    %c0_i32_23 = arith.constant 0 : i32
    %c9_i32_24 = arith.constant 9 : i32
    %10 = arith.addi %c0_i32_23, %c9_i32_24 : i32
    %c1_i32_25 = arith.constant 1 : i32
    scf.for %arg7 = %c0_i32_23 to %10 step %c1_i32_25  : i32 {
      %c72_i32 = arith.constant 72 : i32
      %11 = arith.muli %arg7, %c72_i32 : i32
      %12 = tpu.assume_multiple %11, 8 : i32
      %cst_27 = arith.constant 0.000000e+00 : f32
      %13 = vector.broadcast %cst_27 : f32 to vector<72x128xf32>
      %c24_i32 = arith.constant 24 : i32
      %14 = arith.addi %c24_i32, %12 : i32
      %c-19_i32 = arith.constant -19 : i32
      %15 = arith.addi %14, %c-19_i32 : i32
      %16 = arith.index_cast %15 : i32 to index
      %c0_28 = arith.constant 0 : index
      %17 = vector.load %arg5[%16, %c0_28] : memref<696x128xf32, #tpu.memory_space<vmem>>, vector<72x128xf32>
      %c0_29 = arith.constant 0 : index
      %c0_30 = arith.constant 0 : index
      %c0_31 = arith.constant 0 : index
      %18 = vector.load %arg1[%c0_29, %c0_30, %c0_31] : memref<9x128x128xf32, #tpu.memory_space<vmem>>, vector<1x128x128xf32>
      %19 = vector.shape_cast %18 : vector<1x128x128xf32> to vector<128x128xf32>
      %cst_32 = arith.constant dense<0.000000e+00> : vector<72x128xf32>
      %20 = tpu.matmul %17, %19, %cst_32 {dimension_numbers = #tpu.dot_dimension_numbers<[1], [0], [0], [1], [0, 0, 1, 1], [], []>} : vector<72x128xf32>, vector<128x128xf32>, vector<72x128xf32> -> vector<72x128xf32>
      %21 = arith.addf %13, %20 : vector<72x128xf32>
      %c24_i32_33 = arith.constant 24 : i32
      %22 = arith.addi %c24_i32_33, %12 : i32
      %c-18_i32 = arith.constant -18 : i32
      %23 = arith.addi %22, %c-18_i32 : i32
      %24 = arith.index_cast %23 : i32 to index
      %c0_34 = arith.constant 0 : index
      %25 = vector.load %arg5[%24, %c0_34] : memref<696x128xf32, #tpu.memory_space<vmem>>, vector<72x128xf32>
      %c1 = arith.constant 1 : index
      %c0_35 = arith.constant 0 : index
      %c0_36 = arith.constant 0 : index
      %26 = vector.load %arg1[%c1, %c0_35, %c0_36] : memref<9x128x128xf32, #tpu.memory_space<vmem>>, vector<1x128x128xf32>
      %27 = vector.shape_cast %26 : vector<1x128x128xf32> to vector<128x128xf32>
      %cst_37 = arith.constant dense<0.000000e+00> : vector<72x128xf32>
      %28 = tpu.matmul %25, %27, %cst_37 {dimension_numbers = #tpu.dot_dimension_numbers<[1], [0], [0], [1], [0, 0, 1, 1], [], []>} : vector<72x128xf32>, vector<128x128xf32>, vector<72x128xf32> -> vector<72x128xf32>
      %29 = arith.addf %21, %28 : vector<72x128xf32>
      %c24_i32_38 = arith.constant 24 : i32
      %30 = arith.addi %c24_i32_38, %12 : i32
      %c-17_i32 = arith.constant -17 : i32
      %31 = arith.addi %30, %c-17_i32 : i32
      %32 = arith.index_cast %31 : i32 to index
      %c0_39 = arith.constant 0 : index
      %33 = vector.load %arg5[%32, %c0_39] : memref<696x128xf32, #tpu.memory_space<vmem>>, vector<72x128xf32>
      %c2 = arith.constant 2 : index
      %c0_40 = arith.constant 0 : index
      %c0_41 = arith.constant 0 : index
      %34 = vector.load %arg1[%c2, %c0_40, %c0_41] : memref<9x128x128xf32, #tpu.memory_space<vmem>>, vector<1x128x128xf32>
      %35 = vector.shape_cast %34 : vector<1x128x128xf32> to vector<128x128xf32>
      %cst_42 = arith.constant dense<0.000000e+00> : vector<72x128xf32>
      %36 = tpu.matmul %33, %35, %cst_42 {dimension_numbers = #tpu.dot_dimension_numbers<[1], [0], [0], [1], [0, 0, 1, 1], [], []>} : vector<72x128xf32>, vector<128x128xf32>, vector<72x128xf32> -> vector<72x128xf32>
      %37 = arith.addf %29, %36 : vector<72x128xf32>
      %c24_i32_43 = arith.constant 24 : i32
      %38 = arith.addi %c24_i32_43, %12 : i32
      %c-1_i32 = arith.constant -1 : i32
      %39 = arith.addi %38, %c-1_i32 : i32
      %40 = arith.index_cast %39 : i32 to index
      %c0_44 = arith.constant 0 : index
      %41 = vector.load %arg5[%40, %c0_44] : memref<696x128xf32, #tpu.memory_space<vmem>>, vector<72x128xf32>
      %c3 = arith.constant 3 : index
      %c0_45 = arith.constant 0 : index
      %c0_46 = arith.constant 0 : index
      %42 = vector.load %arg1[%c3, %c0_45, %c0_46] : memref<9x128x128xf32, #tpu.memory_space<vmem>>, vector<1x128x128xf32>
      %43 = vector.shape_cast %42 : vector<1x128x128xf32> to vector<128x128xf32>
      %cst_47 = arith.constant dense<0.000000e+00> : vector<72x128xf32>
      %44 = tpu.matmul %41, %43, %cst_47 {dimension_numbers = #tpu.dot_dimension_numbers<[1], [0], [0], [1], [0, 0, 1, 1], [], []>} : vector<72x128xf32>, vector<128x128xf32>, vector<72x128xf32> -> vector<72x128xf32>
      %45 = arith.addf %37, %44 : vector<72x128xf32>
      %c24_i32_48 = arith.constant 24 : i32
      %46 = arith.addi %c24_i32_48, %12 : i32
      %c0_i32_49 = arith.constant 0 : i32
      %47 = arith.addi %46, %c0_i32_49 : i32
      %48 = arith.index_cast %47 : i32 to index
      %c0_50 = arith.constant 0 : index
      %49 = vector.load %arg5[%48, %c0_50] : memref<696x128xf32, #tpu.memory_space<vmem>>, vector<72x128xf32>
      %c4 = arith.constant 4 : index
      %c0_51 = arith.constant 0 : index
      %c0_52 = arith.constant 0 : index
      %50 = vector.load %arg1[%c4, %c0_51, %c0_52] : memref<9x128x128xf32, #tpu.memory_space<vmem>>, vector<1x128x128xf32>
      %51 = vector.shape_cast %50 : vector<1x128x128xf32> to vector<128x128xf32>
      %cst_53 = arith.constant dense<0.000000e+00> : vector<72x128xf32>
      %52 = tpu.matmul %49, %51, %cst_53 {dimension_numbers = #tpu.dot_dimension_numbers<[1], [0], [0], [1], [0, 0, 1, 1], [], []>} : vector<72x128xf32>, vector<128x128xf32>, vector<72x128xf32> -> vector<72x128xf32>
      %53 = arith.addf %45, %52 : vector<72x128xf32>
      %c24_i32_54 = arith.constant 24 : i32
      %54 = arith.addi %c24_i32_54, %12 : i32
      %c1_i32_55 = arith.constant 1 : i32
      %55 = arith.addi %54, %c1_i32_55 : i32
      %56 = arith.index_cast %55 : i32 to index
      %c0_56 = arith.constant 0 : index
      %57 = vector.load %arg5[%56, %c0_56] : memref<696x128xf32, #tpu.memory_space<vmem>>, vector<72x128xf32>
      %c5 = arith.constant 5 : index
      %c0_57 = arith.constant 0 : index
      %c0_58 = arith.constant 0 : index
      %58 = vector.load %arg1[%c5, %c0_57, %c0_58] : memref<9x128x128xf32, #tpu.memory_space<vmem>>, vector<1x128x128xf32>
      %59 = vector.shape_cast %58 : vector<1x128x128xf32> to vector<128x128xf32>
      %cst_59 = arith.constant dense<0.000000e+00> : vector<72x128xf32>
      %60 = tpu.matmul %57, %59, %cst_59 {dimension_numbers = #tpu.dot_dimension_numbers<[1], [0], [0], [1], [0, 0, 1, 1], [], []>} : vector<72x128xf32>, vector<128x128xf32>, vector<72x128xf32> -> vector<72x128xf32>
      %61 = arith.addf %53, %60 : vector<72x128xf32>
      %c24_i32_60 = arith.constant 24 : i32
      %62 = arith.addi %c24_i32_60, %12 : i32
      %c17_i32 = arith.constant 17 : i32
      %63 = arith.addi %62, %c17_i32 : i32
      %64 = arith.index_cast %63 : i32 to index
      %c0_61 = arith.constant 0 : index
      %65 = vector.load %arg5[%64, %c0_61] : memref<696x128xf32, #tpu.memory_space<vmem>>, vector<72x128xf32>
      %c6 = arith.constant 6 : index
      %c0_62 = arith.constant 0 : index
      %c0_63 = arith.constant 0 : index
      %66 = vector.load %arg1[%c6, %c0_62, %c0_63] : memref<9x128x128xf32, #tpu.memory_space<vmem>>, vector<1x128x128xf32>
      %67 = vector.shape_cast %66 : vector<1x128x128xf32> to vector<128x128xf32>
      %cst_64 = arith.constant dense<0.000000e+00> : vector<72x128xf32>
      %68 = tpu.matmul %65, %67, %cst_64 {dimension_numbers = #tpu.dot_dimension_numbers<[1], [0], [0], [1], [0, 0, 1, 1], [], []>} : vector<72x128xf32>, vector<128x128xf32>, vector<72x128xf32> -> vector<72x128xf32>
      %69 = arith.addf %61, %68 : vector<72x128xf32>
      %c24_i32_65 = arith.constant 24 : i32
      %70 = arith.addi %c24_i32_65, %12 : i32
      %c18_i32 = arith.constant 18 : i32
      %71 = arith.addi %70, %c18_i32 : i32
      %72 = arith.index_cast %71 : i32 to index
      %c0_66 = arith.constant 0 : index
      %73 = vector.load %arg5[%72, %c0_66] : memref<696x128xf32, #tpu.memory_space<vmem>>, vector<72x128xf32>
      %c7 = arith.constant 7 : index
      %c0_67 = arith.constant 0 : index
      %c0_68 = arith.constant 0 : index
      %74 = vector.load %arg1[%c7, %c0_67, %c0_68] : memref<9x128x128xf32, #tpu.memory_space<vmem>>, vector<1x128x128xf32>
      %75 = vector.shape_cast %74 : vector<1x128x128xf32> to vector<128x128xf32>
      %cst_69 = arith.constant dense<0.000000e+00> : vector<72x128xf32>
      %76 = tpu.matmul %73, %75, %cst_69 {dimension_numbers = #tpu.dot_dimension_numbers<[1], [0], [0], [1], [0, 0, 1, 1], [], []>} : vector<72x128xf32>, vector<128x128xf32>, vector<72x128xf32> -> vector<72x128xf32>
      %77 = arith.addf %69, %76 : vector<72x128xf32>
      %c24_i32_70 = arith.constant 24 : i32
      %78 = arith.addi %c24_i32_70, %12 : i32
      %c19_i32 = arith.constant 19 : i32
      %79 = arith.addi %78, %c19_i32 : i32
      %80 = arith.index_cast %79 : i32 to index
      %c0_71 = arith.constant 0 : index
      %81 = vector.load %arg5[%80, %c0_71] : memref<696x128xf32, #tpu.memory_space<vmem>>, vector<72x128xf32>
      %c8 = arith.constant 8 : index
      %c0_72 = arith.constant 0 : index
      %c0_73 = arith.constant 0 : index
      %82 = vector.load %arg1[%c8, %c0_72, %c0_73] : memref<9x128x128xf32, #tpu.memory_space<vmem>>, vector<1x128x128xf32>
      %83 = vector.shape_cast %82 : vector<1x128x128xf32> to vector<128x128xf32>
      %cst_74 = arith.constant dense<0.000000e+00> : vector<72x128xf32>
      %84 = tpu.matmul %81, %83, %cst_74 {dimension_numbers = #tpu.dot_dimension_numbers<[1], [0], [0], [1], [0, 0, 1, 1], [], []>} : vector<72x128xf32>, vector<128x128xf32>, vector<72x128xf32> -> vector<72x128xf32>
      %85 = arith.addf %77, %84 : vector<72x128xf32>
      %86 = vector.broadcast %4 : vector<1x128xf32> to vector<72x128xf32>
      %87 = arith.addf %85, %86 : vector<72x128xf32>
      %c0_i32_75 = arith.constant 0 : i32
      %88 = arith.addi %c0_i32_75, %12 : i32
      %89 = arith.index_cast %88 : i32 to index
      %c0_76 = arith.constant 0 : index
      %90 = vector.load %arg4[%89, %c0_76] : memref<648x128xf32, #tpu.memory_space<vmem>>, vector<72x128xf32>
      tpu.vector_store %arg4[%89, %c0_76], %87 {strides = array<i32>} : memref<648x128xf32, #tpu.memory_space<vmem>>, vector<72x128xf32>,
    }
    %c9_i32_26 = arith.constant 9 : i32
    return
  }
}

</mosaic_0001>

<bundles_post_ra>
// kernel: recursive_net_forward.1
= control target key start
LH: loop header
LB: loop body
LE: loop exit
PB: predicated region body
PF: predicated region fallthrough
CT: control target
= control target key end

     0   :  { %v15896_v0 = vmov 0.0   ;;  %s16119_s17 = smov 0   ;;  %s21072_s0 = inlined_call_operand.vmem [shape: f32[696,128], index: 0, kind: input, shape index: {}]   ;;  %s21073_s1 = inlined_call_operand.vmem [shape: f32[9,128,128], index: 1, kind: input, shape index: {}]   ;;  %s21074_s2 = inlined_call_operand.vmem [shape: f32[1,128], index: 2, kind: input, shape index: {}]   ;;  %s21075_s3 = inlined_call_operand.vmem [shape: f32[648,128], index: 3, kind: input, shape index: {}]   ;;  %s21076_s4 = inlined_call_operand.vmem [shape: f32[648,128], index: 4, kind: output, shape index: {}]  }
   0x1   :  { %17 = vst [vmem:[#allocation2] sm:$0xff] %v15896_v0  ;;  %18 = vst [vmem:[#allocation2 + $0x8] sm:$0xff] %v15896_v0  ;;  %v16117_v1 = vld [vmem:[%s21074_s2] ss:$0 sm:$0xff] }
   0x2   :  { %19 = vst [vmem:[#allocation2 + $0x10] sm:$0xff] %v15896_v0  ;;  %20 = vst [vmem:[#allocation2 + $0x18] sm:$0xff] %v15896_v0 }
   0x3   :  { %21 = vst [vmem:[#allocation2 + $0x20] sm:$0xff] %v15896_v0  ;;  %22 = vst [vmem:[#allocation2 + $0x28] sm:$0xff] %v15896_v0 }
   0x4   :  { %23 = vst [vmem:[#allocation2 + $0x30] sm:$0xff] %v15896_v0  ;;  %24 = vst [vmem:[#allocation2 + $0x38] sm:$0xff] %v15896_v0 }
   0x5   :  { %25 = vst [vmem:[#allocation2 + $0x40] sm:$0xff] %v15896_v0  ;;  %26 = vst [vmem:[#allocation2 + $0x48] sm:$0xff] %v15896_v0 }
   0x6   :  { %27 = vst [vmem:[#allocation2 + $0x50] sm:$0xff] %v15896_v0  ;;  %28 = vst [vmem:[#allocation2 + $0x58] sm:$0xff] %v15896_v0 }
   0x7   :  { %29 = vst [vmem:[#allocation2 + $0x60] sm:$0xff] %v15896_v0  ;;  %30 = vst [vmem:[#allocation2 + $0x68] sm:$0xff] %v15896_v0 }
   0x8   :  { %31 = vst [vmem:[#allocation2 + $0x70] sm:$0xff] %v15896_v0  ;;  %32 = vst [vmem:[#allocation2 + $0x78] sm:$0xff] %v15896_v0 }
   0x9   :  { %33 = vst [vmem:[#allocation2 + $0x80] sm:$0xff] %v15896_v0  ;;  %34 = vst [vmem:[#allocation2 + $0x88] sm:$0xff] %v15896_v0 }
   0xa   :  { %35 = vst [vmem:[#allocation2 + $0x90] sm:$0xff] %v15896_v0  ;;  %36 = vst [vmem:[#allocation2 + $0x98] sm:$0xff] %v15896_v0 }
   0xb   :  { %37 = vst [vmem:[#allocation2 + $0xa0] sm:$0xff] %v15896_v0  ;;  %38 = vst [vmem:[#allocation2 + $0xa8] sm:$0xff] %v15896_v0 }
   0xc   :  { %39 = vst [vmem:[#allocation2 + $0xb0] sm:$0xff] %v15896_v0  ;;  %40 = vst [vmem:[#allocation2 + $0xb8] sm:$0xff] %v15896_v0 }
   0xd   :  { %41 = vst [vmem:[#allocation2 + $0xc0] sm:$0xff] %v15896_v0  ;;  %42 = vst [vmem:[#allocation2 + $0xc8] sm:$0xff] %v15896_v0 }
   0xe   :  { %43 = vst [vmem:[#allocation2 + $0xd0] sm:$0xff] %v15896_v0  ;;  %44 = vst [vmem:[#allocation2 + $0xd8] sm:$0xff] %v15896_v0 }
   0xf   :  { %45 = vst [vmem:[#allocation2 + $0xe0] sm:$0xff] %v15896_v0  ;;  %46 = vst [vmem:[#allocation2 + $0xe8] sm:$0xff] %v15896_v0 }
  0x10   :  { %47 = vst [vmem:[#allocation2 + $0xf0] sm:$0xff] %v15896_v0  ;;  %48 = vst [vmem:[#allocation2 + $0xf8] sm:$0xff] %v15896_v0 }
  0x11   :  { %49 = vst [vmem:[#allocation2 + $0x100] sm:$0xff] %v15896_v0  ;;  %50 = vst [vmem:[#allocation2 + $0x108] sm:$0xff] %v15896_v0 }
  0x12   :  { %51 = vst [vmem:[#allocation2 + $0x110] sm:$0xff] %v15896_v0  ;;  %52 = vst [vmem:[#allocation2 + $0x118] sm:$0xff] %v15896_v0 }
  0x13   :  { %53 = vst [vmem:[#allocation2 + $0x120] sm:$0xff] %v15896_v0  ;;  %54 = vst [vmem:[#allocation2 + $0x128] sm:$0xff] %v15896_v0 }
  0x14   :  { %55 = vst [vmem:[#allocation2 + $0x130] sm:$0xff] %v15896_v0  ;;  %56 = vst [vmem:[#allocation2 + $0x138] sm:$0xff] %v15896_v0 }
  0x15   :  { %57 = vst [vmem:[#allocation2 + $0x140] sm:$0xff] %v15896_v0  ;;  %58 = vst [vmem:[#allocation2 + $0x148] sm:$0xff] %v15896_v0 }
  0x16   :  { %59 = vst [vmem:[#allocation2 + $0x150] sm:$0xff] %v15896_v0  ;;  %60 = vst [vmem:[#allocation2 + $0x158] sm:$0xff] %v15896_v0 }
  0x17   :  { %61 = vst [vmem:[#allocation2 + $0x160] sm:$0xff] %v15896_v0  ;;  %62 = vst [vmem:[#allocation2 + $0x168] sm:$0xff] %v15896_v0 }
  0x18   :  { %63 = vst [vmem:[#allocation2 + $0x170] sm:$0xff] %v15896_v0  ;;  %64 = vst [vmem:[#allocation2 + $0x178] sm:$0xff] %v15896_v0 }
  0x19   :  { %65 = vst [vmem:[#allocation2 + $0x180] sm:$0xff] %v15896_v0  ;;  %66 = vst [vmem:[#allocation2 + $0x188] sm:$0xff] %v15896_v0 }
  0x1a   :  { %67 = vst [vmem:[#allocation2 + $0x190] sm:$0xff] %v15896_v0  ;;  %68 = vst [vmem:[#allocation2 + $0x198] sm:$0xff] %v15896_v0 }
  0x1b   :  { %69 = vst [vmem:[#allocation2 + $0x1a0] sm:$0xff] %v15896_v0  ;;  %70 = vst [vmem:[#allocation2 + $0x1a8] sm:$0xff] %v15896_v0 }
  0x1c   :  { %71 = vst [vmem:[#allocation2 + $0x1b0] sm:$0xff] %v15896_v0  ;;  %72 = vst [vmem:[#allocation2 + $0x1b8] sm:$0xff] %v15896_v0 }
  0x1d   :  { %73 = vst [vmem:[#allocation2 + $0x1c0] sm:$0xff] %v15896_v0  ;;  %74 = vst [vmem:[#allocation2 + $0x1c8] sm:$0xff] %v15896_v0 }
  0x1e   :  { %75 = vst [vmem:[#allocation2 + $0x1d0] sm:$0xff] %v15896_v0  ;;  %76 = vst [vmem:[#allocation2 + $0x1d8] sm:$0xff] %v15896_v0 }
  0x1f   :  { %77 = vst [vmem:[#allocation2 + $0x1e0] sm:$0xff] %v15896_v0  ;;  %78 = vst [vmem:[#allocation2 + $0x1e8] sm:$0xff] %v15896_v0 }
  0x20   :  { %79 = vst [vmem:[#allocation2 + $0x1f0] sm:$0xff] %v15896_v0  ;;  %80 = vst [vmem:[#allocation2 + $0x1f8] sm:$0xff] %v15896_v0 }
  0x21   :  { %81 = vst [vmem:[#allocation2 + $0x200] sm:$0xff] %v15896_v0  ;;  %82 = vst [vmem:[#allocation2 + $0x208] sm:$0xff] %v15896_v0 }
  0x22   :  { %83 = vst [vmem:[#allocation2 + $0x210] sm:$0xff] %v15896_v0  ;;  %84 = vst [vmem:[#allocation2 + $0x218] sm:$0xff] %v15896_v0 }
  0x23   :  { %85 = vst [vmem:[#allocation2 + $0x220] sm:$0xff] %v15896_v0  ;;  %86 = vst [vmem:[#allocation2 + $0x228] sm:$0xff] %v15896_v0 }
  0x24   :  { %87 = vst [vmem:[#allocation2 + $0x230] sm:$0xff] %v15896_v0  ;;  %88 = vst [vmem:[#allocation2 + $0x238] sm:$0xff] %v15896_v0 }
  0x25   :  { %89 = vst [vmem:[#allocation2 + $0x240] sm:$0xff] %v15896_v0  ;;  %90 = vst [vmem:[#allocation2 + $0x248] sm:$0xff] %v15896_v0 }
  0x26   :  { %91 = vst [vmem:[#allocation2 + $0x250] sm:$0xff] %v15896_v0  ;;  %92 = vst [vmem:[#allocation2 + $0x258] sm:$0xff] %v15896_v0 }
  0x27   :  { %93 = vst [vmem:[#allocation2 + $0x260] sm:$0xff] %v15896_v0  ;;  %94 = vst [vmem:[#allocation2 + $0x268] sm:$0xff] %v15896_v0 }
  0x28   :  { %95 = vst [vmem:[#allocation2 + $0x270] sm:$0xff] %v15896_v0  ;;  %96 = vst [vmem:[#allocation2 + $0x278] sm:$0xff] %v15896_v0 }
  0x29   :  { %97 = vst [vmem:[#allocation2 + $0x280] sm:$0xff] %v15896_v0  ;;  %98 = vst [vmem:[#allocation2 + $0x288] sm:$0xff] %v15896_v0 }
  0x2a   :  { %99 = vst [vmem:[#allocation2 + $0x290] sm:$0xff] %v15896_v0  ;;  %100 = vst [vmem:[#allocation2 + $0x298] sm:$0xff] %v15896_v0 }
  0x2b   :  { %101 = vst [vmem:[#allocation2 + $0x2a0] sm:$0xff] %v15896_v0  ;;  %102 = vst [vmem:[#allocation2 + $0x2a8] sm:$0xff] %v15896_v0 }
  0x2c   :  { %103 = vst [vmem:[#allocation2 + $0x2b0] sm:$0xff] %v15896_v0  ;;  %104 = vst [vmem:[#allocation3] sm:$0xff] %v15896_v0 }
  0x2d   :  { %105 = vst [vmem:[#allocation3 + $0x8] sm:$0xff] %v15896_v0  ;;  %106 = vst [vmem:[#allocation3 + $0x10] sm:$0xff] %v15896_v0 }
  0x2e   :  { %107 = vst [vmem:[#allocation3 + $0x18] sm:$0xff] %v15896_v0  ;;  %108 = vst [vmem:[#allocation3 + $0x20] sm:$0xff] %v15896_v0 }
  0x2f   :  { %109 = vst [vmem:[#allocation3 + $0x28] sm:$0xff] %v15896_v0  ;;  %110 = vst [vmem:[#allocation3 + $0x30] sm:$0xff] %v15896_v0 }
  0x30   :  { %111 = vst [vmem:[#allocation3 + $0x38] sm:$0xff] %v15896_v0  ;;  %112 = vst [vmem:[#allocation3 + $0x40] sm:$0xff] %v15896_v0 }
  0x31   :  { %113 = vst [vmem:[#allocation3 + $0x48] sm:$0xff] %v15896_v0  ;;  %114 = vst [vmem:[#allocation3 + $0x50] sm:$0xff] %v15896_v0 }
  0x32   :  { %115 = vst [vmem:[#allocation3 + $0x58] sm:$0xff] %v15896_v0  ;;  %116 = vst [vmem:[#allocation3 + $0x60] sm:$0xff] %v15896_v0 }
  0x33   :  { %117 = vst [vmem:[#allocation3 + $0x68] sm:$0xff] %v15896_v0  ;;  %118 = vst [vmem:[#allocation3 + $0x70] sm:$0xff] %v15896_v0 }
  0x34   :  { %119 = vst [vmem:[#allocation3 + $0x78] sm:$0xff] %v15896_v0  ;;  %120 = vst [vmem:[#allocation3 + $0x80] sm:$0xff] %v15896_v0 }
  0x35   :  { %121 = vst [vmem:[#allocation3 + $0x88] sm:$0xff] %v15896_v0  ;;  %122 = vst [vmem:[#allocation3 + $0x90] sm:$0xff] %v15896_v0 }
  0x36   :  { %123 = vst [vmem:[#allocation3 + $0x98] sm:$0xff] %v15896_v0  ;;  %124 = vst [vmem:[#allocation3 + $0xa0] sm:$0xff] %v15896_v0 }
  0x37   :  { %125 = vst [vmem:[#allocation3 + $0xa8] sm:$0xff] %v15896_v0  ;;  %126 = vst [vmem:[#allocation3 + $0xb0] sm:$0xff] %v15896_v0 }
  0x38   :  { %127 = vst [vmem:[#allocation3 + $0xb8] sm:$0xff] %v15896_v0  ;;  %128 = vst [vmem:[#allocation3 + $0xc0] sm:$0xff] %v15896_v0 }
  0x39   :  { %129 = vst [vmem:[#allocation3 + $0xc8] sm:$0xff] %v15896_v0  ;;  %130 = vst [vmem:[#allocation3 + $0xd0] sm:$0xff] %v15896_v0 }
  0x3a   :  { %131 = vst [vmem:[#allocation3 + $0xd8] sm:$0xff] %v15896_v0  ;;  %132 = vst [vmem:[#allocation3 + $0xe0] sm:$0xff] %v15896_v0 }
  0x3b   :  { %133 = vst [vmem:[#allocation3 + $0xe8] sm:$0xff] %v15896_v0  ;;  %134 = vst [vmem:[#allocation3 + $0xf0] sm:$0xff] %v15896_v0 }
  0x3c   :  { %135 = vst [vmem:[#allocation3 + $0xf8] sm:$0xff] %v15896_v0  ;;  %136 = vst [vmem:[#allocation3 + $0x100] sm:$0xff] %v15896_v0 }
  0x3d   :  { %137 = vst [vmem:[#allocation3 + $0x108] sm:$0xff] %v15896_v0  ;;  %138 = vst [vmem:[#allocation3 + $0x110] sm:$0xff] %v15896_v0 }
  0x3e   :  { %139 = vst [vmem:[#allocation3 + $0x118] sm:$0xff] %v15896_v0  ;;  %140 = vst [vmem:[#allocation3 + $0x120] sm:$0xff] %v15896_v0 }
  0x3f   :  { %141 = vst [vmem:[#allocation3 + $0x128] sm:$0xff] %v15896_v0  ;;  %142 = vst [vmem:[#allocation3 + $0x130] sm:$0xff] %v15896_v0 }
  0x40   :  { %143 = vst [vmem:[#allocation3 + $0x138] sm:$0xff] %v15896_v0  ;;  %144 = vst [vmem:[#allocation3 + $0x140] sm:$0xff] %v15896_v0 }
  0x41   :  { %145 = vst [vmem:[#allocation3 + $0x148] sm:$0xff] %v15896_v0  ;;  %146 = vst [vmem:[#allocation3 + $0x150] sm:$0xff] %v15896_v0 }
  0x42   :  { %147 = vst [vmem:[#allocation3 + $0x158] sm:$0xff] %v15896_v0  ;;  %148 = vst [vmem:[#allocation3 + $0x160] sm:$0xff] %v15896_v0 }
  0x43   :  { %149 = vst [vmem:[#allocation3 + $0x168] sm:$0xff] %v15896_v0  ;;  %150 = vst [vmem:[#allocation3 + $0x170] sm:$0xff] %v15896_v0 }
  0x44   :  { %151 = vst [vmem:[#allocation3 + $0x178] sm:$0xff] %v15896_v0  ;;  %152 = vst [vmem:[#allocation3 + $0x180] sm:$0xff] %v15896_v0 }
  0x45   :  { %153 = vst [vmem:[#allocation3 + $0x188] sm:$0xff] %v15896_v0  ;;  %154 = vst [vmem:[#allocation3 + $0x190] sm:$0xff] %v15896_v0 }
  0x46   :  { %155 = vst [vmem:[#allocation3 + $0x198] sm:$0xff] %v15896_v0  ;;  %156 = vst [vmem:[#allocation3 + $0x1a0] sm:$0xff] %v15896_v0 }
  0x47   :  { %157 = vst [vmem:[#allocation3 + $0x1a8] sm:$0xff] %v15896_v0  ;;  %158 = vst [vmem:[#allocation3 + $0x1b0] sm:$0xff] %v15896_v0 }
  0x48   :  { %159 = vst [vmem:[#allocation3 + $0x1b8] sm:$0xff] %v15896_v0  ;;  %160 = vst [vmem:[#allocation3 + $0x1c0] sm:$0xff] %v15896_v0 }
  0x49   :  { %161 = vst [vmem:[#allocation3 + $0x1c8] sm:$0xff] %v15896_v0  ;;  %162 = vst [vmem:[#allocation3 + $0x1d0] sm:$0xff] %v15896_v0 }
  0x4a   :  { %163 = vst [vmem:[#allocation3 + $0x1d8] sm:$0xff] %v15896_v0  ;;  %164 = vst [vmem:[#allocation3 + $0x1e0] sm:$0xff] %v15896_v0 }
  0x4b   :  { %165 = vst [vmem:[#allocation3 + $0x1e8] sm:$0xff] %v15896_v0  ;;  %166 = vst [vmem:[#allocation3 + $0x1f0] sm:$0xff] %v15896_v0 }
  0x4c   :  { %167 = vst [vmem:[#allocation3 + $0x1f8] sm:$0xff] %v15896_v0  ;;  %168 = vst [vmem:[#allocation3 + $0x200] sm:$0xff] %v15896_v0 }
  0x4d   :  { %169 = vst [vmem:[#allocation3 + $0x208] sm:$0xff] %v15896_v0  ;;  %170 = vst [vmem:[#allocation3 + $0x210] sm:$0xff] %v15896_v0 }
  0x4e   :  { %171 = vst [vmem:[#allocation3 + $0x218] sm:$0xff] %v15896_v0  ;;  %172 = vst [vmem:[#allocation3 + $0x220] sm:$0xff] %v15896_v0 }
  0x4f   :  { %173 = vst [vmem:[#allocation3 + $0x228] sm:$0xff] %v15896_v0  ;;  %174 = vst [vmem:[#allocation3 + $0x230] sm:$0xff] %v15896_v0 }
  0x50   :  { %175 = vst [vmem:[#allocation3 + $0x238] sm:$0xff] %v15896_v0  ;;  %176 = vst [vmem:[#allocation3 + $0x240] sm:$0xff] %v15896_v0 }
  0x51   :  { %177 = vst [vmem:[#allocation3 + $0x248] sm:$0xff] %v15896_v0  ;;  %178 = vst [vmem:[#allocation3 + $0x250] sm:$0xff] %v15896_v0 }
  0x52   :  { %179 = vst [vmem:[#allocation3 + $0x258] sm:$0xff] %v15896_v0  ;;  %180 = vst [vmem:[#allocation3 + $0x260] sm:$0xff] %v15896_v0 }
  0x53   :  { %181 = vst [vmem:[#allocation3 + $0x268] sm:$0xff] %v15896_v0  ;;  %182 = vst [vmem:[#allocation3 + $0x270] sm:$0xff] %v15896_v0 }
  0x54   :  { %183 = vst [vmem:[#allocation3 + $0x278] sm:$0xff] %v15896_v0  ;;  %184 = vst [vmem:[#allocation3 + $0x280] sm:$0xff] %v15896_v0 }
  0x55   :  { %185 = vst [vmem:[#allocation3 + $0x288] sm:$0xff] %v15896_v0  ;;  %186 = vst [vmem:[#allocation3 + $0x290] sm:$0xff] %v15896_v0 }
  0x56   :  { %187 = vst [vmem:[#allocation3 + $0x298] sm:$0xff] %v15896_v0  ;;  %188 = vst [vmem:[#allocation3 + $0x2a0] sm:$0xff] %v15896_v0 }
  0x57   :  { %189 = vst [vmem:[#allocation3 + $0x2a8] sm:$0xff] %v15896_v0  ;;  %190 = vst [vmem:[#allocation3 + $0x2b0] sm:$0xff] %v15896_v0 }
  0x58 LB: > { %v8571_v2 = vld [vmem:[%s21073_s1 + $0x80] sm:$0xff]  ;;  %v8572_v3 = vld [vmem:[%s21073_s1 + $0x88] sm:$0xff]  ;;  %v15897_v5 = vmov 0.0|0.0   ;;  %v8573_v8 = vld [vmem:[%s21073_s1 + $0x90] sm:$0xff]  ;;  %vm15898_vm0 = vmmov 0   ;;  %v15899_v13 = vmov 0.0   ;;  %s15874_s17 = sphi %s16119_s17, %s197_s17  }
  0x59   : > { %v210_v4 = vld [vmem:[%s21073_s1] sm:$0xff]  ;;  %14389 = vmatprep.subr.bf16.mxu0 %v15897_v5  ;;  %14413 = vmatprep.subr.bf16.mxu1 %v15897_v5  ;;  %v14390_v6 = vpack.c.bf16 %v8572_v3, %v8571_v2  ;;  %v211_v7 = vld [vmem:[%s21073_s1 + $0x8] sm:$0xff]  ;;  %v8574_v9 = vld [vmem:[%s21073_s1 + $0x98] sm:$0xff]  ;;  %s16232_s25 = smul.u32 72, %s15874_s17  ;;  %s197_s17 = sadd.s32 1, %s15874_s17  }
  0x5a   : > { %v14414_v10 = vpack.c.bf16 %v211_v7, %v210_v4  ;;  %v212_v11 = vld [vmem:[%s21073_s1 + $0x10] sm:$0xff]  ;;  %v213_v12 = vld [vmem:[%s21073_s1 + $0x18] sm:$0xff]  ;;  %11235 = vmatprep.mubr.msk.f32.mxu0 %vm15898_vm0, %v15899_v13  ;;  %11294 = vmatprep.mubr.msk.f32.mxu1 %vm15898_vm0, %v15899_v13  ;;  %v14393_v14 = vpack.c.bf16 %v8574_v9, %v8573_v8  ;;  %v8575_v16 = vld [vmem:[%s21073_s1 + $0xa0] sm:$0xff]  ;;  %p194_p0 = scmp.ge.s32.totalorder %s197_s17, 9  }
  0x5b   : > { %14391 = vmatpush3.bf16.msra.mxu0 %v14390_v6  ;;  %v14417_v15 = vpack.c.bf16 %v213_v12, %v212_v11  ;;  %v8576_v17 = vld [vmem:[%s21073_s1 + $0xa8] sm:$0xff]  ;;  %v214_v18 = vld [vmem:[%s21073_s1 + $0x20] sm:$0xff]  ;;  %v8577_v22 = vld [vmem:[%s21073_s1 + $0xb0] sm:$0xff]  ;;  %s16246_s6 = scalar_lea.vmem %s21072_s0, %s16232_s25  ;;  %s16912_s16 = scalar_lea.vmem %s21075_s3, %s16232_s25 }
  0x5c   : > { %14415 = vmatpush3.bf16.msra.mxu1 %v14414_v10  ;;  %14392 = vmatprep.subr.bf16.mxu0 %v15897_v5  ;;  %v215_v19 = vld [vmem:[%s21073_s1 + $0x28] sm:$0xff]  ;;  %v14396_v20 = vpack.c.bf16 %v8576_v17, %v8575_v16  ;;  %v8578_v23 = vld [vmem:[%s21073_s1 + $0xb8] sm:$0xff]  ;;  %v216_v24 = vld [vmem:[%s21073_s1 + $0x30] sm:$0xff]  ;;  %s16922_s18 = scalar_lea.vmem [#allocation2], %s16232_s25  ;;  %s16950_s25 = smov (%p194_p0), 0  }
  0x5d   : > { %14416 = vmatprep.subr.bf16.mxu1 %v15897_v5  ;;  %v14420_v21 = vpack.c.bf16 %v215_v19, %v214_v18  ;;  %v217_v25 = vld [vmem:[%s21073_s1 + $0x38] sm:$0xff]  ;;  %v14399_v26 = vpack.c.bf16 %v8578_v23, %v8577_v22  ;;  %v8579_v28 = vld [vmem:[%s21073_s1 + $0xc0] sm:$0xff]  ;;  %v8580_v29 = vld [vmem:[%s21073_s1 + $0xc8] sm:$0xff] }
  0x5e   : > { %v14423_v27 = vpack.c.bf16 %v217_v25, %v216_v24  ;;  %v218_v30 = vld [vmem:[%s21073_s1 + $0x40] sm:$0xff]  ;;  %v219_v31 = vld [vmem:[%s21073_s1 + $0x48] sm:$0xff]  ;;  %v14402_v32 = vpack.c.bf16 %v8580_v29, %v8579_v28  ;;  %v8581_v34 = vld [vmem:[%s21073_s1 + $0xd0] sm:$0xff] }
  0x5f   : > { %14394 = vmatpush3.bf16.msra.mxu0 %v14393_v14  ;;  %v14426_v33 = vpack.c.bf16 %v219_v31, %v218_v30  ;;  %v8582_v35 = vld [vmem:[%s21073_s1 + $0xd8] sm:$0xff]  ;;  %v220_v36 = vld [vmem:[%s21073_s1 + $0x50] sm:$0xff]  ;;  %v8583_v40 = vld [vmem:[%s21073_s1 + $0xe0] sm:$0xff] }
  0x60   : > { %14418 = vmatpush3.bf16.msra.mxu1 %v14417_v15  ;;  %14395 = vmatprep.subr.bf16.mxu0 %v15897_v5  ;;  %v221_v37 = vld [vmem:[%s21073_s1 + $0x58] sm:$0xff]  ;;  %v14405_v38 = vpack.c.bf16 %v8582_v35, %v8581_v34  ;;  %v8584_v41 = vld [vmem:[%s21073_s1 + $0xe8] sm:$0xff]  ;;  %v222_v42 = vld [vmem:[%s21073_s1 + $0x60] sm:$0xff] }
  0x61   : > { %14419 = vmatprep.subr.bf16.mxu1 %v15897_v5  ;;  %v14429_v39 = vpack.c.bf16 %v221_v37, %v220_v36  ;;  %v223_v43 = vld [vmem:[%s21073_s1 + $0x68] sm:$0xff]  ;;  %v14408_v44 = vpack.c.bf16 %v8584_v41, %v8583_v40  ;;  %v8585_v46 = vld [vmem:[%s21073_s1 + $0xf0] sm:$0xff]  ;;  %v8586_v47 = vld [vmem:[%s21073_s1 + $0xf8] sm:$0xff] }
  0x62   : > { %v14432_v45 = vpack.c.bf16 %v223_v43, %v222_v42  ;;  %v224_v48 = vld [vmem:[%s21073_s1 + $0x70] sm:$0xff]  ;;  %v225_v49 = vld [vmem:[%s21073_s1 + $0x78] sm:$0xff]  ;;  %v14411_v50 = vpack.c.bf16 %v8586_v47, %v8585_v46  ;;  %v8596_v52 = vld [vmem:[%s21073_s1 + $0x100] sm:$0xff] }
  0x63   : > { %14397 = vmatpush3.bf16.msra.mxu0 %v14396_v20  ;;  %v14435_v51 = vpack.c.bf16 %v225_v49, %v224_v48  ;;  %v8597_v53 = vld [vmem:[%s21073_s1 + $0x108] sm:$0xff]  ;;  %v8621_v54 = vld [vmem:[%s21073_s1 + $0x180] sm:$0xff]  ;;  %v8598_v59 = vld [vmem:[%s21073_s1 + $0x110] sm:$0xff] }
  0x64   : > { %14421 = vmatpush3.bf16.msra.mxu1 %v14420_v21  ;;  %14398 = vmatprep.subr.bf16.mxu0 %v15897_v5  ;;  %v8622_v55 = vld [vmem:[%s21073_s1 + $0x188] sm:$0xff]  ;;  %v14438_v57 = vpack.c.bf16 %v8597_v53, %v8596_v52  ;;  %v8599_v60 = vld [vmem:[%s21073_s1 + $0x118] sm:$0xff]  ;;  %v8623_v62 = vld [vmem:[%s21073_s1 + $0x190] sm:$0xff] }
  0x65   : > { %14422 = vmatprep.subr.bf16.mxu1 %v15897_v5  ;;  %v8562_v56 = vld [vmem:[%s16246_s6 + $0x6] sm:$0xff]  ;;  %v14462_v61 = vpack.c.bf16 %v8622_v55, %v8621_v54  ;;  %v8624_v63 = vld [vmem:[%s21073_s1 + $0x198] sm:$0xff]  ;;  %v8563_v0 = vld [vmem:[%s16246_s6 + $0xe] sm:$0xff]  ;;  %v14441_v2 = vpack.c.bf16 %v8599_v60, %v8598_v59 }
  0x66   : > { %v8553_v58 = vld [vmem:[%s16246_s6 + $0x5] sm:$0xff]  ;;  %v8554_v3 = vld [vmem:[%s16246_s6 + $0xd] sm:$0xff]  ;;  %v14465_v7 = vpack.c.bf16 %v8624_v63, %v8623_v62  ;;  %v8564_v10 = vld [vmem:[%s16246_s6 + $0x16] sm:$0xff] }
  0x67   : > { %14400 = vmatpush3.bf16.msra.mxu0 %v14399_v26  ;;  %v8600_v4 = vld [vmem:[%s21073_s1 + $0x120] sm:$0xff]  ;;  %v8601_v6 = vld [vmem:[%s21073_s1 + $0x128] sm:$0xff]  ;;  %v8555_v12 = vld [vmem:[%s16246_s6 + $0x15] sm:$0xff] }
  0x68   : > { %14424 = vmatpush3.bf16.msra.mxu1 %v14423_v27  ;;  %14401 = vmatprep.subr.bf16.mxu0 %v15897_v5  ;;  %v8625_v8 = vld [vmem:[%s21073_s1 + $0x1a0] sm:$0xff]  ;;  %v8626_v9 = vld [vmem:[%s21073_s1 + $0x1a8] sm:$0xff]  ;;  %v14444_v11 = vpack.c.bf16 %v8601_v6, %v8600_v4  ;;  %v8602_v15 = vld [vmem:[%s21073_s1 + $0x130] sm:$0xff] }
  0x69   : > { %14425 = vmatprep.subr.bf16.mxu1 %v15897_v5  ;;  %v14468_v14 = vpack.c.bf16 %v8626_v9, %v8625_v8  ;;  %v8603_v16 = vld [vmem:[%s21073_s1 + $0x138] sm:$0xff]  ;;  %v8627_v17 = vld [vmem:[%s21073_s1 + $0x1b0] sm:$0xff]  ;;  %v8604_v23 = vld [vmem:[%s21073_s1 + $0x140] sm:$0xff] }
  0x6a   : > { %v8628_v18 = vld [vmem:[%s21073_s1 + $0x1b8] sm:$0xff]  ;;  %v14447_v21 = vpack.c.bf16 %v8603_v16, %v8602_v15  ;;  %v8605_v24 = vld [vmem:[%s21073_s1 + $0x148] sm:$0xff]  ;;  %v8629_v25 = vld [vmem:[%s21073_s1 + $0x1c0] sm:$0xff] }
  0x6b   : > { %14403 = vmatpush3.bf16.msra.mxu0 %v14402_v32  ;;  %v8565_v19 = vld [vmem:[%s16246_s6 + $0x1e] sm:$0xff]  ;;  %v14471_v22 = vpack.c.bf16 %v8628_v18, %v8627_v17  ;;  %v8630_v26 = vld [vmem:[%s21073_s1 + $0x1c8] sm:$0xff]  ;;  %v14450_v29 = vpack.c.bf16 %v8605_v24, %v8604_v23  ;;  %v8606_v31 = vld [vmem:[%s21073_s1 + $0x150] sm:$0xff] }
  0x6c   : > { %14427 = vmatpush3.bf16.msra.mxu1 %v14426_v33  ;;  %14404 = vmatprep.subr.bf16.mxu0 %v15897_v5  ;;  %v8556_v20 = vld [vmem:[%s16246_s6 + $0x1d] sm:$0xff]  ;;  %v8566_v27 = vld [vmem:[%s16246_s6 + $0x26] sm:$0xff]  ;;  %v14474_v30 = vpack.c.bf16 %v8630_v26, %v8629_v25  ;;  %v8631_v33 = vld [vmem:[%s21073_s1 + $0x1d0] sm:$0xff] }
  0x6d   : > { %14428 = vmatprep.subr.bf16.mxu1 %v15897_v5  ;;  %v8557_v28 = vld [vmem:[%s16246_s6 + $0x25] sm:$0xff]  ;;  %v8607_v32 = vld [vmem:[%s21073_s1 + $0x158] sm:$0xff]  ;;  %v8567_v35 = vld [vmem:[%s16246_s6 + $0x2e] sm:$0xff] }
  0x6e   : > { %v8632_v34 = vld [vmem:[%s21073_s1 + $0x1d8] sm:$0xff]  ;;  %v8558_v36 = vld [vmem:[%s16246_s6 + $0x2d] sm:$0xff]  ;;  %v14453_v37 = vpack.c.bf16 %v8607_v32, %v8606_v31  ;;  %v8633_v41 = vld [vmem:[%s21073_s1 + $0x1e0] sm:$0xff] }
  0x6f   : > { %14406 = vmatpush3.bf16.msra.mxu0 %v14405_v38  ;;  %v14477_v38 = vpack.c.bf16 %v8632_v34, %v8631_v33  ;;  %v8609_v40 = vld [vmem:[%s21073_s1 + $0x168] sm:$0xff]  ;;  %v8568_v43 = vld [vmem:[%s16246_s6 + $0x36] sm:$0xff]  ;;  %v8671_v59 = vld [vmem:[%s21073_s1 + $0x280] sm:$0xff] }
  0x70   : > { %14430 = vmatpush3.bf16.msra.mxu1 %v14429_v39  ;;  %14407 = vmatprep.subr.bf16.mxu0 %v15897_v5  ;;  %v8608_v39 = vld [vmem:[%s21073_s1 + $0x160] sm:$0xff]  ;;  %v8634_v42 = vld [vmem:[%s21073_s1 + $0x1e8] sm:$0xff]  ;;  %v8610_v47 = vld [vmem:[%s21073_s1 + $0x170] sm:$0xff] }
  0x71   : > { %14431 = vmatprep.subr.bf16.mxu1 %v15897_v5  ;;  %v14480_v46 = vpack.c.bf16 %v8634_v42, %v8633_v41  ;;  %v8611_v48 = vld [vmem:[%s21073_s1 + $0x178] sm:$0xff]  ;;  %v8635_v49 = vld [vmem:[%s21073_s1 + $0x1f0] sm:$0xff]  ;;  %v8570_v55 = vld [vmem:[%s16246_s6 + $0x46] sm:$0xff] }
  0x72   : > { %v8560_v52 = vld [vmem:[%s16246_s6 + $0x3d] sm:$0xff]  ;;  %v14459_v53 = vpack.c.bf16 %v8611_v48, %v8610_v47  ;;  %v8672_v60 = vld [vmem:[%s21073_s1 + $0x288] sm:$0xff]  ;;  %v8673_v4 = vld [vmem:[%s21073_s1 + $0x290] sm:$0xff] }
  0x73   : > { %14409 = vmatpush3.bf16.msra.mxu0 %v14408_v44  ;;  %v8559_v44 = vld [vmem:[%s16246_s6 + $0x35] sm:$0xff]  ;;  %v8613_v9 = vld [vmem:[%s16246_s6 + $0x1f] sm:$0xff]  ;;  %v8676_v15 = vld [vmem:[%s21073_s1 + $0x2a8] sm:$0xff] }
  0x74   : > { %14433 = vmatpush3.bf16.msra.mxu1 %v14432_v45  ;;  %14410 = vmatprep.subr.bf16.mxu0 %v15897_v5  ;;  %v14456_v45 = vpack.c.bf16 %v8609_v40, %v8608_v39  ;;  %v8612_v63 = vld [vmem:[%s16246_s6 + $0x17] sm:$0xff]  ;;  %v8614_v17 = vld [vmem:[%s16246_s6 + $0x27] sm:$0xff]  ;;  %v8615_v23 = vld [vmem:[%s16246_s6 + $0x2f] sm:$0xff] }
  0x75   : > { %14434 = vmatprep.subr.bf16.mxu1 %v15897_v5  ;;  %v8674_v6 = vld [vmem:[%s21073_s1 + $0x298] sm:$0xff]  ;;  %v8654_v26 = vld [vmem:[%s21073_s1 + $0x240] sm:$0xff]  ;;  %v8656_v33 = vld [vmem:[%s21073_s1 + $0x250] sm:$0xff] }
  0x76   : > { %v8657_v34 = vld [vmem:[%s21073_s1 + $0x258] sm:$0xff]  ;;  %v8658_v40 = vld [vmem:[%s21073_s1 + $0x260] sm:$0xff]  ;;  %v8659_v41 = vld [vmem:[%s21073_s1 + $0x268] sm:$0xff] }
  0x77   : > { %14412 = vmatpush3.bf16.msra.mxu0 %v14411_v50  ;;  %v8636_v50 = vld [vmem:[%s21073_s1 + $0x1f8] sm:$0xff]  ;;  %v8683_v42 = vld [vmem:[%s21073_s1 + $0x2e0] sm:$0xff]  ;;  %v8660_v47 = vld [vmem:[%s21073_s1 + $0x270] sm:$0xff] }
  0x78   : > { %14436 = vmatpush3.bf16.msra.mxu1 %v14435_v51  ;;  %14437 = vmatprep.subr.bf16.mxu0 %v15897_v5  ;;  %v8569_v51 = vld [vmem:[%s16246_s6 + $0x3e] sm:$0xff]  ;;  %v14483_v54 = vpack.c.bf16 %v8636_v50, %v8635_v49  ;;  %v8685_v49 = vld [vmem:[%s21073_s1 + $0x2f0] sm:$0xff] }
  0x79   : > { %14461 = vmatprep.subr.bf16.mxu1 %v15897_v5  ;;  %v8661_v48 = vld [vmem:[%s21073_s1 + $0x278] sm:$0xff] }
  0x7a   : > { %11236 = vmatmul.mubr.f32.vlgmr.msra.gmra.mrb[0].mxu0 %v8562_v56  ;;  %v8561_v56 = vld [vmem:[%s16246_s6 + $0x45] sm:$0xff]  ;;  %v8686_v50 = vld [vmem:[%s21073_s1 + $0x2f8] sm:$0xff] }
  0x7b   : > { %11295 = vmatmul.mubr.f32.vlgmr.msra.gmra.mrb[0].mxu1 %v8553_v58  ;;  %14439 = vmatpush3.bf16.msra.mxu0 %v14438_v57  ;;  %v8646_v57 = vld [vmem:[%s21073_s1 + $0x200] sm:$0xff]  ;;  %v8647_v58 = vld [vmem:[%s21073_s1 + $0x208] sm:$0xff] }
  0x7c   : > { %11238 = vmatprep.mubr.msk.f32.mxu0 %vm15898_vm0, %v15899_v13  ;;  %11297 = vmatprep.mubr.msk.f32.mxu1 %vm15898_vm0, %v15899_v13  ;;  %v14486_v62 = vpack.c.bf16 %v8647_v58, %v8646_v57  ;;  %v8721_v57 = vld [vmem:[%s21073_s1 + $0x380] sm:$0xff]  ;;  %v8722_v58 = vld [vmem:[%s21073_s1 + $0x388] sm:$0xff] }
  0x7d   : > { %14440 = vmatprep.subr.bf16.mxu0 %v15897_v5  ;;  %14463 = vmatpush3.bf16.msra.mxu1 %v14462_v61  ;;  %v8587_v61 = vld [vmem:[%s16246_s6 + $0x7] sm:$0xff] }
  0x7e   : > { %11239 = vmatmul.mubr.f32.gmra.mrb[2].mxu0 %v8563_v0  ;;  %14464 = vmatprep.subr.bf16.mxu1 %v15897_v5  ;;  %v8648_v0 = vld [vmem:[%s21073_s1 + $0x210] sm:$0xff] }
  0x7f   : > { %11298 = vmatmul.mubr.f32.gmra.mrb[2].mxu1 %v8554_v3  ;;  %14442 = vmatpush3.bf16.msra.mxu0 %v14441_v2  ;;  %v8649_v2 = vld [vmem:[%s21073_s1 + $0x218] sm:$0xff]  ;;  %v14510_v3 = vpack.c.bf16 %v8672_v60, %v8671_v59 }
  0x80   : > { %11241 = vmatprep.mubr.msk.f32.mxu0 %vm15898_vm0, %v15899_v13  ;;  %11300 = vmatprep.mubr.msk.f32.mxu1 %vm15898_vm0, %v15899_v13  ;;  %v14489_v8 = vpack.c.bf16 %v8649_v2, %v8648_v0  ;;  %v8637_v59 = vld [vmem:[%s16246_s6 + $0x18] sm:$0xff]  ;;  %v14558_v0 = vpack.c.bf16 %v8722_v58, %v8721_v57  ;;  %v8723_v2 = vld [vmem:[%s21073_s1 + $0x390] sm:$0xff] }
  0x81   : > { %14443 = vmatprep.subr.bf16.mxu0 %v15897_v5  ;;  %14466 = vmatpush3.bf16.msra.mxu1 %v14465_v7  ;;  %v8588_v7 = vld [vmem:[%s16246_s6 + $0xf] sm:$0xff]  ;;  %v8645_v58 = vld [vmem:[%s16246_s6 + $0x58] sm:$0xff] }
  0x82   : > { %11242 = vmatmul.mubr.f32.gmra.mrb[4].mxu0 %v8564_v10  ;;  %14467 = vmatprep.subr.bf16.mxu1 %v15897_v5  ;;  %v8650_v10 = vld [vmem:[%s21073_s1 + $0x220] sm:$0xff] }
  0x83   : > { %11301 = vmatmul.mubr.f32.gmra.mrb[4].mxu1 %v8555_v12  ;;  %14445 = vmatpush3.bf16.msra.mxu0 %v14444_v11  ;;  %v8651_v11 = vld [vmem:[%s21073_s1 + $0x228] sm:$0xff]  ;;  %v14513_v12 = vpack.c.bf16 %v8674_v6, %v8673_v4  ;;  %v8638_v4 = vld [vmem:[%s16246_s6 + $0x20] sm:$0xff] }
  0x84   : > { %11244 = vmatprep.mubr.msk.f32.mxu0 %vm15898_vm0, %v15899_v13  ;;  %11303 = vmatprep.mubr.msk.f32.mxu1 %vm15898_vm0, %v15899_v13  ;;  %v14492_v16 = vpack.c.bf16 %v8651_v11, %v8650_v10  ;;  %v8725_v11 = vld [vmem:[%s21073_s1 + $0x3a0] sm:$0xff] }
  0x85   : > { %14469 = vmatpush3.bf16.msra.mxu1 %v14468_v14  ;;  %14446 = vmatprep.subr.bf16.mxu0 %v15897_v5  ;;  %v8675_v14 = vld [vmem:[%s21073_s1 + $0x2a0] sm:$0xff] }
  0x86   : > { %11245 = vmatmul.mubr.f32.gmra.mrb[6].mxu0 %v8565_v19  ;;  %14470 = vmatprep.subr.bf16.mxu1 %v15897_v5  ;;  %v14516_v18 = vpack.c.bf16 %v8676_v15, %v8675_v14  ;;  %v8652_v19 = vld [vmem:[%s21073_s1 + $0x230] sm:$0xff]  ;;  %v8639_v14 = vld [vmem:[%s16246_s6 + $0x28] sm:$0xff] }
  0x87   : > { %11304 = vmatmul.mubr.f32.gmra.mrb[6].mxu1 %v8556_v20  ;;  %11247 = vmatprep.mubr.msk.f32.mxu0 %vm15898_vm0, %v15899_v13  ;;  %v8653_v20 = vld [vmem:[%s21073_s1 + $0x238] sm:$0xff] }
  0x88   : > { %11306 = vmatprep.mubr.msk.f32.mxu1 %vm15898_vm0, %v15899_v13  ;;  %14448 = vmatpush3.bf16.msra.mxu0 %v14447_v21  ;;  %v8677_v21 = vld [vmem:[%s21073_s1 + $0x2b0] sm:$0xff]  ;;  %v14495_v24 = vpack.c.bf16 %v8653_v20, %v8652_v19  ;;  %v8703_v19 = vld [vmem:[%s21073_s1 + $0x338] sm:$0xff] }
  0x89   : > { %14472 = vmatpush3.bf16.msra.mxu1 %v14471_v22  ;;  %14449 = vmatprep.subr.bf16.mxu0 %v15897_v5  ;;  %v8678_v22 = vld [vmem:[%s21073_s1 + $0x2b8] sm:$0xff]  ;;  %v8727_v20 = vld [vmem:[%s21073_s1 + $0x3b0] sm:$0xff] }
  0x8a   : > { %11248 = vmatmul.mubr.f32.gmra.mrb[8].mxu0 %v8566_v27  ;;  %14473 = vmatprep.subr.bf16.mxu1 %v15897_v5  ;;  %v14519_v25 = vpack.c.bf16 %v8678_v22, %v8677_v21  ;;  %v8655_v27 = vld [vmem:[%s21073_s1 + $0x248] sm:$0xff]  ;;  %v8728_v21 = vld [vmem:[%s21073_s1 + $0x3b8] sm:$0xff]  ;;  %v8640_v22 = vld [vmem:[%s16246_s6 + $0x30] sm:$0xff] }
  0x8b   : > { %11307 = vmatmul.mubr.f32.gmra.mrb[8].mxu1 %v8557_v28  ;;  %11250 = vmatprep.mubr.msk.f32.mxu0 %vm15898_vm0, %v15899_v13  ;;  %v8679_v28 = vld [vmem:[%s21073_s1 + $0x2c0] sm:$0xff]  ;;  %v14498_v31 = vpack.c.bf16 %v8655_v27, %v8654_v26  ;;  %v8705_v27 = vld [vmem:[%s21073_s1 + $0x348] sm:$0xff] }
  0x8c   : > { %11309 = vmatprep.mubr.msk.f32.mxu1 %vm15898_vm0, %v15899_v13  ;;  %14451 = vmatpush3.bf16.msra.mxu0 %v14450_v29  ;;  %v8680_v29 = vld [vmem:[%s21073_s1 + $0x2c8] sm:$0xff]  ;;  %v8704_v26 = vld [vmem:[%s21073_s1 + $0x340] sm:$0xff] }
  0x8d   : > { %14475 = vmatpush3.bf16.msra.mxu1 %v14474_v30  ;;  %14452 = vmatprep.subr.bf16.mxu0 %v15897_v5  ;;  %v8616_v30 = vld [vmem:[%s16246_s6 + $0x37] sm:$0xff]  ;;  %v14522_v32 = vpack.c.bf16 %v8680_v29, %v8679_v28  ;;  %v8729_v28 = vld [vmem:[%s21073_s1 + $0x3c0] sm:$0xff]  ;;  %v8730_v29 = vld [vmem:[%s21073_s1 + $0x3c8] sm:$0xff] }
  0x8e   : > { %11251 = vmatmul.mubr.f32.gmra.mrb[10].mxu0 %v8567_v35  ;;  %14476 = vmatprep.subr.bf16.mxu1 %v15897_v5  ;;  %v8681_v35 = vld [vmem:[%s21073_s1 + $0x2d0] sm:$0xff] }
  0x8f   : > { %11310 = vmatmul.mubr.f32.gmra.mrb[10].mxu1 %v8558_v36  ;;  %11253 = vmatprep.mubr.msk.f32.mxu0 %vm15898_vm0, %v15899_v13  ;;  %v8682_v36 = vld [vmem:[%s21073_s1 + $0x2d8] sm:$0xff] }
  0x90   : > { %11312 = vmatprep.mubr.msk.f32.mxu1 %vm15898_vm0, %v15899_v13  ;;  %14454 = vmatpush3.bf16.msra.mxu0 %v14453_v37  ;;  %v8617_v37 = vld [vmem:[%s16246_s6 + $0x3f] sm:$0xff]  ;;  %v14525_v39 = vpack.c.bf16 %v8682_v36, %v8681_v35  ;;  %v8731_v36 = vld [vmem:[%s21073_s1 + $0x3d0] sm:$0xff] }
  0x91   : > { %14478 = vmatpush3.bf16.msra.mxu1 %v14477_v38  ;;  %14455 = vmatprep.subr.bf16.mxu0 %v15897_v5  ;;  %v14501_v38 = vpack.c.bf16 %v8657_v34, %v8656_v33  ;;  %v14570_v33 = vpack.c.bf16 %v8730_v29, %v8729_v28  ;;  %v8706_v34 = vld [vmem:[%s21073_s1 + $0x350] sm:$0xff]  ;;  %v8707_v35 = vld [vmem:[%s21073_s1 + $0x358] sm:$0xff]  ;;  %v8694_v29 = vld [vmem:[%s16246_s6 + $0x61] sm:$0xff] }
  0x92   : > { %11254 = vmatmul.mubr.f32.gmra.mrb[12].mxu0 %v8568_v43  ;;  %14479 = vmatprep.subr.bf16.mxu1 %v15897_v5  ;;  %v8684_v43 = vld [vmem:[%s21073_s1 + $0x2e8] sm:$0xff]  ;;  %v8761_v28 = vld [vmem:[%s21073_s1 + $0x478] sm:$0xff] }
  0x93   : > { %11313 = vmatmul.mubr.f32.gmra.mrb[12].mxu1 %v8559_v44  ;;  %11256 = vmatprep.mubr.msk.f32.mxu0 %vm15898_vm0, %v15899_v13  ;;  %v8618_v44 = vld [vmem:[%s16246_s6 + $0x47] sm:$0xff] }
  0x94   : > { %11315 = vmatprep.mubr.msk.f32.mxu1 %vm15898_vm0, %v15899_v13  ;;  %14457 = vmatpush3.bf16.msra.mxu0 %v14456_v45  ;;  %v14504_v45 = vpack.c.bf16 %v8659_v41, %v8658_v40  ;;  %v14549_v40 = vpack.c.bf16 %v8707_v35, %v8706_v34  ;;  %v8742_v34 = vld [vmem:[%s16246_s6 + $0x53] sm:$0xff] }
  0x95   : > { %14481 = vmatpush3.bf16.msra.mxu1 %v14480_v46  ;;  %14458 = vmatprep.subr.bf16.mxu0 %v15897_v5  ;;  %v14528_v46 = vpack.c.bf16 %v8684_v43, %v8683_v42  ;;  %v8708_v42 = vld [vmem:[%s21073_s1 + $0x360] sm:$0xff]  ;;  %v8709_v43 = vld [vmem:[%s21073_s1 + $0x368] sm:$0xff]  ;;  %v8738_v35 = vld [vmem:[%s16246_s6 + $0x33] sm:$0xff] }
  0x96   : > { %11257 = vmatmul.mubr.f32.gmra.mrb[14].mxu0 %v8569_v51  ;;  %14482 = vmatprep.subr.bf16.mxu1 %v15897_v5  ;;  %v8619_v51 = vld [vmem:[%s16246_s6 + $0x4f] sm:$0xff] }
  0x97   : > { %11316 = vmatmul.mubr.f32.gmra.mrb[14].mxu1 %v8560_v52  ;;  %11259 = vmatprep.mubr.msk.f32.mxu0 %vm15898_vm0, %v15899_v13  ;;  %v14507_v52 = vpack.c.bf16 %v8661_v48, %v8660_v47  ;;  %v16720_v47 = vld [vmem:[%s16246_s6 + $0x49] sm:$0xff]  ;;  %v14552_v48 = vpack.c.bf16 %v8709_v43, %v8708_v42 }
  0x98   : > { %11318 = vmatprep.mubr.msk.f32.mxu1 %vm15898_vm0, %v15899_v13  ;;  %14460 = vmatpush3.bf16.msra.mxu0 %v14459_v53  ;;  %v14531_v53 = vpack.c.bf16 %v8686_v50, %v8685_v49  ;;  %v8710_v50 = vld [vmem:[%s21073_s1 + $0x370] sm:$0xff] }
  0x99   : > { %14484 = vmatpush3.bf16.msra.mxu1 %v14483_v54  ;;  %14485 = vmatprep.subr.bf16.mxu0 %v15897_v5  ;;  %v8620_v54 = vld [vmem:[%s16246_s6 + $0x57] sm:$0xff] }
  0x9a   : > { %11260 = vmatmul.mubr.f32.gmra.mrb[16].mxu0 %v8570_v55  ;;  %14509 = vmatprep.subr.bf16.mxu1 %v15897_v5  ;;  %v8696_v55 = vld [vmem:[%s21073_s1 + $0x300] sm:$0xff] }
  0x9b   : > { %11319 = vmatmul.mubr.f32.gmra.mrb[16].mxu1 %v8561_v56  ;;  %11353 = vmatprep.mubr.msk.f32.mxu0 %vm15898_vm0, %v15899_v13  ;;  %v8697_v56 = vld [vmem:[%s21073_s1 + $0x308] sm:$0xff] }
  0x9c   : > { %11412 = vmatprep.mubr.msk.f32.mxu1 %vm15898_vm0, %v15899_v13  ;;  %v14534_v60 = vpack.c.bf16 %v8697_v56, %v8696_v55  ;;  %v16743_v55 = vld [vmem:[%s16246_s6 + $0x51] sm:$0xff] }
  0x9e   : > { %11354 = vmatmul.mubr.f32.vlgmr.msra.gmra.mrb[18].mxu0 %v8587_v61  ;;  %v8662_v61 = vld [vmem:[%s16246_s6 + $0x19] sm:$0xff] }
  0x9f   : > { %11413 = vmatmul.mubr.f32.vlgmr.msra.gmra.mrb[18].mxu1 %v8612_v63  ;;  %14487 = vmatpush3.bf16.msra.mxu0 %v14486_v62  ;;  %v8698_v62 = vld [vmem:[%s21073_s1 + $0x310] sm:$0xff] }
  0xa0   : > { %11356 = vmatprep.mubr.msk.f32.mxu0 %vm15898_vm0, %v15899_v13  ;;  %11415 = vmatprep.mubr.msk.f32.mxu1 %vm15898_vm0, %v15899_v13 }
  0xa1   : > { %14488 = vmatprep.subr.bf16.mxu0 %v15897_v5  ;;  %14511 = vmatpush3.bf16.msra.mxu1 %v14510_v3  ;;  %v8724_v3 = vld [vmem:[%s21073_s1 + $0x398] sm:$0xff] }
  0xa2   : > { %11357 = vmatmul.mubr.f32.gmra.mrb[20].mxu0 %v8588_v7  ;;  %14512 = vmatprep.subr.bf16.mxu1 %v15897_v5  ;;  %v8663_v7 = vld [vmem:[%s16246_s6 + $0x21] sm:$0xff]  ;;  %v14561_v10 = vpack.c.bf16 %v8724_v3, %v8723_v2  ;;  %v8749_v2 = vld [vmem:[%s21073_s1 + $0x418] sm:$0xff] }
  0xa3   : > { %11416 = vmatmul.mubr.f32.gmra.mrb[20].mxu1 %v8613_v9  ;;  %14490 = vmatpush3.bf16.msra.mxu0 %v14489_v8  ;;  %v8700_v8 = vld [vmem:[%s21073_s1 + $0x320] sm:$0xff] }
  0xa4   : > { %11359 = vmatprep.mubr.msk.f32.mxu0 %vm15898_vm0, %v15899_v13  ;;  %11418 = vmatprep.mubr.msk.f32.mxu1 %vm15898_vm0, %v15899_v13 }
  0xa5   : > { %14491 = vmatprep.subr.bf16.mxu0 %v15897_v5  ;;  %14514 = vmatpush3.bf16.msra.mxu1 %v14513_v12  ;;  %v8726_v12 = vld [vmem:[%s21073_s1 + $0x3a8] sm:$0xff] }
  0xa6   : > { %11360 = vmatmul.mubr.f32.gmra.mrb[22].mxu0 %v8612_v63  ;;  %14515 = vmatprep.subr.bf16.mxu1 %v15897_v5  ;;  %v8699_v63 = vld [vmem:[%s21073_s1 + $0x318] sm:$0xff] }
  0xa7   : > { %11419 = vmatmul.mubr.f32.gmra.mrb[22].mxu1 %v8614_v17  ;;  %14493 = vmatpush3.bf16.msra.mxu0 %v14492_v16  ;;  %v14537_v6 = vpack.c.bf16 %v8699_v63, %v8698_v62  ;;  %v16628_v16 = vld [vmem:[%s16246_s6 + $0x29] sm:$0xff] }
  0xa8   : > { %11362 = vmatprep.mubr.msk.f32.mxu0 %vm15898_vm0, %v15899_v13  ;;  %11421 = vmatprep.mubr.msk.f32.mxu1 %vm15898_vm0, %v15899_v13  ;;  %v8712_v63 = vld [vmem:[%s16246_s6 + $0x2a] sm:$0xff] }
  0xa9   : > { %14517 = vmatpush3.bf16.msra.mxu1 %v14516_v18  ;;  %14494 = vmatprep.subr.bf16.mxu0 %v15897_v5  ;;  %v8702_v18 = vld [vmem:[%s21073_s1 + $0x330] sm:$0xff] }
  0xaa   : > { %11363 = vmatmul.mubr.f32.gmra.mrb[24].mxu0 %v8613_v9  ;;  %14518 = vmatprep.subr.bf16.mxu1 %v15897_v5  ;;  %v8701_v9 = vld [vmem:[%s21073_s1 + $0x328] sm:$0xff] }
  0xab   : > { %11422 = vmatmul.mubr.f32.gmra.mrb[24].mxu1 %v8615_v23  ;;  %11365 = vmatprep.mubr.msk.f32.mxu0 %vm15898_vm0, %v15899_v13  ;;  %v14540_v15 = vpack.c.bf16 %v8701_v9, %v8700_v8  ;;  %v8714_v9 = vld [vmem:[%s16246_s6 + $0x3a] sm:$0xff] }
  0xac   : > { %11424 = vmatprep.mubr.msk.f32.mxu1 %vm15898_vm0, %v15899_v13  ;;  %14496 = vmatpush3.bf16.msra.mxu0 %v14495_v24  ;;  %v14543_v24 = vpack.c.bf16 %v8703_v19, %v8702_v18  ;;  %v8756_v19 = vld [vmem:[%s21073_s1 + $0x450] sm:$0xff] }
  0xad   : > { %14520 = vmatpush3.bf16.msra.mxu1 %v14519_v25  ;;  %14497 = vmatprep.subr.bf16.mxu0 %v15897_v5  ;;  %v14567_v25 = vpack.c.bf16 %v8728_v21, %v8727_v20  ;;  %v8757_v20 = vld [vmem:[%s21073_s1 + $0x458] sm:$0xff] }
  0xae   : > { %11366 = vmatmul.mubr.f32.gmra.mrb[26].mxu0 %v8614_v17  ;;  %14521 = vmatprep.subr.bf16.mxu1 %v15897_v5  ;;  %v14564_v17 = vpack.c.bf16 %v8726_v12, %v8725_v11  ;;  %v8753_v11 = vld [vmem:[%s21073_s1 + $0x438] sm:$0xff]  ;;  %v8715_v12 = vld [vmem:[%s16246_s6 + $0x42] sm:$0xff] }
  0xaf   : > { %11425 = vmatmul.mubr.f32.gmra.mrb[26].mxu1 %v8616_v30  ;;  %11368 = vmatprep.mubr.msk.f32.mxu0 %vm15898_vm0, %v15899_v13  ;;  %v8717_v21 = vld [vmem:[%s16246_s6 + $0x52] sm:$0xff] }
  0xb0   : > { %11427 = vmatprep.mubr.msk.f32.mxu1 %vm15898_vm0, %v15899_v13  ;;  %14499 = vmatpush3.bf16.msra.mxu0 %v14498_v31  ;;  %v16674_v31 = vld [vmem:[%s16246_s6 + $0x39] sm:$0xff] }
  0xb1   : > { %14523 = vmatpush3.bf16.msra.mxu1 %v14522_v32  ;;  %14500 = vmatprep.subr.bf16.mxu0 %v15897_v5  ;;  %v14546_v32 = vpack.c.bf16 %v8705_v27, %v8704_v26  ;;  %v8760_v27 = vld [vmem:[%s21073_s1 + $0x470] sm:$0xff] }
  0xb2   : > { %11369 = vmatmul.mubr.f32.gmra.mrb[28].mxu0 %v8615_v23  ;;  %14524 = vmatprep.subr.bf16.mxu1 %v15897_v5  ;;  %v16651_v23 = vld [vmem:[%s16246_s6 + $0x31] sm:$0xff] }
  0xb3   : > { %11428 = vmatmul.mubr.f32.gmra.mrb[28].mxu1 %v8617_v37  ;;  %11371 = vmatprep.mubr.msk.f32.mxu0 %vm15898_vm0, %v15899_v13 }
  0xb4   : > { %11430 = vmatprep.mubr.msk.f32.mxu1 %vm15898_vm0, %v15899_v13  ;;  %14502 = vmatpush3.bf16.msra.mxu0 %v14501_v38  ;;  %v8642_v38 = vld [vmem:[%s16246_s6 + $0x40] sm:$0xff] }
  0xb5   : > { %14526 = vmatpush3.bf16.msra.mxu1 %v14525_v39  ;;  %14503 = vmatprep.subr.bf16.mxu0 %v15897_v5  ;;  %v16697_v39 = vld [vmem:[%s16246_s6 + $0x41] sm:$0xff] }
  0xb6   : > { %11372 = vmatmul.mubr.f32.gmra.mrb[30].mxu0 %v8616_v30  ;;  %14527 = vmatprep.subr.bf16.mxu1 %v15897_v5  ;;  %v8641_v30 = vld [vmem:[%s16246_s6 + $0x38] sm:$0xff] }
  0xb7   : > { %11431 = vmatmul.mubr.f32.gmra.mrb[30].mxu1 %v8618_v44  ;;  %11374 = vmatprep.mubr.msk.f32.mxu0 %vm15898_vm0, %v15899_v13 }
  0xb8   : > { %11433 = vmatprep.mubr.msk.f32.mxu1 %vm15898_vm0, %v15899_v13  ;;  %14505 = vmatpush3.bf16.msra.mxu0 %v14504_v45  ;;  %v8734_v45 = vld [vmem:[%s21073_s1 + $0x3e8] sm:$0xff] }
  0xb9   : > { %14529 = vmatpush3.bf16.msra.mxu1 %v14528_v46  ;;  %14506 = vmatprep.subr.bf16.mxu0 %v15897_v5  ;;  %v8643_v46 = vld [vmem:[%s16246_s6 + $0x48] sm:$0xff] }
  0xba   : > { %11375 = vmatmul.mubr.f32.gmra.mrb[32].mxu0 %v8617_v37  ;;  %14530 = vmatprep.subr.bf16.mxu1 %v15897_v5  ;;  %v8732_v37 = vld [vmem:[%s21073_s1 + $0x3d8] sm:$0xff] }
  0xbb   : > { %11434 = vmatmul.mubr.f32.gmra.mrb[32].mxu1 %v8619_v51  ;;  %11377 = vmatprep.mubr.msk.f32.mxu0 %vm15898_vm0, %v15899_v13  ;;  %v14573_v41 = vpack.c.bf16 %v8732_v37, %v8731_v36  ;;  %v8711_v51 = vld [vmem:[%s21073_s1 + $0x378] sm:$0xff] }
  0xbc   : > { %11436 = vmatprep.mubr.msk.f32.mxu1 %vm15898_vm0, %v15899_v13  ;;  %14508 = vmatpush3.bf16.msra.mxu0 %v14507_v52  ;;  %v8735_v52 = vld [vmem:[%s21073_s1 + $0x3f0] sm:$0xff]  ;;  %v14555_v56 = vpack.c.bf16 %v8711_v51, %v8710_v50  ;;  %v8743_v36 = vld [vmem:[%s16246_s6 + $0x5b] sm:$0xff] }
  0xbd   : > { %14532 = vmatpush3.bf16.msra.mxu1 %v14531_v53  ;;  %14533 = vmatprep.subr.bf16.mxu0 %v15897_v5  ;;  %v8736_v53 = vld [vmem:[%s21073_s1 + $0x3f8] sm:$0xff] }
  0xbe   : > { %11378 = vmatmul.mubr.f32.gmra.mrb[34].mxu0 %v8618_v44  ;;  %14557 = vmatprep.subr.bf16.mxu1 %v15897_v5  ;;  %v8733_v44 = vld [vmem:[%s21073_s1 + $0x3e0] sm:$0xff]  ;;  %v14579_v57 = vpack.c.bf16 %v8736_v53, %v8735_v52 }
  0xbf   : > { %11437 = vmatmul.mubr.f32.gmra.mrb[34].mxu1 %v8620_v54  ;;  %11471 = vmatprep.mubr.msk.f32.mxu0 %vm15898_vm0, %v15899_v13  ;;  %v14576_v49 = vpack.c.bf16 %v8734_v45, %v8733_v44  ;;  %v8644_v54 = vld [vmem:[%s16246_s6 + $0x50] sm:$0xff]  ;;  %v8739_v37 = vld [vmem:[%s16246_s6 + $0x3b] sm:$0xff] }
  0xc0   : > { %11530 = vmatprep.mubr.msk.f32.mxu1 %vm15898_vm0, %v15899_v13 }
  0xc2   : > { %11472 = vmatmul.mubr.f32.vlgmr.msra.gmra.mrb[36].mxu0 %v8637_v59  ;;  %v16754_v59 = vld [vmem:[%s16246_s6 + $0x59] sm:$0xff] }
  0xc3   : > { %11531 = vmatmul.mubr.f32.vlgmr.msra.gmra.mrb[36].mxu1 %v8662_v61  ;;  %14535 = vmatpush3.bf16.msra.mxu0 %v14534_v60  ;;  %v8746_v60 = vld [vmem:[%s21073_s1 + $0x400] sm:$0xff]  ;;  %v8747_v61 = vld [vmem:[%s21073_s1 + $0x408] sm:$0xff] }
  0xc4   : > { %11474 = vmatprep.mubr.msk.f32.mxu0 %vm15898_vm0, %v15899_v13  ;;  %11533 = vmatprep.mubr.msk.f32.mxu1 %vm15898_vm0, %v15899_v13  ;;  %v14582_v62 = vpack.c.bf16 %v8747_v61, %v8746_v60 }
  0xc5   : > { %14536 = vmatprep.subr.bf16.mxu0 %v15897_v5  ;;  %14559 = vmatpush3.bf16.msra.mxu1 %v14558_v0  ;;  %v8748_v0 = vld [vmem:[%s21073_s1 + $0x410] sm:$0xff] }
  0xc6   : > { %11475 = vmatmul.mubr.f32.gmra.mrb[38].mxu0 %v8638_v4  ;;  %14560 = vmatprep.subr.bf16.mxu1 %v15897_v5  ;;  %v14585_v3 = vpack.c.bf16 %v8749_v2, %v8748_v0  ;;  %v8713_v4 = vld [vmem:[%s16246_s6 + $0x32] sm:$0xff] }
  0xc7   : > { %11534 = vmatmul.mubr.f32.gmra.mrb[38].mxu1 %v8663_v7  ;;  %14538 = vmatpush3.bf16.msra.mxu0 %v14537_v6  ;;  %v8750_v6 = vld [vmem:[%s21073_s1 + $0x420] sm:$0xff]  ;;  %v8751_v7 = vld [vmem:[%s21073_s1 + $0x428] sm:$0xff] }
  0xc8   : > { %11477 = vmatprep.mubr.msk.f32.mxu0 %vm15898_vm0, %v15899_v13  ;;  %11536 = vmatprep.mubr.msk.f32.mxu1 %vm15898_vm0, %v15899_v13  ;;  %v14588_v8 = vpack.c.bf16 %v8751_v7, %v8750_v6 }
  0xc9   : > { %14539 = vmatprep.subr.bf16.mxu0 %v15897_v5  ;;  %14562 = vmatpush3.bf16.msra.mxu1 %v14561_v10  ;;  %v8752_v10 = vld [vmem:[%s21073_s1 + $0x430] sm:$0xff] }
  0xca   : > { %11478 = vmatmul.mubr.f32.gmra.mrb[40].mxu0 %v8639_v14  ;;  %14563 = vmatprep.subr.bf16.mxu1 %v15897_v5  ;;  %v14591_v14 = vpack.c.bf16 %v8753_v11, %v8752_v10 }
  0xcb   : > { %11537 = vmatmul.mubr.f32.gmra.mrb[40].mxu1 %v16628_v16  ;;  %14541 = vmatpush3.bf16.msra.mxu0 %v14540_v15  ;;  %v8754_v15 = vld [vmem:[%s21073_s1 + $0x440] sm:$0xff] }
  0xcc   : > { %11480 = vmatprep.mubr.msk.f32.mxu0 %vm15898_vm0, %v15899_v13  ;;  %11539 = vmatprep.mubr.msk.f32.mxu1 %vm15898_vm0, %v15899_v13 }
  0xcd   : > { %14565 = vmatpush3.bf16.msra.mxu1 %v14564_v17  ;;  %14542 = vmatprep.subr.bf16.mxu0 %v15897_v5  ;;  %v8716_v17 = vld [vmem:[%s16246_s6 + $0x4a] sm:$0xff] }
  0xce   : > { %11481 = vmatmul.mubr.f32.gmra.mrb[42].mxu0 %v8640_v22  ;;  %14566 = vmatprep.subr.bf16.mxu1 %v15897_v5  ;;  %v14597_v22 = vpack.c.bf16 %v8757_v20, %v8756_v19 }
  0xcf   : > { %11540 = vmatmul.mubr.f32.gmra.mrb[42].mxu1 %v16651_v23  ;;  %11483 = vmatprep.mubr.msk.f32.mxu0 %vm15898_vm0, %v15899_v13 }
  0xd0   : > { %11542 = vmatprep.mubr.msk.f32.mxu1 %vm15898_vm0, %v15899_v13  ;;  %14544 = vmatpush3.bf16.msra.mxu0 %v14543_v24  ;;  %v8759_v24 = vld [vmem:[%s21073_s1 + $0x468] sm:$0xff] }
  0xd1   : > { %14568 = vmatpush3.bf16.msra.mxu1 %v14567_v25  ;;  %14545 = vmatprep.subr.bf16.mxu0 %v15897_v5  ;;  %v8718_v25 = vld [vmem:[%s16246_s6 + $0x5a] sm:$0xff] }
  0xd2   : > { %11484 = vmatmul.mubr.f32.gmra.mrb[44].mxu0 %v8641_v30  ;;  %14569 = vmatprep.subr.bf16.mxu1 %v15897_v5  ;;  %v8719_v30 = vld [vmem:[%s16246_s6 + $0x62] sm:$0xff] }
  0xd3   : > { %11543 = vmatmul.mubr.f32.gmra.mrb[44].mxu1 %v16674_v31  ;;  %11486 = vmatprep.mubr.msk.f32.mxu0 %vm15898_vm0, %v15899_v13 }
  0xd4   : > { %11545 = vmatprep.mubr.msk.f32.mxu1 %vm15898_vm0, %v15899_v13  ;;  %14547 = vmatpush3.bf16.msra.mxu0 %v14546_v32  ;;  %v8695_v32 = vld [vmem:[%s16246_s6 + $0x69] sm:$0xff] }
  0xd5   : > { %14571 = vmatpush3.bf16.msra.mxu1 %v14570_v33  ;;  %14548 = vmatprep.subr.bf16.mxu0 %v15897_v5  ;;  %v8720_v33 = vld [vmem:[%s16246_s6 + $0x6a] sm:$0xff] }
  0xd6   : > { %11487 = vmatmul.mubr.f32.gmra.mrb[46].mxu0 %v8642_v38  ;;  %14572 = vmatprep.subr.bf16.mxu1 %v15897_v5  ;;  %v8744_v38 = vld [vmem:[%s16246_s6 + $0x63] sm:$0xff] }
  0xd7   : > { %11546 = vmatmul.mubr.f32.gmra.mrb[46].mxu1 %v16697_v39  ;;  %11489 = vmatprep.mubr.msk.f32.mxu0 %vm15898_vm0, %v15899_v13 }
  0xd8   : > { %11548 = vmatprep.mubr.msk.f32.mxu1 %vm15898_vm0, %v15899_v13  ;;  %14550 = vmatpush3.bf16.msra.mxu0 %v14549_v40  ;;  %v8745_v40 = vld [vmem:[%s16246_s6 + $0x6b] sm:$0xff] }
  0xd9   : > { %14574 = vmatpush3.bf16.msra.mxu1 %v14573_v41  ;;  %14551 = vmatprep.subr.bf16.mxu0 %v15897_v5  ;;  %v8741_v41 = vld [vmem:[%s16246_s6 + $0x4b] sm:$0xff] }
  0xda   : > { %11490 = vmatmul.mubr.f32.gmra.mrb[48].mxu0 %v8643_v46  ;;  %14575 = vmatprep.subr.bf16.mxu1 %v15897_v5 }
  0xdb   : > { %11549 = vmatmul.mubr.f32.gmra.mrb[48].mxu1 %v16720_v47  ;;  %11492 = vmatprep.mubr.msk.f32.mxu0 %vm15898_vm0, %v15899_v13 }
  0xdc   : > { %11551 = vmatprep.mubr.msk.f32.mxu1 %vm15898_vm0, %v15899_v13  ;;  %14553 = vmatpush3.bf16.msra.mxu0 %v14552_v48 }
  0xdd   : > { %14577 = vmatpush3.bf16.msra.mxu1 %v14576_v49  ;;  %14554 = vmatprep.subr.bf16.mxu0 %v15897_v5 }
  0xde   : > { %11493 = vmatmul.mubr.f32.gmra.mrb[50].mxu0 %v8644_v54  ;;  %14578 = vmatprep.subr.bf16.mxu1 %v15897_v5 }
  0xdf   : > { %11552 = vmatmul.mubr.f32.gmra.mrb[50].mxu1 %v16743_v55  ;;  %11495 = vmatprep.mubr.msk.f32.mxu0 %vm15898_vm0, %v15899_v13 }
  0xe0   : > { %11554 = vmatprep.mubr.msk.f32.mxu1 %vm15898_vm0, %v15899_v13  ;;  %14556 = vmatpush3.bf16.msra.mxu0 %v14555_v56 }
  0xe1   : > { %14580 = vmatpush3.bf16.msra.mxu1 %v14579_v57  ;;  %14581 = vmatprep.subr.bf16.mxu0 %v15897_v5 }
  0xe2   : > { %11496 = vmatmul.mubr.f32.gmra.mrb[52].mxu0 %v8645_v58  ;;  %15685 = vmatprep.subr.bf16.mxu1 %v15897_v5 }
  0xe3   : > { %11555 = vmatmul.mubr.f32.gmra.mrb[52].mxu1 %v16754_v59  ;;  %11589 = vmatprep.mubr.msk.f32.mxu0 %vm15898_vm0, %v15899_v13 }
  0xe4   : > { %11648 = vmatprep.mubr.msk.f32.mxu1 %vm15898_vm0, %v15899_v13 }
  0xe6   : > { %11590 = vmatmul.mubr.f32.vlgmr.msra.gmra.mrb[54].mxu0 %v16628_v16  ;;  %v8755_v16 = vld [vmem:[%s21073_s1 + $0x448] sm:$0xff] }
  0xe7   : > { %11649 = vmatmul.mubr.f32.vlgmr.msra.gmra.mrb[54].mxu1 %v8712_v63  ;;  %14583 = vmatpush3.bf16.msra.mxu0 %v14582_v62  ;;  %v14594_v18 = vpack.c.bf16 %v8755_v16, %v8754_v15 }
  0xe8   : > { %11592 = vmatprep.mubr.msk.f32.mxu0 %vm15898_vm0, %v15899_v13  ;;  %11651 = vmatprep.mubr.msk.f32.mxu1 %vm15898_vm0, %v15899_v13 }
  0xe9   : > { %15693 = vmatpush3.bf16.msra.mxu1 %v14582_v62  ;;  %14584 = vmatprep.subr.bf16.mxu0 %v15897_v5 }
  0xea   : > { %11593 = vmatmul.mubr.f32.gmra.mrb[56].mxu0 %v16651_v23  ;;  %15686 = vmatprep.subr.bf16.mxu1 %v15897_v5  ;;  %v8758_v23 = vld [vmem:[%s21073_s1 + $0x460] sm:$0xff] }
  0xeb   : > { %11652 = vmatmul.mubr.f32.gmra.mrb[56].mxu1 %v8713_v4  ;;  %14586 = vmatpush3.bf16.msra.mxu0 %v14585_v3  ;;  %v14600_v26 = vpack.c.bf16 %v8759_v24, %v8758_v23 }
  0xec   : > { %11595 = vmatprep.mubr.msk.f32.mxu0 %vm15898_vm0, %v15899_v13  ;;  %11654 = vmatprep.mubr.msk.f32.mxu1 %vm15898_vm0, %v15899_v13 }
  0xed   : > { %15694 = vmatpush3.bf16.msra.mxu1 %v14585_v3  ;;  %14587 = vmatprep.subr.bf16.mxu0 %v15897_v5 }
  0xee   : > { %11596 = vmatmul.mubr.f32.gmra.mrb[58].mxu0 %v16674_v31  ;;  %15687 = vmatprep.subr.bf16.mxu1 %v15897_v5  ;;  %v14603_v31 = vpack.c.bf16 %v8761_v28, %v8760_v27 }
  0xef   : > { %11655 = vmatmul.mubr.f32.gmra.mrb[58].mxu1 %v8714_v9  ;;  %14589 = vmatpush3.bf16.msra.mxu0 %v14588_v8 }
  0xf0   : > { %11598 = vmatprep.mubr.msk.f32.mxu0 %vm15898_vm0, %v15899_v13  ;;  %11657 = vmatprep.mubr.msk.f32.mxu1 %vm15898_vm0, %v15899_v13 }
  0xf1   : > { %15695 = vmatpush3.bf16.msra.mxu1 %v14588_v8  ;;  %14590 = vmatprep.subr.bf16.mxu0 %v15897_v5 }
  0xf2   : > { %11599 = vmatmul.mubr.f32.gmra.mrb[60].mxu0 %v16697_v39  ;;  %15688 = vmatprep.subr.bf16.mxu1 %v15897_v5  ;;  %v8740_v39 = vld [vmem:[%s16246_s6 + $0x43] sm:$0xff] }
  0xf3   : > { %11658 = vmatmul.mubr.f32.gmra.mrb[60].mxu1 %v8715_v12  ;;  %11601 = vmatprep.mubr.msk.f32.mxu0 %vm15898_vm0, %v15899_v13 }
  0xf4   : > { %11660 = vmatprep.mubr.msk.f32.mxu1 %vm15898_vm0, %v15899_v13  ;;  %14592 = vmatpush3.bf16.msra.mxu0 %v14591_v14 }
  0xf5   : > { %15696 = vmatpush3.bf16.msra.mxu1 %v14591_v14  ;;  %14593 = vmatprep.subr.bf16.mxu0 %v15897_v5 }
  0xf6   : > { %11602 = vmatmul.mubr.f32.gmra.mrb[62].mxu0 %v16720_v47  ;;  %15689 = vmatprep.subr.bf16.mxu1 %v15897_v5 }
  0xf7   : > { %11661 = vmatmul.mubr.f32.gmra.mrb[62].mxu1 %v8716_v17  ;;  %11604 = vmatprep.mubr.msk.f32.mxu0 %vm15898_vm0, %v15899_v13 }
  0xf8   : > { %11663 = vmatprep.mubr.msk.f32.mxu1 %vm15898_vm0, %v15899_v13  ;;  %14595 = vmatpush3.bf16.msra.mxu0 %v14594_v18 }
  0xf9   : > { %15697 = vmatpush3.bf16.msra.mxu1 %v14594_v18  ;;  %14596 = vmatprep.subr.bf16.mxu0 %v15897_v5 }
  0xfa   : > { %11605 = vmatmul.mubr.f32.gmra.mrb[64].mxu0 %v16743_v55  ;;  %15690 = vmatprep.subr.bf16.mxu1 %v15897_v5 }
  0xfb   : > { %11664 = vmatmul.mubr.f32.gmra.mrb[64].mxu1 %v8717_v21  ;;  %11607 = vmatprep.mubr.msk.f32.mxu0 %vm15898_vm0, %v15899_v13 }
  0xfc   : > { %11666 = vmatprep.mubr.msk.f32.mxu1 %vm15898_vm0, %v15899_v13  ;;  %14598 = vmatpush3.bf16.msra.mxu0 %v14597_v22 }
  0xfd   : > { %15698 = vmatpush3.bf16.msra.mxu1 %v14597_v22  ;;  %14599 = vmatprep.subr.bf16.mxu0 %v15897_v5 }
  0xfe   : > { %11608 = vmatmul.mubr.f32.gmra.mrb[66].mxu0 %v16754_v59  ;;  %15691 = vmatprep.subr.bf16.mxu1 %v15897_v5 }
  0xff   : > { %11667 = vmatmul.mubr.f32.gmra.mrb[66].mxu1 %v8718_v25  ;;  %11610 = vmatprep.mubr.msk.f32.mxu0 %vm15898_vm0, %v15899_v13 }
 0x100   : > { %11669 = vmatprep.mubr.msk.f32.mxu1 %vm15898_vm0, %v15899_v13  ;;  %14601 = vmatpush3.bf16.msra.mxu0 %v14600_v26 }
 0x101   : > { %15699 = vmatpush3.bf16.msra.mxu1 %v14600_v26  ;;  %14602 = vmatprep.subr.bf16.mxu0 %v15897_v5 }
 0x102   : > { %11611 = vmatmul.mubr.f32.gmra.mrb[68].mxu0 %v8694_v29  ;;  %15692 = vmatprep.subr.bf16.mxu1 %v15897_v5  ;;  %v8737_v5 = vld [vmem:[%s16246_s6 + $0x2b] sm:$0xff] }
 0x103   : > { %11670 = vmatmul.mubr.f32.gmra.mrb[68].mxu1 %v8719_v30  ;;  %11613 = vmatprep.mubr.msk.f32.mxu0 %vm15898_vm0, %v15899_v13 }
 0x104   : > { %11672 = vmatprep.mubr.msk.f32.mxu1 %vm15898_vm0, %v15899_v13  ;;  %14604 = vmatpush3.bf16.msra.mxu0 %v14603_v31 }
 0x105   : > { %15700 = vmatpush3.bf16.msra.mxu1 %v14603_v31 }
 0x106   : > { %11614 = vmatmul.mubr.f32.gmra.mrb[70].mxu0 %v8695_v32 }
 0x107   : > { %11673 = vmatmul.mubr.f32.gmra.mrb[70].mxu1 %v8720_v33  ;;  %11707 = vmatprep.mubr.msk.f32.mxu0 %vm15898_vm0, %v15899_v13 }
 0x108   : > { %11722 = vmatprep.mubr.msk.f32.mxu1 %vm15898_vm0, %v15899_v13 }
 0x10a   : > { %11708 = vmatmul.mubr.f32.vlgmr.msra.gmra.mrb[72].mxu0 %v8737_v5 }
 0x10b   : > { %11723 = vmatmul.mubr.f32.vlgmr.msra.gmra.mrb[72].mxu1 %v8742_v34  ;;  %11710 = vmatprep.mubr.msk.f32.mxu0 %vm15898_vm0, %v15899_v13 }
 0x10c   : > { %11725 = vmatprep.mubr.msk.f32.mxu1 %vm15898_vm0, %v15899_v13 }
 0x10e   : > { %11711 = vmatmul.mubr.f32.gmra.mrb[74].mxu0 %v8738_v35 }
 0x10f   : > { %11726 = vmatmul.mubr.f32.gmra.mrb[74].mxu1 %v8743_v36  ;;  %11713 = vmatprep.mubr.msk.f32.mxu0 %vm15898_vm0, %v15899_v13 }
 0x110   : > { %11728 = vmatprep.mubr.msk.f32.mxu1 %vm15898_vm0, %v15899_v13 }
 0x112   : > { %11714 = vmatmul.mubr.f32.gmra.mrb[76].mxu0 %v8739_v37 }
 0x113   : > { %11729 = vmatmul.mubr.f32.gmra.mrb[76].mxu1 %v8744_v38  ;;  %11716 = vmatprep.mubr.msk.f32.mxu0 %vm15898_vm0, %v15899_v13 }
 0x114   : > { %11731 = vmatprep.mubr.msk.f32.mxu1 %vm15898_vm0, %v15899_v13 }
 0x116   : > { %11717 = vmatmul.mubr.f32.gmra.mrb[78].mxu0 %v8740_v39 }
 0x117   : > { %11732 = vmatmul.mubr.f32.gmra.mrb[78].mxu1 %v8745_v40  ;;  %11719 = vmatprep.mubr.msk.f32.mxu0 %vm15898_vm0, %v15899_v13 }
 0x11a   : > { %11720 = vmatmul.mubr.f32.gmra.mrb[80].mxu0 %v8741_v41 }
 0x14d   : > { %v320_v42 = vpop.f32.mrb[0].mxu0 }
 0x14e   : > { %v11237_v43 = vpop.f32.mrb[1].mxu0  ;;  %v430_v44 = vpop.f32.mrb[0].mxu1 }
 0x14f   : > { %v431_v45 = vadd.f32 %v430_v44, %v320_v42  ;;  %v11296_v46 = vpop.f32.mrb[1].mxu1 }
 0x151   : > { %v325_v47 = vpop.f32.mrb[2].mxu0 }
 0x152   : > { %v11240_v48 = vpop.f32.mrb[3].mxu0  ;;  %v435_v49 = vpop.f32.mrb[2].mxu1 }
 0x153   : > { %v436_v50 = vadd.f32 %v435_v49, %v325_v47  ;;  %v11299_v51 = vpop.f32.mrb[3].mxu1 }
 0x155   : > { %v330_v52 = vpop.f32.mrb[4].mxu0 }
 0x156   : > { %v11243_v53 = vpop.f32.mrb[5].mxu0  ;;  %v440_v54 = vpop.f32.mrb[4].mxu1 }
 0x157   : > { %v441_v55 = vadd.f32 %v440_v54, %v330_v52  ;;  %v11302_v56 = vpop.f32.mrb[5].mxu1 }
 0x159   : > { %v335_v57 = vpop.f32.mrb[6].mxu0 }
 0x15a   : > { %v11246_v58 = vpop.f32.mrb[7].mxu0  ;;  %v445_v13 = vpop.f32.mrb[6].mxu1 }
 0x15b   : > { %v446_v59 = vadd.f32 %v445_v13, %v335_v57  ;;  %v11305_v60 = vpop.f32.mrb[7].mxu1 }
 0x15d   : > { %v340_v61 = vpop.f32.mrb[8].mxu0 }
 0x15e   : > { %v11249_v62 = vpop.f32.mrb[9].mxu0  ;;  %v450_v63 = vpop.f32.mrb[8].mxu1 }
 0x15f   : > { %v451_v0 = vadd.f32 %v450_v63, %v340_v61  ;;  %v11308_v2 = vpop.f32.mrb[9].mxu1 }
 0x161   : > { %v345_v3 = vpop.f32.mrb[10].mxu0 }
 0x162   : > { %v11252_v4 = vpop.f32.mrb[11].mxu0  ;;  %v455_v6 = vpop.f32.mrb[10].mxu1 }
 0x163   : > { %v456_v7 = vadd.f32 %v455_v6, %v345_v3  ;;  %v11311_v8 = vpop.f32.mrb[11].mxu1 }
 0x165   : > { %v350_v9 = vpop.f32.mrb[12].mxu0 }
 0x166   : > { %v11255_v10 = vpop.f32.mrb[13].mxu0  ;;  %v460_v11 = vpop.f32.mrb[12].mxu1 }
 0x167   : > { %v461_v12 = vadd.f32 %v460_v11, %v350_v9  ;;  %v11314_v14 = vpop.f32.mrb[13].mxu1 }
 0x169   : > { %v355_v15 = vpop.f32.mrb[14].mxu0 }
 0x16a   : > { %v11258_v16 = vpop.f32.mrb[15].mxu0  ;;  %v465_v17 = vpop.f32.mrb[14].mxu1 }
 0x16b   : > { %v466_v18 = vadd.f32 %v465_v17, %v355_v15  ;;  %v11317_v19 = vpop.f32.mrb[15].mxu1 }
 0x16d   : > { %v360_v20 = vpop.f32.mrb[16].mxu0 }
 0x16e   : > { %v11261_v21 = vpop.f32.mrb[17].mxu0  ;;  %v470_v22 = vpop.f32.mrb[16].mxu1 }
 0x16f   : > { %v471_v23 = vadd.f32 %v470_v22, %v360_v20  ;;  %v11320_v24 = vpop.f32.mrb[17].mxu1 }
 0x171   : > { %v568_v25 = vpop.f32.mrb[18].mxu0 }
 0x172   : > { %v612_v26 = vadd.f32 %v568_v25, %v431_v45  ;;  %v11355_v27 = vpop.f32.mrb[19].mxu0  ;;  %v715_v28 = vpop.f32.mrb[18].mxu1 }
 0x173   : > { %v11414_v29 = vpop.f32.mrb[19].mxu1 }
 0x174   : > { %v759_v30 = vadd.f32 %v715_v28, %v612_v26 }
 0x175   : > { %v573_v31 = vpop.f32.mrb[20].mxu0 }
 0x176   : > { %v613_v32 = vadd.f32 %v573_v31, %v436_v50  ;;  %v11358_v33 = vpop.f32.mrb[21].mxu0  ;;  %v720_v5 = vpop.f32.mrb[20].mxu1 }
 0x177   : > { %v11417_v34 = vpop.f32.mrb[21].mxu1 }
 0x178   : > { %v760_v35 = vadd.f32 %v720_v5, %v613_v32 }
 0x179   : > { %v578_v36 = vpop.f32.mrb[22].mxu0 }
 0x17a   : > { %v614_v37 = vadd.f32 %v578_v36, %v441_v55  ;;  %v11361_v38 = vpop.f32.mrb[23].mxu0  ;;  %v725_v39 = vpop.f32.mrb[22].mxu1 }
 0x17b   : > { %v11420_v40 = vpop.f32.mrb[23].mxu1 }
 0x17c   : > { %v761_v41 = vadd.f32 %v725_v39, %v614_v37 }
 0x17d   : > { %v583_v42 = vpop.f32.mrb[24].mxu0 }
 0x17e   : > { %v615_v43 = vadd.f32 %v583_v42, %v446_v59  ;;  %v11364_v44 = vpop.f32.mrb[25].mxu0  ;;  %v730_v45 = vpop.f32.mrb[24].mxu1 }
 0x17f   : > { %v11423_v46 = vpop.f32.mrb[25].mxu1 }
 0x180   : > { %v762_v47 = vadd.f32 %v730_v45, %v615_v43 }
 0x181   : > { %v588_v48 = vpop.f32.mrb[26].mxu0 }
 0x182   : > { %v616_v49 = vadd.f32 %v588_v48, %v451_v0  ;;  %v11367_v51 = vpop.f32.mrb[27].mxu0  ;;  %v735_v50 = vpop.f32.mrb[26].mxu1 }
 0x183   : > { %v11426_v52 = vpop.f32.mrb[27].mxu1 }
 0x184   : > { %v763_v53 = vadd.f32 %v735_v50, %v616_v49 }
 0x185   : > { %v593_v54 = vpop.f32.mrb[28].mxu0 }
 0x186   : > { %v617_v56 = vadd.f32 %v593_v54, %v456_v7  ;;  %v11370_v57 = vpop.f32.mrb[29].mxu0  ;;  %v740_v55 = vpop.f32.mrb[28].mxu1 }
 0x187   : > { %v11429_v58 = vpop.f32.mrb[29].mxu1 }
 0x188   : > { %v764_v13 = vadd.f32 %v740_v55, %v617_v56 }
 0x189   : > { %v598_v60 = vpop.f32.mrb[30].mxu0 }
 0x18a   : > { %v618_v61 = vadd.f32 %v598_v60, %v461_v12  ;;  %v11373_v62 = vpop.f32.mrb[31].mxu0  ;;  %v745_v59 = vpop.f32.mrb[30].mxu1 }
 0x18b   : > { %v11432_v63 = vpop.f32.mrb[31].mxu1 }
 0x18c   : > { %v765_v2 = vadd.f32 %v745_v59, %v618_v61 }
 0x18d   : > { %v603_v3 = vpop.f32.mrb[32].mxu0 }
 0x18e   : > { %v619_v4 = vadd.f32 %v603_v3, %v466_v18  ;;  %v11376_v6 = vpop.f32.mrb[33].mxu0  ;;  %v750_v0 = vpop.f32.mrb[32].mxu1 }
 0x18f   : > { %v11435_v8 = vpop.f32.mrb[33].mxu1 }
 0x190   : > { %v766_v9 = vadd.f32 %v750_v0, %v619_v4 }
 0x191   : > { %v608_v10 = vpop.f32.mrb[34].mxu0 }
 0x192   : > { %v620_v11 = vadd.f32 %v608_v10, %v471_v23  ;;  %v11379_v14 = vpop.f32.mrb[35].mxu0  ;;  %v755_v7 = vpop.f32.mrb[34].mxu1 }
 0x193   : > { %v11438_v15 = vpop.f32.mrb[35].mxu1 }
 0x194   : > { %v767_v16 = vadd.f32 %v755_v7, %v620_v11 }
 0x195   : > { %v862_v17 = vpop.f32.mrb[36].mxu0 }
 0x196   : > { %v906_v19 = vadd.f32 %v862_v17, %v759_v30  ;;  %v11473_v20 = vpop.f32.mrb[37].mxu0  ;;  %v1009_v12 = vpop.f32.mrb[36].mxu1 }
 0x197   : > { %v11532_v21 = vpop.f32.mrb[37].mxu1 }
 0x198   : > { %v1053_v22 = vadd.f32 %v1009_v12, %v906_v19 }
 0x199   : > { %v867_v24 = vpop.f32.mrb[38].mxu0 }
 0x19a   : > { %v907_v25 = vadd.f32 %v867_v24, %v760_v35  ;;  %v11476_v26 = vpop.f32.mrb[39].mxu0  ;;  %v1014_v18 = vpop.f32.mrb[38].mxu1 }
 0x19b   : > { %v11535_v27 = vpop.f32.mrb[39].mxu1 }
 0x19c   : > { %v1054_v28 = vadd.f32 %v1014_v18, %v907_v25 }
 0x19d   : > { %v872_v29 = vpop.f32.mrb[40].mxu0 }
 0x19e   : > { %v908_v31 = vadd.f32 %v872_v29, %v761_v41  ;;  %v11479_v32 = vpop.f32.mrb[41].mxu0  ;;  %v1019_v23 = vpop.f32.mrb[40].mxu1 }
 0x19f   : > { %v11538_v33 = vpop.f32.mrb[41].mxu1 }
 0x1a0   : > { %v1055_v5 = vadd.f32 %v1019_v23, %v908_v31 }
 0x1a1   : > { %v877_v34 = vpop.f32.mrb[42].mxu0 }
 0x1a2   : > { %v909_v36 = vadd.f32 %v877_v34, %v762_v47  ;;  %v11482_v37 = vpop.f32.mrb[43].mxu0  ;;  %v1024_v30 = vpop.f32.mrb[42].mxu1 }
 0x1a3   : > { %v11541_v38 = vpop.f32.mrb[43].mxu1 }
 0x1a4   : > { %v1056_v39 = vadd.f32 %v1024_v30, %v909_v36 }
 0x1a5   : > { %v882_v40 = vpop.f32.mrb[44].mxu0 }
 0x1a6   : > { %v910_v42 = vadd.f32 %v882_v40, %v763_v53  ;;  %v11485_v43 = vpop.f32.mrb[45].mxu0  ;;  %v1029_v35 = vpop.f32.mrb[44].mxu1 }
 0x1a7   : > { %v11544_v44 = vpop.f32.mrb[45].mxu1 }
 0x1a8   : > { %v1057_v45 = vadd.f32 %v1029_v35, %v910_v42 }
 0x1a9   : > { %v887_v46 = vpop.f32.mrb[46].mxu0 }
 0x1aa   : > { %v911_v48 = vadd.f32 %v887_v46, %v764_v13  ;;  %v11488_v49 = vpop.f32.mrb[47].mxu0  ;;  %v1034_v41 = vpop.f32.mrb[46].mxu1 }
 0x1ab   : > { %v11547_v51 = vpop.f32.mrb[47].mxu1 }
 0x1ac   : > { %v1058_v50 = vadd.f32 %v1034_v41, %v911_v48 }
 0x1ad   : > { %v892_v52 = vpop.f32.mrb[48].mxu0 }
 0x1ae   : > { %v912_v54 = vadd.f32 %v892_v52, %v765_v2  ;;  %v11491_v56 = vpop.f32.mrb[49].mxu0  ;;  %v1039_v47 = vpop.f32.mrb[48].mxu1 }
 0x1af   : > { %v11550_v57 = vpop.f32.mrb[49].mxu1 }
 0x1b0   : > { %v1059_v55 = vadd.f32 %v1039_v47, %v912_v54 }
 0x1b1   : > { %v897_v58 = vpop.f32.mrb[50].mxu0 }
 0x1b2   : > { %v913_v60 = vadd.f32 %v897_v58, %v766_v9  ;;  %v11494_v61 = vpop.f32.mrb[51].mxu0  ;;  %v1044_v53 = vpop.f32.mrb[50].mxu1 }
 0x1b3   : > { %v11553_v62 = vpop.f32.mrb[51].mxu1 }
 0x1b4   : > { %v1060_v59 = vadd.f32 %v1044_v53, %v913_v60 }
 0x1b5   : > { %v902_v63 = vpop.f32.mrb[52].mxu0 }
 0x1b6   : > { %v914_v3 = vadd.f32 %v902_v63, %v767_v16  ;;  %v11497_v4 = vpop.f32.mrb[53].mxu0  ;;  %v1049_v13 = vpop.f32.mrb[52].mxu1 }
 0x1b7   : > { %v11556_v6 = vpop.f32.mrb[53].mxu1 }
 0x1b8   : > { %v1061_v0 = vadd.f32 %v1049_v13, %v914_v3  ;;  %v1528_v6 = vld [vmem:[%s16912_s16] sm:$0xff] }
 0x1b9   : > { %v1156_v8 = vpop.f32.mrb[54].mxu0 }
 0x1ba   : > { %v1200_v10 = vadd.f32 %v1156_v8, %v1053_v22  ;;  %v11591_v11 = vpop.f32.mrb[55].mxu0  ;;  %v1303_v2 = vpop.f32.mrb[54].mxu1 }
 0x1bb   : > { %v11650_v14 = vpop.f32.mrb[55].mxu1  ;;  %v1533_v11 = vld [vmem:[%s16912_s16 + $0x28] sm:$0xff] }
 0x1bc   : > { %v1347_v7 = vadd.f32 %v1303_v2, %v1200_v10 }
 0x1bd   : > { %v1161_v15 = vpop.f32.mrb[56].mxu0 }
 0x1be   : > { %v1201_v17 = vadd.f32 %v1161_v15, %v1054_v28  ;;  %v11594_v19 = vpop.f32.mrb[57].mxu0  ;;  %v1308_v9 = vpop.f32.mrb[56].mxu1 }
 0x1bf   : > { %v11653_v20 = vpop.f32.mrb[57].mxu1 }
 0x1c0   : > { %v1348_v12 = vadd.f32 %v1308_v9, %v1201_v17 }
 0x1c1   : > { %v1166_v21 = vpop.f32.mrb[58].mxu0 }
 0x1c2   : > { %v1202_v24 = vadd.f32 %v1166_v21, %v1055_v5  ;;  %v11597_v25 = vpop.f32.mrb[59].mxu0  ;;  %v1313_v16 = vpop.f32.mrb[58].mxu1 }
 0x1c3   : > { %v11656_v26 = vpop.f32.mrb[59].mxu1 }
 0x1c4   : > { %v16902_v18 = vadd.f32 %v1313_v16, %v1202_v24  ;;  %v1529_v24 = vld [vmem:[%s16912_s16 + $0x8] sm:$0xff]  ;;  %v1534_v26 = vld [vmem:[%s16912_s16 + $0x30] sm:$0xff] }
 0x1c5   : > { %v1171_v27 = vpop.f32.mrb[60].mxu0 }
 0x1c6   : > { %v1203_v29 = vadd.f32 %v1171_v27, %v1056_v39  ;;  %v11600_v22 = vpop.f32.mrb[61].mxu0  ;;  %v1318_v31 = vpop.f32.mrb[60].mxu1 }
 0x1c7   : > { %v11659_v32 = vpop.f32.mrb[61].mxu1 }
 0x1c8   : > { %v16904_v23 = vadd.f32 %v1318_v31, %v1203_v29 }
 0x1c9   : > { %v1176_v33 = vpop.f32.mrb[62].mxu0 }
 0x1ca   : > { %v1204_v28 = vadd.f32 %v1176_v33, %v1057_v45  ;;  %v11603_v34 = vpop.f32.mrb[63].mxu0  ;;  %v1323_v36 = vpop.f32.mrb[62].mxu1 }
 0x1cb   : > { %v11662_v37 = vpop.f32.mrb[63].mxu1 }
 0x1cc   : > { %v16906_v30 = vadd.f32 %v1323_v36, %v1204_v28  ;;  %v1530_v37 = vld [vmem:[%s16912_s16 + $0x10] sm:$0xff] }
 0x1cd   : > { %v1181_v5 = vpop.f32.mrb[64].mxu0 }
 0x1ce   : > { %v1205_v38 = vadd.f32 %v1181_v5, %v1058_v50  ;;  %v11606_v40 = vpop.f32.mrb[65].mxu0  ;;  %v1328_v42 = vpop.f32.mrb[64].mxu1 }
 0x1cf   : > { %v11665_v43 = vpop.f32.mrb[65].mxu1 }
 0x1d0   : > { %v1352_v35 = vadd.f32 %v1328_v42, %v1205_v38 }
 0x1d1   : > { %v1186_v44 = vpop.f32.mrb[66].mxu0 }
 0x1d2   : > { %v1206_v39 = vadd.f32 %v1186_v44, %v1059_v55  ;;  %v11609_v46 = vpop.f32.mrb[67].mxu0  ;;  %v1333_v48 = vpop.f32.mrb[66].mxu1 }
 0x1d3   : > { %v11668_v49 = vpop.f32.mrb[67].mxu1 }
 0x1d4   : > { %v1353_v41 = vadd.f32 %v1333_v48, %v1206_v39 }
 0x1d5   : > { %v1191_v51 = vpop.f32.mrb[68].mxu0 }
 0x1d6   : > { %v1207_v45 = vadd.f32 %v1191_v51, %v1060_v59  ;;  %v11612_v52 = vpop.f32.mrb[69].mxu0  ;;  %v1338_v54 = vpop.f32.mrb[68].mxu1  ;;  %v1531_v51 = vld [vmem:[%s16912_s16 + $0x18] sm:$0xff] }
 0x1d7   : > { %v11671_v56 = vpop.f32.mrb[69].mxu1 }
 0x1d8   : > { %v1354_v47 = vadd.f32 %v1338_v54, %v1207_v45  ;;  %v1536_v54 = vld [vmem:[%s16912_s16 + $0x40] sm:$0xff] }
 0x1d9   : > { %v1196_v57 = vpop.f32.mrb[70].mxu0 }
 0x1da   : > { %v1208_v58 = vadd.f32 %v1196_v57, %v1061_v0  ;;  %v11615_v50 = vpop.f32.mrb[71].mxu0  ;;  %v1343_v60 = vpop.f32.mrb[70].mxu1 }
 0x1db   : > { %v11674_v61 = vpop.f32.mrb[71].mxu1 }
 0x1dc   : > { %v1355_v53 = vadd.f32 %v1343_v60, %v1208_v58  ;;  %v1532_v61 = vld [vmem:[%s16912_s16 + $0x20] sm:$0xff] }
 0x1dd   : > { %v1450_v62 = vpop.f32.mrb[72].mxu0 }
 0x1de   : > { %v1494_v63 = vadd.f32 %v1450_v62, %v1347_v7  ;;  %v1475_v55 = vpop.f32.mrb[72].mxu1  ;;  %v11709_v59 = vpop.f32.mrb[73].mxu0 }
 0x1df   : > { %v1499_v3 = vadd.f32 %v1475_v55, %v1352_v35  ;;  %v11724_v4 = vpop.f32.mrb[73].mxu1 }
 0x1e0   : > { %v1509_v13 = vadd.f32 %v16117_v1, %v1494_v63 }
 0x1e1   : > { %v1514_v0 = vadd.f32 %v16117_v1, %v1499_v3  ;;  %v1455_v8 = vpop.f32.mrb[74].mxu0 }
 0x1e2   : > { %v1518_v10 = vmax.f32 %v1509_v13, 0.0  ;;  %v1495_v2 = vadd.f32 %v1455_v8, %v1348_v12  ;;  %v1480_v14 = vpop.f32.mrb[74].mxu1  ;;  %v11712_v7 = vpop.f32.mrb[75].mxu0 }
 0x1e3   : > { %v1523_v15 = vmax.f32 %v1514_v0, 0.0  ;;  %v1500_v17 = vadd.f32 %v1480_v14, %v1353_v41  ;;  %v11727_v19 = vpop.f32.mrb[75].mxu1 }
 0x1e4   : > { %v1537_v9 = vmul.f32 %v1528_v6, %v1518_v10  ;;  %v1510_v20 = vadd.f32 %v16117_v1, %v1495_v2 }
 0x1e5   : > { %v1542_v21 = vmul.f32 %v1533_v11, %v1523_v15  ;;  %v1515_v25 = vadd.f32 %v16117_v1, %v1500_v17  ;;  %v1460_v16 = vpop.f32.mrb[76].mxu0 }
 0x1e6   : > { %8762 = vst [vmem:[%s16922_s18 + $0x18] sm:$0xff] %v1537_v9  ;;  %v1519_v12 = vmax.f32 %v1510_v20, 0.0  ;;  %v1496_v27 = vadd.f32 %v1460_v16, %v16902_v18  ;;  %v1485_v29 = vpop.f32.mrb[76].mxu1  ;;  %v11715_v22 = vpop.f32.mrb[77].mxu0  ;;  %v1535_v18 = vld [vmem:[%s16912_s16 + $0x38] sm:$0xff] }
 0x1e7   : > { %8767 = vst [vmem:[%s16922_s18 + $0x40] sm:$0xff] %v1542_v21  ;;  %v1524_v31 = vmax.f32 %v1515_v25, 0.0  ;;  %v1501_v32 = vadd.f32 %v1485_v29, %v1354_v47  ;;  %v11730_v33 = vpop.f32.mrb[77].mxu1 }
 0x1e8   : > { %v1538_v28 = vmul.f32 %v1529_v24, %v1519_v12  ;;  %v1511_v34 = vadd.f32 %v16117_v1, %v1496_v27 }
 0x1e9   : > { %v1543_v36 = vmul.f32 %v1534_v26, %v1524_v31  ;;  %v1516_v5 = vadd.f32 %v16117_v1, %v1501_v32  ;;  %v1465_v38 = vpop.f32.mrb[78].mxu0 }
 0x1ea   : > { %8763 = vst [vmem:[%s16922_s18 + $0x20] sm:$0xff] %v1538_v28  ;;  %v1520_v40 = vmax.f32 %v1511_v34, 0.0  ;;  %v1497_v42 = vadd.f32 %v1465_v38, %v16904_v23  ;;  %v1490_v43 = vpop.f32.mrb[78].mxu1  ;;  %v11718_v35 = vpop.f32.mrb[79].mxu0 }
 0x1eb   : > { %8768 = vst [vmem:[%s16922_s18 + $0x48] sm:$0xff] %v1543_v36  ;;  %v1525_v44 = vmax.f32 %v1516_v5, 0.0  ;;  %v1502_v39 = vadd.f32 %v1490_v43, %v1355_v53  ;;  %v11733_v46 = vpop.f32.mrb[79].mxu1 }
 0x1ec   : > { %v1539_v48 = vmul.f32 %v1530_v37, %v1520_v40  ;;  %v1512_v49 = vadd.f32 %v16117_v1, %v1497_v42 }
 0x1ed   : > { %v1544_v41 = vmul.f32 %v1535_v18, %v1525_v44  ;;  %v1517_v45 = vadd.f32 %v16117_v1, %v1502_v39  ;;  %v1470_v52 = vpop.f32.mrb[80].mxu0 }
 0x1ee   : > { %8764 = vst [vmem:[%s16922_s18 + $0x28] sm:$0xff] %v1539_v48  ;;  %v1521_v23 = vmax.f32 %v1512_v49, 0.0  ;;  %v1498_v56 = vadd.f32 %v1470_v52, %v16906_v30  ;;  %v11721_v47 = vpop.f32.mrb[81].mxu0 }
 0x1ef   : > { %8769 = vst [vmem:[%s16922_s18 + $0x50] sm:$0xff] %v1544_v41  ;;  %v1526_v57 = vmax.f32 %v1517_v45, 0.0 }
 0x1f0   : > { %v1540_v58 = vmul.f32 %v1531_v51, %v1521_v23  ;;  %v1513_v50 = vadd.f32 %v16117_v1, %v1498_v56  ;;  %196 = sbr.rel (!%p194_p0) target bundleno = 88 (0x58), region = 191 }
 0x1f1   : > { %v1545_v60 = vmul.f32 %v1536_v54, %v1526_v57 }
 0x1f2   : > { %8765 = vst [vmem:[%s16922_s18 + $0x30] sm:$0xff] %v1540_v58  ;;  %v1522_v53 = vmax.f32 %v1513_v50, 0.0 }
 0x1f3   : > { %8770 = vst [vmem:[%s16922_s18 + $0x58] sm:$0xff] %v1545_v60 }
 0x1f4   : > { %v1541_v62 = vmul.f32 %v1532_v61, %v1522_v53 }
 0x1f6   : > { %8766 = vst [vmem:[%s16922_s18 + $0x38] sm:$0xff] %v1541_v62 }
 0x1f7 LB: > { %v8789_v30 = vld [vmem:[%s21073_s1 + $0x80] sm:$0xff]  ;;  %v8790_v63 = vld [vmem:[%s21073_s1 + $0x88] sm:$0xff]  ;;  %v15900_v59 = vmov 0.0|0.0   ;;  %v8791_v13 = vld [vmem:[%s21073_s1 + $0x90] sm:$0xff]  ;;  %vm15901_vm1 = vmmov 0   ;;  %v15902_v11 = vmov 0.0   ;;  %s15878_s25 = sphi %s16950_s25, %s1561_s25  }
 0x1f8   : > { %v1574_v55 = vld [vmem:[%s21073_s1] sm:$0xff]  ;;  %14605 = vmatprep.subr.bf16.mxu0 %v15900_v59  ;;  %14629 = vmatprep.subr.bf16.mxu1 %v15900_v59  ;;  %v14606_v3 = vpack.c.bf16 %v8790_v63, %v8789_v30  ;;  %v1575_v4 = vld [vmem:[%s21073_s1 + $0x8] sm:$0xff]  ;;  %v8792_v6 = vld [vmem:[%s21073_s1 + $0x98] sm:$0xff]  ;;  %s17063_s0 = smul.u32 72, %s15878_s25  ;;  %s1561_s25 = sadd.s32 1, %s15878_s25  }
 0x1f9   : > { %v14630_v0 = vpack.c.bf16 %v1575_v4, %v1574_v55  ;;  %v1576_v8 = vld [vmem:[%s21073_s1 + $0x10] sm:$0xff]  ;;  %v1577_v10 = vld [vmem:[%s21073_s1 + $0x18] sm:$0xff]  ;;  %11766 = vmatprep.mubr.msk.f32.mxu0 %vm15901_vm1, %v15902_v11  ;;  %11825 = vmatprep.mubr.msk.f32.mxu1 %vm15901_vm1, %v15902_v11  ;;  %v14609_v2 = vpack.c.bf16 %v8792_v6, %v8791_v13  ;;  %v8793_v7 = vld [vmem:[%s21073_s1 + $0xa0] sm:$0xff]  ;;  %p1558_p1 = scmp.ge.s32.totalorder %s1561_s25, 9  }
 0x1fa   : > { %14607 = vmatpush3.bf16.msra.mxu0 %v14606_v3  ;;  %v14633_v14 = vpack.c.bf16 %v1577_v10, %v1576_v8  ;;  %v8794_v15 = vld [vmem:[%s21073_s1 + $0xa8] sm:$0xff]  ;;  %v1578_v17 = vld [vmem:[%s21073_s1 + $0x20] sm:$0xff]  ;;  %v8795_v21 = vld [vmem:[%s21073_s1 + $0xb0] sm:$0xff]  ;;  %s17087_s11 = scalar_lea.vmem [#allocation2], %s17063_s0  ;;  %s17740_s28 = scalar_lea.vmem %s21075_s3, %s17063_s0 }
 0x1fb   : > { %14631 = vmatpush3.bf16.msra.mxu1 %v14630_v0  ;;  %14608 = vmatprep.subr.bf16.mxu0 %v15900_v59  ;;  %v1579_v19 = vld [vmem:[%s21073_s1 + $0x28] sm:$0xff]  ;;  %v14612_v9 = vpack.c.bf16 %v8794_v15, %v8793_v7  ;;  %v8796_v24 = vld [vmem:[%s21073_s1 + $0xb8] sm:$0xff]  ;;  %v1580_v25 = vld [vmem:[%s21073_s1 + $0x30] sm:$0xff]  ;;  %s17748_s29 = scalar_lea.vmem [#allocation3], %s17063_s0  ;;  %s17778_s0 = smov (%p1558_p1), 0  }
 0x1fc   : > { %14632 = vmatprep.subr.bf16.mxu1 %v15900_v59  ;;  %v14636_v20 = vpack.c.bf16 %v1579_v19, %v1578_v17  ;;  %v1581_v16 = vld [vmem:[%s21073_s1 + $0x38] sm:$0xff]  ;;  %v14615_v12 = vpack.c.bf16 %v8796_v24, %v8795_v21  ;;  %v8797_v27 = vld [vmem:[%s21073_s1 + $0xc0] sm:$0xff]  ;;  %v8798_v29 = vld [vmem:[%s21073_s1 + $0xc8] sm:$0xff] }
 0x1fd   : > { %v14639_v26 = vpack.c.bf16 %v1581_v16, %v1580_v25  ;;  %v1582_v22 = vld [vmem:[%s21073_s1 + $0x40] sm:$0xff]  ;;  %v1583_v31 = vld [vmem:[%s21073_s1 + $0x48] sm:$0xff]  ;;  %v14618_v32 = vpack.c.bf16 %v8798_v29, %v8797_v27  ;;  %v8799_v28 = vld [vmem:[%s21073_s1 + $0xd0] sm:$0xff] }
 0x1fe   : > { %14610 = vmatpush3.bf16.msra.mxu0 %v14609_v2  ;;  %v14642_v33 = vpack.c.bf16 %v1583_v31, %v1582_v22  ;;  %v8800_v34 = vld [vmem:[%s21073_s1 + $0xd8] sm:$0xff]  ;;  %v1584_v36 = vld [vmem:[%s21073_s1 + $0x50] sm:$0xff]  ;;  %v8801_v40 = vld [vmem:[%s21073_s1 + $0xe0] sm:$0xff] }
 0x1ff   : > { %14634 = vmatpush3.bf16.msra.mxu1 %v14633_v14  ;;  %14611 = vmatprep.subr.bf16.mxu0 %v15900_v59  ;;  %v1585_v37 = vld [vmem:[%s21073_s1 + $0x58] sm:$0xff]  ;;  %v14621_v5 = vpack.c.bf16 %v8800_v34, %v8799_v28  ;;  %v8802_v18 = vld [vmem:[%s21073_s1 + $0xe8] sm:$0xff]  ;;  %v1586_v42 = vld [vmem:[%s21073_s1 + $0x60] sm:$0xff] }
 0x200   : > { %14635 = vmatprep.subr.bf16.mxu1 %v15900_v59  ;;  %v14645_v38 = vpack.c.bf16 %v1585_v37, %v1584_v36  ;;  %v1587_v43 = vld [vmem:[%s21073_s1 + $0x68] sm:$0xff]  ;;  %v14624_v35 = vpack.c.bf16 %v8802_v18, %v8801_v40  ;;  %v8803_v39 = vld [vmem:[%s21073_s1 + $0xf0] sm:$0xff]  ;;  %v8804_v46 = vld [vmem:[%s21073_s1 + $0xf8] sm:$0xff] }
 0x201   : > { %v14648_v44 = vpack.c.bf16 %v1587_v43, %v1586_v42  ;;  %v1588_v48 = vld [vmem:[%s21073_s1 + $0x70] sm:$0xff]  ;;  %v1589_v49 = vld [vmem:[%s21073_s1 + $0x78] sm:$0xff]  ;;  %v14627_v41 = vpack.c.bf16 %v8804_v46, %v8803_v39  ;;  %v8814_v45 = vld [vmem:[%s21073_s1 + $0x100] sm:$0xff] }
 0x202   : > { %14613 = vmatpush3.bf16.msra.mxu0 %v14612_v9  ;;  %v14651_v51 = vpack.c.bf16 %v1589_v49, %v1588_v48  ;;  %v8815_v52 = vld [vmem:[%s21073_s1 + $0x108] sm:$0xff]  ;;  %v8839_v23 = vld [vmem:[%s21073_s1 + $0x180] sm:$0xff]  ;;  %v8816_v58 = vld [vmem:[%s21073_s1 + $0x110] sm:$0xff] }
 0x203   : > { %14637 = vmatpush3.bf16.msra.mxu1 %v14636_v20  ;;  %14614 = vmatprep.subr.bf16.mxu0 %v15900_v59  ;;  %v8840_v54 = vld [vmem:[%s21073_s1 + $0x188] sm:$0xff]  ;;  %v14654_v47 = vpack.c.bf16 %v8815_v52, %v8814_v45  ;;  %v8817_v50 = vld [vmem:[%s21073_s1 + $0x118] sm:$0xff]  ;;  %v8841_v61 = vld [vmem:[%s21073_s1 + $0x190] sm:$0xff] }
 0x204   : > { %14638 = vmatprep.subr.bf16.mxu1 %v15900_v59  ;;  %v8780_v56 = vld [vmem:[%s17087_s11 + $0x6] sm:$0xff]  ;;  %v14678_v60 = vpack.c.bf16 %v8840_v54, %v8839_v23  ;;  %v8842_v53 = vld [vmem:[%s21073_s1 + $0x198] sm:$0xff]  ;;  %v8781_v62 = vld [vmem:[%s17087_s11 + $0xe] sm:$0xff]  ;;  %v14657_v30 = vpack.c.bf16 %v8817_v50, %v8816_v58 }
 0x205   : > { %v8771_v57 = vld [vmem:[%s17087_s11 + $0x5] sm:$0xff]  ;;  %v8772_v63 = vld [vmem:[%s17087_s11 + $0xd] sm:$0xff]  ;;  %v14681_v4 = vpack.c.bf16 %v8842_v53, %v8841_v61  ;;  %v8782_v0 = vld [vmem:[%s17087_s11 + $0x16] sm:$0xff] }
 0x206   : > { %14616 = vmatpush3.bf16.msra.mxu0 %v14615_v12  ;;  %v8818_v55 = vld [vmem:[%s21073_s1 + $0x120] sm:$0xff]  ;;  %v8819_v3 = vld [vmem:[%s21073_s1 + $0x128] sm:$0xff]  ;;  %v8773_v10 = vld [vmem:[%s17087_s11 + $0x15] sm:$0xff] }
 0x207   : > { %14640 = vmatpush3.bf16.msra.mxu1 %v14639_v26  ;;  %14617 = vmatprep.subr.bf16.mxu0 %v15900_v59  ;;  %v8843_v13 = vld [vmem:[%s21073_s1 + $0x1a0] sm:$0xff]  ;;  %v8844_v6 = vld [vmem:[%s21073_s1 + $0x1a8] sm:$0xff]  ;;  %v14660_v8 = vpack.c.bf16 %v8819_v3, %v8818_v55  ;;  %v8820_v14 = vld [vmem:[%s21073_s1 + $0x130] sm:$0xff] }
 0x208   : > { %14641 = vmatprep.subr.bf16.mxu1 %v15900_v59  ;;  %v14684_v2 = vpack.c.bf16 %v8844_v6, %v8843_v13  ;;  %v8821_v7 = vld [vmem:[%s21073_s1 + $0x138] sm:$0xff]  ;;  %v8845_v15 = vld [vmem:[%s21073_s1 + $0x1b0] sm:$0xff]  ;;  %v8822_v24 = vld [vmem:[%s21073_s1 + $0x140] sm:$0xff] }
 0x209   : > { %v8846_v17 = vld [vmem:[%s21073_s1 + $0x1b8] sm:$0xff]  ;;  %v14663_v20 = vpack.c.bf16 %v8821_v7, %v8820_v14  ;;  %v8823_v25 = vld [vmem:[%s21073_s1 + $0x148] sm:$0xff]  ;;  %v8847_v16 = vld [vmem:[%s21073_s1 + $0x1c0] sm:$0xff] }
 0x20a   : > { %14619 = vmatpush3.bf16.msra.mxu0 %v14618_v32  ;;  %v8783_v19 = vld [vmem:[%s17087_s11 + $0x1e] sm:$0xff]  ;;  %v14687_v21 = vpack.c.bf16 %v8846_v17, %v8845_v15  ;;  %v8848_v12 = vld [vmem:[%s21073_s1 + $0x1c8] sm:$0xff]  ;;  %v14666_v29 = vpack.c.bf16 %v8823_v25, %v8822_v24  ;;  %v8824_v31 = vld [vmem:[%s21073_s1 + $0x150] sm:$0xff] }
 0x20b   : > { %14643 = vmatpush3.bf16.msra.mxu1 %v14642_v33  ;;  %14620 = vmatprep.subr.bf16.mxu0 %v15900_v59  ;;  %v8774_v9 = vld [vmem:[%s17087_s11 + $0x1d] sm:$0xff]  ;;  %v8784_v26 = vld [vmem:[%s17087_s11 + $0x26] sm:$0xff]  ;;  %v14690_v22 = vpack.c.bf16 %v8848_v12, %v8847_v16  ;;  %v8849_v33 = vld [vmem:[%s21073_s1 + $0x1d0] sm:$0xff] }
 0x20c   : > { %14644 = vmatprep.subr.bf16.mxu1 %v15900_v59  ;;  %v8775_v27 = vld [vmem:[%s17087_s11 + $0x25] sm:$0xff]  ;;  %v8825_v32 = vld [vmem:[%s21073_s1 + $0x158] sm:$0xff]  ;;  %v8785_v34 = vld [vmem:[%s17087_s11 + $0x2e] sm:$0xff] }
 0x20d   : > { %v8850_v28 = vld [vmem:[%s21073_s1 + $0x1d8] sm:$0xff]  ;;  %v8776_v36 = vld [vmem:[%s17087_s11 + $0x2d] sm:$0xff]  ;;  %v14669_v37 = vpack.c.bf16 %v8825_v32, %v8824_v31  ;;  %v8851_v18 = vld [vmem:[%s21073_s1 + $0x1e0] sm:$0xff] }
 0x20e   : > { %14622 = vmatpush3.bf16.msra.mxu0 %v14621_v5  ;;  %v14693_v5 = vpack.c.bf16 %v8850_v28, %v8849_v33  ;;  %v8827_v40 = vld [vmem:[%s21073_s1 + $0x168] sm:$0xff]  ;;  %v8786_v43 = vld [vmem:[%s17087_s11 + $0x36] sm:$0xff]  ;;  %v8889_v58 = vld [vmem:[%s21073_s1 + $0x280] sm:$0xff] }
 0x20f   : > { %14646 = vmatpush3.bf16.msra.mxu1 %v14645_v38  ;;  %14623 = vmatprep.subr.bf16.mxu0 %v15900_v59  ;;  %v8826_v38 = vld [vmem:[%s21073_s1 + $0x160] sm:$0xff]  ;;  %v8852_v42 = vld [vmem:[%s21073_s1 + $0x1e8] sm:$0xff]  ;;  %v8828_v46 = vld [vmem:[%s21073_s1 + $0x170] sm:$0xff] }
 0x210   : > { %14647 = vmatprep.subr.bf16.mxu1 %v15900_v59  ;;  %v14696_v39 = vpack.c.bf16 %v8852_v42, %v8851_v18  ;;  %v8829_v48 = vld [vmem:[%s21073_s1 + $0x178] sm:$0xff]  ;;  %v8853_v49 = vld [vmem:[%s21073_s1 + $0x1f0] sm:$0xff]  ;;  %v8788_v54 = vld [vmem:[%s17087_s11 + $0x46] sm:$0xff] }
 0x211   : > { %v8778_v45 = vld [vmem:[%s17087_s11 + $0x3d] sm:$0xff]  ;;  %v14675_v52 = vpack.c.bf16 %v8829_v48, %v8828_v46  ;;  %v8890_v50 = vld [vmem:[%s21073_s1 + $0x288] sm:$0xff]  ;;  %v8891_v55 = vld [vmem:[%s21073_s1 + $0x290] sm:$0xff] }
 0x212   : > { %14625 = vmatpush3.bf16.msra.mxu0 %v14624_v35  ;;  %v8777_v35 = vld [vmem:[%s17087_s11 + $0x35] sm:$0xff]  ;;  %v8831_v6 = vld [vmem:[%s17087_s11 + $0x1f] sm:$0xff]  ;;  %v8894_v14 = vld [vmem:[%s21073_s1 + $0x2a8] sm:$0xff] }
 0x213   : > { %14649 = vmatpush3.bf16.msra.mxu1 %v14648_v44  ;;  %14626 = vmatprep.subr.bf16.mxu0 %v15900_v59  ;;  %v14672_v44 = vpack.c.bf16 %v8827_v40, %v8826_v38  ;;  %v8830_v53 = vld [vmem:[%s17087_s11 + $0x17] sm:$0xff]  ;;  %v8832_v15 = vld [vmem:[%s17087_s11 + $0x27] sm:$0xff]  ;;  %v8833_v24 = vld [vmem:[%s17087_s11 + $0x2f] sm:$0xff] }
 0x214   : > { %14650 = vmatprep.subr.bf16.mxu1 %v15900_v59  ;;  %v8892_v3 = vld [vmem:[%s21073_s1 + $0x298] sm:$0xff]  ;;  %v8872_v12 = vld [vmem:[%s21073_s1 + $0x240] sm:$0xff]  ;;  %v8874_v33 = vld [vmem:[%s21073_s1 + $0x250] sm:$0xff] }
 0x215   : > { %v8875_v28 = vld [vmem:[%s21073_s1 + $0x258] sm:$0xff]  ;;  %v8876_v40 = vld [vmem:[%s21073_s1 + $0x260] sm:$0xff]  ;;  %v8877_v18 = vld [vmem:[%s21073_s1 + $0x268] sm:$0xff] }
 0x216   : > { %14628 = vmatpush3.bf16.msra.mxu0 %v14627_v41  ;;  %v8854_v41 = vld [vmem:[%s21073_s1 + $0x1f8] sm:$0xff]  ;;  %v8901_v42 = vld [vmem:[%s21073_s1 + $0x2e0] sm:$0xff]  ;;  %v8878_v46 = vld [vmem:[%s21073_s1 + $0x270] sm:$0xff] }
 0x217   : > { %14652 = vmatpush3.bf16.msra.mxu1 %v14651_v51  ;;  %14653 = vmatprep.subr.bf16.mxu0 %v15900_v59  ;;  %v8787_v51 = vld [vmem:[%s17087_s11 + $0x3e] sm:$0xff]  ;;  %v14699_v23 = vpack.c.bf16 %v8854_v41, %v8853_v49  ;;  %v8903_v49 = vld [vmem:[%s21073_s1 + $0x2f0] sm:$0xff] }
 0x218   : > { %14677 = vmatprep.subr.bf16.mxu1 %v15900_v59  ;;  %v8879_v48 = vld [vmem:[%s21073_s1 + $0x278] sm:$0xff] }
 0x219   : > { %11767 = vmatmul.mubr.f32.vlgmr.msra.gmra.mrb[0].mxu0 %v8780_v56  ;;  %v8779_v56 = vld [vmem:[%s17087_s11 + $0x45] sm:$0xff]  ;;  %v8904_v41 = vld [vmem:[%s21073_s1 + $0x2f8] sm:$0xff] }
 0x21a   : > { %11826 = vmatmul.mubr.f32.vlgmr.msra.gmra.mrb[0].mxu1 %v8771_v57  ;;  %14655 = vmatpush3.bf16.msra.mxu0 %v14654_v47  ;;  %v8864_v47 = vld [vmem:[%s21073_s1 + $0x200] sm:$0xff]  ;;  %v8865_v57 = vld [vmem:[%s21073_s1 + $0x208] sm:$0xff] }
 0x21b   : > { %11769 = vmatprep.mubr.msk.f32.mxu0 %vm15901_vm1, %v15902_v11  ;;  %11828 = vmatprep.mubr.msk.f32.mxu1 %vm15901_vm1, %v15902_v11  ;;  %v14702_v61 = vpack.c.bf16 %v8865_v57, %v8864_v47  ;;  %v8939_v47 = vld [vmem:[%s21073_s1 + $0x380] sm:$0xff]  ;;  %v8940_v57 = vld [vmem:[%s21073_s1 + $0x388] sm:$0xff] }
 0x21c   : > { %14656 = vmatprep.subr.bf16.mxu0 %v15900_v59  ;;  %14679 = vmatpush3.bf16.msra.mxu1 %v14678_v60  ;;  %v8805_v60 = vld [vmem:[%s17087_s11 + $0x7] sm:$0xff] }
 0x21d   : > { %11770 = vmatmul.mubr.f32.gmra.mrb[2].mxu0 %v8781_v62  ;;  %14680 = vmatprep.subr.bf16.mxu1 %v15900_v59  ;;  %v8866_v62 = vld [vmem:[%s21073_s1 + $0x210] sm:$0xff] }
 0x21e   : > { %11829 = vmatmul.mubr.f32.gmra.mrb[2].mxu1 %v8772_v63  ;;  %14658 = vmatpush3.bf16.msra.mxu0 %v14657_v30  ;;  %v8867_v30 = vld [vmem:[%s21073_s1 + $0x218] sm:$0xff]  ;;  %v14726_v63 = vpack.c.bf16 %v8890_v50, %v8889_v58 }
 0x21f   : > { %11772 = vmatprep.mubr.msk.f32.mxu0 %vm15901_vm1, %v15902_v11  ;;  %11831 = vmatprep.mubr.msk.f32.mxu1 %vm15901_vm1, %v15902_v11  ;;  %v14705_v13 = vpack.c.bf16 %v8867_v30, %v8866_v62  ;;  %v8855_v58 = vld [vmem:[%s17087_s11 + $0x18] sm:$0xff]  ;;  %v14774_v62 = vpack.c.bf16 %v8940_v57, %v8939_v47  ;;  %v8941_v30 = vld [vmem:[%s21073_s1 + $0x390] sm:$0xff] }
 0x220   : > { %14659 = vmatprep.subr.bf16.mxu0 %v15900_v59  ;;  %14682 = vmatpush3.bf16.msra.mxu1 %v14681_v4  ;;  %v8806_v4 = vld [vmem:[%s17087_s11 + $0xf] sm:$0xff]  ;;  %v8863_v57 = vld [vmem:[%s17087_s11 + $0x58] sm:$0xff] }
 0x221   : > { %11773 = vmatmul.mubr.f32.gmra.mrb[4].mxu0 %v8782_v0  ;;  %14683 = vmatprep.subr.bf16.mxu1 %v15900_v59  ;;  %v8868_v0 = vld [vmem:[%s21073_s1 + $0x220] sm:$0xff] }
 0x222   : > { %11832 = vmatmul.mubr.f32.gmra.mrb[4].mxu1 %v8773_v10  ;;  %14661 = vmatpush3.bf16.msra.mxu0 %v14660_v8  ;;  %v8869_v8 = vld [vmem:[%s21073_s1 + $0x228] sm:$0xff]  ;;  %v14729_v10 = vpack.c.bf16 %v8892_v3, %v8891_v55  ;;  %v8856_v55 = vld [vmem:[%s17087_s11 + $0x20] sm:$0xff] }
 0x223   : > { %11775 = vmatprep.mubr.msk.f32.mxu0 %vm15901_vm1, %v15902_v11  ;;  %11834 = vmatprep.mubr.msk.f32.mxu1 %vm15901_vm1, %v15902_v11  ;;  %v14708_v7 = vpack.c.bf16 %v8869_v8, %v8868_v0  ;;  %v8943_v8 = vld [vmem:[%s21073_s1 + $0x3a0] sm:$0xff] }
 0x224   : > { %14685 = vmatpush3.bf16.msra.mxu1 %v14684_v2  ;;  %14662 = vmatprep.subr.bf16.mxu0 %v15900_v59  ;;  %v8893_v2 = vld [vmem:[%s21073_s1 + $0x2a0] sm:$0xff] }
 0x225   : > { %11776 = vmatmul.mubr.f32.gmra.mrb[6].mxu0 %v8783_v19  ;;  %14686 = vmatprep.subr.bf16.mxu1 %v15900_v59  ;;  %v14732_v17 = vpack.c.bf16 %v8894_v14, %v8893_v2  ;;  %v8870_v19 = vld [vmem:[%s21073_s1 + $0x230] sm:$0xff]  ;;  %v8857_v2 = vld [vmem:[%s17087_s11 + $0x28] sm:$0xff] }
 0x226   : > { %11835 = vmatmul.mubr.f32.gmra.mrb[6].mxu1 %v8774_v9  ;;  %11778 = vmatprep.mubr.msk.f32.mxu0 %vm15901_vm1, %v15902_v11  ;;  %v8871_v9 = vld [vmem:[%s21073_s1 + $0x238] sm:$0xff] }
 0x227   : > { %11837 = vmatprep.mubr.msk.f32.mxu1 %vm15901_vm1, %v15902_v11  ;;  %14664 = vmatpush3.bf16.msra.mxu0 %v14663_v20  ;;  %v8895_v20 = vld [vmem:[%s21073_s1 + $0x2b0] sm:$0xff]  ;;  %v14711_v25 = vpack.c.bf16 %v8871_v9, %v8870_v19  ;;  %v8921_v19 = vld [vmem:[%s21073_s1 + $0x338] sm:$0xff] }
 0x228   : > { %14688 = vmatpush3.bf16.msra.mxu1 %v14687_v21  ;;  %14665 = vmatprep.subr.bf16.mxu0 %v15900_v59  ;;  %v8896_v21 = vld [vmem:[%s21073_s1 + $0x2b8] sm:$0xff]  ;;  %v8945_v9 = vld [vmem:[%s21073_s1 + $0x3b0] sm:$0xff] }
 0x229   : > { %11779 = vmatmul.mubr.f32.gmra.mrb[8].mxu0 %v8784_v26  ;;  %14689 = vmatprep.subr.bf16.mxu1 %v15900_v59  ;;  %v14735_v16 = vpack.c.bf16 %v8896_v21, %v8895_v20  ;;  %v8873_v26 = vld [vmem:[%s21073_s1 + $0x248] sm:$0xff]  ;;  %v8946_v20 = vld [vmem:[%s21073_s1 + $0x3b8] sm:$0xff]  ;;  %v8858_v21 = vld [vmem:[%s17087_s11 + $0x30] sm:$0xff] }
 0x22a   : > { %11838 = vmatmul.mubr.f32.gmra.mrb[8].mxu1 %v8775_v27  ;;  %11781 = vmatprep.mubr.msk.f32.mxu0 %vm15901_vm1, %v15902_v11  ;;  %v8897_v27 = vld [vmem:[%s21073_s1 + $0x2c0] sm:$0xff]  ;;  %v14714_v31 = vpack.c.bf16 %v8873_v26, %v8872_v12  ;;  %v8923_v26 = vld [vmem:[%s21073_s1 + $0x348] sm:$0xff] }
 0x22b   : > { %11840 = vmatprep.mubr.msk.f32.mxu1 %vm15901_vm1, %v15902_v11  ;;  %14667 = vmatpush3.bf16.msra.mxu0 %v14666_v29  ;;  %v8898_v29 = vld [vmem:[%s21073_s1 + $0x2c8] sm:$0xff]  ;;  %v8922_v12 = vld [vmem:[%s21073_s1 + $0x340] sm:$0xff] }
 0x22c   : > { %14691 = vmatpush3.bf16.msra.mxu1 %v14690_v22  ;;  %14668 = vmatprep.subr.bf16.mxu0 %v15900_v59  ;;  %v8834_v22 = vld [vmem:[%s17087_s11 + $0x37] sm:$0xff]  ;;  %v14738_v32 = vpack.c.bf16 %v8898_v29, %v8897_v27  ;;  %v8947_v27 = vld [vmem:[%s21073_s1 + $0x3c0] sm:$0xff]  ;;  %v8948_v29 = vld [vmem:[%s21073_s1 + $0x3c8] sm:$0xff] }
 0x22d   : > { %11782 = vmatmul.mubr.f32.gmra.mrb[10].mxu0 %v8785_v34  ;;  %14692 = vmatprep.subr.bf16.mxu1 %v15900_v59  ;;  %v8899_v34 = vld [vmem:[%s21073_s1 + $0x2d0] sm:$0xff] }
 0x22e   : > { %11841 = vmatmul.mubr.f32.gmra.mrb[10].mxu1 %v8776_v36  ;;  %11784 = vmatprep.mubr.msk.f32.mxu0 %vm15901_vm1, %v15902_v11  ;;  %v8900_v36 = vld [vmem:[%s21073_s1 + $0x2d8] sm:$0xff] }
 0x22f   : > { %11843 = vmatprep.mubr.msk.f32.mxu1 %vm15901_vm1, %v15902_v11  ;;  %14670 = vmatpush3.bf16.msra.mxu0 %v14669_v37  ;;  %v8835_v37 = vld [vmem:[%s17087_s11 + $0x3f] sm:$0xff]  ;;  %v14741_v38 = vpack.c.bf16 %v8900_v36, %v8899_v34  ;;  %v8949_v36 = vld [vmem:[%s21073_s1 + $0x3d0] sm:$0xff] }
 0x230   : > { %14694 = vmatpush3.bf16.msra.mxu1 %v14693_v5  ;;  %14671 = vmatprep.subr.bf16.mxu0 %v15900_v59  ;;  %v14717_v5 = vpack.c.bf16 %v8875_v28, %v8874_v33  ;;  %v14786_v33 = vpack.c.bf16 %v8948_v29, %v8947_v27  ;;  %v8924_v28 = vld [vmem:[%s21073_s1 + $0x350] sm:$0xff]  ;;  %v8925_v34 = vld [vmem:[%s21073_s1 + $0x358] sm:$0xff]  ;;  %v8912_v29 = vld [vmem:[%s17087_s11 + $0x61] sm:$0xff] }
 0x231   : > { %11785 = vmatmul.mubr.f32.gmra.mrb[12].mxu0 %v8786_v43  ;;  %14695 = vmatprep.subr.bf16.mxu1 %v15900_v59  ;;  %v8902_v43 = vld [vmem:[%s21073_s1 + $0x2e8] sm:$0xff]  ;;  %v8979_v27 = vld [vmem:[%s21073_s1 + $0x478] sm:$0xff] }
 0x232   : > { %11844 = vmatmul.mubr.f32.gmra.mrb[12].mxu1 %v8777_v35  ;;  %11787 = vmatprep.mubr.msk.f32.mxu0 %vm15901_vm1, %v15902_v11  ;;  %v8836_v35 = vld [vmem:[%s17087_s11 + $0x47] sm:$0xff] }
 0x233   : > { %11846 = vmatprep.mubr.msk.f32.mxu1 %vm15901_vm1, %v15902_v11  ;;  %14673 = vmatpush3.bf16.msra.mxu0 %v14672_v44  ;;  %v14720_v44 = vpack.c.bf16 %v8877_v18, %v8876_v40  ;;  %v14765_v40 = vpack.c.bf16 %v8925_v34, %v8924_v28  ;;  %v8960_v28 = vld [vmem:[%s17087_s11 + $0x53] sm:$0xff] }
 0x234   : > { %14697 = vmatpush3.bf16.msra.mxu1 %v14696_v39  ;;  %14674 = vmatprep.subr.bf16.mxu0 %v15900_v59  ;;  %v14744_v39 = vpack.c.bf16 %v8902_v43, %v8901_v42  ;;  %v8926_v42 = vld [vmem:[%s21073_s1 + $0x360] sm:$0xff]  ;;  %v8927_v43 = vld [vmem:[%s21073_s1 + $0x368] sm:$0xff]  ;;  %v8956_v34 = vld [vmem:[%s17087_s11 + $0x33] sm:$0xff] }
 0x235   : > { %11788 = vmatmul.mubr.f32.gmra.mrb[14].mxu0 %v8787_v51  ;;  %14698 = vmatprep.subr.bf16.mxu1 %v15900_v59  ;;  %v8837_v51 = vld [vmem:[%s17087_s11 + $0x4f] sm:$0xff] }
 0x236   : > { %11847 = vmatmul.mubr.f32.gmra.mrb[14].mxu1 %v8778_v45  ;;  %11790 = vmatprep.mubr.msk.f32.mxu0 %vm15901_vm1, %v15902_v11  ;;  %v14723_v45 = vpack.c.bf16 %v8879_v48, %v8878_v46  ;;  %v17548_v46 = vld [vmem:[%s17087_s11 + $0x49] sm:$0xff]  ;;  %v14768_v48 = vpack.c.bf16 %v8927_v43, %v8926_v42 }
 0x237   : > { %11849 = vmatprep.mubr.msk.f32.mxu1 %vm15901_vm1, %v15902_v11  ;;  %14676 = vmatpush3.bf16.msra.mxu0 %v14675_v52  ;;  %v14747_v52 = vpack.c.bf16 %v8904_v41, %v8903_v49  ;;  %v8928_v41 = vld [vmem:[%s21073_s1 + $0x370] sm:$0xff] }
 0x238   : > { %14700 = vmatpush3.bf16.msra.mxu1 %v14699_v23  ;;  %14701 = vmatprep.subr.bf16.mxu0 %v15900_v59  ;;  %v8838_v23 = vld [vmem:[%s17087_s11 + $0x57] sm:$0xff] }
 0x239   : > { %11791 = vmatmul.mubr.f32.gmra.mrb[16].mxu0 %v8788_v54  ;;  %14725 = vmatprep.subr.bf16.mxu1 %v15900_v59  ;;  %v8914_v54 = vld [vmem:[%s21073_s1 + $0x300] sm:$0xff] }
 0x23a   : > { %11850 = vmatmul.mubr.f32.gmra.mrb[16].mxu1 %v8779_v56  ;;  %11884 = vmatprep.mubr.msk.f32.mxu0 %vm15901_vm1, %v15902_v11  ;;  %v8915_v56 = vld [vmem:[%s21073_s1 + $0x308] sm:$0xff] }
 0x23b   : > { %11943 = vmatprep.mubr.msk.f32.mxu1 %vm15901_vm1, %v15902_v11  ;;  %v14750_v50 = vpack.c.bf16 %v8915_v56, %v8914_v54  ;;  %v17571_v54 = vld [vmem:[%s17087_s11 + $0x51] sm:$0xff] }
 0x23d   : > { %11885 = vmatmul.mubr.f32.vlgmr.msra.gmra.mrb[18].mxu0 %v8805_v60  ;;  %v8880_v60 = vld [vmem:[%s17087_s11 + $0x19] sm:$0xff] }
 0x23e   : > { %11944 = vmatmul.mubr.f32.vlgmr.msra.gmra.mrb[18].mxu1 %v8830_v53  ;;  %14703 = vmatpush3.bf16.msra.mxu0 %v14702_v61  ;;  %v8916_v61 = vld [vmem:[%s21073_s1 + $0x310] sm:$0xff] }
 0x23f   : > { %11887 = vmatprep.mubr.msk.f32.mxu0 %vm15901_vm1, %v15902_v11  ;;  %11946 = vmatprep.mubr.msk.f32.mxu1 %vm15901_vm1, %v15902_v11 }
 0x240   : > { %14704 = vmatprep.subr.bf16.mxu0 %v15900_v59  ;;  %14727 = vmatpush3.bf16.msra.mxu1 %v14726_v63  ;;  %v8942_v63 = vld [vmem:[%s21073_s1 + $0x398] sm:$0xff] }
 0x241   : > { %11888 = vmatmul.mubr.f32.gmra.mrb[20].mxu0 %v8806_v4  ;;  %14728 = vmatprep.subr.bf16.mxu1 %v15900_v59  ;;  %v8881_v4 = vld [vmem:[%s17087_s11 + $0x21] sm:$0xff]  ;;  %v14777_v0 = vpack.c.bf16 %v8942_v63, %v8941_v30  ;;  %v8967_v30 = vld [vmem:[%s21073_s1 + $0x418] sm:$0xff] }
 0x242   : > { %11947 = vmatmul.mubr.f32.gmra.mrb[20].mxu1 %v8831_v6  ;;  %14706 = vmatpush3.bf16.msra.mxu0 %v14705_v13  ;;  %v8918_v13 = vld [vmem:[%s21073_s1 + $0x320] sm:$0xff] }
 0x243   : > { %11890 = vmatprep.mubr.msk.f32.mxu0 %vm15901_vm1, %v15902_v11  ;;  %11949 = vmatprep.mubr.msk.f32.mxu1 %vm15901_vm1, %v15902_v11 }
 0x244   : > { %14707 = vmatprep.subr.bf16.mxu0 %v15900_v59  ;;  %14730 = vmatpush3.bf16.msra.mxu1 %v14729_v10  ;;  %v8944_v10 = vld [vmem:[%s21073_s1 + $0x3a8] sm:$0xff] }
 0x245   : > { %11891 = vmatmul.mubr.f32.gmra.mrb[22].mxu0 %v8830_v53  ;;  %14731 = vmatprep.subr.bf16.mxu1 %v15900_v59  ;;  %v8917_v53 = vld [vmem:[%s21073_s1 + $0x318] sm:$0xff] }
 0x246   : > { %11950 = vmatmul.mubr.f32.gmra.mrb[22].mxu1 %v8832_v15  ;;  %14709 = vmatpush3.bf16.msra.mxu0 %v14708_v7  ;;  %v14753_v3 = vpack.c.bf16 %v8917_v53, %v8916_v61  ;;  %v17456_v7 = vld [vmem:[%s17087_s11 + $0x29] sm:$0xff] }
 0x247   : > { %11893 = vmatprep.mubr.msk.f32.mxu0 %vm15901_vm1, %v15902_v11  ;;  %11952 = vmatprep.mubr.msk.f32.mxu1 %vm15901_vm1, %v15902_v11  ;;  %v8930_v53 = vld [vmem:[%s17087_s11 + $0x2a] sm:$0xff] }
 0x248   : > { %14733 = vmatpush3.bf16.msra.mxu1 %v14732_v17  ;;  %14710 = vmatprep.subr.bf16.mxu0 %v15900_v59  ;;  %v8920_v17 = vld [vmem:[%s21073_s1 + $0x330] sm:$0xff] }
 0x249   : > { %11894 = vmatmul.mubr.f32.gmra.mrb[24].mxu0 %v8831_v6  ;;  %14734 = vmatprep.subr.bf16.mxu1 %v15900_v59  ;;  %v8919_v6 = vld [vmem:[%s21073_s1 + $0x328] sm:$0xff] }
 0x24a   : > { %11953 = vmatmul.mubr.f32.gmra.mrb[24].mxu1 %v8833_v24  ;;  %11896 = vmatprep.mubr.msk.f32.mxu0 %vm15901_vm1, %v15902_v11  ;;  %v14756_v14 = vpack.c.bf16 %v8919_v6, %v8918_v13  ;;  %v8932_v6 = vld [vmem:[%s17087_s11 + $0x3a] sm:$0xff] }
 0x24b   : > { %11955 = vmatprep.mubr.msk.f32.mxu1 %vm15901_vm1, %v15902_v11  ;;  %14712 = vmatpush3.bf16.msra.mxu0 %v14711_v25  ;;  %v14759_v25 = vpack.c.bf16 %v8921_v19, %v8920_v17  ;;  %v8974_v19 = vld [vmem:[%s21073_s1 + $0x450] sm:$0xff] }
 0x24c   : > { %14736 = vmatpush3.bf16.msra.mxu1 %v14735_v16  ;;  %14713 = vmatprep.subr.bf16.mxu0 %v15900_v59  ;;  %v14783_v16 = vpack.c.bf16 %v8946_v20, %v8945_v9  ;;  %v8975_v9 = vld [vmem:[%s21073_s1 + $0x458] sm:$0xff] }
 0x24d   : > { %11897 = vmatmul.mubr.f32.gmra.mrb[26].mxu0 %v8832_v15  ;;  %14737 = vmatprep.subr.bf16.mxu1 %v15900_v59  ;;  %v14780_v15 = vpack.c.bf16 %v8944_v10, %v8943_v8  ;;  %v8971_v8 = vld [vmem:[%s21073_s1 + $0x438] sm:$0xff]  ;;  %v8933_v10 = vld [vmem:[%s17087_s11 + $0x42] sm:$0xff] }
 0x24e   : > { %11956 = vmatmul.mubr.f32.gmra.mrb[26].mxu1 %v8834_v22  ;;  %11899 = vmatprep.mubr.msk.f32.mxu0 %vm15901_vm1, %v15902_v11  ;;  %v8935_v20 = vld [vmem:[%s17087_s11 + $0x52] sm:$0xff] }
 0x24f   : > { %11958 = vmatprep.mubr.msk.f32.mxu1 %vm15901_vm1, %v15902_v11  ;;  %14715 = vmatpush3.bf16.msra.mxu0 %v14714_v31  ;;  %v17502_v31 = vld [vmem:[%s17087_s11 + $0x39] sm:$0xff] }
 0x250   : > { %14739 = vmatpush3.bf16.msra.mxu1 %v14738_v32  ;;  %14716 = vmatprep.subr.bf16.mxu0 %v15900_v59  ;;  %v14762_v32 = vpack.c.bf16 %v8923_v26, %v8922_v12  ;;  %v8978_v26 = vld [vmem:[%s21073_s1 + $0x470] sm:$0xff] }
 0x251   : > { %11900 = vmatmul.mubr.f32.gmra.mrb[28].mxu0 %v8833_v24  ;;  %14740 = vmatprep.subr.bf16.mxu1 %v15900_v59  ;;  %v17479_v24 = vld [vmem:[%s17087_s11 + $0x31] sm:$0xff] }
 0x252   : > { %11959 = vmatmul.mubr.f32.gmra.mrb[28].mxu1 %v8835_v37  ;;  %11902 = vmatprep.mubr.msk.f32.mxu0 %vm15901_vm1, %v15902_v11 }
 0x253   : > { %11961 = vmatprep.mubr.msk.f32.mxu1 %vm15901_vm1, %v15902_v11  ;;  %14718 = vmatpush3.bf16.msra.mxu0 %v14717_v5  ;;  %v8860_v5 = vld [vmem:[%s17087_s11 + $0x40] sm:$0xff] }
 0x254   : > { %14742 = vmatpush3.bf16.msra.mxu1 %v14741_v38  ;;  %14719 = vmatprep.subr.bf16.mxu0 %v15900_v59  ;;  %v17525_v38 = vld [vmem:[%s17087_s11 + $0x41] sm:$0xff] }
 0x255   : > { %11903 = vmatmul.mubr.f32.gmra.mrb[30].mxu0 %v8834_v22  ;;  %14743 = vmatprep.subr.bf16.mxu1 %v15900_v59  ;;  %v8859_v22 = vld [vmem:[%s17087_s11 + $0x38] sm:$0xff] }
 0x256   : > { %11962 = vmatmul.mubr.f32.gmra.mrb[30].mxu1 %v8836_v35  ;;  %11905 = vmatprep.mubr.msk.f32.mxu0 %vm15901_vm1, %v15902_v11 }
 0x257   : > { %11964 = vmatprep.mubr.msk.f32.mxu1 %vm15901_vm1, %v15902_v11  ;;  %14721 = vmatpush3.bf16.msra.mxu0 %v14720_v44  ;;  %v8952_v44 = vld [vmem:[%s21073_s1 + $0x3e8] sm:$0xff] }
 0x258   : > { %14745 = vmatpush3.bf16.msra.mxu1 %v14744_v39  ;;  %14722 = vmatprep.subr.bf16.mxu0 %v15900_v59  ;;  %v8861_v39 = vld [vmem:[%s17087_s11 + $0x48] sm:$0xff] }
 0x259   : > { %11906 = vmatmul.mubr.f32.gmra.mrb[32].mxu0 %v8835_v37  ;;  %14746 = vmatprep.subr.bf16.mxu1 %v15900_v59  ;;  %v8950_v37 = vld [vmem:[%s21073_s1 + $0x3d8] sm:$0xff] }
 0x25a   : > { %11965 = vmatmul.mubr.f32.gmra.mrb[32].mxu1 %v8837_v51  ;;  %11908 = vmatprep.mubr.msk.f32.mxu0 %vm15901_vm1, %v15902_v11  ;;  %v14789_v18 = vpack.c.bf16 %v8950_v37, %v8949_v36  ;;  %v8929_v51 = vld [vmem:[%s21073_s1 + $0x378] sm:$0xff] }
 0x25b   : > { %11967 = vmatprep.mubr.msk.f32.mxu1 %vm15901_vm1, %v15902_v11  ;;  %14724 = vmatpush3.bf16.msra.mxu0 %v14723_v45  ;;  %v8953_v45 = vld [vmem:[%s21073_s1 + $0x3f0] sm:$0xff]  ;;  %v14771_v56 = vpack.c.bf16 %v8929_v51, %v8928_v41  ;;  %v8961_v36 = vld [vmem:[%s17087_s11 + $0x5b] sm:$0xff] }
 0x25c   : > { %14748 = vmatpush3.bf16.msra.mxu1 %v14747_v52  ;;  %14749 = vmatprep.subr.bf16.mxu0 %v15900_v59  ;;  %v8954_v52 = vld [vmem:[%s21073_s1 + $0x3f8] sm:$0xff] }
 0x25d   : > { %11909 = vmatmul.mubr.f32.gmra.mrb[34].mxu0 %v8836_v35  ;;  %14773 = vmatprep.subr.bf16.mxu1 %v15900_v59  ;;  %v8951_v35 = vld [vmem:[%s21073_s1 + $0x3e0] sm:$0xff]  ;;  %v14795_v47 = vpack.c.bf16 %v8954_v52, %v8953_v45 }
 0x25e   : > { %11968 = vmatmul.mubr.f32.gmra.mrb[34].mxu1 %v8838_v23  ;;  %12002 = vmatprep.mubr.msk.f32.mxu0 %vm15901_vm1, %v15902_v11  ;;  %v14792_v49 = vpack.c.bf16 %v8952_v44, %v8951_v35  ;;  %v8862_v23 = vld [vmem:[%s17087_s11 + $0x50] sm:$0xff]  ;;  %v8957_v37 = vld [vmem:[%s17087_s11 + $0x3b] sm:$0xff] }
 0x25f   : > { %12061 = vmatprep.mubr.msk.f32.mxu1 %vm15901_vm1, %v15902_v11 }
 0x261   : > { %12003 = vmatmul.mubr.f32.vlgmr.msra.gmra.mrb[36].mxu0 %v8855_v58  ;;  %v17582_v58 = vld [vmem:[%s17087_s11 + $0x59] sm:$0xff] }
 0x262   : > { %12062 = vmatmul.mubr.f32.vlgmr.msra.gmra.mrb[36].mxu1 %v8880_v60  ;;  %14751 = vmatpush3.bf16.msra.mxu0 %v14750_v50  ;;  %v8964_v50 = vld [vmem:[%s21073_s1 + $0x400] sm:$0xff]  ;;  %v8965_v60 = vld [vmem:[%s21073_s1 + $0x408] sm:$0xff] }
 0x263   : > { %12005 = vmatprep.mubr.msk.f32.mxu0 %vm15901_vm1, %v15902_v11  ;;  %12064 = vmatprep.mubr.msk.f32.mxu1 %vm15901_vm1, %v15902_v11  ;;  %v14798_v61 = vpack.c.bf16 %v8965_v60, %v8964_v50 }
 0x264   : > { %14752 = vmatprep.subr.bf16.mxu0 %v15900_v59  ;;  %14775 = vmatpush3.bf16.msra.mxu1 %v14774_v62  ;;  %v8966_v62 = vld [vmem:[%s21073_s1 + $0x410] sm:$0xff] }
 0x265   : > { %12006 = vmatmul.mubr.f32.gmra.mrb[38].mxu0 %v8856_v55  ;;  %14776 = vmatprep.subr.bf16.mxu1 %v15900_v59  ;;  %v14801_v63 = vpack.c.bf16 %v8967_v30, %v8966_v62  ;;  %v8931_v55 = vld [vmem:[%s17087_s11 + $0x32] sm:$0xff] }
 0x266   : > { %12065 = vmatmul.mubr.f32.gmra.mrb[38].mxu1 %v8881_v4  ;;  %14754 = vmatpush3.bf16.msra.mxu0 %v14753_v3  ;;  %v8968_v3 = vld [vmem:[%s21073_s1 + $0x420] sm:$0xff]  ;;  %v8969_v4 = vld [vmem:[%s21073_s1 + $0x428] sm:$0xff] }
 0x267   : > { %12008 = vmatprep.mubr.msk.f32.mxu0 %vm15901_vm1, %v15902_v11  ;;  %12067 = vmatprep.mubr.msk.f32.mxu1 %vm15901_vm1, %v15902_v11  ;;  %v14804_v13 = vpack.c.bf16 %v8969_v4, %v8968_v3 }
 0x268   : > { %14755 = vmatprep.subr.bf16.mxu0 %v15900_v59  ;;  %14778 = vmatpush3.bf16.msra.mxu1 %v14777_v0  ;;  %v8970_v0 = vld [vmem:[%s21073_s1 + $0x430] sm:$0xff] }
 0x269   : > { %12009 = vmatmul.mubr.f32.gmra.mrb[40].mxu0 %v8857_v2  ;;  %14779 = vmatprep.subr.bf16.mxu1 %v15900_v59  ;;  %v14807_v2 = vpack.c.bf16 %v8971_v8, %v8970_v0 }
 0x26a   : > { %12068 = vmatmul.mubr.f32.gmra.mrb[40].mxu1 %v17456_v7  ;;  %14757 = vmatpush3.bf16.msra.mxu0 %v14756_v14  ;;  %v8972_v14 = vld [vmem:[%s21073_s1 + $0x440] sm:$0xff] }
 0x26b   : > { %12011 = vmatprep.mubr.msk.f32.mxu0 %vm15901_vm1, %v15902_v11  ;;  %12070 = vmatprep.mubr.msk.f32.mxu1 %vm15901_vm1, %v15902_v11 }
 0x26c   : > { %14781 = vmatpush3.bf16.msra.mxu1 %v14780_v15  ;;  %14758 = vmatprep.subr.bf16.mxu0 %v15900_v59  ;;  %v8934_v15 = vld [vmem:[%s17087_s11 + $0x4a] sm:$0xff] }
 0x26d   : > { %12012 = vmatmul.mubr.f32.gmra.mrb[42].mxu0 %v8858_v21  ;;  %14782 = vmatprep.subr.bf16.mxu1 %v15900_v59  ;;  %v14813_v21 = vpack.c.bf16 %v8975_v9, %v8974_v19 }
 0x26e   : > { %12071 = vmatmul.mubr.f32.gmra.mrb[42].mxu1 %v17479_v24  ;;  %12014 = vmatprep.mubr.msk.f32.mxu0 %vm15901_vm1, %v15902_v11 }
 0x26f   : > { %12073 = vmatprep.mubr.msk.f32.mxu1 %vm15901_vm1, %v15902_v11  ;;  %14760 = vmatpush3.bf16.msra.mxu0 %v14759_v25  ;;  %v8977_v25 = vld [vmem:[%s21073_s1 + $0x468] sm:$0xff] }
 0x270   : > { %14784 = vmatpush3.bf16.msra.mxu1 %v14783_v16  ;;  %14761 = vmatprep.subr.bf16.mxu0 %v15900_v59  ;;  %v8936_v16 = vld [vmem:[%s17087_s11 + $0x5a] sm:$0xff] }
 0x271   : > { %12015 = vmatmul.mubr.f32.gmra.mrb[44].mxu0 %v8859_v22  ;;  %14785 = vmatprep.subr.bf16.mxu1 %v15900_v59  ;;  %v8937_v22 = vld [vmem:[%s17087_s11 + $0x62] sm:$0xff] }
 0x272   : > { %12074 = vmatmul.mubr.f32.gmra.mrb[44].mxu1 %v17502_v31  ;;  %12017 = vmatprep.mubr.msk.f32.mxu0 %vm15901_vm1, %v15902_v11 }
 0x273   : > { %12076 = vmatprep.mubr.msk.f32.mxu1 %vm15901_vm1, %v15902_v11  ;;  %14763 = vmatpush3.bf16.msra.mxu0 %v14762_v32  ;;  %v8913_v32 = vld [vmem:[%s17087_s11 + $0x69] sm:$0xff] }
 0x274   : > { %14787 = vmatpush3.bf16.msra.mxu1 %v14786_v33  ;;  %14764 = vmatprep.subr.bf16.mxu0 %v15900_v59  ;;  %v8938_v33 = vld [vmem:[%s17087_s11 + $0x6a] sm:$0xff] }
 0x275   : > { %12018 = vmatmul.mubr.f32.gmra.mrb[46].mxu0 %v8860_v5  ;;  %14788 = vmatprep.subr.bf16.mxu1 %v15900_v59  ;;  %v8962_v5 = vld [vmem:[%s17087_s11 + $0x63] sm:$0xff] }
 0x276   : > { %12077 = vmatmul.mubr.f32.gmra.mrb[46].mxu1 %v17525_v38  ;;  %12020 = vmatprep.mubr.msk.f32.mxu0 %vm15901_vm1, %v15902_v11 }
 0x277   : > { %12079 = vmatprep.mubr.msk.f32.mxu1 %vm15901_vm1, %v15902_v11  ;;  %14766 = vmatpush3.bf16.msra.mxu0 %v14765_v40  ;;  %v8963_v40 = vld [vmem:[%s17087_s11 + $0x6b] sm:$0xff] }
 0x278   : > { %14790 = vmatpush3.bf16.msra.mxu1 %v14789_v18  ;;  %14767 = vmatprep.subr.bf16.mxu0 %v15900_v59  ;;  %v8959_v18 = vld [vmem:[%s17087_s11 + $0x4b] sm:$0xff] }
 0x279   : > { %12021 = vmatmul.mubr.f32.gmra.mrb[48].mxu0 %v8861_v39  ;;  %14791 = vmatprep.subr.bf16.mxu1 %v15900_v59 }
 0x27a   : > { %12080 = vmatmul.mubr.f32.gmra.mrb[48].mxu1 %v17548_v46  ;;  %12023 = vmatprep.mubr.msk.f32.mxu0 %vm15901_vm1, %v15902_v11 }
 0x27b   : > { %12082 = vmatprep.mubr.msk.f32.mxu1 %vm15901_vm1, %v15902_v11  ;;  %14769 = vmatpush3.bf16.msra.mxu0 %v14768_v48 }
 0x27c   : > { %14793 = vmatpush3.bf16.msra.mxu1 %v14792_v49  ;;  %14770 = vmatprep.subr.bf16.mxu0 %v15900_v59 }
 0x27d   : > { %12024 = vmatmul.mubr.f32.gmra.mrb[50].mxu0 %v8862_v23  ;;  %14794 = vmatprep.subr.bf16.mxu1 %v15900_v59 }
 0x27e   : > { %12083 = vmatmul.mubr.f32.gmra.mrb[50].mxu1 %v17571_v54  ;;  %12026 = vmatprep.mubr.msk.f32.mxu0 %vm15901_vm1, %v15902_v11 }
 0x27f   : > { %12085 = vmatprep.mubr.msk.f32.mxu1 %vm15901_vm1, %v15902_v11  ;;  %14772 = vmatpush3.bf16.msra.mxu0 %v14771_v56 }
 0x280   : > { %14796 = vmatpush3.bf16.msra.mxu1 %v14795_v47  ;;  %14797 = vmatprep.subr.bf16.mxu0 %v15900_v59 }
 0x281   : > { %12027 = vmatmul.mubr.f32.gmra.mrb[52].mxu0 %v8863_v57  ;;  %15701 = vmatprep.subr.bf16.mxu1 %v15900_v59 }
 0x282   : > { %12086 = vmatmul.mubr.f32.gmra.mrb[52].mxu1 %v17582_v58  ;;  %12120 = vmatprep.mubr.msk.f32.mxu0 %vm15901_vm1, %v15902_v11 }
 0x283   : > { %12179 = vmatprep.mubr.msk.f32.mxu1 %vm15901_vm1, %v15902_v11 }
 0x285   : > { %12121 = vmatmul.mubr.f32.vlgmr.msra.gmra.mrb[54].mxu0 %v17456_v7  ;;  %v8973_v7 = vld [vmem:[%s21073_s1 + $0x448] sm:$0xff] }
 0x286   : > { %12180 = vmatmul.mubr.f32.vlgmr.msra.gmra.mrb[54].mxu1 %v8930_v53  ;;  %14799 = vmatpush3.bf16.msra.mxu0 %v14798_v61  ;;  %v14810_v17 = vpack.c.bf16 %v8973_v7, %v8972_v14 }
 0x287   : > { %12123 = vmatprep.mubr.msk.f32.mxu0 %vm15901_vm1, %v15902_v11  ;;  %12182 = vmatprep.mubr.msk.f32.mxu1 %vm15901_vm1, %v15902_v11 }
 0x288   : > { %15709 = vmatpush3.bf16.msra.mxu1 %v14798_v61  ;;  %14800 = vmatprep.subr.bf16.mxu0 %v15900_v59 }
 0x289   : > { %12124 = vmatmul.mubr.f32.gmra.mrb[56].mxu0 %v17479_v24  ;;  %15702 = vmatprep.subr.bf16.mxu1 %v15900_v59  ;;  %v8976_v24 = vld [vmem:[%s21073_s1 + $0x460] sm:$0xff] }
 0x28a   : > { %12183 = vmatmul.mubr.f32.gmra.mrb[56].mxu1 %v8931_v55  ;;  %14802 = vmatpush3.bf16.msra.mxu0 %v14801_v63  ;;  %v14816_v12 = vpack.c.bf16 %v8977_v25, %v8976_v24 }
 0x28b   : > { %12126 = vmatprep.mubr.msk.f32.mxu0 %vm15901_vm1, %v15902_v11  ;;  %12185 = vmatprep.mubr.msk.f32.mxu1 %vm15901_vm1, %v15902_v11 }
 0x28c   : > { %15710 = vmatpush3.bf16.msra.mxu1 %v14801_v63  ;;  %14803 = vmatprep.subr.bf16.mxu0 %v15900_v59 }
 0x28d   : > { %12127 = vmatmul.mubr.f32.gmra.mrb[58].mxu0 %v17502_v31  ;;  %15703 = vmatprep.subr.bf16.mxu1 %v15900_v59  ;;  %v14819_v31 = vpack.c.bf16 %v8979_v27, %v8978_v26 }
 0x28e   : > { %12186 = vmatmul.mubr.f32.gmra.mrb[58].mxu1 %v8932_v6  ;;  %14805 = vmatpush3.bf16.msra.mxu0 %v14804_v13 }
 0x28f   : > { %12129 = vmatprep.mubr.msk.f32.mxu0 %vm15901_vm1, %v15902_v11  ;;  %12188 = vmatprep.mubr.msk.f32.mxu1 %vm15901_vm1, %v15902_v11 }
 0x290   : > { %15711 = vmatpush3.bf16.msra.mxu1 %v14804_v13  ;;  %14806 = vmatprep.subr.bf16.mxu0 %v15900_v59 }
 0x291   : > { %12130 = vmatmul.mubr.f32.gmra.mrb[60].mxu0 %v17525_v38  ;;  %15704 = vmatprep.subr.bf16.mxu1 %v15900_v59  ;;  %v8958_v38 = vld [vmem:[%s17087_s11 + $0x43] sm:$0xff] }
 0x292   : > { %12189 = vmatmul.mubr.f32.gmra.mrb[60].mxu1 %v8933_v10  ;;  %12132 = vmatprep.mubr.msk.f32.mxu0 %vm15901_vm1, %v15902_v11 }
 0x293   : > { %12191 = vmatprep.mubr.msk.f32.mxu1 %vm15901_vm1, %v15902_v11  ;;  %14808 = vmatpush3.bf16.msra.mxu0 %v14807_v2 }
 0x294   : > { %15712 = vmatpush3.bf16.msra.mxu1 %v14807_v2  ;;  %14809 = vmatprep.subr.bf16.mxu0 %v15900_v59 }
 0x295   : > { %12133 = vmatmul.mubr.f32.gmra.mrb[62].mxu0 %v17548_v46  ;;  %15705 = vmatprep.subr.bf16.mxu1 %v15900_v59 }
 0x296   : > { %12192 = vmatmul.mubr.f32.gmra.mrb[62].mxu1 %v8934_v15  ;;  %12135 = vmatprep.mubr.msk.f32.mxu0 %vm15901_vm1, %v15902_v11 }
 0x297   : > { %12194 = vmatprep.mubr.msk.f32.mxu1 %vm15901_vm1, %v15902_v11  ;;  %14811 = vmatpush3.bf16.msra.mxu0 %v14810_v17 }
 0x298   : > { %15713 = vmatpush3.bf16.msra.mxu1 %v14810_v17  ;;  %14812 = vmatprep.subr.bf16.mxu0 %v15900_v59 }
 0x299   : > { %12136 = vmatmul.mubr.f32.gmra.mrb[64].mxu0 %v17571_v54  ;;  %15706 = vmatprep.subr.bf16.mxu1 %v15900_v59 }
 0x29a   : > { %12195 = vmatmul.mubr.f32.gmra.mrb[64].mxu1 %v8935_v20  ;;  %12138 = vmatprep.mubr.msk.f32.mxu0 %vm15901_vm1, %v15902_v11 }
 0x29b   : > { %12197 = vmatprep.mubr.msk.f32.mxu1 %vm15901_vm1, %v15902_v11  ;;  %14814 = vmatpush3.bf16.msra.mxu0 %v14813_v21 }
 0x29c   : > { %15714 = vmatpush3.bf16.msra.mxu1 %v14813_v21  ;;  %14815 = vmatprep.subr.bf16.mxu0 %v15900_v59 }
 0x29d   : > { %12139 = vmatmul.mubr.f32.gmra.mrb[66].mxu0 %v17582_v58  ;;  %15707 = vmatprep.subr.bf16.mxu1 %v15900_v59 }
 0x29e   : > { %12198 = vmatmul.mubr.f32.gmra.mrb[66].mxu1 %v8936_v16  ;;  %12141 = vmatprep.mubr.msk.f32.mxu0 %vm15901_vm1, %v15902_v11 }
 0x29f   : > { %12200 = vmatprep.mubr.msk.f32.mxu1 %vm15901_vm1, %v15902_v11  ;;  %14817 = vmatpush3.bf16.msra.mxu0 %v14816_v12 }
 0x2a0   : > { %15715 = vmatpush3.bf16.msra.mxu1 %v14816_v12  ;;  %14818 = vmatprep.subr.bf16.mxu0 %v15900_v59 }
 0x2a1   : > { %12142 = vmatmul.mubr.f32.gmra.mrb[68].mxu0 %v8912_v29  ;;  %15708 = vmatprep.subr.bf16.mxu1 %v15900_v59  ;;  %v8955_v59 = vld [vmem:[%s17087_s11 + $0x2b] sm:$0xff] }
 0x2a2   : > { %12201 = vmatmul.mubr.f32.gmra.mrb[68].mxu1 %v8937_v22  ;;  %12144 = vmatprep.mubr.msk.f32.mxu0 %vm15901_vm1, %v15902_v11 }
 0x2a3   : > { %12203 = vmatprep.mubr.msk.f32.mxu1 %vm15901_vm1, %v15902_v11  ;;  %14820 = vmatpush3.bf16.msra.mxu0 %v14819_v31 }
 0x2a4   : > { %15716 = vmatpush3.bf16.msra.mxu1 %v14819_v31 }
 0x2a5   : > { %12145 = vmatmul.mubr.f32.gmra.mrb[70].mxu0 %v8913_v32 }
 0x2a6   : > { %12204 = vmatmul.mubr.f32.gmra.mrb[70].mxu1 %v8938_v33  ;;  %12238 = vmatprep.mubr.msk.f32.mxu0 %vm15901_vm1, %v15902_v11 }
 0x2a7   : > { %12253 = vmatprep.mubr.msk.f32.mxu1 %vm15901_vm1, %v15902_v11 }
 0x2a9   : > { %12239 = vmatmul.mubr.f32.vlgmr.msra.gmra.mrb[72].mxu0 %v8955_v59 }
 0x2aa   : > { %12254 = vmatmul.mubr.f32.vlgmr.msra.gmra.mrb[72].mxu1 %v8960_v28  ;;  %12241 = vmatprep.mubr.msk.f32.mxu0 %vm15901_vm1, %v15902_v11 }
 0x2ab   : > { %12256 = vmatprep.mubr.msk.f32.mxu1 %vm15901_vm1, %v15902_v11 }
 0x2ad   : > { %12242 = vmatmul.mubr.f32.gmra.mrb[74].mxu0 %v8956_v34 }
 0x2ae   : > { %12257 = vmatmul.mubr.f32.gmra.mrb[74].mxu1 %v8961_v36  ;;  %12244 = vmatprep.mubr.msk.f32.mxu0 %vm15901_vm1, %v15902_v11 }
 0x2af   : > { %12259 = vmatprep.mubr.msk.f32.mxu1 %vm15901_vm1, %v15902_v11 }
 0x2b1   : > { %12245 = vmatmul.mubr.f32.gmra.mrb[76].mxu0 %v8957_v37 }
 0x2b2   : > { %12260 = vmatmul.mubr.f32.gmra.mrb[76].mxu1 %v8962_v5  ;;  %12247 = vmatprep.mubr.msk.f32.mxu0 %vm15901_vm1, %v15902_v11 }
 0x2b3   : > { %12262 = vmatprep.mubr.msk.f32.mxu1 %vm15901_vm1, %v15902_v11 }
 0x2b5   : > { %12248 = vmatmul.mubr.f32.gmra.mrb[78].mxu0 %v8958_v38 }
 0x2b6   : > { %12263 = vmatmul.mubr.f32.gmra.mrb[78].mxu1 %v8963_v40  ;;  %12250 = vmatprep.mubr.msk.f32.mxu0 %vm15901_vm1, %v15902_v11 }
 0x2b9   : > { %12251 = vmatmul.mubr.f32.gmra.mrb[80].mxu0 %v8959_v18 }
 0x2ec   : > { %v1684_v42 = vpop.f32.mrb[0].mxu0 }
 0x2ed   : > { %v11768_v43 = vpop.f32.mrb[1].mxu0  ;;  %v1794_v35 = vpop.f32.mrb[0].mxu1 }
 0x2ee   : > { %v1795_v44 = vadd.f32 %v1794_v35, %v1684_v42  ;;  %v11827_v39 = vpop.f32.mrb[1].mxu1 }
 0x2f0   : > { %v1689_v46 = vpop.f32.mrb[2].mxu0 }
 0x2f1   : > { %v11771_v48 = vpop.f32.mrb[3].mxu0  ;;  %v1799_v49 = vpop.f32.mrb[2].mxu1 }
 0x2f2   : > { %v1800_v41 = vadd.f32 %v1799_v49, %v1689_v46  ;;  %v11830_v51 = vpop.f32.mrb[3].mxu1 }
 0x2f4   : > { %v1694_v45 = vpop.f32.mrb[4].mxu0 }
 0x2f5   : > { %v11774_v52 = vpop.f32.mrb[5].mxu0  ;;  %v1804_v23 = vpop.f32.mrb[4].mxu1 }
 0x2f6   : > { %v1805_v54 = vadd.f32 %v1804_v23, %v1694_v45  ;;  %v11833_v56 = vpop.f32.mrb[5].mxu1 }
 0x2f8   : > { %v1699_v47 = vpop.f32.mrb[6].mxu0 }
 0x2f9   : > { %v11777_v57 = vpop.f32.mrb[7].mxu0  ;;  %v1809_v11 = vpop.f32.mrb[6].mxu1 }
 0x2fa   : > { %v1810_v58 = vadd.f32 %v1809_v11, %v1699_v47  ;;  %v11836_v50 = vpop.f32.mrb[7].mxu1 }
 0x2fc   : > { %v1704_v60 = vpop.f32.mrb[8].mxu0 }
 0x2fd   : > { %v11780_v61 = vpop.f32.mrb[9].mxu0  ;;  %v1814_v53 = vpop.f32.mrb[8].mxu1 }
 0x2fe   : > { %v1815_v62 = vadd.f32 %v1814_v53, %v1704_v60  ;;  %v11839_v30 = vpop.f32.mrb[9].mxu1 }
 0x300   : > { %v1709_v63 = vpop.f32.mrb[10].mxu0 }
 0x301   : > { %v11783_v55 = vpop.f32.mrb[11].mxu0  ;;  %v1819_v3 = vpop.f32.mrb[10].mxu1 }
 0x302   : > { %v1820_v4 = vadd.f32 %v1819_v3, %v1709_v63  ;;  %v11842_v13 = vpop.f32.mrb[11].mxu1 }
 0x304   : > { %v1714_v6 = vpop.f32.mrb[12].mxu0 }
 0x305   : > { %v11786_v0 = vpop.f32.mrb[13].mxu0  ;;  %v1824_v8 = vpop.f32.mrb[12].mxu1 }
 0x306   : > { %v1825_v10 = vadd.f32 %v1824_v8, %v1714_v6  ;;  %v11845_v2 = vpop.f32.mrb[13].mxu1 }
 0x308   : > { %v1719_v14 = vpop.f32.mrb[14].mxu0 }
 0x309   : > { %v11789_v7 = vpop.f32.mrb[15].mxu0  ;;  %v1829_v15 = vpop.f32.mrb[14].mxu1 }
 0x30a   : > { %v1830_v17 = vadd.f32 %v1829_v15, %v1719_v14  ;;  %v11848_v19 = vpop.f32.mrb[15].mxu1 }
 0x30c   : > { %v1724_v9 = vpop.f32.mrb[16].mxu0 }
 0x30d   : > { %v11792_v20 = vpop.f32.mrb[17].mxu0  ;;  %v1834_v21 = vpop.f32.mrb[16].mxu1 }
 0x30e   : > { %v1835_v24 = vadd.f32 %v1834_v21, %v1724_v9  ;;  %v11851_v25 = vpop.f32.mrb[17].mxu1 }
 0x310   : > { %v1932_v16 = vpop.f32.mrb[18].mxu0 }
 0x311   : > { %v1976_v12 = vadd.f32 %v1932_v16, %v1795_v44  ;;  %v11886_v26 = vpop.f32.mrb[19].mxu0  ;;  %v2079_v27 = vpop.f32.mrb[18].mxu1 }
 0x312   : > { %v11945_v29 = vpop.f32.mrb[19].mxu1 }
 0x313   : > { %v2123_v22 = vadd.f32 %v2079_v27, %v1976_v12 }
 0x314   : > { %v1937_v31 = vpop.f32.mrb[20].mxu0 }
 0x315   : > { %v1977_v32 = vadd.f32 %v1937_v31, %v1800_v41  ;;  %v11889_v33 = vpop.f32.mrb[21].mxu0  ;;  %v2084_v59 = vpop.f32.mrb[20].mxu1 }
 0x316   : > { %v11948_v28 = vpop.f32.mrb[21].mxu1 }
 0x317   : > { %v2124_v34 = vadd.f32 %v2084_v59, %v1977_v32 }
 0x318   : > { %v1942_v36 = vpop.f32.mrb[22].mxu0 }
 0x319   : > { %v1978_v37 = vadd.f32 %v1942_v36, %v1805_v54  ;;  %v11892_v5 = vpop.f32.mrb[23].mxu0  ;;  %v2089_v38 = vpop.f32.mrb[22].mxu1 }
 0x31a   : > { %v11951_v40 = vpop.f32.mrb[23].mxu1 }
 0x31b   : > { %v2125_v18 = vadd.f32 %v2089_v38, %v1978_v37 }
 0x31c   : > { %v1947_v42 = vpop.f32.mrb[24].mxu0 }
 0x31d   : > { %v1979_v43 = vadd.f32 %v1947_v42, %v1810_v58  ;;  %v11895_v35 = vpop.f32.mrb[25].mxu0  ;;  %v2094_v44 = vpop.f32.mrb[24].mxu1 }
 0x31e   : > { %v11954_v39 = vpop.f32.mrb[25].mxu1 }
 0x31f   : > { %v2126_v46 = vadd.f32 %v2094_v44, %v1979_v43 }
 0x320   : > { %v1952_v48 = vpop.f32.mrb[26].mxu0 }
 0x321   : > { %v1980_v49 = vadd.f32 %v1952_v48, %v1815_v62  ;;  %v11898_v51 = vpop.f32.mrb[27].mxu0  ;;  %v2099_v41 = vpop.f32.mrb[26].mxu1 }
 0x322   : > { %v11957_v45 = vpop.f32.mrb[27].mxu1 }
 0x323   : > { %v2127_v52 = vadd.f32 %v2099_v41, %v1980_v49 }
 0x324   : > { %v1957_v23 = vpop.f32.mrb[28].mxu0 }
 0x325   : > { %v1981_v56 = vadd.f32 %v1957_v23, %v1820_v4  ;;  %v11901_v47 = vpop.f32.mrb[29].mxu0  ;;  %v2104_v54 = vpop.f32.mrb[28].mxu1 }
 0x326   : > { %v11960_v57 = vpop.f32.mrb[29].mxu1 }
 0x327   : > { %v2128_v11 = vadd.f32 %v2104_v54, %v1981_v56 }
 0x328   : > { %v1962_v50 = vpop.f32.mrb[30].mxu0 }
 0x329   : > { %v1982_v60 = vadd.f32 %v1962_v50, %v1825_v10  ;;  %v11904_v61 = vpop.f32.mrb[31].mxu0  ;;  %v2109_v58 = vpop.f32.mrb[30].mxu1 }
 0x32a   : > { %v11963_v53 = vpop.f32.mrb[31].mxu1 }
 0x32b   : > { %v2129_v30 = vadd.f32 %v2109_v58, %v1982_v60 }
 0x32c   : > { %v1967_v63 = vpop.f32.mrb[32].mxu0 }
 0x32d   : > { %v1983_v55 = vadd.f32 %v1967_v63, %v1830_v17  ;;  %v11907_v3 = vpop.f32.mrb[33].mxu0  ;;  %v2114_v62 = vpop.f32.mrb[32].mxu1 }
 0x32e   : > { %v11966_v13 = vpop.f32.mrb[33].mxu1 }
 0x32f   : > { %v2130_v6 = vadd.f32 %v2114_v62, %v1983_v55 }
 0x330   : > { %v1972_v0 = vpop.f32.mrb[34].mxu0 }
 0x331   : > { %v1984_v8 = vadd.f32 %v1972_v0, %v1835_v24  ;;  %v11910_v2 = vpop.f32.mrb[35].mxu0  ;;  %v2119_v4 = vpop.f32.mrb[34].mxu1 }
 0x332   : > { %v11969_v14 = vpop.f32.mrb[35].mxu1 }
 0x333   : > { %v2131_v7 = vadd.f32 %v2119_v4, %v1984_v8 }
 0x334   : > { %v2226_v15 = vpop.f32.mrb[36].mxu0 }
 0x335   : > { %v2270_v19 = vadd.f32 %v2226_v15, %v2123_v22  ;;  %v12004_v9 = vpop.f32.mrb[37].mxu0  ;;  %v2373_v10 = vpop.f32.mrb[36].mxu1 }
 0x336   : > { %v12063_v20 = vpop.f32.mrb[37].mxu1 }
 0x337   : > { %v2417_v21 = vadd.f32 %v2373_v10, %v2270_v19 }
 0x338   : > { %v2231_v25 = vpop.f32.mrb[38].mxu0 }
 0x339   : > { %v2271_v16 = vadd.f32 %v2231_v25, %v2124_v34  ;;  %v12007_v12 = vpop.f32.mrb[39].mxu0  ;;  %v2378_v17 = vpop.f32.mrb[38].mxu1 }
 0x33a   : > { %v12066_v26 = vpop.f32.mrb[39].mxu1 }
 0x33b   : > { %v2418_v27 = vadd.f32 %v2378_v17, %v2271_v16 }
 0x33c   : > { %v2236_v29 = vpop.f32.mrb[40].mxu0 }
 0x33d   : > { %v2272_v31 = vadd.f32 %v2236_v29, %v2125_v18  ;;  %v12010_v32 = vpop.f32.mrb[41].mxu0  ;;  %v2383_v24 = vpop.f32.mrb[40].mxu1 }
 0x33e   : > { %v12069_v33 = vpop.f32.mrb[41].mxu1 }
 0x33f   : > { %v2419_v59 = vadd.f32 %v2383_v24, %v2272_v31 }
 0x340   : > { %v2241_v28 = vpop.f32.mrb[42].mxu0 }
 0x341   : > { %v2273_v36 = vadd.f32 %v2241_v28, %v2126_v46  ;;  %v12013_v37 = vpop.f32.mrb[43].mxu0  ;;  %v2388_v22 = vpop.f32.mrb[42].mxu1 }
 0x342   : > { %v12072_v5 = vpop.f32.mrb[43].mxu1 }
 0x343   : > { %v2420_v38 = vadd.f32 %v2388_v22, %v2273_v36 }
 0x344   : > { %v2246_v40 = vpop.f32.mrb[44].mxu0 }
 0x345   : > { %v2274_v42 = vadd.f32 %v2246_v40, %v2127_v52  ;;  %v12016_v43 = vpop.f32.mrb[45].mxu0  ;;  %v2393_v34 = vpop.f32.mrb[44].mxu1 }
 0x346   : > { %v12075_v35 = vpop.f32.mrb[45].mxu1 }
 0x347   : > { %v2421_v44 = vadd.f32 %v2393_v34, %v2274_v42 }
 0x348   : > { %v2251_v39 = vpop.f32.mrb[46].mxu0 }
 0x349   : > { %v2275_v48 = vadd.f32 %v2251_v39, %v2128_v11  ;;  %v12019_v49 = vpop.f32.mrb[47].mxu0  ;;  %v2398_v18 = vpop.f32.mrb[46].mxu1 }
 0x34a   : > { %v12078_v51 = vpop.f32.mrb[47].mxu1 }
 0x34b   : > { %v2422_v41 = vadd.f32 %v2398_v18, %v2275_v48 }
 0x34c   : > { %v2256_v45 = vpop.f32.mrb[48].mxu0 }
 0x34d   : > { %v2276_v23 = vadd.f32 %v2256_v45, %v2129_v30  ;;  %v12022_v56 = vpop.f32.mrb[49].mxu0  ;;  %v2403_v46 = vpop.f32.mrb[48].mxu1 }
 0x34e   : > { %v12081_v47 = vpop.f32.mrb[49].mxu1 }
 0x34f   : > { %v2423_v54 = vadd.f32 %v2403_v46, %v2276_v23 }
 0x350   : > { %v2261_v57 = vpop.f32.mrb[50].mxu0 }
 0x351   : > { %v2277_v50 = vadd.f32 %v2261_v57, %v2130_v6  ;;  %v12025_v60 = vpop.f32.mrb[51].mxu0  ;;  %v2408_v52 = vpop.f32.mrb[50].mxu1 }
 0x352   : > { %v12084_v61 = vpop.f32.mrb[51].mxu1 }
 0x353   : > { %v2424_v58 = vadd.f32 %v2408_v52, %v2277_v50 }
 0x354   : > { %v2266_v53 = vpop.f32.mrb[52].mxu0 }
 0x355   : > { %v2278_v63 = vadd.f32 %v2266_v53, %v2131_v7  ;;  %v12028_v55 = vpop.f32.mrb[53].mxu0  ;;  %v2413_v11 = vpop.f32.mrb[52].mxu1 }
 0x356   : > { %v12087_v3 = vpop.f32.mrb[53].mxu1 }
 0x357   : > { %v2425_v62 = vadd.f32 %v2413_v11, %v2278_v63  ;;  %v2883_v63 = vld [vmem:[%s17740_s28] sm:$0xff] }
 0x358   : > { %v2520_v13 = vpop.f32.mrb[54].mxu0 }
 0x359   : > { %v2564_v0 = vadd.f32 %v2520_v13, %v2417_v21  ;;  %v12122_v8 = vpop.f32.mrb[55].mxu0  ;;  %v2667_v30 = vpop.f32.mrb[54].mxu1 }
 0x35a   : > { %v12181_v2 = vpop.f32.mrb[55].mxu1 }
 0x35b   : > { %v2711_v4 = vadd.f32 %v2667_v30, %v2564_v0 }
 0x35c   : > { %v2525_v14 = vpop.f32.mrb[56].mxu0 }
 0x35d   : > { %v2565_v15 = vadd.f32 %v2525_v14, %v2418_v27  ;;  %v12125_v19 = vpop.f32.mrb[57].mxu0  ;;  %v2672_v6 = vpop.f32.mrb[56].mxu1 }
 0x35e   : > { %v12184_v9 = vpop.f32.mrb[57].mxu1 }
 0x35f   : > { %v2712_v10 = vadd.f32 %v2672_v6, %v2565_v15 }
 0x360   : > { %v2530_v20 = vpop.f32.mrb[58].mxu0 }
 0x361   : > { %v2566_v25 = vadd.f32 %v2530_v20, %v2419_v59  ;;  %v12128_v16 = vpop.f32.mrb[59].mxu0  ;;  %v2677_v7 = vpop.f32.mrb[58].mxu1  ;;  %v2889_v20 = vld [vmem:[%s17740_s28 + $0x30] sm:$0xff] }
 0x362   : > { %v12187_v12 = vpop.f32.mrb[59].mxu1 }
 0x363   : > { %v17730_v17 = vadd.f32 %v2677_v7, %v2566_v25 }
 0x364   : > { %v2535_v26 = vpop.f32.mrb[60].mxu0 }
 0x365   : > { %v2567_v29 = vadd.f32 %v2535_v26, %v2420_v38  ;;  %v12131_v21 = vpop.f32.mrb[61].mxu0  ;;  %v2682_v31 = vpop.f32.mrb[60].mxu1 }
 0x366   : > { %v12190_v32 = vpop.f32.mrb[61].mxu1  ;;  %v2885_v21 = vld [vmem:[%s17740_s28 + $0x10] sm:$0xff] }
 0x367   : > { %v17732_v24 = vadd.f32 %v2682_v31, %v2567_v29 }
 0x368   : > { %v2540_v33 = vpop.f32.mrb[62].mxu0 }
 0x369   : > { %v2568_v27 = vadd.f32 %v2540_v33, %v2421_v44  ;;  %v12134_v28 = vpop.f32.mrb[63].mxu0  ;;  %v2687_v36 = vpop.f32.mrb[62].mxu1 }
 0x36a   : > { %v12193_v37 = vpop.f32.mrb[63].mxu1 }
 0x36b   : > { %v17734_v22 = vadd.f32 %v2687_v36, %v2568_v27  ;;  %v2890_v27 = vld [vmem:[%s17740_s28 + $0x38] sm:$0xff] }
 0x36c   : > { %v2545_v59 = vpop.f32.mrb[64].mxu0 }
 0x36d   : > { %v2569_v5 = vadd.f32 %v2545_v59, %v2422_v41  ;;  %v12137_v40 = vpop.f32.mrb[65].mxu0  ;;  %v2692_v42 = vpop.f32.mrb[64].mxu1 }
 0x36e   : > { %v12196_v43 = vpop.f32.mrb[65].mxu1 }
 0x36f   : > { %v2716_v34 = vadd.f32 %v2692_v42, %v2569_v5  ;;  %v2886_v42 = vld [vmem:[%s17740_s28 + $0x18] sm:$0xff] }
 0x370   : > { %v2550_v35 = vpop.f32.mrb[66].mxu0 }
 0x371   : > { %v2570_v38 = vadd.f32 %v2550_v35, %v2423_v54  ;;  %v12140_v39 = vpop.f32.mrb[67].mxu0  ;;  %v2697_v48 = vpop.f32.mrb[66].mxu1 }
 0x372   : > { %v12199_v49 = vpop.f32.mrb[67].mxu1 }
 0x373   : > { %v2717_v18 = vadd.f32 %v2697_v48, %v2570_v38  ;;  %v2891_v38 = vld [vmem:[%s17740_s28 + $0x40] sm:$0xff] }
 0x374   : > { %v2555_v51 = vpop.f32.mrb[68].mxu0 }
 0x375   : > { %v2571_v44 = vadd.f32 %v2555_v51, %v2424_v58  ;;  %v12143_v45 = vpop.f32.mrb[69].mxu0  ;;  %v2702_v23 = vpop.f32.mrb[68].mxu1 }
 0x376   : > { %v12202_v56 = vpop.f32.mrb[69].mxu1 }
 0x377   : > { %v2718_v46 = vadd.f32 %v2702_v23, %v2571_v44  ;;  %v2887_v44 = vld [vmem:[%s17740_s28 + $0x20] sm:$0xff] }
 0x378   : > { %v2560_v47 = vpop.f32.mrb[70].mxu0 }
 0x379   : > { %v2572_v57 = vadd.f32 %v2560_v47, %v2425_v62  ;;  %v12146_v41 = vpop.f32.mrb[71].mxu0  ;;  %v2707_v50 = vpop.f32.mrb[70].mxu1  ;;  %v2888_v62 = vld [vmem:[%s17740_s28 + $0x28] sm:$0xff] }
 0x37a   : > { %v12205_v60 = vpop.f32.mrb[71].mxu1 }
 0x37b   : > { %v2719_v52 = vadd.f32 %v2707_v50, %v2572_v57 }
 0x37c   : > { %v2814_v54 = vpop.f32.mrb[72].mxu0 }
 0x37d   : > { %v2858_v61 = vadd.f32 %v2814_v54, %v2711_v4  ;;  %v2839_v58 = vpop.f32.mrb[72].mxu1  ;;  %v12240_v53 = vpop.f32.mrb[73].mxu0  ;;  %v2884_v4 = vld [vmem:[%s17740_s28 + $0x8] sm:$0xff] }
 0x37e   : > { %v2863_v55 = vadd.f32 %v2839_v58, %v2716_v34  ;;  %v12255_v11 = vpop.f32.mrb[73].mxu1 }
 0x37f   : > { %v2873_v3 = vadd.f32 %v16117_v1, %v2858_v61 }
 0x380   : > { %v2878_v13 = vadd.f32 %v16117_v1, %v2863_v55  ;;  %v2819_v0 = vpop.f32.mrb[74].mxu0 }
 0x381   : > { %v2892_v8 = vmul.f32 %v2883_v63, %v2873_v3  ;;  %v2859_v30 = vadd.f32 %v2819_v0, %v2712_v10  ;;  %v2844_v2 = vpop.f32.mrb[74].mxu1  ;;  %v12243_v14 = vpop.f32.mrb[75].mxu0 }
 0x382   : > { %v2897_v15 = vmul.f32 %v2888_v62, %v2878_v13  ;;  %v2864_v19 = vadd.f32 %v2844_v2, %v2717_v18  ;;  %v12258_v6 = vpop.f32.mrb[75].mxu1 }
 0x383   : > { %8980 = vst [vmem:[%s17748_s29 + $0x18] sm:$0xff] %v2892_v8  ;;  %v2874_v9 = vadd.f32 %v16117_v1, %v2859_v30 }
 0x384   : > { %8985 = vst [vmem:[%s17748_s29 + $0x40] sm:$0xff] %v2897_v15  ;;  %v2879_v10 = vadd.f32 %v16117_v1, %v2864_v19  ;;  %v2824_v25 = vpop.f32.mrb[76].mxu0 }
 0x385   : > { %v2893_v16 = vmul.f32 %v2884_v4, %v2874_v9  ;;  %v2860_v7 = vadd.f32 %v2824_v25, %v17730_v17  ;;  %v2849_v12 = vpop.f32.mrb[76].mxu1  ;;  %v12246_v26 = vpop.f32.mrb[77].mxu0 }
 0x386   : > { %v2898_v29 = vmul.f32 %v2889_v20, %v2879_v10  ;;  %v2865_v31 = vadd.f32 %v2849_v12, %v2718_v46  ;;  %v12261_v32 = vpop.f32.mrb[77].mxu1 }
 0x387   : > { %8981 = vst [vmem:[%s17748_s29 + $0x20] sm:$0xff] %v2893_v16  ;;  %v2875_v33 = vadd.f32 %v16117_v1, %v2860_v7 }
 0x388   : > { %8986 = vst [vmem:[%s17748_s29 + $0x48] sm:$0xff] %v2898_v29  ;;  %v2880_v28 = vadd.f32 %v16117_v1, %v2865_v31  ;;  %v2829_v36 = vpop.f32.mrb[78].mxu0 }
 0x389   : > { %v2894_v37 = vmul.f32 %v2885_v21, %v2875_v33  ;;  %v2861_v17 = vadd.f32 %v2829_v36, %v17732_v24  ;;  %v2854_v59 = vpop.f32.mrb[78].mxu1  ;;  %v12249_v5 = vpop.f32.mrb[79].mxu0 }
 0x38a   : > { %v2899_v40 = vmul.f32 %v2890_v27, %v2880_v28  ;;  %v2866_v43 = vadd.f32 %v2854_v59, %v2719_v52  ;;  %v12264_v34 = vpop.f32.mrb[79].mxu1 }
 0x38b   : > { %8982 = vst [vmem:[%s17748_s29 + $0x28] sm:$0xff] %v2894_v37  ;;  %v2876_v35 = vadd.f32 %v16117_v1, %v2861_v17 }
 0x38c   : > { %8987 = vst [vmem:[%s17748_s29 + $0x50] sm:$0xff] %v2899_v40  ;;  %v2881_v39 = vadd.f32 %v16117_v1, %v2866_v43  ;;  %v2834_v48 = vpop.f32.mrb[80].mxu0 }
 0x38d   : > { %v2895_v49 = vmul.f32 %v2886_v42, %v2876_v35  ;;  %v2862_v24 = vadd.f32 %v2834_v48, %v17734_v22  ;;  %v12252_v18 = vpop.f32.mrb[81].mxu0  ;;  %1560 = sbr.rel (!%p1558_p1) target bundleno = 503 (0x1f7), region = 202 }
 0x38e   : > { %v2900_v51 = vmul.f32 %v2891_v38, %v2881_v39 }
 0x38f   : > { %8983 = vst [vmem:[%s17748_s29 + $0x30] sm:$0xff] %v2895_v49  ;;  %v2877_v45 = vadd.f32 %v16117_v1, %v2862_v24 }
 0x390   : > { %8988 = vst [vmem:[%s17748_s29 + $0x58] sm:$0xff] %v2900_v51 }
 0x391   : > { %v2896_v23 = vmul.f32 %v2887_v44, %v2877_v45 }
 0x393   : > { %8984 = vst [vmem:[%s17748_s29 + $0x38] sm:$0xff] %v2896_v23 }
 0x394 LB: > { %v9007_v22 = vld [vmem:[%s21073_s1 + $0x80] sm:$0xff]  ;;  %v9008_v56 = vld [vmem:[%s21073_s1 + $0x88] sm:$0xff]  ;;  %v15903_v47 = vmov 0.0|0.0   ;;  %v9009_v50 = vld [vmem:[%s21073_s1 + $0x90] sm:$0xff]  ;;  %vm15904_vm2 = vmmov 0   ;;  %v15905_v58 = vmov 0.0   ;;  %s15882_s0 = sphi %s17778_s0, %s2916_s0  }
 0x395   : > { %v2929_v46 = vld [vmem:[%s21073_s1] sm:$0xff]  ;;  %14821 = vmatprep.subr.bf16.mxu0 %v15903_v47  ;;  %14845 = vmatprep.subr.bf16.mxu1 %v15903_v47  ;;  %v14822_v57 = vpack.c.bf16 %v9008_v56, %v9007_v22  ;;  %v2930_v41 = vld [vmem:[%s21073_s1 + $0x8] sm:$0xff]  ;;  %v9010_v60 = vld [vmem:[%s21073_s1 + $0x98] sm:$0xff]  ;;  %s17891_s25 = smul.u32 72, %s15882_s0  ;;  %s2916_s0 = sadd.s32 1, %s15882_s0  }
 0x396   : > { %v14846_v52 = vpack.c.bf16 %v2930_v41, %v2929_v46  ;;  %v2931_v54 = vld [vmem:[%s21073_s1 + $0x10] sm:$0xff]  ;;  %v2932_v61 = vld [vmem:[%s21073_s1 + $0x18] sm:$0xff]  ;;  %12297 = vmatprep.mubr.msk.f32.mxu0 %vm15904_vm2, %v15905_v58  ;;  %12356 = vmatprep.mubr.msk.f32.mxu1 %vm15904_vm2, %v15905_v58  ;;  %v14825_v53 = vpack.c.bf16 %v9010_v60, %v9009_v50  ;;  %v9011_v55 = vld [vmem:[%s21073_s1 + $0xa0] sm:$0xff]  ;;  %p2913_p2 = scmp.ge.s32.totalorder %s2916_s0, 9  }
 0x397   : > { %14823 = vmatpush3.bf16.msra.mxu0 %v14822_v57  ;;  %v14849_v63 = vpack.c.bf16 %v2932_v61, %v2931_v54  ;;  %v9012_v11 = vld [vmem:[%s21073_s1 + $0xa8] sm:$0xff]  ;;  %v2933_v3 = vld [vmem:[%s21073_s1 + $0x20] sm:$0xff]  ;;  %v9013_v8 = vld [vmem:[%s21073_s1 + $0xb0] sm:$0xff]  ;;  %s17915_s2 = scalar_lea.vmem [#allocation3], %s17891_s25  ;;  %s18568_s15 = scalar_lea.vmem %s21075_s3, %s17891_s25 }
 0x398   : > { %14847 = vmatpush3.bf16.msra.mxu1 %v14846_v52  ;;  %14824 = vmatprep.subr.bf16.mxu0 %v15903_v47  ;;  %v2934_v62 = vld [vmem:[%s21073_s1 + $0x28] sm:$0xff]  ;;  %v14828_v13 = vpack.c.bf16 %v9012_v11, %v9011_v55  ;;  %v9014_v30 = vld [vmem:[%s21073_s1 + $0xb8] sm:$0xff]  ;;  %v2935_v2 = vld [vmem:[%s21073_s1 + $0x30] sm:$0xff]  ;;  %s18578_s16 = scalar_lea.vmem [#allocation2], %s17891_s25  ;;  %s18606_s25 = smov (%p2913_p2), 0  }
 0x399   : > { %14848 = vmatprep.subr.bf16.mxu1 %v15903_v47  ;;  %v14852_v0 = vpack.c.bf16 %v2934_v62, %v2933_v3  ;;  %v2936_v14 = vld [vmem:[%s21073_s1 + $0x38] sm:$0xff]  ;;  %v14831_v15 = vpack.c.bf16 %v9014_v30, %v9013_v8  ;;  %v9015_v19 = vld [vmem:[%s21073_s1 + $0xc0] sm:$0xff]  ;;  %v9016_v6 = vld [vmem:[%s21073_s1 + $0xc8] sm:$0xff] }
 0x39a   : > { %v14855_v4 = vpack.c.bf16 %v2936_v14, %v2935_v2  ;;  %v2937_v9 = vld [vmem:[%s21073_s1 + $0x40] sm:$0xff]  ;;  %v2938_v20 = vld [vmem:[%s21073_s1 + $0x48] sm:$0xff]  ;;  %v14834_v10 = vpack.c.bf16 %v9016_v6, %v9015_v19  ;;  %v9017_v16 = vld [vmem:[%s21073_s1 + $0xd0] sm:$0xff] }
 0x39b   : > { %14826 = vmatpush3.bf16.msra.mxu0 %v14825_v53  ;;  %v14858_v25 = vpack.c.bf16 %v2938_v20, %v2937_v9  ;;  %v9018_v7 = vld [vmem:[%s21073_s1 + $0xd8] sm:$0xff]  ;;  %v2939_v12 = vld [vmem:[%s21073_s1 + $0x50] sm:$0xff]  ;;  %v9019_v31 = vld [vmem:[%s21073_s1 + $0xe0] sm:$0xff] }
 0x39c   : > { %14850 = vmatpush3.bf16.msra.mxu1 %v14849_v63  ;;  %14827 = vmatprep.subr.bf16.mxu0 %v15903_v47  ;;  %v2940_v26 = vld [vmem:[%s21073_s1 + $0x58] sm:$0xff]  ;;  %v14837_v29 = vpack.c.bf16 %v9018_v7, %v9017_v16  ;;  %v9020_v32 = vld [vmem:[%s21073_s1 + $0xe8] sm:$0xff]  ;;  %v2941_v33 = vld [vmem:[%s21073_s1 + $0x60] sm:$0xff] }
 0x39d   : > { %14851 = vmatprep.subr.bf16.mxu1 %v15903_v47  ;;  %v14861_v21 = vpack.c.bf16 %v2940_v26, %v2939_v12  ;;  %v2942_v27 = vld [vmem:[%s21073_s1 + $0x68] sm:$0xff]  ;;  %v14840_v28 = vpack.c.bf16 %v9020_v32, %v9019_v31  ;;  %v9021_v37 = vld [vmem:[%s21073_s1 + $0xf0] sm:$0xff]  ;;  %v9022_v17 = vld [vmem:[%s21073_s1 + $0xf8] sm:$0xff] }
 0x39e   : > { %v14864_v36 = vpack.c.bf16 %v2942_v27, %v2941_v33  ;;  %v2943_v59 = vld [vmem:[%s21073_s1 + $0x70] sm:$0xff]  ;;  %v2944_v5 = vld [vmem:[%s21073_s1 + $0x78] sm:$0xff]  ;;  %v14843_v40 = vpack.c.bf16 %v9022_v17, %v9021_v37  ;;  %v9032_v43 = vld [vmem:[%s21073_s1 + $0x100] sm:$0xff] }
 0x39f   : > { %14829 = vmatpush3.bf16.msra.mxu0 %v14828_v13  ;;  %v14867_v42 = vpack.c.bf16 %v2944_v5, %v2943_v59  ;;  %v9033_v34 = vld [vmem:[%s21073_s1 + $0x108] sm:$0xff]  ;;  %v9057_v35 = vld [vmem:[%s21073_s1 + $0x180] sm:$0xff]  ;;  %v9034_v24 = vld [vmem:[%s21073_s1 + $0x110] sm:$0xff] }
 0x3a0   : > { %14853 = vmatpush3.bf16.msra.mxu1 %v14852_v0  ;;  %14830 = vmatprep.subr.bf16.mxu0 %v15903_v47  ;;  %v9058_v38 = vld [vmem:[%s21073_s1 + $0x188] sm:$0xff]  ;;  %v14870_v48 = vpack.c.bf16 %v9033_v34, %v9032_v43  ;;  %v9035_v18 = vld [vmem:[%s21073_s1 + $0x118] sm:$0xff]  ;;  %v9059_v44 = vld [vmem:[%s21073_s1 + $0x190] sm:$0xff] }
 0x3a1   : > { %14854 = vmatprep.subr.bf16.mxu1 %v15903_v47  ;;  %v8998_v39 = vld [vmem:[%s17915_s2 + $0x6] sm:$0xff]  ;;  %v14894_v51 = vpack.c.bf16 %v9058_v38, %v9057_v35  ;;  %v9060_v45 = vld [vmem:[%s21073_s1 + $0x198] sm:$0xff]  ;;  %v8999_v23 = vld [vmem:[%s17915_s2 + $0xe] sm:$0xff]  ;;  %v14873_v22 = vpack.c.bf16 %v9035_v18, %v9034_v24 }
 0x3a2   : > { %v8989_v49 = vld [vmem:[%s17915_s2 + $0x5] sm:$0xff]  ;;  %v8990_v56 = vld [vmem:[%s17915_s2 + $0xd] sm:$0xff]  ;;  %v14897_v41 = vpack.c.bf16 %v9060_v45, %v9059_v44  ;;  %v9000_v52 = vld [vmem:[%s17915_s2 + $0x16] sm:$0xff] }
 0x3a3   : > { %14832 = vmatpush3.bf16.msra.mxu0 %v14831_v15  ;;  %v9036_v46 = vld [vmem:[%s21073_s1 + $0x120] sm:$0xff]  ;;  %v9037_v57 = vld [vmem:[%s21073_s1 + $0x128] sm:$0xff]  ;;  %v8991_v61 = vld [vmem:[%s17915_s2 + $0x15] sm:$0xff] }
 0x3a4   : > { %14856 = vmatpush3.bf16.msra.mxu1 %v14855_v4  ;;  %14833 = vmatprep.subr.bf16.mxu0 %v15903_v47  ;;  %v9061_v50 = vld [vmem:[%s21073_s1 + $0x1a0] sm:$0xff]  ;;  %v9062_v60 = vld [vmem:[%s21073_s1 + $0x1a8] sm:$0xff]  ;;  %v14876_v54 = vpack.c.bf16 %v9037_v57, %v9036_v46  ;;  %v9038_v63 = vld [vmem:[%s21073_s1 + $0x130] sm:$0xff] }
 0x3a5   : > { %14857 = vmatprep.subr.bf16.mxu1 %v15903_v47  ;;  %v14900_v53 = vpack.c.bf16 %v9062_v60, %v9061_v50  ;;  %v9039_v55 = vld [vmem:[%s21073_s1 + $0x138] sm:$0xff]  ;;  %v9063_v11 = vld [vmem:[%s21073_s1 + $0x1b0] sm:$0xff]  ;;  %v9040_v30 = vld [vmem:[%s21073_s1 + $0x140] sm:$0xff] }
 0x3a6   : > { %v9064_v3 = vld [vmem:[%s21073_s1 + $0x1b8] sm:$0xff]  ;;  %v14879_v0 = vpack.c.bf16 %v9039_v55, %v9038_v63  ;;  %v9041_v2 = vld [vmem:[%s21073_s1 + $0x148] sm:$0xff]  ;;  %v9065_v14 = vld [vmem:[%s21073_s1 + $0x1c0] sm:$0xff] }
 0x3a7   : > { %14835 = vmatpush3.bf16.msra.mxu0 %v14834_v10  ;;  %v9001_v62 = vld [vmem:[%s17915_s2 + $0x1e] sm:$0xff]  ;;  %v14903_v8 = vpack.c.bf16 %v9064_v3, %v9063_v11  ;;  %v9066_v15 = vld [vmem:[%s21073_s1 + $0x1c8] sm:$0xff]  ;;  %v14882_v6 = vpack.c.bf16 %v9041_v2, %v9040_v30  ;;  %v9042_v20 = vld [vmem:[%s21073_s1 + $0x150] sm:$0xff] }
 0x3a8   : > { %14859 = vmatpush3.bf16.msra.mxu1 %v14858_v25  ;;  %14836 = vmatprep.subr.bf16.mxu0 %v15903_v47  ;;  %v8992_v13 = vld [vmem:[%s17915_s2 + $0x1d] sm:$0xff]  ;;  %v9002_v4 = vld [vmem:[%s17915_s2 + $0x26] sm:$0xff]  ;;  %v14906_v9 = vpack.c.bf16 %v9066_v15, %v9065_v14  ;;  %v9067_v25 = vld [vmem:[%s21073_s1 + $0x1d0] sm:$0xff] }
 0x3a9   : > { %14860 = vmatprep.subr.bf16.mxu1 %v15903_v47  ;;  %v8993_v19 = vld [vmem:[%s17915_s2 + $0x25] sm:$0xff]  ;;  %v9043_v10 = vld [vmem:[%s21073_s1 + $0x158] sm:$0xff]  ;;  %v9003_v7 = vld [vmem:[%s17915_s2 + $0x2e] sm:$0xff] }
 0x3aa   : > { %v9068_v16 = vld [vmem:[%s21073_s1 + $0x1d8] sm:$0xff]  ;;  %v8994_v12 = vld [vmem:[%s17915_s2 + $0x2d] sm:$0xff]  ;;  %v14885_v26 = vpack.c.bf16 %v9043_v10, %v9042_v20  ;;  %v9069_v32 = vld [vmem:[%s21073_s1 + $0x1e0] sm:$0xff] }
 0x3ab   : > { %14838 = vmatpush3.bf16.msra.mxu0 %v14837_v29  ;;  %v14909_v29 = vpack.c.bf16 %v9068_v16, %v9067_v25  ;;  %v9045_v31 = vld [vmem:[%s21073_s1 + $0x168] sm:$0xff]  ;;  %v9004_v27 = vld [vmem:[%s17915_s2 + $0x36] sm:$0xff]  ;;  %v9107_v24 = vld [vmem:[%s21073_s1 + $0x280] sm:$0xff] }
 0x3ac   : > { %14862 = vmatpush3.bf16.msra.mxu1 %v14861_v21  ;;  %14839 = vmatprep.subr.bf16.mxu0 %v15903_v47  ;;  %v9044_v21 = vld [vmem:[%s21073_s1 + $0x160] sm:$0xff]  ;;  %v9070_v33 = vld [vmem:[%s21073_s1 + $0x1e8] sm:$0xff]  ;;  %v9046_v17 = vld [vmem:[%s21073_s1 + $0x170] sm:$0xff] }
 0x3ad   : > { %14863 = vmatprep.subr.bf16.mxu1 %v15903_v47  ;;  %v14912_v37 = vpack.c.bf16 %v9070_v33, %v9069_v32  ;;  %v9047_v59 = vld [vmem:[%s21073_s1 + $0x178] sm:$0xff]  ;;  %v9071_v5 = vld [vmem:[%s21073_s1 + $0x1f0] sm:$0xff]  ;;  %v9006_v38 = vld [vmem:[%s17915_s2 + $0x46] sm:$0xff] }
 0x3ae   : > { %v8996_v43 = vld [vmem:[%s17915_s2 + $0x3d] sm:$0xff]  ;;  %v14891_v34 = vpack.c.bf16 %v9047_v59, %v9046_v17  ;;  %v9108_v18 = vld [vmem:[%s21073_s1 + $0x288] sm:$0xff]  ;;  %v9109_v46 = vld [vmem:[%s21073_s1 + $0x290] sm:$0xff] }
 0x3af   : > { %14841 = vmatpush3.bf16.msra.mxu0 %v14840_v28  ;;  %v8995_v28 = vld [vmem:[%s17915_s2 + $0x35] sm:$0xff]  ;;  %v9049_v60 = vld [vmem:[%s17915_s2 + $0x1f] sm:$0xff]  ;;  %v9112_v63 = vld [vmem:[%s21073_s1 + $0x2a8] sm:$0xff] }
 0x3b0   : > { %14865 = vmatpush3.bf16.msra.mxu1 %v14864_v36  ;;  %14842 = vmatprep.subr.bf16.mxu0 %v15903_v47  ;;  %v14888_v36 = vpack.c.bf16 %v9045_v31, %v9044_v21  ;;  %v9048_v45 = vld [vmem:[%s17915_s2 + $0x17] sm:$0xff]  ;;  %v9050_v11 = vld [vmem:[%s17915_s2 + $0x27] sm:$0xff]  ;;  %v9051_v30 = vld [vmem:[%s17915_s2 + $0x2f] sm:$0xff] }
 0x3b1   : > { %14866 = vmatprep.subr.bf16.mxu1 %v15903_v47  ;;  %v9110_v57 = vld [vmem:[%s21073_s1 + $0x298] sm:$0xff]  ;;  %v9090_v15 = vld [vmem:[%s21073_s1 + $0x240] sm:$0xff]  ;;  %v9092_v25 = vld [vmem:[%s21073_s1 + $0x250] sm:$0xff] }
 0x3b2   : > { %v9093_v16 = vld [vmem:[%s21073_s1 + $0x258] sm:$0xff]  ;;  %v9094_v31 = vld [vmem:[%s21073_s1 + $0x260] sm:$0xff]  ;;  %v9095_v32 = vld [vmem:[%s21073_s1 + $0x268] sm:$0xff] }
 0x3b3   : > { %14844 = vmatpush3.bf16.msra.mxu0 %v14843_v40  ;;  %v9072_v40 = vld [vmem:[%s21073_s1 + $0x1f8] sm:$0xff]  ;;  %v9119_v33 = vld [vmem:[%s21073_s1 + $0x2e0] sm:$0xff]  ;;  %v9096_v17 = vld [vmem:[%s21073_s1 + $0x270] sm:$0xff] }
 0x3b4   : > { %14868 = vmatpush3.bf16.msra.mxu1 %v14867_v42  ;;  %14869 = vmatprep.subr.bf16.mxu0 %v15903_v47  ;;  %v9005_v42 = vld [vmem:[%s17915_s2 + $0x3e] sm:$0xff]  ;;  %v14915_v35 = vpack.c.bf16 %v9072_v40, %v9071_v5  ;;  %v9121_v5 = vld [vmem:[%s21073_s1 + $0x2f0] sm:$0xff] }
 0x3b5   : > { %14893 = vmatprep.subr.bf16.mxu1 %v15903_v47  ;;  %v9097_v59 = vld [vmem:[%s21073_s1 + $0x278] sm:$0xff] }
 0x3b6   : > { %12298 = vmatmul.mubr.f32.vlgmr.msra.gmra.mrb[0].mxu0 %v8998_v39  ;;  %v8997_v39 = vld [vmem:[%s17915_s2 + $0x45] sm:$0xff]  ;;  %v9122_v40 = vld [vmem:[%s21073_s1 + $0x2f8] sm:$0xff] }
 0x3b7   : > { %12357 = vmatmul.mubr.f32.vlgmr.msra.gmra.mrb[0].mxu1 %v8989_v49  ;;  %14871 = vmatpush3.bf16.msra.mxu0 %v14870_v48  ;;  %v9082_v48 = vld [vmem:[%s21073_s1 + $0x200] sm:$0xff]  ;;  %v9083_v49 = vld [vmem:[%s21073_s1 + $0x208] sm:$0xff] }
 0x3b8   : > { %12300 = vmatprep.mubr.msk.f32.mxu0 %vm15904_vm2, %v15905_v58  ;;  %12359 = vmatprep.mubr.msk.f32.mxu1 %vm15904_vm2, %v15905_v58  ;;  %v14918_v44 = vpack.c.bf16 %v9083_v49, %v9082_v48  ;;  %v9157_v48 = vld [vmem:[%s21073_s1 + $0x380] sm:$0xff]  ;;  %v9158_v49 = vld [vmem:[%s21073_s1 + $0x388] sm:$0xff] }
 0x3b9   : > { %14872 = vmatprep.subr.bf16.mxu0 %v15903_v47  ;;  %14895 = vmatpush3.bf16.msra.mxu1 %v14894_v51  ;;  %v9023_v51 = vld [vmem:[%s17915_s2 + $0x7] sm:$0xff] }
 0x3ba   : > { %12301 = vmatmul.mubr.f32.gmra.mrb[2].mxu0 %v8999_v23  ;;  %14896 = vmatprep.subr.bf16.mxu1 %v15903_v47  ;;  %v9084_v23 = vld [vmem:[%s21073_s1 + $0x210] sm:$0xff] }
 0x3bb   : > { %12360 = vmatmul.mubr.f32.gmra.mrb[2].mxu1 %v8990_v56  ;;  %14874 = vmatpush3.bf16.msra.mxu0 %v14873_v22  ;;  %v9085_v22 = vld [vmem:[%s21073_s1 + $0x218] sm:$0xff]  ;;  %v14942_v56 = vpack.c.bf16 %v9108_v18, %v9107_v24 }
 0x3bc   : > { %12303 = vmatprep.mubr.msk.f32.mxu0 %vm15904_vm2, %v15905_v58  ;;  %12362 = vmatprep.mubr.msk.f32.mxu1 %vm15904_vm2, %v15905_v58  ;;  %v14921_v50 = vpack.c.bf16 %v9085_v22, %v9084_v23  ;;  %v9073_v24 = vld [vmem:[%s17915_s2 + $0x18] sm:$0xff]  ;;  %v14990_v23 = vpack.c.bf16 %v9158_v49, %v9157_v48  ;;  %v9159_v22 = vld [vmem:[%s21073_s1 + $0x390] sm:$0xff] }
 0x3bd   : > { %14875 = vmatprep.subr.bf16.mxu0 %v15903_v47  ;;  %14898 = vmatpush3.bf16.msra.mxu1 %v14897_v41  ;;  %v9024_v41 = vld [vmem:[%s17915_s2 + $0xf] sm:$0xff]  ;;  %v9081_v49 = vld [vmem:[%s17915_s2 + $0x58] sm:$0xff] }
 0x3be   : > { %12304 = vmatmul.mubr.f32.gmra.mrb[4].mxu0 %v9000_v52  ;;  %14899 = vmatprep.subr.bf16.mxu1 %v15903_v47  ;;  %v9086_v52 = vld [vmem:[%s21073_s1 + $0x220] sm:$0xff] }
 0x3bf   : > { %12363 = vmatmul.mubr.f32.gmra.mrb[4].mxu1 %v8991_v61  ;;  %14877 = vmatpush3.bf16.msra.mxu0 %v14876_v54  ;;  %v9087_v54 = vld [vmem:[%s21073_s1 + $0x228] sm:$0xff]  ;;  %v14945_v61 = vpack.c.bf16 %v9110_v57, %v9109_v46  ;;  %v9074_v46 = vld [vmem:[%s17915_s2 + $0x20] sm:$0xff] }
 0x3c0   : > { %12306 = vmatprep.mubr.msk.f32.mxu0 %vm15904_vm2, %v15905_v58  ;;  %12365 = vmatprep.mubr.msk.f32.mxu1 %vm15904_vm2, %v15905_v58  ;;  %v14924_v55 = vpack.c.bf16 %v9087_v54, %v9086_v52  ;;  %v9161_v54 = vld [vmem:[%s21073_s1 + $0x3a0] sm:$0xff] }
 0x3c1   : > { %14901 = vmatpush3.bf16.msra.mxu1 %v14900_v53  ;;  %14878 = vmatprep.subr.bf16.mxu0 %v15903_v47  ;;  %v9111_v53 = vld [vmem:[%s21073_s1 + $0x2a0] sm:$0xff] }
 0x3c2   : > { %12307 = vmatmul.mubr.f32.gmra.mrb[6].mxu0 %v9001_v62  ;;  %14902 = vmatprep.subr.bf16.mxu1 %v15903_v47  ;;  %v14948_v3 = vpack.c.bf16 %v9112_v63, %v9111_v53  ;;  %v9088_v62 = vld [vmem:[%s21073_s1 + $0x230] sm:$0xff]  ;;  %v9075_v53 = vld [vmem:[%s17915_s2 + $0x28] sm:$0xff] }
 0x3c3   : > { %12366 = vmatmul.mubr.f32.gmra.mrb[6].mxu1 %v8992_v13  ;;  %12309 = vmatprep.mubr.msk.f32.mxu0 %vm15904_vm2, %v15905_v58  ;;  %v9089_v13 = vld [vmem:[%s21073_s1 + $0x238] sm:$0xff] }
 0x3c4   : > { %12368 = vmatprep.mubr.msk.f32.mxu1 %vm15904_vm2, %v15905_v58  ;;  %14880 = vmatpush3.bf16.msra.mxu0 %v14879_v0  ;;  %v9113_v0 = vld [vmem:[%s21073_s1 + $0x2b0] sm:$0xff]  ;;  %v14927_v2 = vpack.c.bf16 %v9089_v13, %v9088_v62  ;;  %v9139_v62 = vld [vmem:[%s21073_s1 + $0x338] sm:$0xff] }
 0x3c5   : > { %14904 = vmatpush3.bf16.msra.mxu1 %v14903_v8  ;;  %14881 = vmatprep.subr.bf16.mxu0 %v15903_v47  ;;  %v9114_v8 = vld [vmem:[%s21073_s1 + $0x2b8] sm:$0xff]  ;;  %v9163_v13 = vld [vmem:[%s21073_s1 + $0x3b0] sm:$0xff] }
 0x3c6   : > { %12310 = vmatmul.mubr.f32.gmra.mrb[8].mxu0 %v9002_v4  ;;  %14905 = vmatprep.subr.bf16.mxu1 %v15903_v47  ;;  %v14951_v14 = vpack.c.bf16 %v9114_v8, %v9113_v0  ;;  %v9091_v4 = vld [vmem:[%s21073_s1 + $0x248] sm:$0xff]  ;;  %v9164_v0 = vld [vmem:[%s21073_s1 + $0x3b8] sm:$0xff]  ;;  %v9076_v8 = vld [vmem:[%s17915_s2 + $0x30] sm:$0xff] }
 0x3c7   : > { %12369 = vmatmul.mubr.f32.gmra.mrb[8].mxu1 %v8993_v19  ;;  %12312 = vmatprep.mubr.msk.f32.mxu0 %vm15904_vm2, %v15905_v58  ;;  %v9115_v19 = vld [vmem:[%s21073_s1 + $0x2c0] sm:$0xff]  ;;  %v14930_v20 = vpack.c.bf16 %v9091_v4, %v9090_v15  ;;  %v9141_v4 = vld [vmem:[%s21073_s1 + $0x348] sm:$0xff] }
 0x3c8   : > { %12371 = vmatprep.mubr.msk.f32.mxu1 %vm15904_vm2, %v15905_v58  ;;  %14883 = vmatpush3.bf16.msra.mxu0 %v14882_v6  ;;  %v9116_v6 = vld [vmem:[%s21073_s1 + $0x2c8] sm:$0xff]  ;;  %v9140_v15 = vld [vmem:[%s21073_s1 + $0x340] sm:$0xff] }
 0x3c9   : > { %14907 = vmatpush3.bf16.msra.mxu1 %v14906_v9  ;;  %14884 = vmatprep.subr.bf16.mxu0 %v15903_v47  ;;  %v9052_v9 = vld [vmem:[%s17915_s2 + $0x37] sm:$0xff]  ;;  %v14954_v10 = vpack.c.bf16 %v9116_v6, %v9115_v19  ;;  %v9165_v19 = vld [vmem:[%s21073_s1 + $0x3c0] sm:$0xff]  ;;  %v9166_v6 = vld [vmem:[%s21073_s1 + $0x3c8] sm:$0xff] }
 0x3ca   : > { %12313 = vmatmul.mubr.f32.gmra.mrb[10].mxu0 %v9003_v7  ;;  %14908 = vmatprep.subr.bf16.mxu1 %v15903_v47  ;;  %v9117_v7 = vld [vmem:[%s21073_s1 + $0x2d0] sm:$0xff] }
 0x3cb   : > { %12372 = vmatmul.mubr.f32.gmra.mrb[10].mxu1 %v8994_v12  ;;  %12315 = vmatprep.mubr.msk.f32.mxu0 %vm15904_vm2, %v15905_v58  ;;  %v9118_v12 = vld [vmem:[%s21073_s1 + $0x2d8] sm:$0xff] }
 0x3cc   : > { %12374 = vmatprep.mubr.msk.f32.mxu1 %vm15904_vm2, %v15905_v58  ;;  %14886 = vmatpush3.bf16.msra.mxu0 %v14885_v26  ;;  %v9053_v26 = vld [vmem:[%s17915_s2 + $0x3f] sm:$0xff]  ;;  %v14957_v21 = vpack.c.bf16 %v9118_v12, %v9117_v7  ;;  %v9167_v12 = vld [vmem:[%s21073_s1 + $0x3d0] sm:$0xff] }
 0x3cd   : > { %14910 = vmatpush3.bf16.msra.mxu1 %v14909_v29  ;;  %14887 = vmatprep.subr.bf16.mxu0 %v15903_v47  ;;  %v14933_v29 = vpack.c.bf16 %v9093_v16, %v9092_v25  ;;  %v15002_v25 = vpack.c.bf16 %v9166_v6, %v9165_v19  ;;  %v9142_v16 = vld [vmem:[%s21073_s1 + $0x350] sm:$0xff]  ;;  %v9143_v7 = vld [vmem:[%s21073_s1 + $0x358] sm:$0xff]  ;;  %v9130_v6 = vld [vmem:[%s17915_s2 + $0x61] sm:$0xff] }
 0x3ce   : > { %12316 = vmatmul.mubr.f32.gmra.mrb[12].mxu0 %v9004_v27  ;;  %14911 = vmatprep.subr.bf16.mxu1 %v15903_v47  ;;  %v9120_v27 = vld [vmem:[%s21073_s1 + $0x2e8] sm:$0xff]  ;;  %v9197_v19 = vld [vmem:[%s21073_s1 + $0x478] sm:$0xff] }
 0x3cf   : > { %12375 = vmatmul.mubr.f32.gmra.mrb[12].mxu1 %v8995_v28  ;;  %12318 = vmatprep.mubr.msk.f32.mxu0 %vm15904_vm2, %v15905_v58  ;;  %v9054_v28 = vld [vmem:[%s17915_s2 + $0x47] sm:$0xff] }
 0x3d0   : > { %12377 = vmatprep.mubr.msk.f32.mxu1 %vm15904_vm2, %v15905_v58  ;;  %14889 = vmatpush3.bf16.msra.mxu0 %v14888_v36  ;;  %v14936_v36 = vpack.c.bf16 %v9095_v32, %v9094_v31  ;;  %v14981_v31 = vpack.c.bf16 %v9143_v7, %v9142_v16  ;;  %v9178_v16 = vld [vmem:[%s17915_s2 + $0x53] sm:$0xff] }
 0x3d1   : > { %14913 = vmatpush3.bf16.msra.mxu1 %v14912_v37  ;;  %14890 = vmatprep.subr.bf16.mxu0 %v15903_v47  ;;  %v14960_v37 = vpack.c.bf16 %v9120_v27, %v9119_v33  ;;  %v9144_v33 = vld [vmem:[%s21073_s1 + $0x360] sm:$0xff]  ;;  %v9145_v27 = vld [vmem:[%s21073_s1 + $0x368] sm:$0xff]  ;;  %v9174_v7 = vld [vmem:[%s17915_s2 + $0x33] sm:$0xff] }
 0x3d2   : > { %12319 = vmatmul.mubr.f32.gmra.mrb[14].mxu0 %v9005_v42  ;;  %14914 = vmatprep.subr.bf16.mxu1 %v15903_v47  ;;  %v9055_v42 = vld [vmem:[%s17915_s2 + $0x4f] sm:$0xff] }
 0x3d3   : > { %12378 = vmatmul.mubr.f32.gmra.mrb[14].mxu1 %v8996_v43  ;;  %12321 = vmatprep.mubr.msk.f32.mxu0 %vm15904_vm2, %v15905_v58  ;;  %v14939_v43 = vpack.c.bf16 %v9097_v59, %v9096_v17  ;;  %v18376_v17 = vld [vmem:[%s17915_s2 + $0x49] sm:$0xff]  ;;  %v14984_v59 = vpack.c.bf16 %v9145_v27, %v9144_v33 }
 0x3d4   : > { %12380 = vmatprep.mubr.msk.f32.mxu1 %vm15904_vm2, %v15905_v58  ;;  %14892 = vmatpush3.bf16.msra.mxu0 %v14891_v34  ;;  %v14963_v34 = vpack.c.bf16 %v9122_v40, %v9121_v5  ;;  %v9146_v40 = vld [vmem:[%s21073_s1 + $0x370] sm:$0xff] }
 0x3d5   : > { %14916 = vmatpush3.bf16.msra.mxu1 %v14915_v35  ;;  %14917 = vmatprep.subr.bf16.mxu0 %v15903_v47  ;;  %v9056_v35 = vld [vmem:[%s17915_s2 + $0x57] sm:$0xff] }
 0x3d6   : > { %12322 = vmatmul.mubr.f32.gmra.mrb[16].mxu0 %v9006_v38  ;;  %14941 = vmatprep.subr.bf16.mxu1 %v15903_v47  ;;  %v9132_v38 = vld [vmem:[%s21073_s1 + $0x300] sm:$0xff] }
 0x3d7   : > { %12381 = vmatmul.mubr.f32.gmra.mrb[16].mxu1 %v8997_v39  ;;  %12415 = vmatprep.mubr.msk.f32.mxu0 %vm15904_vm2, %v15905_v58  ;;  %v9133_v39 = vld [vmem:[%s21073_s1 + $0x308] sm:$0xff] }
 0x3d8   : > { %12474 = vmatprep.mubr.msk.f32.mxu1 %vm15904_vm2, %v15905_v58  ;;  %v14966_v18 = vpack.c.bf16 %v9133_v39, %v9132_v38  ;;  %v18399_v38 = vld [vmem:[%s17915_s2 + $0x51] sm:$0xff] }
 0x3da   : > { %12416 = vmatmul.mubr.f32.vlgmr.msra.gmra.mrb[18].mxu0 %v9023_v51  ;;  %v9098_v51 = vld [vmem:[%s17915_s2 + $0x19] sm:$0xff] }
 0x3db   : > { %12475 = vmatmul.mubr.f32.vlgmr.msra.gmra.mrb[18].mxu1 %v9048_v45  ;;  %14919 = vmatpush3.bf16.msra.mxu0 %v14918_v44  ;;  %v9134_v44 = vld [vmem:[%s21073_s1 + $0x310] sm:$0xff] }
 0x3dc   : > { %12418 = vmatprep.mubr.msk.f32.mxu0 %vm15904_vm2, %v15905_v58  ;;  %12477 = vmatprep.mubr.msk.f32.mxu1 %vm15904_vm2, %v15905_v58 }
 0x3dd   : > { %14920 = vmatprep.subr.bf16.mxu0 %v15903_v47  ;;  %14943 = vmatpush3.bf16.msra.mxu1 %v14942_v56  ;;  %v9160_v56 = vld [vmem:[%s21073_s1 + $0x398] sm:$0xff] }
 0x3de   : > { %12419 = vmatmul.mubr.f32.gmra.mrb[20].mxu0 %v9024_v41  ;;  %14944 = vmatprep.subr.bf16.mxu1 %v15903_v47  ;;  %v9099_v41 = vld [vmem:[%s17915_s2 + $0x21] sm:$0xff]  ;;  %v14993_v52 = vpack.c.bf16 %v9160_v56, %v9159_v22  ;;  %v9185_v22 = vld [vmem:[%s21073_s1 + $0x418] sm:$0xff] }
 0x3df   : > { %12478 = vmatmul.mubr.f32.gmra.mrb[20].mxu1 %v9049_v60  ;;  %14922 = vmatpush3.bf16.msra.mxu0 %v14921_v50  ;;  %v9136_v50 = vld [vmem:[%s21073_s1 + $0x320] sm:$0xff] }
 0x3e0   : > { %12421 = vmatprep.mubr.msk.f32.mxu0 %vm15904_vm2, %v15905_v58  ;;  %12480 = vmatprep.mubr.msk.f32.mxu1 %vm15904_vm2, %v15905_v58 }
 0x3e1   : > { %14923 = vmatprep.subr.bf16.mxu0 %v15903_v47  ;;  %14946 = vmatpush3.bf16.msra.mxu1 %v14945_v61  ;;  %v9162_v61 = vld [vmem:[%s21073_s1 + $0x3a8] sm:$0xff] }
 0x3e2   : > { %12422 = vmatmul.mubr.f32.gmra.mrb[22].mxu0 %v9048_v45  ;;  %14947 = vmatprep.subr.bf16.mxu1 %v15903_v47  ;;  %v9135_v45 = vld [vmem:[%s21073_s1 + $0x318] sm:$0xff] }
 0x3e3   : > { %12481 = vmatmul.mubr.f32.gmra.mrb[22].mxu1 %v9050_v11  ;;  %14925 = vmatpush3.bf16.msra.mxu0 %v14924_v55  ;;  %v14969_v57 = vpack.c.bf16 %v9135_v45, %v9134_v44  ;;  %v18284_v55 = vld [vmem:[%s17915_s2 + $0x29] sm:$0xff] }
 0x3e4   : > { %12424 = vmatprep.mubr.msk.f32.mxu0 %vm15904_vm2, %v15905_v58  ;;  %12483 = vmatprep.mubr.msk.f32.mxu1 %vm15904_vm2, %v15905_v58  ;;  %v9148_v45 = vld [vmem:[%s17915_s2 + $0x2a] sm:$0xff] }
 0x3e5   : > { %14949 = vmatpush3.bf16.msra.mxu1 %v14948_v3  ;;  %14926 = vmatprep.subr.bf16.mxu0 %v15903_v47  ;;  %v9138_v3 = vld [vmem:[%s21073_s1 + $0x330] sm:$0xff] }
 0x3e6   : > { %12425 = vmatmul.mubr.f32.gmra.mrb[24].mxu0 %v9049_v60  ;;  %14950 = vmatprep.subr.bf16.mxu1 %v15903_v47  ;;  %v9137_v60 = vld [vmem:[%s21073_s1 + $0x328] sm:$0xff] }
 0x3e7   : > { %12484 = vmatmul.mubr.f32.gmra.mrb[24].mxu1 %v9051_v30  ;;  %12427 = vmatprep.mubr.msk.f32.mxu0 %vm15904_vm2, %v15905_v58  ;;  %v14972_v63 = vpack.c.bf16 %v9137_v60, %v9136_v50  ;;  %v9150_v60 = vld [vmem:[%s17915_s2 + $0x3a] sm:$0xff] }
 0x3e8   : > { %12486 = vmatprep.mubr.msk.f32.mxu1 %vm15904_vm2, %v15905_v58  ;;  %14928 = vmatpush3.bf16.msra.mxu0 %v14927_v2  ;;  %v14975_v2 = vpack.c.bf16 %v9139_v62, %v9138_v3  ;;  %v9192_v62 = vld [vmem:[%s21073_s1 + $0x450] sm:$0xff] }
 0x3e9   : > { %14952 = vmatpush3.bf16.msra.mxu1 %v14951_v14  ;;  %14929 = vmatprep.subr.bf16.mxu0 %v15903_v47  ;;  %v14999_v14 = vpack.c.bf16 %v9164_v0, %v9163_v13  ;;  %v9193_v13 = vld [vmem:[%s21073_s1 + $0x458] sm:$0xff] }
 0x3ea   : > { %12428 = vmatmul.mubr.f32.gmra.mrb[26].mxu0 %v9050_v11  ;;  %14953 = vmatprep.subr.bf16.mxu1 %v15903_v47  ;;  %v14996_v11 = vpack.c.bf16 %v9162_v61, %v9161_v54  ;;  %v9189_v54 = vld [vmem:[%s21073_s1 + $0x438] sm:$0xff]  ;;  %v9151_v61 = vld [vmem:[%s17915_s2 + $0x42] sm:$0xff] }
 0x3eb   : > { %12487 = vmatmul.mubr.f32.gmra.mrb[26].mxu1 %v9052_v9  ;;  %12430 = vmatprep.mubr.msk.f32.mxu0 %vm15904_vm2, %v15905_v58  ;;  %v9153_v0 = vld [vmem:[%s17915_s2 + $0x52] sm:$0xff] }
 0x3ec   : > { %12489 = vmatprep.mubr.msk.f32.mxu1 %vm15904_vm2, %v15905_v58  ;;  %14931 = vmatpush3.bf16.msra.mxu0 %v14930_v20  ;;  %v18330_v20 = vld [vmem:[%s17915_s2 + $0x39] sm:$0xff] }
 0x3ed   : > { %14955 = vmatpush3.bf16.msra.mxu1 %v14954_v10  ;;  %14932 = vmatprep.subr.bf16.mxu0 %v15903_v47  ;;  %v14978_v10 = vpack.c.bf16 %v9141_v4, %v9140_v15  ;;  %v9196_v4 = vld [vmem:[%s21073_s1 + $0x470] sm:$0xff] }
 0x3ee   : > { %12431 = vmatmul.mubr.f32.gmra.mrb[28].mxu0 %v9051_v30  ;;  %14956 = vmatprep.subr.bf16.mxu1 %v15903_v47  ;;  %v18307_v30 = vld [vmem:[%s17915_s2 + $0x31] sm:$0xff] }
 0x3ef   : > { %12490 = vmatmul.mubr.f32.gmra.mrb[28].mxu1 %v9053_v26  ;;  %12433 = vmatprep.mubr.msk.f32.mxu0 %vm15904_vm2, %v15905_v58 }
 0x3f0   : > { %12492 = vmatprep.mubr.msk.f32.mxu1 %vm15904_vm2, %v15905_v58  ;;  %14934 = vmatpush3.bf16.msra.mxu0 %v14933_v29  ;;  %v9078_v29 = vld [vmem:[%s17915_s2 + $0x40] sm:$0xff] }
 0x3f1   : > { %14958 = vmatpush3.bf16.msra.mxu1 %v14957_v21  ;;  %14935 = vmatprep.subr.bf16.mxu0 %v15903_v47  ;;  %v18353_v21 = vld [vmem:[%s17915_s2 + $0x41] sm:$0xff] }
 0x3f2   : > { %12434 = vmatmul.mubr.f32.gmra.mrb[30].mxu0 %v9052_v9  ;;  %14959 = vmatprep.subr.bf16.mxu1 %v15903_v47  ;;  %v9077_v9 = vld [vmem:[%s17915_s2 + $0x38] sm:$0xff] }
 0x3f3   : > { %12493 = vmatmul.mubr.f32.gmra.mrb[30].mxu1 %v9054_v28  ;;  %12436 = vmatprep.mubr.msk.f32.mxu0 %vm15904_vm2, %v15905_v58 }
 0x3f4   : > { %12495 = vmatprep.mubr.msk.f32.mxu1 %vm15904_vm2, %v15905_v58  ;;  %14937 = vmatpush3.bf16.msra.mxu0 %v14936_v36  ;;  %v9170_v36 = vld [vmem:[%s21073_s1 + $0x3e8] sm:$0xff] }
 0x3f5   : > { %14961 = vmatpush3.bf16.msra.mxu1 %v14960_v37  ;;  %14938 = vmatprep.subr.bf16.mxu0 %v15903_v47  ;;  %v9079_v37 = vld [vmem:[%s17915_s2 + $0x48] sm:$0xff] }
 0x3f6   : > { %12437 = vmatmul.mubr.f32.gmra.mrb[32].mxu0 %v9053_v26  ;;  %14962 = vmatprep.subr.bf16.mxu1 %v15903_v47  ;;  %v9168_v26 = vld [vmem:[%s21073_s1 + $0x3d8] sm:$0xff] }
 0x3f7   : > { %12496 = vmatmul.mubr.f32.gmra.mrb[32].mxu1 %v9055_v42  ;;  %12439 = vmatprep.mubr.msk.f32.mxu0 %vm15904_vm2, %v15905_v58  ;;  %v15005_v32 = vpack.c.bf16 %v9168_v26, %v9167_v12  ;;  %v9147_v42 = vld [vmem:[%s21073_s1 + $0x378] sm:$0xff] }
 0x3f8   : > { %12498 = vmatprep.mubr.msk.f32.mxu1 %vm15904_vm2, %v15905_v58  ;;  %14940 = vmatpush3.bf16.msra.mxu0 %v14939_v43  ;;  %v9171_v43 = vld [vmem:[%s21073_s1 + $0x3f0] sm:$0xff]  ;;  %v14987_v39 = vpack.c.bf16 %v9147_v42, %v9146_v40  ;;  %v9179_v12 = vld [vmem:[%s17915_s2 + $0x5b] sm:$0xff] }
 0x3f9   : > { %14964 = vmatpush3.bf16.msra.mxu1 %v14963_v34  ;;  %14965 = vmatprep.subr.bf16.mxu0 %v15903_v47  ;;  %v9172_v34 = vld [vmem:[%s21073_s1 + $0x3f8] sm:$0xff] }
 0x3fa   : > { %12440 = vmatmul.mubr.f32.gmra.mrb[34].mxu0 %v9054_v28  ;;  %14989 = vmatprep.subr.bf16.mxu1 %v15903_v47  ;;  %v9169_v28 = vld [vmem:[%s21073_s1 + $0x3e0] sm:$0xff]  ;;  %v15011_v48 = vpack.c.bf16 %v9172_v34, %v9171_v43 }
 0x3fb   : > { %12499 = vmatmul.mubr.f32.gmra.mrb[34].mxu1 %v9056_v35  ;;  %12533 = vmatprep.mubr.msk.f32.mxu0 %vm15904_vm2, %v15905_v58  ;;  %v15008_v5 = vpack.c.bf16 %v9170_v36, %v9169_v28  ;;  %v9080_v35 = vld [vmem:[%s17915_s2 + $0x50] sm:$0xff]  ;;  %v9175_v26 = vld [vmem:[%s17915_s2 + $0x3b] sm:$0xff] }
 0x3fc   : > { %12592 = vmatprep.mubr.msk.f32.mxu1 %vm15904_vm2, %v15905_v58 }
 0x3fe   : > { %12534 = vmatmul.mubr.f32.vlgmr.msra.gmra.mrb[36].mxu0 %v9073_v24  ;;  %v18410_v24 = vld [vmem:[%s17915_s2 + $0x59] sm:$0xff] }
 0x3ff   : > { %12593 = vmatmul.mubr.f32.vlgmr.msra.gmra.mrb[36].mxu1 %v9098_v51  ;;  %14967 = vmatpush3.bf16.msra.mxu0 %v14966_v18  ;;  %v9182_v18 = vld [vmem:[%s21073_s1 + $0x400] sm:$0xff]  ;;  %v9183_v51 = vld [vmem:[%s21073_s1 + $0x408] sm:$0xff] }
 0x400   : > { %12536 = vmatprep.mubr.msk.f32.mxu0 %vm15904_vm2, %v15905_v58  ;;  %12595 = vmatprep.mubr.msk.f32.mxu1 %vm15904_vm2, %v15905_v58  ;;  %v15014_v44 = vpack.c.bf16 %v9183_v51, %v9182_v18 }
 0x401   : > { %14968 = vmatprep.subr.bf16.mxu0 %v15903_v47  ;;  %14991 = vmatpush3.bf16.msra.mxu1 %v14990_v23  ;;  %v9184_v23 = vld [vmem:[%s21073_s1 + $0x410] sm:$0xff] }
 0x402   : > { %12537 = vmatmul.mubr.f32.gmra.mrb[38].mxu0 %v9074_v46  ;;  %14992 = vmatprep.subr.bf16.mxu1 %v15903_v47  ;;  %v15017_v56 = vpack.c.bf16 %v9185_v22, %v9184_v23  ;;  %v9149_v46 = vld [vmem:[%s17915_s2 + $0x32] sm:$0xff] }
 0x403   : > { %12596 = vmatmul.mubr.f32.gmra.mrb[38].mxu1 %v9099_v41  ;;  %14970 = vmatpush3.bf16.msra.mxu0 %v14969_v57  ;;  %v9186_v57 = vld [vmem:[%s21073_s1 + $0x420] sm:$0xff]  ;;  %v9187_v41 = vld [vmem:[%s21073_s1 + $0x428] sm:$0xff] }
 0x404   : > { %12539 = vmatprep.mubr.msk.f32.mxu0 %vm15904_vm2, %v15905_v58  ;;  %12598 = vmatprep.mubr.msk.f32.mxu1 %vm15904_vm2, %v15905_v58  ;;  %v15020_v50 = vpack.c.bf16 %v9187_v41, %v9186_v57 }
 0x405   : > { %14971 = vmatprep.subr.bf16.mxu0 %v15903_v47  ;;  %14994 = vmatpush3.bf16.msra.mxu1 %v14993_v52  ;;  %v9188_v52 = vld [vmem:[%s21073_s1 + $0x430] sm:$0xff] }
 0x406   : > { %12540 = vmatmul.mubr.f32.gmra.mrb[40].mxu0 %v9075_v53  ;;  %14995 = vmatprep.subr.bf16.mxu1 %v15903_v47  ;;  %v15023_v53 = vpack.c.bf16 %v9189_v54, %v9188_v52 }
 0x407   : > { %12599 = vmatmul.mubr.f32.gmra.mrb[40].mxu1 %v18284_v55  ;;  %14973 = vmatpush3.bf16.msra.mxu0 %v14972_v63  ;;  %v9190_v63 = vld [vmem:[%s21073_s1 + $0x440] sm:$0xff] }
 0x408   : > { %12542 = vmatprep.mubr.msk.f32.mxu0 %vm15904_vm2, %v15905_v58  ;;  %12601 = vmatprep.mubr.msk.f32.mxu1 %vm15904_vm2, %v15905_v58 }
 0x409   : > { %14997 = vmatpush3.bf16.msra.mxu1 %v14996_v11  ;;  %14974 = vmatprep.subr.bf16.mxu0 %v15903_v47  ;;  %v9152_v11 = vld [vmem:[%s17915_s2 + $0x4a] sm:$0xff] }
 0x40a   : > { %12543 = vmatmul.mubr.f32.gmra.mrb[42].mxu0 %v9076_v8  ;;  %14998 = vmatprep.subr.bf16.mxu1 %v15903_v47  ;;  %v15029_v8 = vpack.c.bf16 %v9193_v13, %v9192_v62 }
 0x40b   : > { %12602 = vmatmul.mubr.f32.gmra.mrb[42].mxu1 %v18307_v30  ;;  %12545 = vmatprep.mubr.msk.f32.mxu0 %vm15904_vm2, %v15905_v58 }
 0x40c   : > { %12604 = vmatprep.mubr.msk.f32.mxu1 %vm15904_vm2, %v15905_v58  ;;  %14976 = vmatpush3.bf16.msra.mxu0 %v14975_v2  ;;  %v9195_v2 = vld [vmem:[%s21073_s1 + $0x468] sm:$0xff] }
 0x40d   : > { %15000 = vmatpush3.bf16.msra.mxu1 %v14999_v14  ;;  %14977 = vmatprep.subr.bf16.mxu0 %v15903_v47  ;;  %v9154_v14 = vld [vmem:[%s17915_s2 + $0x5a] sm:$0xff] }
 0x40e   : > { %12546 = vmatmul.mubr.f32.gmra.mrb[44].mxu0 %v9077_v9  ;;  %15001 = vmatprep.subr.bf16.mxu1 %v15903_v47  ;;  %v9155_v9 = vld [vmem:[%s17915_s2 + $0x62] sm:$0xff] }
 0x40f   : > { %12605 = vmatmul.mubr.f32.gmra.mrb[44].mxu1 %v18330_v20  ;;  %12548 = vmatprep.mubr.msk.f32.mxu0 %vm15904_vm2, %v15905_v58 }
 0x410   : > { %12607 = vmatprep.mubr.msk.f32.mxu1 %vm15904_vm2, %v15905_v58  ;;  %14979 = vmatpush3.bf16.msra.mxu0 %v14978_v10  ;;  %v9131_v10 = vld [vmem:[%s17915_s2 + $0x69] sm:$0xff] }
 0x411   : > { %15003 = vmatpush3.bf16.msra.mxu1 %v15002_v25  ;;  %14980 = vmatprep.subr.bf16.mxu0 %v15903_v47  ;;  %v9156_v25 = vld [vmem:[%s17915_s2 + $0x6a] sm:$0xff] }
 0x412   : > { %12549 = vmatmul.mubr.f32.gmra.mrb[46].mxu0 %v9078_v29  ;;  %15004 = vmatprep.subr.bf16.mxu1 %v15903_v47  ;;  %v9180_v29 = vld [vmem:[%s17915_s2 + $0x63] sm:$0xff] }
 0x413   : > { %12608 = vmatmul.mubr.f32.gmra.mrb[46].mxu1 %v18353_v21  ;;  %12551 = vmatprep.mubr.msk.f32.mxu0 %vm15904_vm2, %v15905_v58 }
 0x414   : > { %12610 = vmatprep.mubr.msk.f32.mxu1 %vm15904_vm2, %v15905_v58  ;;  %14982 = vmatpush3.bf16.msra.mxu0 %v14981_v31  ;;  %v9181_v31 = vld [vmem:[%s17915_s2 + $0x6b] sm:$0xff] }
 0x415   : > { %15006 = vmatpush3.bf16.msra.mxu1 %v15005_v32  ;;  %14983 = vmatprep.subr.bf16.mxu0 %v15903_v47  ;;  %v9177_v32 = vld [vmem:[%s17915_s2 + $0x4b] sm:$0xff] }
 0x416   : > { %12552 = vmatmul.mubr.f32.gmra.mrb[48].mxu0 %v9079_v37  ;;  %15007 = vmatprep.subr.bf16.mxu1 %v15903_v47 }
 0x417   : > { %12611 = vmatmul.mubr.f32.gmra.mrb[48].mxu1 %v18376_v17  ;;  %12554 = vmatprep.mubr.msk.f32.mxu0 %vm15904_vm2, %v15905_v58 }
 0x418   : > { %12613 = vmatprep.mubr.msk.f32.mxu1 %vm15904_vm2, %v15905_v58  ;;  %14985 = vmatpush3.bf16.msra.mxu0 %v14984_v59 }
 0x419   : > { %15009 = vmatpush3.bf16.msra.mxu1 %v15008_v5  ;;  %14986 = vmatprep.subr.bf16.mxu0 %v15903_v47 }
 0x41a   : > { %12555 = vmatmul.mubr.f32.gmra.mrb[50].mxu0 %v9080_v35  ;;  %15010 = vmatprep.subr.bf16.mxu1 %v15903_v47 }
 0x41b   : > { %12614 = vmatmul.mubr.f32.gmra.mrb[50].mxu1 %v18399_v38  ;;  %12557 = vmatprep.mubr.msk.f32.mxu0 %vm15904_vm2, %v15905_v58 }
 0x41c   : > { %12616 = vmatprep.mubr.msk.f32.mxu1 %vm15904_vm2, %v15905_v58  ;;  %14988 = vmatpush3.bf16.msra.mxu0 %v14987_v39 }
 0x41d   : > { %15012 = vmatpush3.bf16.msra.mxu1 %v15011_v48  ;;  %15013 = vmatprep.subr.bf16.mxu0 %v15903_v47 }
 0x41e   : > { %12558 = vmatmul.mubr.f32.gmra.mrb[52].mxu0 %v9081_v49  ;;  %15717 = vmatprep.subr.bf16.mxu1 %v15903_v47 }
 0x41f   : > { %12617 = vmatmul.mubr.f32.gmra.mrb[52].mxu1 %v18410_v24  ;;  %12651 = vmatprep.mubr.msk.f32.mxu0 %vm15904_vm2, %v15905_v58 }
 0x420   : > { %12710 = vmatprep.mubr.msk.f32.mxu1 %vm15904_vm2, %v15905_v58 }
 0x422   : > { %12652 = vmatmul.mubr.f32.vlgmr.msra.gmra.mrb[54].mxu0 %v18284_v55  ;;  %v9191_v55 = vld [vmem:[%s21073_s1 + $0x448] sm:$0xff] }
 0x423   : > { %12711 = vmatmul.mubr.f32.vlgmr.msra.gmra.mrb[54].mxu1 %v9148_v45  ;;  %15015 = vmatpush3.bf16.msra.mxu0 %v15014_v44  ;;  %v15026_v3 = vpack.c.bf16 %v9191_v55, %v9190_v63 }
 0x424   : > { %12654 = vmatprep.mubr.msk.f32.mxu0 %vm15904_vm2, %v15905_v58  ;;  %12713 = vmatprep.mubr.msk.f32.mxu1 %vm15904_vm2, %v15905_v58 }
 0x425   : > { %15725 = vmatpush3.bf16.msra.mxu1 %v15014_v44  ;;  %15016 = vmatprep.subr.bf16.mxu0 %v15903_v47 }
 0x426   : > { %12655 = vmatmul.mubr.f32.gmra.mrb[56].mxu0 %v18307_v30  ;;  %15718 = vmatprep.subr.bf16.mxu1 %v15903_v47  ;;  %v9194_v30 = vld [vmem:[%s21073_s1 + $0x460] sm:$0xff] }
 0x427   : > { %12714 = vmatmul.mubr.f32.gmra.mrb[56].mxu1 %v9149_v46  ;;  %15018 = vmatpush3.bf16.msra.mxu0 %v15017_v56  ;;  %v15032_v15 = vpack.c.bf16 %v9195_v2, %v9194_v30 }
 0x428   : > { %12657 = vmatprep.mubr.msk.f32.mxu0 %vm15904_vm2, %v15905_v58  ;;  %12716 = vmatprep.mubr.msk.f32.mxu1 %vm15904_vm2, %v15905_v58 }
 0x429   : > { %15726 = vmatpush3.bf16.msra.mxu1 %v15017_v56  ;;  %15019 = vmatprep.subr.bf16.mxu0 %v15903_v47 }
 0x42a   : > { %12658 = vmatmul.mubr.f32.gmra.mrb[58].mxu0 %v18330_v20  ;;  %15719 = vmatprep.subr.bf16.mxu1 %v15903_v47  ;;  %v15035_v20 = vpack.c.bf16 %v9197_v19, %v9196_v4 }
 0x42b   : > { %12717 = vmatmul.mubr.f32.gmra.mrb[58].mxu1 %v9150_v60  ;;  %15021 = vmatpush3.bf16.msra.mxu0 %v15020_v50 }
 0x42c   : > { %12660 = vmatprep.mubr.msk.f32.mxu0 %vm15904_vm2, %v15905_v58  ;;  %12719 = vmatprep.mubr.msk.f32.mxu1 %vm15904_vm2, %v15905_v58 }
 0x42d   : > { %15727 = vmatpush3.bf16.msra.mxu1 %v15020_v50  ;;  %15022 = vmatprep.subr.bf16.mxu0 %v15903_v47 }
 0x42e   : > { %12661 = vmatmul.mubr.f32.gmra.mrb[60].mxu0 %v18353_v21  ;;  %15720 = vmatprep.subr.bf16.mxu1 %v15903_v47  ;;  %v9176_v21 = vld [vmem:[%s17915_s2 + $0x43] sm:$0xff] }
 0x42f   : > { %12720 = vmatmul.mubr.f32.gmra.mrb[60].mxu1 %v9151_v61  ;;  %12663 = vmatprep.mubr.msk.f32.mxu0 %vm15904_vm2, %v15905_v58 }
 0x430   : > { %12722 = vmatprep.mubr.msk.f32.mxu1 %vm15904_vm2, %v15905_v58  ;;  %15024 = vmatpush3.bf16.msra.mxu0 %v15023_v53 }
 0x431   : > { %15728 = vmatpush3.bf16.msra.mxu1 %v15023_v53  ;;  %15025 = vmatprep.subr.bf16.mxu0 %v15903_v47 }
 0x432   : > { %12664 = vmatmul.mubr.f32.gmra.mrb[62].mxu0 %v18376_v17  ;;  %15721 = vmatprep.subr.bf16.mxu1 %v15903_v47 }
 0x433   : > { %12723 = vmatmul.mubr.f32.gmra.mrb[62].mxu1 %v9152_v11  ;;  %12666 = vmatprep.mubr.msk.f32.mxu0 %vm15904_vm2, %v15905_v58 }
 0x434   : > { %12725 = vmatprep.mubr.msk.f32.mxu1 %vm15904_vm2, %v15905_v58  ;;  %15027 = vmatpush3.bf16.msra.mxu0 %v15026_v3 }
 0x435   : > { %15729 = vmatpush3.bf16.msra.mxu1 %v15026_v3  ;;  %15028 = vmatprep.subr.bf16.mxu0 %v15903_v47 }
 0x436   : > { %12667 = vmatmul.mubr.f32.gmra.mrb[64].mxu0 %v18399_v38  ;;  %15722 = vmatprep.subr.bf16.mxu1 %v15903_v47 }
 0x437   : > { %12726 = vmatmul.mubr.f32.gmra.mrb[64].mxu1 %v9153_v0  ;;  %12669 = vmatprep.mubr.msk.f32.mxu0 %vm15904_vm2, %v15905_v58 }
 0x438   : > { %12728 = vmatprep.mubr.msk.f32.mxu1 %vm15904_vm2, %v15905_v58  ;;  %15030 = vmatpush3.bf16.msra.mxu0 %v15029_v8 }
 0x439   : > { %15730 = vmatpush3.bf16.msra.mxu1 %v15029_v8  ;;  %15031 = vmatprep.subr.bf16.mxu0 %v15903_v47 }
 0x43a   : > { %12670 = vmatmul.mubr.f32.gmra.mrb[66].mxu0 %v18410_v24  ;;  %15723 = vmatprep.subr.bf16.mxu1 %v15903_v47 }
 0x43b   : > { %12729 = vmatmul.mubr.f32.gmra.mrb[66].mxu1 %v9154_v14  ;;  %12672 = vmatprep.mubr.msk.f32.mxu0 %vm15904_vm2, %v15905_v58 }
 0x43c   : > { %12731 = vmatprep.mubr.msk.f32.mxu1 %vm15904_vm2, %v15905_v58  ;;  %15033 = vmatpush3.bf16.msra.mxu0 %v15032_v15 }
 0x43d   : > { %15731 = vmatpush3.bf16.msra.mxu1 %v15032_v15  ;;  %15034 = vmatprep.subr.bf16.mxu0 %v15903_v47 }
 0x43e   : > { %12673 = vmatmul.mubr.f32.gmra.mrb[68].mxu0 %v9130_v6  ;;  %15724 = vmatprep.subr.bf16.mxu1 %v15903_v47  ;;  %v9173_v47 = vld [vmem:[%s17915_s2 + $0x2b] sm:$0xff] }
 0x43f   : > { %12732 = vmatmul.mubr.f32.gmra.mrb[68].mxu1 %v9155_v9  ;;  %12675 = vmatprep.mubr.msk.f32.mxu0 %vm15904_vm2, %v15905_v58 }
 0x440   : > { %12734 = vmatprep.mubr.msk.f32.mxu1 %vm15904_vm2, %v15905_v58  ;;  %15036 = vmatpush3.bf16.msra.mxu0 %v15035_v20 }
 0x441   : > { %15732 = vmatpush3.bf16.msra.mxu1 %v15035_v20 }
 0x442   : > { %12676 = vmatmul.mubr.f32.gmra.mrb[70].mxu0 %v9131_v10 }
 0x443   : > { %12735 = vmatmul.mubr.f32.gmra.mrb[70].mxu1 %v9156_v25  ;;  %12769 = vmatprep.mubr.msk.f32.mxu0 %vm15904_vm2, %v15905_v58 }
 0x444   : > { %12784 = vmatprep.mubr.msk.f32.mxu1 %vm15904_vm2, %v15905_v58 }
 0x446   : > { %12770 = vmatmul.mubr.f32.vlgmr.msra.gmra.mrb[72].mxu0 %v9173_v47 }
 0x447   : > { %12785 = vmatmul.mubr.f32.vlgmr.msra.gmra.mrb[72].mxu1 %v9178_v16  ;;  %12772 = vmatprep.mubr.msk.f32.mxu0 %vm15904_vm2, %v15905_v58 }
 0x448   : > { %12787 = vmatprep.mubr.msk.f32.mxu1 %vm15904_vm2, %v15905_v58 }
 0x44a   : > { %12773 = vmatmul.mubr.f32.gmra.mrb[74].mxu0 %v9174_v7 }
 0x44b   : > { %12788 = vmatmul.mubr.f32.gmra.mrb[74].mxu1 %v9179_v12  ;;  %12775 = vmatprep.mubr.msk.f32.mxu0 %vm15904_vm2, %v15905_v58 }
 0x44c   : > { %12790 = vmatprep.mubr.msk.f32.mxu1 %vm15904_vm2, %v15905_v58 }
 0x44e   : > { %12776 = vmatmul.mubr.f32.gmra.mrb[76].mxu0 %v9175_v26 }
 0x44f   : > { %12791 = vmatmul.mubr.f32.gmra.mrb[76].mxu1 %v9180_v29  ;;  %12778 = vmatprep.mubr.msk.f32.mxu0 %vm15904_vm2, %v15905_v58 }
 0x450   : > { %12793 = vmatprep.mubr.msk.f32.mxu1 %vm15904_vm2, %v15905_v58 }
 0x452   : > { %12779 = vmatmul.mubr.f32.gmra.mrb[78].mxu0 %v9176_v21 }
 0x453   : > { %12794 = vmatmul.mubr.f32.gmra.mrb[78].mxu1 %v9181_v31  ;;  %12781 = vmatprep.mubr.msk.f32.mxu0 %vm15904_vm2, %v15905_v58 }
 0x456   : > { %12782 = vmatmul.mubr.f32.gmra.mrb[80].mxu0 %v9177_v32 }
 0x489   : > { %v3039_v33 = vpop.f32.mrb[0].mxu0 }
 0x48a   : > { %v12299_v27 = vpop.f32.mrb[1].mxu0  ;;  %v3149_v28 = vpop.f32.mrb[0].mxu1 }
 0x48b   : > { %v3150_v36 = vadd.f32 %v3149_v28, %v3039_v33  ;;  %v12358_v37 = vpop.f32.mrb[1].mxu1 }
 0x48d   : > { %v3044_v17 = vpop.f32.mrb[2].mxu0 }
 0x48e   : > { %v12302_v59 = vpop.f32.mrb[3].mxu0  ;;  %v3154_v5 = vpop.f32.mrb[2].mxu1 }
 0x48f   : > { %v3155_v40 = vadd.f32 %v3154_v5, %v3044_v17  ;;  %v12361_v42 = vpop.f32.mrb[3].mxu1 }
 0x491   : > { %v3049_v43 = vpop.f32.mrb[4].mxu0 }
 0x492   : > { %v12305_v34 = vpop.f32.mrb[5].mxu0  ;;  %v3159_v35 = vpop.f32.mrb[4].mxu1 }
 0x493   : > { %v3160_v38 = vadd.f32 %v3159_v35, %v3049_v43  ;;  %v12364_v39 = vpop.f32.mrb[5].mxu1 }
 0x495   : > { %v3054_v48 = vpop.f32.mrb[6].mxu0 }
 0x496   : > { %v12308_v49 = vpop.f32.mrb[7].mxu0  ;;  %v3164_v58 = vpop.f32.mrb[6].mxu1 }
 0x497   : > { %v3165_v24 = vadd.f32 %v3164_v58, %v3054_v48  ;;  %v12367_v18 = vpop.f32.mrb[7].mxu1 }
 0x499   : > { %v3059_v51 = vpop.f32.mrb[8].mxu0 }
 0x49a   : > { %v12311_v44 = vpop.f32.mrb[9].mxu0  ;;  %v3169_v45 = vpop.f32.mrb[8].mxu1 }
 0x49b   : > { %v3170_v23 = vadd.f32 %v3169_v45, %v3059_v51  ;;  %v12370_v22 = vpop.f32.mrb[9].mxu1 }
 0x49d   : > { %v3064_v56 = vpop.f32.mrb[10].mxu0 }
 0x49e   : > { %v12314_v46 = vpop.f32.mrb[11].mxu0  ;;  %v3174_v57 = vpop.f32.mrb[10].mxu1 }
 0x49f   : > { %v3175_v41 = vadd.f32 %v3174_v57, %v3064_v56  ;;  %v12373_v50 = vpop.f32.mrb[11].mxu1 }
 0x4a1   : > { %v3069_v60 = vpop.f32.mrb[12].mxu0 }
 0x4a2   : > { %v12317_v52 = vpop.f32.mrb[13].mxu0  ;;  %v3179_v54 = vpop.f32.mrb[12].mxu1 }
 0x4a3   : > { %v3180_v61 = vadd.f32 %v3179_v54, %v3069_v60  ;;  %v12376_v53 = vpop.f32.mrb[13].mxu1 }
 0x4a5   : > { %v3074_v63 = vpop.f32.mrb[14].mxu0 }
 0x4a6   : > { %v12320_v55 = vpop.f32.mrb[15].mxu0  ;;  %v3184_v11 = vpop.f32.mrb[14].mxu1 }
 0x4a7   : > { %v3185_v3 = vadd.f32 %v3184_v11, %v3074_v63  ;;  %v12379_v62 = vpop.f32.mrb[15].mxu1 }
 0x4a9   : > { %v3079_v13 = vpop.f32.mrb[16].mxu0 }
 0x4aa   : > { %v12323_v0 = vpop.f32.mrb[17].mxu0  ;;  %v3189_v8 = vpop.f32.mrb[16].mxu1 }
 0x4ab   : > { %v3190_v30 = vadd.f32 %v3189_v8, %v3079_v13  ;;  %v12382_v2 = vpop.f32.mrb[17].mxu1 }
 0x4ad   : > { %v3287_v14 = vpop.f32.mrb[18].mxu0 }
 0x4ae   : > { %v3331_v15 = vadd.f32 %v3287_v14, %v3150_v36  ;;  %v12417_v4 = vpop.f32.mrb[19].mxu0  ;;  %v3434_v19 = vpop.f32.mrb[18].mxu1 }
 0x4af   : > { %v12476_v6 = vpop.f32.mrb[19].mxu1 }
 0x4b0   : > { %v3478_v9 = vadd.f32 %v3434_v19, %v3331_v15 }
 0x4b1   : > { %v3292_v20 = vpop.f32.mrb[20].mxu0 }
 0x4b2   : > { %v3332_v10 = vadd.f32 %v3292_v20, %v3155_v40  ;;  %v12420_v25 = vpop.f32.mrb[21].mxu0  ;;  %v3439_v47 = vpop.f32.mrb[20].mxu1 }
 0x4b3   : > { %v12479_v16 = vpop.f32.mrb[21].mxu1 }
 0x4b4   : > { %v3479_v7 = vadd.f32 %v3439_v47, %v3332_v10 }
 0x4b5   : > { %v3297_v12 = vpop.f32.mrb[22].mxu0 }
 0x4b6   : > { %v3333_v26 = vadd.f32 %v3297_v12, %v3160_v38  ;;  %v12423_v29 = vpop.f32.mrb[23].mxu0  ;;  %v3444_v21 = vpop.f32.mrb[22].mxu1 }
 0x4b7   : > { %v12482_v31 = vpop.f32.mrb[23].mxu1 }
 0x4b8   : > { %v3480_v32 = vadd.f32 %v3444_v21, %v3333_v26 }
 0x4b9   : > { %v3302_v33 = vpop.f32.mrb[24].mxu0 }
 0x4ba   : > { %v3334_v27 = vadd.f32 %v3302_v33, %v3165_v24  ;;  %v12426_v28 = vpop.f32.mrb[25].mxu0  ;;  %v3449_v36 = vpop.f32.mrb[24].mxu1 }
 0x4bb   : > { %v12485_v37 = vpop.f32.mrb[25].mxu1 }
 0x4bc   : > { %v3481_v17 = vadd.f32 %v3449_v36, %v3334_v27 }
 0x4bd   : > { %v3307_v59 = vpop.f32.mrb[26].mxu0 }
 0x4be   : > { %v3335_v5 = vadd.f32 %v3307_v59, %v3170_v23  ;;  %v12429_v42 = vpop.f32.mrb[27].mxu0  ;;  %v3454_v40 = vpop.f32.mrb[26].mxu1 }
 0x4bf   : > { %v12488_v43 = vpop.f32.mrb[27].mxu1 }
 0x4c0   : > { %v3482_v34 = vadd.f32 %v3454_v40, %v3335_v5 }
 0x4c1   : > { %v3312_v35 = vpop.f32.mrb[28].mxu0 }
 0x4c2   : > { %v3336_v39 = vadd.f32 %v3312_v35, %v3175_v41  ;;  %v12432_v48 = vpop.f32.mrb[29].mxu0  ;;  %v3459_v38 = vpop.f32.mrb[28].mxu1 }
 0x4c3   : > { %v12491_v49 = vpop.f32.mrb[29].mxu1 }
 0x4c4   : > { %v3483_v58 = vadd.f32 %v3459_v38, %v3336_v39 }
 0x4c5   : > { %v3317_v18 = vpop.f32.mrb[30].mxu0 }
 0x4c6   : > { %v3337_v51 = vadd.f32 %v3317_v18, %v3180_v61  ;;  %v12435_v44 = vpop.f32.mrb[31].mxu0  ;;  %v3464_v24 = vpop.f32.mrb[30].mxu1 }
 0x4c7   : > { %v12494_v45 = vpop.f32.mrb[31].mxu1 }
 0x4c8   : > { %v3484_v22 = vadd.f32 %v3464_v24, %v3337_v51 }
 0x4c9   : > { %v3322_v56 = vpop.f32.mrb[32].mxu0 }
 0x4ca   : > { %v3338_v46 = vadd.f32 %v3322_v56, %v3185_v3  ;;  %v12438_v57 = vpop.f32.mrb[33].mxu0  ;;  %v3469_v23 = vpop.f32.mrb[32].mxu1 }
 0x4cb   : > { %v12497_v50 = vpop.f32.mrb[33].mxu1 }
 0x4cc   : > { %v3485_v60 = vadd.f32 %v3469_v23, %v3338_v46 }
 0x4cd   : > { %v3327_v52 = vpop.f32.mrb[34].mxu0 }
 0x4ce   : > { %v3339_v54 = vadd.f32 %v3327_v52, %v3190_v30  ;;  %v12441_v53 = vpop.f32.mrb[35].mxu0  ;;  %v3474_v41 = vpop.f32.mrb[34].mxu1 }
 0x4cf   : > { %v12500_v63 = vpop.f32.mrb[35].mxu1 }
 0x4d0   : > { %v3486_v55 = vadd.f32 %v3474_v41, %v3339_v54 }
 0x4d1   : > { %v3581_v11 = vpop.f32.mrb[36].mxu0 }
 0x4d2   : > { %v3625_v62 = vadd.f32 %v3581_v11, %v3478_v9  ;;  %v12535_v13 = vpop.f32.mrb[37].mxu0  ;;  %v3728_v61 = vpop.f32.mrb[36].mxu1 }
 0x4d3   : > { %v12594_v0 = vpop.f32.mrb[37].mxu1 }
 0x4d4   : > { %v3772_v8 = vadd.f32 %v3728_v61, %v3625_v62 }
 0x4d5   : > { %v3586_v2 = vpop.f32.mrb[38].mxu0 }
 0x4d6   : > { %v3626_v14 = vadd.f32 %v3586_v2, %v3479_v7  ;;  %v12538_v15 = vpop.f32.mrb[39].mxu0  ;;  %v3733_v3 = vpop.f32.mrb[38].mxu1 }
 0x4d7   : > { %v12597_v4 = vpop.f32.mrb[39].mxu1 }
 0x4d8   : > { %v3773_v19 = vadd.f32 %v3733_v3, %v3626_v14 }
 0x4d9   : > { %v3591_v6 = vpop.f32.mrb[40].mxu0 }
 0x4da   : > { %v3627_v20 = vadd.f32 %v3591_v6, %v3480_v32  ;;  %v12541_v10 = vpop.f32.mrb[41].mxu0  ;;  %v3738_v30 = vpop.f32.mrb[40].mxu1 }
 0x4db   : > { %v12600_v25 = vpop.f32.mrb[41].mxu1 }
 0x4dc   : > { %v3774_v47 = vadd.f32 %v3738_v30, %v3627_v20 }
 0x4dd   : > { %v3596_v16 = vpop.f32.mrb[42].mxu0 }
 0x4de   : > { %v3628_v12 = vadd.f32 %v3596_v16, %v3481_v17  ;;  %v12544_v26 = vpop.f32.mrb[43].mxu0  ;;  %v3743_v9 = vpop.f32.mrb[42].mxu1 }
 0x4df   : > { %v12603_v29 = vpop.f32.mrb[43].mxu1 }
 0x4e0   : > { %v3775_v21 = vadd.f32 %v3743_v9, %v3628_v12 }
 0x4e1   : > { %v3601_v31 = vpop.f32.mrb[44].mxu0 }
 0x4e2   : > { %v3629_v33 = vadd.f32 %v3601_v31, %v3482_v34  ;;  %v12547_v27 = vpop.f32.mrb[45].mxu0  ;;  %v3748_v7 = vpop.f32.mrb[44].mxu1 }
 0x4e3   : > { %v12606_v28 = vpop.f32.mrb[45].mxu1 }
 0x4e4   : > { %v3776_v36 = vadd.f32 %v3748_v7, %v3629_v33 }
 0x4e5   : > { %v3606_v37 = vpop.f32.mrb[46].mxu0 }
 0x4e6   : > { %v3630_v59 = vadd.f32 %v3606_v37, %v3483_v58  ;;  %v12550_v5 = vpop.f32.mrb[47].mxu0  ;;  %v3753_v32 = vpop.f32.mrb[46].mxu1 }
 0x4e7   : > { %v12609_v42 = vpop.f32.mrb[47].mxu1 }
 0x4e8   : > { %v3777_v40 = vadd.f32 %v3753_v32, %v3630_v59 }
 0x4e9   : > { %v3611_v43 = vpop.f32.mrb[48].mxu0 }
 0x4ea   : > { %v3631_v35 = vadd.f32 %v3611_v43, %v3484_v22  ;;  %v12553_v39 = vpop.f32.mrb[49].mxu0  ;;  %v3758_v17 = vpop.f32.mrb[48].mxu1 }
 0x4eb   : > { %v12612_v48 = vpop.f32.mrb[49].mxu1 }
 0x4ec   : > { %v3778_v38 = vadd.f32 %v3758_v17, %v3631_v35 }
 0x4ed   : > { %v3616_v49 = vpop.f32.mrb[50].mxu0 }
 0x4ee   : > { %v3632_v18 = vadd.f32 %v3616_v49, %v3485_v60  ;;  %v12556_v51 = vpop.f32.mrb[51].mxu0  ;;  %v3763_v34 = vpop.f32.mrb[50].mxu1 }
 0x4ef   : > { %v12615_v44 = vpop.f32.mrb[51].mxu1 }
 0x4f0   : > { %v3779_v24 = vadd.f32 %v3763_v34, %v3632_v18 }
 0x4f1   : > { %v3621_v45 = vpop.f32.mrb[52].mxu0 }
 0x4f2   : > { %v3633_v56 = vadd.f32 %v3621_v45, %v3486_v55  ;;  %v12559_v46 = vpop.f32.mrb[53].mxu0  ;;  %v3768_v58 = vpop.f32.mrb[52].mxu1 }
 0x4f3   : > { %v12618_v57 = vpop.f32.mrb[53].mxu1 }
 0x4f4   : > { %v3780_v23 = vadd.f32 %v3768_v58, %v3633_v56  ;;  %v4247_v57 = vld [vmem:[%s18568_s15] sm:$0xff] }
 0x4f5   : > { %v3875_v50 = vpop.f32.mrb[54].mxu0 }
 0x4f6   : > { %v3919_v52 = vadd.f32 %v3875_v50, %v3772_v8  ;;  %v12653_v54 = vpop.f32.mrb[55].mxu0  ;;  %v4022_v22 = vpop.f32.mrb[54].mxu1 }
 0x4f7   : > { %v12712_v53 = vpop.f32.mrb[55].mxu1  ;;  %v4252_v54 = vld [vmem:[%s18568_s15 + $0x28] sm:$0xff] }
 0x4f8   : > { %v4066_v41 = vadd.f32 %v4022_v22, %v3919_v52 }
 0x4f9   : > { %v3880_v63 = vpop.f32.mrb[56].mxu0 }
 0x4fa   : > { %v3920_v11 = vadd.f32 %v3880_v63, %v3773_v19  ;;  %v12656_v62 = vpop.f32.mrb[57].mxu0  ;;  %v4027_v60 = vpop.f32.mrb[56].mxu1 }
 0x4fb   : > { %v12715_v13 = vpop.f32.mrb[57].mxu1 }
 0x4fc   : > { %v4067_v61 = vadd.f32 %v4027_v60, %v3920_v11 }
 0x4fd   : > { %v3885_v0 = vpop.f32.mrb[58].mxu0 }
 0x4fe   : > { %v3921_v2 = vadd.f32 %v3885_v0, %v3774_v47  ;;  %v12659_v14 = vpop.f32.mrb[59].mxu0  ;;  %v4032_v55 = vpop.f32.mrb[58].mxu1 }
 0x4ff   : > { %v12718_v15 = vpop.f32.mrb[59].mxu1 }
 0x500   : > { %v18558_v3 = vadd.f32 %v4032_v55, %v3921_v2  ;;  %v4248_v2 = vld [vmem:[%s18568_s15 + $0x8] sm:$0xff]  ;;  %v4253_v15 = vld [vmem:[%s18568_s15 + $0x30] sm:$0xff] }
 0x501   : > { %v3890_v4 = vpop.f32.mrb[60].mxu0 }
 0x502   : > { %v3922_v6 = vadd.f32 %v3890_v4, %v3775_v21  ;;  %v12662_v8 = vpop.f32.mrb[61].mxu0  ;;  %v4037_v20 = vpop.f32.mrb[60].mxu1 }
 0x503   : > { %v12721_v10 = vpop.f32.mrb[61].mxu1 }
 0x504   : > { %v18560_v30 = vadd.f32 %v4037_v20, %v3922_v6 }
 0x505   : > { %v3895_v25 = vpop.f32.mrb[62].mxu0 }
 0x506   : > { %v3923_v19 = vadd.f32 %v3895_v25, %v3776_v36  ;;  %v12665_v16 = vpop.f32.mrb[63].mxu0  ;;  %v4042_v12 = vpop.f32.mrb[62].mxu1 }
 0x507   : > { %v12724_v26 = vpop.f32.mrb[63].mxu1 }
 0x508   : > { %v18562_v9 = vadd.f32 %v4042_v12, %v3923_v19  ;;  %v4249_v26 = vld [vmem:[%s18568_s15 + $0x10] sm:$0xff] }
 0x509   : > { %v3900_v47 = vpop.f32.mrb[64].mxu0 }
 0x50a   : > { %v3924_v29 = vadd.f32 %v3900_v47, %v3777_v40  ;;  %v12668_v31 = vpop.f32.mrb[65].mxu0  ;;  %v4047_v33 = vpop.f32.mrb[64].mxu1 }
 0x50b   : > { %v12727_v27 = vpop.f32.mrb[65].mxu1 }
 0x50c   : > { %v4071_v7 = vadd.f32 %v4047_v33, %v3924_v29 }
 0x50d   : > { %v3905_v28 = vpop.f32.mrb[66].mxu0 }
 0x50e   : > { %v3925_v21 = vadd.f32 %v3905_v28, %v3778_v38  ;;  %v12671_v37 = vpop.f32.mrb[67].mxu0  ;;  %v4052_v59 = vpop.f32.mrb[66].mxu1 }
 0x50f   : > { %v12730_v5 = vpop.f32.mrb[67].mxu1 }
 0x510   : > { %v4072_v32 = vadd.f32 %v4052_v59, %v3925_v21 }
 0x511   : > { %v3910_v42 = vpop.f32.mrb[68].mxu0 }
 0x512   : > { %v3926_v36 = vadd.f32 %v3910_v42, %v3779_v24  ;;  %v12674_v43 = vpop.f32.mrb[69].mxu0  ;;  %v4057_v35 = vpop.f32.mrb[68].mxu1  ;;  %v4250_v42 = vld [vmem:[%s18568_s15 + $0x18] sm:$0xff] }
 0x513   : > { %v12733_v39 = vpop.f32.mrb[69].mxu1 }
 0x514   : > { %v4073_v17 = vadd.f32 %v4057_v35, %v3926_v36  ;;  %v4255_v35 = vld [vmem:[%s18568_s15 + $0x40] sm:$0xff] }
 0x515   : > { %v3915_v48 = vpop.f32.mrb[70].mxu0 }
 0x516   : > { %v3927_v49 = vadd.f32 %v3915_v48, %v3780_v23  ;;  %v12677_v40 = vpop.f32.mrb[71].mxu0  ;;  %v4062_v18 = vpop.f32.mrb[70].mxu1 }
 0x517   : > { %v12736_v51 = vpop.f32.mrb[71].mxu1 }
 0x518   : > { %v4074_v34 = vadd.f32 %v4062_v18, %v3927_v49  ;;  %v4251_v51 = vld [vmem:[%s18568_s15 + $0x20] sm:$0xff] }
 0x519   : > { %v4169_v44 = vpop.f32.mrb[72].mxu0 }
 0x51a   : > { %v4213_v45 = vadd.f32 %v4169_v44, %v4066_v41  ;;  %v4194_v38 = vpop.f32.mrb[72].mxu1  ;;  %v12771_v24 = vpop.f32.mrb[73].mxu0 }
 0x51b   : > { %v4218_v56 = vadd.f32 %v4194_v38, %v4071_v7  ;;  %v12786_v46 = vpop.f32.mrb[73].mxu1 }
 0x51c   : > { %v4228_v58 = vadd.f32 %v16117_v1, %v4213_v45 }
 0x51d   : > { %v4233_v23 = vadd.f32 %v16117_v1, %v4218_v56  ;;  %v4174_v50 = vpop.f32.mrb[74].mxu0 }
 0x51e   : > { %v4237_v52 = vmax.f32 %v4228_v58, 0.0  ;;  %v4214_v22 = vadd.f32 %v4174_v50, %v4067_v61  ;;  %v4199_v53 = vpop.f32.mrb[74].mxu1  ;;  %v12774_v41 = vpop.f32.mrb[75].mxu0 }
 0x51f   : > { %v4242_v63 = vmax.f32 %v4233_v23, 0.0  ;;  %v4219_v11 = vadd.f32 %v4199_v53, %v4072_v32  ;;  %v12789_v62 = vpop.f32.mrb[75].mxu1 }
 0x520   : > { %v4256_v60 = vmul.f32 %v4247_v57, %v4237_v52  ;;  %v4229_v13 = vadd.f32 %v16117_v1, %v4214_v22 }
 0x521   : > { %v4261_v0 = vmul.f32 %v4252_v54, %v4242_v63  ;;  %v4234_v14 = vadd.f32 %v16117_v1, %v4219_v11  ;;  %v4179_v55 = vpop.f32.mrb[76].mxu0 }
 0x522   : > { %9198 = vst [vmem:[%s18578_s16 + $0x18] sm:$0xff] %v4256_v60  ;;  %v4238_v61 = vmax.f32 %v4229_v13, 0.0  ;;  %v4215_v4 = vadd.f32 %v4179_v55, %v18558_v3  ;;  %v4204_v6 = vpop.f32.mrb[76].mxu1  ;;  %v12777_v8 = vpop.f32.mrb[77].mxu0  ;;  %v4254_v3 = vld [vmem:[%s18568_s15 + $0x38] sm:$0xff] }
 0x523   : > { %9203 = vst [vmem:[%s18578_s16 + $0x40] sm:$0xff] %v4261_v0  ;;  %v4243_v20 = vmax.f32 %v4234_v14, 0.0  ;;  %v4220_v10 = vadd.f32 %v4204_v6, %v4073_v17  ;;  %v12792_v25 = vpop.f32.mrb[77].mxu1 }
 0x524   : > { %v4257_v19 = vmul.f32 %v4248_v2, %v4238_v61  ;;  %v4230_v16 = vadd.f32 %v16117_v1, %v4215_v4 }
 0x525   : > { %v4262_v12 = vmul.f32 %v4253_v15, %v4243_v20  ;;  %v4235_v47 = vadd.f32 %v16117_v1, %v4220_v10  ;;  %v4184_v29 = vpop.f32.mrb[78].mxu0 }
 0x526   : > { %9199 = vst [vmem:[%s18578_s16 + $0x20] sm:$0xff] %v4257_v19  ;;  %v4239_v31 = vmax.f32 %v4230_v16, 0.0  ;;  %v4216_v33 = vadd.f32 %v4184_v29, %v18560_v30  ;;  %v4209_v27 = vpop.f32.mrb[78].mxu1  ;;  %v12780_v7 = vpop.f32.mrb[79].mxu0 }
 0x527   : > { %9204 = vst [vmem:[%s18578_s16 + $0x48] sm:$0xff] %v4262_v12  ;;  %v4244_v28 = vmax.f32 %v4235_v47, 0.0  ;;  %v4221_v21 = vadd.f32 %v4209_v27, %v4074_v34  ;;  %v12795_v37 = vpop.f32.mrb[79].mxu1 }
 0x528   : > { %v4258_v59 = vmul.f32 %v4249_v26, %v4239_v31  ;;  %v4231_v5 = vadd.f32 %v16117_v1, %v4216_v33 }
 0x529   : > { %v4263_v32 = vmul.f32 %v4254_v3, %v4244_v28  ;;  %v4236_v36 = vadd.f32 %v16117_v1, %v4221_v21  ;;  %v4189_v43 = vpop.f32.mrb[80].mxu0 }
 0x52a   : > { %9200 = vst [vmem:[%s18578_s16 + $0x28] sm:$0xff] %v4258_v59  ;;  %v4240_v30 = vmax.f32 %v4231_v5, 0.0  ;;  %v4217_v39 = vadd.f32 %v4189_v43, %v18562_v9  ;;  %v12783_v17 = vpop.f32.mrb[81].mxu0 }
 0x52b   : > { %9205 = vst [vmem:[%s18578_s16 + $0x50] sm:$0xff] %v4263_v32  ;;  %v4245_v48 = vmax.f32 %v4236_v36, 0.0 }
 0x52c   : > { %v4259_v49 = vmul.f32 %v4250_v42, %v4240_v30  ;;  %v4232_v40 = vadd.f32 %v16117_v1, %v4217_v39  ;;  %2915 = sbr.rel (!%p2913_p2) target bundleno = 916 (0x394), region = 213 }
 0x52d   : > { %v4264_v18 = vmul.f32 %v4255_v35, %v4245_v48 }
 0x52e   : > { %9201 = vst [vmem:[%s18578_s16 + $0x30] sm:$0xff] %v4259_v49  ;;  %v4241_v34 = vmax.f32 %v4232_v40, 0.0 }
 0x52f   : > { %9206 = vst [vmem:[%s18578_s16 + $0x58] sm:$0xff] %v4264_v18 }
 0x530   : > { %v4260_v44 = vmul.f32 %v4251_v51, %v4241_v34 }
 0x532   : > { %9202 = vst [vmem:[%s18578_s16 + $0x38] sm:$0xff] %v4260_v44 }
 0x533 LB: > { %v9225_v9 = vld [vmem:[%s21073_s1 + $0x80] sm:$0xff]  ;;  %v9226_v45 = vld [vmem:[%s21073_s1 + $0x88] sm:$0xff]  ;;  %v15906_v24 = vmov 0.0|0.0   ;;  %v9227_v58 = vld [vmem:[%s21073_s1 + $0x90] sm:$0xff]  ;;  %vm15907_vm3 = vmmov 0   ;;  %v15908_v54 = vmov 0.0   ;;  %s15886_s25 = sphi %s18606_s25, %s4280_s25  }
 0x534   : > { %v4293_v38 = vld [vmem:[%s21073_s1] sm:$0xff]  ;;  %15037 = vmatprep.subr.bf16.mxu0 %v15906_v24  ;;  %15061 = vmatprep.subr.bf16.mxu1 %v15906_v24  ;;  %v15038_v56 = vpack.c.bf16 %v9226_v45, %v9225_v9  ;;  %v4294_v46 = vld [vmem:[%s21073_s1 + $0x8] sm:$0xff]  ;;  %v9228_v57 = vld [vmem:[%s21073_s1 + $0x98] sm:$0xff]  ;;  %s18719_s0 = smul.u32 72, %s15886_s25  ;;  %s4280_s25 = sadd.s32 1, %s15886_s25  }
 0x535   : > { %v15062_v23 = vpack.c.bf16 %v4294_v46, %v4293_v38  ;;  %v4295_v50 = vld [vmem:[%s21073_s1 + $0x10] sm:$0xff]  ;;  %v4296_v52 = vld [vmem:[%s21073_s1 + $0x18] sm:$0xff]  ;;  %12828 = vmatprep.mubr.msk.f32.mxu0 %vm15907_vm3, %v15908_v54  ;;  %12887 = vmatprep.mubr.msk.f32.mxu1 %vm15907_vm3, %v15908_v54  ;;  %v15041_v22 = vpack.c.bf16 %v9228_v57, %v9227_v58  ;;  %v9229_v41 = vld [vmem:[%s21073_s1 + $0xa0] sm:$0xff]  ;;  %p4277_p3 = scmp.ge.s32.totalorder %s4280_s25, 9  }
 0x536   : > { %15039 = vmatpush3.bf16.msra.mxu0 %v15038_v56  ;;  %v15065_v53 = vpack.c.bf16 %v4296_v52, %v4295_v50  ;;  %v9230_v63 = vld [vmem:[%s21073_s1 + $0xa8] sm:$0xff]  ;;  %v4297_v11 = vld [vmem:[%s21073_s1 + $0x20] sm:$0xff]  ;;  %v9231_v0 = vld [vmem:[%s21073_s1 + $0xb0] sm:$0xff]  ;;  %s18743_s10 = scalar_lea.vmem [#allocation2], %s18719_s0  ;;  %s19396_s27 = scalar_lea.vmem %s21075_s3, %s18719_s0 }
 0x537   : > { %15063 = vmatpush3.bf16.msra.mxu1 %v15062_v23  ;;  %15040 = vmatprep.subr.bf16.mxu0 %v15906_v24  ;;  %v4298_v62 = vld [vmem:[%s21073_s1 + $0x28] sm:$0xff]  ;;  %v15044_v60 = vpack.c.bf16 %v9230_v63, %v9229_v41  ;;  %v9232_v2 = vld [vmem:[%s21073_s1 + $0xb8] sm:$0xff]  ;;  %v4299_v14 = vld [vmem:[%s21073_s1 + $0x30] sm:$0xff]  ;;  %s19404_s28 = scalar_lea.vmem [#allocation3], %s18719_s0  ;;  %s19434_s0 = smov (%p4277_p3), 0  }
 0x538   : > { %15064 = vmatprep.subr.bf16.mxu1 %v15906_v24  ;;  %v15068_v13 = vpack.c.bf16 %v4298_v62, %v4297_v11  ;;  %v4300_v55 = vld [vmem:[%s21073_s1 + $0x38] sm:$0xff]  ;;  %v15047_v61 = vpack.c.bf16 %v9232_v2, %v9231_v0  ;;  %v9233_v4 = vld [vmem:[%s21073_s1 + $0xc0] sm:$0xff]  ;;  %v9234_v6 = vld [vmem:[%s21073_s1 + $0xc8] sm:$0xff] }
 0x539   : > { %v15071_v15 = vpack.c.bf16 %v4300_v55, %v4299_v14  ;;  %v4301_v8 = vld [vmem:[%s21073_s1 + $0x40] sm:$0xff]  ;;  %v4302_v20 = vld [vmem:[%s21073_s1 + $0x48] sm:$0xff]  ;;  %v15050_v10 = vpack.c.bf16 %v9234_v6, %v9233_v4  ;;  %v9235_v19 = vld [vmem:[%s21073_s1 + $0xd0] sm:$0xff] }
 0x53a   : > { %15042 = vmatpush3.bf16.msra.mxu0 %v15041_v22  ;;  %v15074_v25 = vpack.c.bf16 %v4302_v20, %v4301_v8  ;;  %v9236_v16 = vld [vmem:[%s21073_s1 + $0xd8] sm:$0xff]  ;;  %v4303_v12 = vld [vmem:[%s21073_s1 + $0x50] sm:$0xff]  ;;  %v9237_v31 = vld [vmem:[%s21073_s1 + $0xe0] sm:$0xff] }
 0x53b   : > { %15066 = vmatpush3.bf16.msra.mxu1 %v15065_v53  ;;  %15043 = vmatprep.subr.bf16.mxu0 %v15906_v24  ;;  %v4304_v26 = vld [vmem:[%s21073_s1 + $0x58] sm:$0xff]  ;;  %v15053_v47 = vpack.c.bf16 %v9236_v16, %v9235_v19  ;;  %v9238_v3 = vld [vmem:[%s21073_s1 + $0xe8] sm:$0xff]  ;;  %v4305_v33 = vld [vmem:[%s21073_s1 + $0x60] sm:$0xff] }
 0x53c   : > { %15067 = vmatprep.subr.bf16.mxu1 %v15906_v24  ;;  %v15077_v29 = vpack.c.bf16 %v4304_v26, %v4303_v12  ;;  %v4306_v27 = vld [vmem:[%s21073_s1 + $0x68] sm:$0xff]  ;;  %v15056_v7 = vpack.c.bf16 %v9238_v3, %v9237_v31  ;;  %v9239_v21 = vld [vmem:[%s21073_s1 + $0xf0] sm:$0xff]  ;;  %v9240_v37 = vld [vmem:[%s21073_s1 + $0xf8] sm:$0xff] }
 0x53d   : > { %v15080_v28 = vpack.c.bf16 %v4306_v27, %v4305_v33  ;;  %v4307_v59 = vld [vmem:[%s21073_s1 + $0x70] sm:$0xff]  ;;  %v4308_v5 = vld [vmem:[%s21073_s1 + $0x78] sm:$0xff]  ;;  %v15059_v32 = vpack.c.bf16 %v9240_v37, %v9239_v21  ;;  %v9250_v36 = vld [vmem:[%s21073_s1 + $0x100] sm:$0xff] }
 0x53e   : > { %15045 = vmatpush3.bf16.msra.mxu0 %v15044_v60  ;;  %v15083_v42 = vpack.c.bf16 %v4308_v5, %v4307_v59  ;;  %v9251_v43 = vld [vmem:[%s21073_s1 + $0x108] sm:$0xff]  ;;  %v9275_v30 = vld [vmem:[%s21073_s1 + $0x180] sm:$0xff]  ;;  %v9252_v49 = vld [vmem:[%s21073_s1 + $0x110] sm:$0xff] }
 0x53f   : > { %15069 = vmatpush3.bf16.msra.mxu1 %v15068_v13  ;;  %15046 = vmatprep.subr.bf16.mxu0 %v15906_v24  ;;  %v9276_v35 = vld [vmem:[%s21073_s1 + $0x188] sm:$0xff]  ;;  %v15086_v17 = vpack.c.bf16 %v9251_v43, %v9250_v36  ;;  %v9253_v40 = vld [vmem:[%s21073_s1 + $0x118] sm:$0xff]  ;;  %v9277_v51 = vld [vmem:[%s21073_s1 + $0x190] sm:$0xff] }
 0x540   : > { %15070 = vmatprep.subr.bf16.mxu1 %v15906_v24  ;;  %v9216_v39 = vld [vmem:[%s18743_s10 + $0x6] sm:$0xff]  ;;  %v15110_v18 = vpack.c.bf16 %v9276_v35, %v9275_v30  ;;  %v9278_v34 = vld [vmem:[%s21073_s1 + $0x198] sm:$0xff]  ;;  %v9217_v44 = vld [vmem:[%s18743_s10 + $0xe] sm:$0xff]  ;;  %v15089_v9 = vpack.c.bf16 %v9253_v40, %v9252_v49 }
 0x541   : > { %v9207_v48 = vld [vmem:[%s18743_s10 + $0x5] sm:$0xff]  ;;  %v9208_v45 = vld [vmem:[%s18743_s10 + $0xd] sm:$0xff]  ;;  %v15113_v46 = vpack.c.bf16 %v9278_v34, %v9277_v51  ;;  %v9218_v23 = vld [vmem:[%s18743_s10 + $0x16] sm:$0xff] }
 0x542   : > { %15048 = vmatpush3.bf16.msra.mxu0 %v15047_v61  ;;  %v9254_v38 = vld [vmem:[%s21073_s1 + $0x120] sm:$0xff]  ;;  %v9255_v56 = vld [vmem:[%s21073_s1 + $0x128] sm:$0xff]  ;;  %v9209_v52 = vld [vmem:[%s18743_s10 + $0x15] sm:$0xff] }
 0x543   : > { %15072 = vmatpush3.bf16.msra.mxu1 %v15071_v15  ;;  %15049 = vmatprep.subr.bf16.mxu0 %v15906_v24  ;;  %v9279_v58 = vld [vmem:[%s21073_s1 + $0x1a0] sm:$0xff]  ;;  %v9280_v57 = vld [vmem:[%s21073_s1 + $0x1a8] sm:$0xff]  ;;  %v15092_v50 = vpack.c.bf16 %v9255_v56, %v9254_v38  ;;  %v9256_v53 = vld [vmem:[%s21073_s1 + $0x130] sm:$0xff] }
 0x544   : > { %15073 = vmatprep.subr.bf16.mxu1 %v15906_v24  ;;  %v15116_v22 = vpack.c.bf16 %v9280_v57, %v9279_v58  ;;  %v9257_v41 = vld [vmem:[%s21073_s1 + $0x138] sm:$0xff]  ;;  %v9281_v63 = vld [vmem:[%s21073_s1 + $0x1b0] sm:$0xff]  ;;  %v9258_v2 = vld [vmem:[%s21073_s1 + $0x140] sm:$0xff] }
 0x545   : > { %v9282_v11 = vld [vmem:[%s21073_s1 + $0x1b8] sm:$0xff]  ;;  %v15095_v13 = vpack.c.bf16 %v9257_v41, %v9256_v53  ;;  %v9259_v14 = vld [vmem:[%s21073_s1 + $0x148] sm:$0xff]  ;;  %v9283_v55 = vld [vmem:[%s21073_s1 + $0x1c0] sm:$0xff] }
 0x546   : > { %15051 = vmatpush3.bf16.msra.mxu0 %v15050_v10  ;;  %v9219_v62 = vld [vmem:[%s18743_s10 + $0x1e] sm:$0xff]  ;;  %v15119_v0 = vpack.c.bf16 %v9282_v11, %v9281_v63  ;;  %v9284_v61 = vld [vmem:[%s21073_s1 + $0x1c8] sm:$0xff]  ;;  %v15098_v6 = vpack.c.bf16 %v9259_v14, %v9258_v2  ;;  %v9260_v20 = vld [vmem:[%s21073_s1 + $0x150] sm:$0xff] }
 0x547   : > { %15075 = vmatpush3.bf16.msra.mxu1 %v15074_v25  ;;  %15052 = vmatprep.subr.bf16.mxu0 %v15906_v24  ;;  %v9210_v60 = vld [vmem:[%s18743_s10 + $0x1d] sm:$0xff]  ;;  %v9220_v15 = vld [vmem:[%s18743_s10 + $0x26] sm:$0xff]  ;;  %v15122_v8 = vpack.c.bf16 %v9284_v61, %v9283_v55  ;;  %v9285_v25 = vld [vmem:[%s21073_s1 + $0x1d0] sm:$0xff] }
 0x548   : > { %15076 = vmatprep.subr.bf16.mxu1 %v15906_v24  ;;  %v9211_v4 = vld [vmem:[%s18743_s10 + $0x25] sm:$0xff]  ;;  %v9261_v10 = vld [vmem:[%s21073_s1 + $0x158] sm:$0xff]  ;;  %v9221_v16 = vld [vmem:[%s18743_s10 + $0x2e] sm:$0xff] }
 0x549   : > { %v9286_v19 = vld [vmem:[%s21073_s1 + $0x1d8] sm:$0xff]  ;;  %v9212_v12 = vld [vmem:[%s18743_s10 + $0x2d] sm:$0xff]  ;;  %v15101_v26 = vpack.c.bf16 %v9261_v10, %v9260_v20  ;;  %v9287_v3 = vld [vmem:[%s21073_s1 + $0x1e0] sm:$0xff] }
 0x54a   : > { %15054 = vmatpush3.bf16.msra.mxu0 %v15053_v47  ;;  %v15125_v47 = vpack.c.bf16 %v9286_v19, %v9285_v25  ;;  %v9263_v31 = vld [vmem:[%s21073_s1 + $0x168] sm:$0xff]  ;;  %v9222_v27 = vld [vmem:[%s18743_s10 + $0x36] sm:$0xff]  ;;  %v9325_v49 = vld [vmem:[%s21073_s1 + $0x280] sm:$0xff] }
 0x54b   : > { %15078 = vmatpush3.bf16.msra.mxu1 %v15077_v29  ;;  %15055 = vmatprep.subr.bf16.mxu0 %v15906_v24  ;;  %v9262_v29 = vld [vmem:[%s21073_s1 + $0x160] sm:$0xff]  ;;  %v9288_v33 = vld [vmem:[%s21073_s1 + $0x1e8] sm:$0xff]  ;;  %v9264_v37 = vld [vmem:[%s21073_s1 + $0x170] sm:$0xff] }
 0x54c   : > { %15079 = vmatprep.subr.bf16.mxu1 %v15906_v24  ;;  %v15128_v21 = vpack.c.bf16 %v9288_v33, %v9287_v3  ;;  %v9265_v59 = vld [vmem:[%s21073_s1 + $0x178] sm:$0xff]  ;;  %v9289_v5 = vld [vmem:[%s21073_s1 + $0x1f0] sm:$0xff]  ;;  %v9224_v35 = vld [vmem:[%s18743_s10 + $0x46] sm:$0xff] }
 0x54d   : > { %v9214_v36 = vld [vmem:[%s18743_s10 + $0x3d] sm:$0xff]  ;;  %v15107_v43 = vpack.c.bf16 %v9265_v59, %v9264_v37  ;;  %v9326_v40 = vld [vmem:[%s21073_s1 + $0x288] sm:$0xff]  ;;  %v9327_v38 = vld [vmem:[%s21073_s1 + $0x290] sm:$0xff] }
 0x54e   : > { %15057 = vmatpush3.bf16.msra.mxu0 %v15056_v7  ;;  %v9213_v7 = vld [vmem:[%s18743_s10 + $0x35] sm:$0xff]  ;;  %v9267_v57 = vld [vmem:[%s18743_s10 + $0x1f] sm:$0xff]  ;;  %v9330_v53 = vld [vmem:[%s21073_s1 + $0x2a8] sm:$0xff] }
 0x54f   : > { %15081 = vmatpush3.bf16.msra.mxu1 %v15080_v28  ;;  %15058 = vmatprep.subr.bf16.mxu0 %v15906_v24  ;;  %v15104_v28 = vpack.c.bf16 %v9263_v31, %v9262_v29  ;;  %v9266_v34 = vld [vmem:[%s18743_s10 + $0x17] sm:$0xff]  ;;  %v9268_v63 = vld [vmem:[%s18743_s10 + $0x27] sm:$0xff]  ;;  %v9269_v2 = vld [vmem:[%s18743_s10 + $0x2f] sm:$0xff] }
 0x550   : > { %15082 = vmatprep.subr.bf16.mxu1 %v15906_v24  ;;  %v9328_v56 = vld [vmem:[%s21073_s1 + $0x298] sm:$0xff]  ;;  %v9308_v61 = vld [vmem:[%s21073_s1 + $0x240] sm:$0xff]  ;;  %v9310_v25 = vld [vmem:[%s21073_s1 + $0x250] sm:$0xff] }
 0x551   : > { %v9311_v19 = vld [vmem:[%s21073_s1 + $0x258] sm:$0xff]  ;;  %v9312_v31 = vld [vmem:[%s21073_s1 + $0x260] sm:$0xff]  ;;  %v9313_v3 = vld [vmem:[%s21073_s1 + $0x268] sm:$0xff] }
 0x552   : > { %15060 = vmatpush3.bf16.msra.mxu0 %v15059_v32  ;;  %v9290_v32 = vld [vmem:[%s21073_s1 + $0x1f8] sm:$0xff]  ;;  %v9337_v33 = vld [vmem:[%s21073_s1 + $0x2e0] sm:$0xff]  ;;  %v9314_v37 = vld [vmem:[%s21073_s1 + $0x270] sm:$0xff] }
 0x553   : > { %15084 = vmatpush3.bf16.msra.mxu1 %v15083_v42  ;;  %15085 = vmatprep.subr.bf16.mxu0 %v15906_v24  ;;  %v9223_v42 = vld [vmem:[%s18743_s10 + $0x3e] sm:$0xff]  ;;  %v15131_v30 = vpack.c.bf16 %v9290_v32, %v9289_v5  ;;  %v9339_v5 = vld [vmem:[%s21073_s1 + $0x2f0] sm:$0xff] }
 0x554   : > { %15109 = vmatprep.subr.bf16.mxu1 %v15906_v24  ;;  %v9315_v59 = vld [vmem:[%s21073_s1 + $0x278] sm:$0xff] }
 0x555   : > { %12829 = vmatmul.mubr.f32.vlgmr.msra.gmra.mrb[0].mxu0 %v9216_v39  ;;  %v9215_v39 = vld [vmem:[%s18743_s10 + $0x45] sm:$0xff]  ;;  %v9340_v32 = vld [vmem:[%s21073_s1 + $0x2f8] sm:$0xff] }
 0x556   : > { %12888 = vmatmul.mubr.f32.vlgmr.msra.gmra.mrb[0].mxu1 %v9207_v48  ;;  %15087 = vmatpush3.bf16.msra.mxu0 %v15086_v17  ;;  %v9300_v17 = vld [vmem:[%s21073_s1 + $0x200] sm:$0xff]  ;;  %v9301_v48 = vld [vmem:[%s21073_s1 + $0x208] sm:$0xff] }
 0x557   : > { %12831 = vmatprep.mubr.msk.f32.mxu0 %vm15907_vm3, %v15908_v54  ;;  %12890 = vmatprep.mubr.msk.f32.mxu1 %vm15907_vm3, %v15908_v54  ;;  %v15134_v51 = vpack.c.bf16 %v9301_v48, %v9300_v17  ;;  %v9375_v17 = vld [vmem:[%s21073_s1 + $0x380] sm:$0xff]  ;;  %v9376_v48 = vld [vmem:[%s21073_s1 + $0x388] sm:$0xff] }
 0x558   : > { %15088 = vmatprep.subr.bf16.mxu0 %v15906_v24  ;;  %15111 = vmatpush3.bf16.msra.mxu1 %v15110_v18  ;;  %v9241_v18 = vld [vmem:[%s18743_s10 + $0x7] sm:$0xff] }
 0x559   : > { %12832 = vmatmul.mubr.f32.gmra.mrb[2].mxu0 %v9217_v44  ;;  %15112 = vmatprep.subr.bf16.mxu1 %v15906_v24  ;;  %v9302_v44 = vld [vmem:[%s21073_s1 + $0x210] sm:$0xff] }
 0x55a   : > { %12891 = vmatmul.mubr.f32.gmra.mrb[2].mxu1 %v9208_v45  ;;  %15090 = vmatpush3.bf16.msra.mxu0 %v15089_v9  ;;  %v9303_v9 = vld [vmem:[%s21073_s1 + $0x218] sm:$0xff]  ;;  %v15158_v45 = vpack.c.bf16 %v9326_v40, %v9325_v49 }
 0x55b   : > { %12834 = vmatprep.mubr.msk.f32.mxu0 %vm15907_vm3, %v15908_v54  ;;  %12893 = vmatprep.mubr.msk.f32.mxu1 %vm15907_vm3, %v15908_v54  ;;  %v15137_v58 = vpack.c.bf16 %v9303_v9, %v9302_v44  ;;  %v9291_v49 = vld [vmem:[%s18743_s10 + $0x18] sm:$0xff]  ;;  %v15206_v44 = vpack.c.bf16 %v9376_v48, %v9375_v17  ;;  %v9377_v9 = vld [vmem:[%s21073_s1 + $0x390] sm:$0xff] }
 0x55c   : > { %15091 = vmatprep.subr.bf16.mxu0 %v15906_v24  ;;  %15114 = vmatpush3.bf16.msra.mxu1 %v15113_v46  ;;  %v9242_v46 = vld [vmem:[%s18743_s10 + $0xf] sm:$0xff]  ;;  %v9299_v48 = vld [vmem:[%s18743_s10 + $0x58] sm:$0xff] }
 0x55d   : > { %12835 = vmatmul.mubr.f32.gmra.mrb[4].mxu0 %v9218_v23  ;;  %15115 = vmatprep.subr.bf16.mxu1 %v15906_v24  ;;  %v9304_v23 = vld [vmem:[%s21073_s1 + $0x220] sm:$0xff] }
 0x55e   : > { %12894 = vmatmul.mubr.f32.gmra.mrb[4].mxu1 %v9209_v52  ;;  %15093 = vmatpush3.bf16.msra.mxu0 %v15092_v50  ;;  %v9305_v50 = vld [vmem:[%s21073_s1 + $0x228] sm:$0xff]  ;;  %v15161_v52 = vpack.c.bf16 %v9328_v56, %v9327_v38  ;;  %v9292_v38 = vld [vmem:[%s18743_s10 + $0x20] sm:$0xff] }
 0x55f   : > { %12837 = vmatprep.mubr.msk.f32.mxu0 %vm15907_vm3, %v15908_v54  ;;  %12896 = vmatprep.mubr.msk.f32.mxu1 %vm15907_vm3, %v15908_v54  ;;  %v15140_v41 = vpack.c.bf16 %v9305_v50, %v9304_v23  ;;  %v9379_v50 = vld [vmem:[%s21073_s1 + $0x3a0] sm:$0xff] }
 0x560   : > { %15117 = vmatpush3.bf16.msra.mxu1 %v15116_v22  ;;  %15094 = vmatprep.subr.bf16.mxu0 %v15906_v24  ;;  %v9329_v22 = vld [vmem:[%s21073_s1 + $0x2a0] sm:$0xff] }
 0x561   : > { %12838 = vmatmul.mubr.f32.gmra.mrb[6].mxu0 %v9219_v62  ;;  %15118 = vmatprep.subr.bf16.mxu1 %v15906_v24  ;;  %v15164_v11 = vpack.c.bf16 %v9330_v53, %v9329_v22  ;;  %v9306_v62 = vld [vmem:[%s21073_s1 + $0x230] sm:$0xff]  ;;  %v9293_v22 = vld [vmem:[%s18743_s10 + $0x28] sm:$0xff] }
 0x562   : > { %12897 = vmatmul.mubr.f32.gmra.mrb[6].mxu1 %v9210_v60  ;;  %12840 = vmatprep.mubr.msk.f32.mxu0 %vm15907_vm3, %v15908_v54  ;;  %v9307_v60 = vld [vmem:[%s21073_s1 + $0x238] sm:$0xff] }
 0x563   : > { %12899 = vmatprep.mubr.msk.f32.mxu1 %vm15907_vm3, %v15908_v54  ;;  %15096 = vmatpush3.bf16.msra.mxu0 %v15095_v13  ;;  %v9331_v13 = vld [vmem:[%s21073_s1 + $0x2b0] sm:$0xff]  ;;  %v15143_v14 = vpack.c.bf16 %v9307_v60, %v9306_v62  ;;  %v9357_v62 = vld [vmem:[%s21073_s1 + $0x338] sm:$0xff] }
 0x564   : > { %15120 = vmatpush3.bf16.msra.mxu1 %v15119_v0  ;;  %15097 = vmatprep.subr.bf16.mxu0 %v15906_v24  ;;  %v9332_v0 = vld [vmem:[%s21073_s1 + $0x2b8] sm:$0xff]  ;;  %v9381_v60 = vld [vmem:[%s21073_s1 + $0x3b0] sm:$0xff] }
 0x565   : > { %12841 = vmatmul.mubr.f32.gmra.mrb[8].mxu0 %v9220_v15  ;;  %15121 = vmatprep.subr.bf16.mxu1 %v15906_v24  ;;  %v15167_v55 = vpack.c.bf16 %v9332_v0, %v9331_v13  ;;  %v9309_v15 = vld [vmem:[%s21073_s1 + $0x248] sm:$0xff]  ;;  %v9382_v13 = vld [vmem:[%s21073_s1 + $0x3b8] sm:$0xff]  ;;  %v9294_v0 = vld [vmem:[%s18743_s10 + $0x30] sm:$0xff] }
 0x566   : > { %12900 = vmatmul.mubr.f32.gmra.mrb[8].mxu1 %v9211_v4  ;;  %12843 = vmatprep.mubr.msk.f32.mxu0 %vm15907_vm3, %v15908_v54  ;;  %v9333_v4 = vld [vmem:[%s21073_s1 + $0x2c0] sm:$0xff]  ;;  %v15146_v20 = vpack.c.bf16 %v9309_v15, %v9308_v61  ;;  %v9359_v15 = vld [vmem:[%s21073_s1 + $0x348] sm:$0xff] }
 0x567   : > { %12902 = vmatprep.mubr.msk.f32.mxu1 %vm15907_vm3, %v15908_v54  ;;  %15099 = vmatpush3.bf16.msra.mxu0 %v15098_v6  ;;  %v9334_v6 = vld [vmem:[%s21073_s1 + $0x2c8] sm:$0xff]  ;;  %v9358_v61 = vld [vmem:[%s21073_s1 + $0x340] sm:$0xff] }
 0x568   : > { %15123 = vmatpush3.bf16.msra.mxu1 %v15122_v8  ;;  %15100 = vmatprep.subr.bf16.mxu0 %v15906_v24  ;;  %v9270_v8 = vld [vmem:[%s18743_s10 + $0x37] sm:$0xff]  ;;  %v15170_v10 = vpack.c.bf16 %v9334_v6, %v9333_v4  ;;  %v9383_v4 = vld [vmem:[%s21073_s1 + $0x3c0] sm:$0xff]  ;;  %v9384_v6 = vld [vmem:[%s21073_s1 + $0x3c8] sm:$0xff] }
 0x569   : > { %12844 = vmatmul.mubr.f32.gmra.mrb[10].mxu0 %v9221_v16  ;;  %15124 = vmatprep.subr.bf16.mxu1 %v15906_v24  ;;  %v9335_v16 = vld [vmem:[%s21073_s1 + $0x2d0] sm:$0xff] }
 0x56a   : > { %12903 = vmatmul.mubr.f32.gmra.mrb[10].mxu1 %v9212_v12  ;;  %12846 = vmatprep.mubr.msk.f32.mxu0 %vm15907_vm3, %v15908_v54  ;;  %v9336_v12 = vld [vmem:[%s21073_s1 + $0x2d8] sm:$0xff] }
 0x56b   : > { %12905 = vmatprep.mubr.msk.f32.mxu1 %vm15907_vm3, %v15908_v54  ;;  %15102 = vmatpush3.bf16.msra.mxu0 %v15101_v26  ;;  %v9271_v26 = vld [vmem:[%s18743_s10 + $0x3f] sm:$0xff]  ;;  %v15173_v29 = vpack.c.bf16 %v9336_v12, %v9335_v16  ;;  %v9385_v12 = vld [vmem:[%s21073_s1 + $0x3d0] sm:$0xff] }
 0x56c   : > { %15126 = vmatpush3.bf16.msra.mxu1 %v15125_v47  ;;  %15103 = vmatprep.subr.bf16.mxu0 %v15906_v24  ;;  %v15149_v47 = vpack.c.bf16 %v9311_v19, %v9310_v25  ;;  %v15218_v25 = vpack.c.bf16 %v9384_v6, %v9383_v4  ;;  %v9360_v19 = vld [vmem:[%s21073_s1 + $0x350] sm:$0xff]  ;;  %v9361_v16 = vld [vmem:[%s21073_s1 + $0x358] sm:$0xff]  ;;  %v9348_v6 = vld [vmem:[%s18743_s10 + $0x61] sm:$0xff] }
 0x56d   : > { %12847 = vmatmul.mubr.f32.gmra.mrb[12].mxu0 %v9222_v27  ;;  %15127 = vmatprep.subr.bf16.mxu1 %v15906_v24  ;;  %v9338_v27 = vld [vmem:[%s21073_s1 + $0x2e8] sm:$0xff]  ;;  %v9415_v4 = vld [vmem:[%s21073_s1 + $0x478] sm:$0xff] }
 0x56e   : > { %12906 = vmatmul.mubr.f32.gmra.mrb[12].mxu1 %v9213_v7  ;;  %12849 = vmatprep.mubr.msk.f32.mxu0 %vm15907_vm3, %v15908_v54  ;;  %v9272_v7 = vld [vmem:[%s18743_s10 + $0x47] sm:$0xff] }
 0x56f   : > { %12908 = vmatprep.mubr.msk.f32.mxu1 %vm15907_vm3, %v15908_v54  ;;  %15105 = vmatpush3.bf16.msra.mxu0 %v15104_v28  ;;  %v15152_v28 = vpack.c.bf16 %v9313_v3, %v9312_v31  ;;  %v15197_v31 = vpack.c.bf16 %v9361_v16, %v9360_v19  ;;  %v9396_v19 = vld [vmem:[%s18743_s10 + $0x53] sm:$0xff] }
 0x570   : > { %15129 = vmatpush3.bf16.msra.mxu1 %v15128_v21  ;;  %15106 = vmatprep.subr.bf16.mxu0 %v15906_v24  ;;  %v15176_v21 = vpack.c.bf16 %v9338_v27, %v9337_v33  ;;  %v9362_v33 = vld [vmem:[%s21073_s1 + $0x360] sm:$0xff]  ;;  %v9363_v27 = vld [vmem:[%s21073_s1 + $0x368] sm:$0xff]  ;;  %v9392_v16 = vld [vmem:[%s18743_s10 + $0x33] sm:$0xff] }
 0x571   : > { %12850 = vmatmul.mubr.f32.gmra.mrb[14].mxu0 %v9223_v42  ;;  %15130 = vmatprep.subr.bf16.mxu1 %v15906_v24  ;;  %v9273_v42 = vld [vmem:[%s18743_s10 + $0x4f] sm:$0xff] }
 0x572   : > { %12909 = vmatmul.mubr.f32.gmra.mrb[14].mxu1 %v9214_v36  ;;  %12852 = vmatprep.mubr.msk.f32.mxu0 %vm15907_vm3, %v15908_v54  ;;  %v15155_v36 = vpack.c.bf16 %v9315_v59, %v9314_v37  ;;  %v19204_v37 = vld [vmem:[%s18743_s10 + $0x49] sm:$0xff]  ;;  %v15200_v59 = vpack.c.bf16 %v9363_v27, %v9362_v33 }
 0x573   : > { %12911 = vmatprep.mubr.msk.f32.mxu1 %vm15907_vm3, %v15908_v54  ;;  %15108 = vmatpush3.bf16.msra.mxu0 %v15107_v43  ;;  %v15179_v43 = vpack.c.bf16 %v9340_v32, %v9339_v5  ;;  %v9364_v32 = vld [vmem:[%s21073_s1 + $0x370] sm:$0xff] }
 0x574   : > { %15132 = vmatpush3.bf16.msra.mxu1 %v15131_v30  ;;  %15133 = vmatprep.subr.bf16.mxu0 %v15906_v24  ;;  %v9274_v30 = vld [vmem:[%s18743_s10 + $0x57] sm:$0xff] }
 0x575   : > { %12853 = vmatmul.mubr.f32.gmra.mrb[16].mxu0 %v9224_v35  ;;  %15157 = vmatprep.subr.bf16.mxu1 %v15906_v24  ;;  %v9350_v35 = vld [vmem:[%s21073_s1 + $0x300] sm:$0xff] }
 0x576   : > { %12912 = vmatmul.mubr.f32.gmra.mrb[16].mxu1 %v9215_v39  ;;  %12946 = vmatprep.mubr.msk.f32.mxu0 %vm15907_vm3, %v15908_v54  ;;  %v9351_v39 = vld [vmem:[%s21073_s1 + $0x308] sm:$0xff] }
 0x577   : > { %13005 = vmatprep.mubr.msk.f32.mxu1 %vm15907_vm3, %v15908_v54  ;;  %v15182_v40 = vpack.c.bf16 %v9351_v39, %v9350_v35  ;;  %v19227_v35 = vld [vmem:[%s18743_s10 + $0x51] sm:$0xff] }
 0x579   : > { %12947 = vmatmul.mubr.f32.vlgmr.msra.gmra.mrb[18].mxu0 %v9241_v18  ;;  %v9316_v18 = vld [vmem:[%s18743_s10 + $0x19] sm:$0xff] }
 0x57a   : > { %13006 = vmatmul.mubr.f32.vlgmr.msra.gmra.mrb[18].mxu1 %v9266_v34  ;;  %15135 = vmatpush3.bf16.msra.mxu0 %v15134_v51  ;;  %v9352_v51 = vld [vmem:[%s21073_s1 + $0x310] sm:$0xff] }
 0x57b   : > { %12949 = vmatprep.mubr.msk.f32.mxu0 %vm15907_vm3, %v15908_v54  ;;  %13008 = vmatprep.mubr.msk.f32.mxu1 %vm15907_vm3, %v15908_v54 }
 0x57c   : > { %15136 = vmatprep.subr.bf16.mxu0 %v15906_v24  ;;  %15159 = vmatpush3.bf16.msra.mxu1 %v15158_v45  ;;  %v9378_v45 = vld [vmem:[%s21073_s1 + $0x398] sm:$0xff] }
 0x57d   : > { %12950 = vmatmul.mubr.f32.gmra.mrb[20].mxu0 %v9242_v46  ;;  %15160 = vmatprep.subr.bf16.mxu1 %v15906_v24  ;;  %v9317_v46 = vld [vmem:[%s18743_s10 + $0x21] sm:$0xff]  ;;  %v15209_v23 = vpack.c.bf16 %v9378_v45, %v9377_v9  ;;  %v9403_v9 = vld [vmem:[%s21073_s1 + $0x418] sm:$0xff] }
 0x57e   : > { %13009 = vmatmul.mubr.f32.gmra.mrb[20].mxu1 %v9267_v57  ;;  %15138 = vmatpush3.bf16.msra.mxu0 %v15137_v58  ;;  %v9354_v58 = vld [vmem:[%s21073_s1 + $0x320] sm:$0xff] }
 0x57f   : > { %12952 = vmatprep.mubr.msk.f32.mxu0 %vm15907_vm3, %v15908_v54  ;;  %13011 = vmatprep.mubr.msk.f32.mxu1 %vm15907_vm3, %v15908_v54 }
 0x580   : > { %15139 = vmatprep.subr.bf16.mxu0 %v15906_v24  ;;  %15162 = vmatpush3.bf16.msra.mxu1 %v15161_v52  ;;  %v9380_v52 = vld [vmem:[%s21073_s1 + $0x3a8] sm:$0xff] }
 0x581   : > { %12953 = vmatmul.mubr.f32.gmra.mrb[22].mxu0 %v9266_v34  ;;  %15163 = vmatprep.subr.bf16.mxu1 %v15906_v24  ;;  %v9353_v34 = vld [vmem:[%s21073_s1 + $0x318] sm:$0xff] }
 0x582   : > { %13012 = vmatmul.mubr.f32.gmra.mrb[22].mxu1 %v9268_v63  ;;  %15141 = vmatpush3.bf16.msra.mxu0 %v15140_v41  ;;  %v15185_v56 = vpack.c.bf16 %v9353_v34, %v9352_v51  ;;  %v19112_v41 = vld [vmem:[%s18743_s10 + $0x29] sm:$0xff] }
 0x583   : > { %12955 = vmatprep.mubr.msk.f32.mxu0 %vm15907_vm3, %v15908_v54  ;;  %13014 = vmatprep.mubr.msk.f32.mxu1 %vm15907_vm3, %v15908_v54  ;;  %v9366_v34 = vld [vmem:[%s18743_s10 + $0x2a] sm:$0xff] }
 0x584   : > { %15165 = vmatpush3.bf16.msra.mxu1 %v15164_v11  ;;  %15142 = vmatprep.subr.bf16.mxu0 %v15906_v24  ;;  %v9356_v11 = vld [vmem:[%s21073_s1 + $0x330] sm:$0xff] }
 0x585   : > { %12956 = vmatmul.mubr.f32.gmra.mrb[24].mxu0 %v9267_v57  ;;  %15166 = vmatprep.subr.bf16.mxu1 %v15906_v24  ;;  %v9355_v57 = vld [vmem:[%s21073_s1 + $0x328] sm:$0xff] }
 0x586   : > { %13015 = vmatmul.mubr.f32.gmra.mrb[24].mxu1 %v9269_v2  ;;  %12958 = vmatprep.mubr.msk.f32.mxu0 %vm15907_vm3, %v15908_v54  ;;  %v15188_v53 = vpack.c.bf16 %v9355_v57, %v9354_v58  ;;  %v9368_v57 = vld [vmem:[%s18743_s10 + $0x3a] sm:$0xff] }
 0x587   : > { %13017 = vmatprep.mubr.msk.f32.mxu1 %vm15907_vm3, %v15908_v54  ;;  %15144 = vmatpush3.bf16.msra.mxu0 %v15143_v14  ;;  %v15191_v14 = vpack.c.bf16 %v9357_v62, %v9356_v11  ;;  %v9410_v62 = vld [vmem:[%s21073_s1 + $0x450] sm:$0xff] }
 0x588   : > { %15168 = vmatpush3.bf16.msra.mxu1 %v15167_v55  ;;  %15145 = vmatprep.subr.bf16.mxu0 %v15906_v24  ;;  %v15215_v55 = vpack.c.bf16 %v9382_v13, %v9381_v60  ;;  %v9411_v60 = vld [vmem:[%s21073_s1 + $0x458] sm:$0xff] }
 0x589   : > { %12959 = vmatmul.mubr.f32.gmra.mrb[26].mxu0 %v9268_v63  ;;  %15169 = vmatprep.subr.bf16.mxu1 %v15906_v24  ;;  %v15212_v63 = vpack.c.bf16 %v9380_v52, %v9379_v50  ;;  %v9407_v50 = vld [vmem:[%s21073_s1 + $0x438] sm:$0xff]  ;;  %v9369_v52 = vld [vmem:[%s18743_s10 + $0x42] sm:$0xff] }
 0x58a   : > { %13018 = vmatmul.mubr.f32.gmra.mrb[26].mxu1 %v9270_v8  ;;  %12961 = vmatprep.mubr.msk.f32.mxu0 %vm15907_vm3, %v15908_v54  ;;  %v9371_v13 = vld [vmem:[%s18743_s10 + $0x52] sm:$0xff] }
 0x58b   : > { %13020 = vmatprep.mubr.msk.f32.mxu1 %vm15907_vm3, %v15908_v54  ;;  %15147 = vmatpush3.bf16.msra.mxu0 %v15146_v20  ;;  %v19158_v20 = vld [vmem:[%s18743_s10 + $0x39] sm:$0xff] }
 0x58c   : > { %15171 = vmatpush3.bf16.msra.mxu1 %v15170_v10  ;;  %15148 = vmatprep.subr.bf16.mxu0 %v15906_v24  ;;  %v15194_v10 = vpack.c.bf16 %v9359_v15, %v9358_v61  ;;  %v9414_v15 = vld [vmem:[%s21073_s1 + $0x470] sm:$0xff] }
 0x58d   : > { %12962 = vmatmul.mubr.f32.gmra.mrb[28].mxu0 %v9269_v2  ;;  %15172 = vmatprep.subr.bf16.mxu1 %v15906_v24  ;;  %v19135_v2 = vld [vmem:[%s18743_s10 + $0x31] sm:$0xff] }
 0x58e   : > { %13021 = vmatmul.mubr.f32.gmra.mrb[28].mxu1 %v9271_v26  ;;  %12964 = vmatprep.mubr.msk.f32.mxu0 %vm15907_vm3, %v15908_v54 }
 0x58f   : > { %13023 = vmatprep.mubr.msk.f32.mxu1 %vm15907_vm3, %v15908_v54  ;;  %15150 = vmatpush3.bf16.msra.mxu0 %v15149_v47  ;;  %v9296_v47 = vld [vmem:[%s18743_s10 + $0x40] sm:$0xff] }
 0x590   : > { %15174 = vmatpush3.bf16.msra.mxu1 %v15173_v29  ;;  %15151 = vmatprep.subr.bf16.mxu0 %v15906_v24  ;;  %v19181_v29 = vld [vmem:[%s18743_s10 + $0x41] sm:$0xff] }
 0x591   : > { %12965 = vmatmul.mubr.f32.gmra.mrb[30].mxu0 %v9270_v8  ;;  %15175 = vmatprep.subr.bf16.mxu1 %v15906_v24  ;;  %v9295_v8 = vld [vmem:[%s18743_s10 + $0x38] sm:$0xff] }
 0x592   : > { %13024 = vmatmul.mubr.f32.gmra.mrb[30].mxu1 %v9272_v7  ;;  %12967 = vmatprep.mubr.msk.f32.mxu0 %vm15907_vm3, %v15908_v54 }
 0x593   : > { %13026 = vmatprep.mubr.msk.f32.mxu1 %vm15907_vm3, %v15908_v54  ;;  %15153 = vmatpush3.bf16.msra.mxu0 %v15152_v28  ;;  %v9388_v28 = vld [vmem:[%s21073_s1 + $0x3e8] sm:$0xff] }
 0x594   : > { %15177 = vmatpush3.bf16.msra.mxu1 %v15176_v21  ;;  %15154 = vmatprep.subr.bf16.mxu0 %v15906_v24  ;;  %v9297_v21 = vld [vmem:[%s18743_s10 + $0x48] sm:$0xff] }
 0x595   : > { %12968 = vmatmul.mubr.f32.gmra.mrb[32].mxu0 %v9271_v26  ;;  %15178 = vmatprep.subr.bf16.mxu1 %v15906_v24  ;;  %v9386_v26 = vld [vmem:[%s21073_s1 + $0x3d8] sm:$0xff] }
 0x596   : > { %13027 = vmatmul.mubr.f32.gmra.mrb[32].mxu1 %v9273_v42  ;;  %12970 = vmatprep.mubr.msk.f32.mxu0 %vm15907_vm3, %v15908_v54  ;;  %v15221_v3 = vpack.c.bf16 %v9386_v26, %v9385_v12  ;;  %v9365_v42 = vld [vmem:[%s21073_s1 + $0x378] sm:$0xff] }
 0x597   : > { %13029 = vmatprep.mubr.msk.f32.mxu1 %vm15907_vm3, %v15908_v54  ;;  %15156 = vmatpush3.bf16.msra.mxu0 %v15155_v36  ;;  %v9389_v36 = vld [vmem:[%s21073_s1 + $0x3f0] sm:$0xff]  ;;  %v15203_v39 = vpack.c.bf16 %v9365_v42, %v9364_v32  ;;  %v9397_v12 = vld [vmem:[%s18743_s10 + $0x5b] sm:$0xff] }
 0x598   : > { %15180 = vmatpush3.bf16.msra.mxu1 %v15179_v43  ;;  %15181 = vmatprep.subr.bf16.mxu0 %v15906_v24  ;;  %v9390_v43 = vld [vmem:[%s21073_s1 + $0x3f8] sm:$0xff] }
 0x599   : > { %12971 = vmatmul.mubr.f32.gmra.mrb[34].mxu0 %v9272_v7  ;;  %15205 = vmatprep.subr.bf16.mxu1 %v15906_v24  ;;  %v9387_v7 = vld [vmem:[%s21073_s1 + $0x3e0] sm:$0xff]  ;;  %v15227_v17 = vpack.c.bf16 %v9390_v43, %v9389_v36 }
 0x59a   : > { %13030 = vmatmul.mubr.f32.gmra.mrb[34].mxu1 %v9274_v30  ;;  %13064 = vmatprep.mubr.msk.f32.mxu0 %vm15907_vm3, %v15908_v54  ;;  %v15224_v5 = vpack.c.bf16 %v9388_v28, %v9387_v7  ;;  %v9298_v30 = vld [vmem:[%s18743_s10 + $0x50] sm:$0xff]  ;;  %v9393_v26 = vld [vmem:[%s18743_s10 + $0x3b] sm:$0xff] }
 0x59b   : > { %13123 = vmatprep.mubr.msk.f32.mxu1 %vm15907_vm3, %v15908_v54 }
 0x59d   : > { %13065 = vmatmul.mubr.f32.vlgmr.msra.gmra.mrb[36].mxu0 %v9291_v49  ;;  %v19238_v49 = vld [vmem:[%s18743_s10 + $0x59] sm:$0xff] }
 0x59e   : > { %13124 = vmatmul.mubr.f32.vlgmr.msra.gmra.mrb[36].mxu1 %v9316_v18  ;;  %15183 = vmatpush3.bf16.msra.mxu0 %v15182_v40  ;;  %v9400_v40 = vld [vmem:[%s21073_s1 + $0x400] sm:$0xff]  ;;  %v9401_v18 = vld [vmem:[%s21073_s1 + $0x408] sm:$0xff] }
 0x59f   : > { %13067 = vmatprep.mubr.msk.f32.mxu0 %vm15907_vm3, %v15908_v54  ;;  %13126 = vmatprep.mubr.msk.f32.mxu1 %vm15907_vm3, %v15908_v54  ;;  %v15230_v51 = vpack.c.bf16 %v9401_v18, %v9400_v40 }
 0x5a0   : > { %15184 = vmatprep.subr.bf16.mxu0 %v15906_v24  ;;  %15207 = vmatpush3.bf16.msra.mxu1 %v15206_v44  ;;  %v9402_v44 = vld [vmem:[%s21073_s1 + $0x410] sm:$0xff] }
 0x5a1   : > { %13068 = vmatmul.mubr.f32.gmra.mrb[38].mxu0 %v9292_v38  ;;  %15208 = vmatprep.subr.bf16.mxu1 %v15906_v24  ;;  %v15233_v45 = vpack.c.bf16 %v9403_v9, %v9402_v44  ;;  %v9367_v38 = vld [vmem:[%s18743_s10 + $0x32] sm:$0xff] }
 0x5a2   : > { %13127 = vmatmul.mubr.f32.gmra.mrb[38].mxu1 %v9317_v46  ;;  %15186 = vmatpush3.bf16.msra.mxu0 %v15185_v56  ;;  %v9404_v56 = vld [vmem:[%s21073_s1 + $0x420] sm:$0xff]  ;;  %v9405_v46 = vld [vmem:[%s21073_s1 + $0x428] sm:$0xff] }
 0x5a3   : > { %13070 = vmatprep.mubr.msk.f32.mxu0 %vm15907_vm3, %v15908_v54  ;;  %13129 = vmatprep.mubr.msk.f32.mxu1 %vm15907_vm3, %v15908_v54  ;;  %v15236_v58 = vpack.c.bf16 %v9405_v46, %v9404_v56 }
 0x5a4   : > { %15187 = vmatprep.subr.bf16.mxu0 %v15906_v24  ;;  %15210 = vmatpush3.bf16.msra.mxu1 %v15209_v23  ;;  %v9406_v23 = vld [vmem:[%s21073_s1 + $0x430] sm:$0xff] }
 0x5a5   : > { %13071 = vmatmul.mubr.f32.gmra.mrb[40].mxu0 %v9293_v22  ;;  %15211 = vmatprep.subr.bf16.mxu1 %v15906_v24  ;;  %v15239_v22 = vpack.c.bf16 %v9407_v50, %v9406_v23 }
 0x5a6   : > { %13130 = vmatmul.mubr.f32.gmra.mrb[40].mxu1 %v19112_v41  ;;  %15189 = vmatpush3.bf16.msra.mxu0 %v15188_v53  ;;  %v9408_v53 = vld [vmem:[%s21073_s1 + $0x440] sm:$0xff] }
 0x5a7   : > { %13073 = vmatprep.mubr.msk.f32.mxu0 %vm15907_vm3, %v15908_v54  ;;  %13132 = vmatprep.mubr.msk.f32.mxu1 %vm15907_vm3, %v15908_v54 }
 0x5a8   : > { %15213 = vmatpush3.bf16.msra.mxu1 %v15212_v63  ;;  %15190 = vmatprep.subr.bf16.mxu0 %v15906_v24  ;;  %v9370_v63 = vld [vmem:[%s18743_s10 + $0x4a] sm:$0xff] }
 0x5a9   : > { %13074 = vmatmul.mubr.f32.gmra.mrb[42].mxu0 %v9294_v0  ;;  %15214 = vmatprep.subr.bf16.mxu1 %v15906_v24  ;;  %v15245_v0 = vpack.c.bf16 %v9411_v60, %v9410_v62 }
 0x5aa   : > { %13133 = vmatmul.mubr.f32.gmra.mrb[42].mxu1 %v19135_v2  ;;  %13076 = vmatprep.mubr.msk.f32.mxu0 %vm15907_vm3, %v15908_v54 }
 0x5ab   : > { %13135 = vmatprep.mubr.msk.f32.mxu1 %vm15907_vm3, %v15908_v54  ;;  %15192 = vmatpush3.bf16.msra.mxu0 %v15191_v14  ;;  %v9413_v14 = vld [vmem:[%s21073_s1 + $0x468] sm:$0xff] }
 0x5ac   : > { %15216 = vmatpush3.bf16.msra.mxu1 %v15215_v55  ;;  %15193 = vmatprep.subr.bf16.mxu0 %v15906_v24  ;;  %v9372_v55 = vld [vmem:[%s18743_s10 + $0x5a] sm:$0xff] }
 0x5ad   : > { %13077 = vmatmul.mubr.f32.gmra.mrb[44].mxu0 %v9295_v8  ;;  %15217 = vmatprep.subr.bf16.mxu1 %v15906_v24  ;;  %v9373_v8 = vld [vmem:[%s18743_s10 + $0x62] sm:$0xff] }
 0x5ae   : > { %13136 = vmatmul.mubr.f32.gmra.mrb[44].mxu1 %v19158_v20  ;;  %13079 = vmatprep.mubr.msk.f32.mxu0 %vm15907_vm3, %v15908_v54 }
 0x5af   : > { %13138 = vmatprep.mubr.msk.f32.mxu1 %vm15907_vm3, %v15908_v54  ;;  %15195 = vmatpush3.bf16.msra.mxu0 %v15194_v10  ;;  %v9349_v10 = vld [vmem:[%s18743_s10 + $0x69] sm:$0xff] }
 0x5b0   : > { %15219 = vmatpush3.bf16.msra.mxu1 %v15218_v25  ;;  %15196 = vmatprep.subr.bf16.mxu0 %v15906_v24  ;;  %v9374_v25 = vld [vmem:[%s18743_s10 + $0x6a] sm:$0xff] }
 0x5b1   : > { %13080 = vmatmul.mubr.f32.gmra.mrb[46].mxu0 %v9296_v47  ;;  %15220 = vmatprep.subr.bf16.mxu1 %v15906_v24  ;;  %v9398_v47 = vld [vmem:[%s18743_s10 + $0x63] sm:$0xff] }
 0x5b2   : > { %13139 = vmatmul.mubr.f32.gmra.mrb[46].mxu1 %v19181_v29  ;;  %13082 = vmatprep.mubr.msk.f32.mxu0 %vm15907_vm3, %v15908_v54 }
 0x5b3   : > { %13141 = vmatprep.mubr.msk.f32.mxu1 %vm15907_vm3, %v15908_v54  ;;  %15198 = vmatpush3.bf16.msra.mxu0 %v15197_v31  ;;  %v9399_v31 = vld [vmem:[%s18743_s10 + $0x6b] sm:$0xff] }
 0x5b4   : > { %15222 = vmatpush3.bf16.msra.mxu1 %v15221_v3  ;;  %15199 = vmatprep.subr.bf16.mxu0 %v15906_v24  ;;  %v9395_v3 = vld [vmem:[%s18743_s10 + $0x4b] sm:$0xff] }
 0x5b5   : > { %13083 = vmatmul.mubr.f32.gmra.mrb[48].mxu0 %v9297_v21  ;;  %15223 = vmatprep.subr.bf16.mxu1 %v15906_v24 }
 0x5b6   : > { %13142 = vmatmul.mubr.f32.gmra.mrb[48].mxu1 %v19204_v37  ;;  %13085 = vmatprep.mubr.msk.f32.mxu0 %vm15907_vm3, %v15908_v54 }
 0x5b7   : > { %13144 = vmatprep.mubr.msk.f32.mxu1 %vm15907_vm3, %v15908_v54  ;;  %15201 = vmatpush3.bf16.msra.mxu0 %v15200_v59 }
 0x5b8   : > { %15225 = vmatpush3.bf16.msra.mxu1 %v15224_v5  ;;  %15202 = vmatprep.subr.bf16.mxu0 %v15906_v24 }
 0x5b9   : > { %13086 = vmatmul.mubr.f32.gmra.mrb[50].mxu0 %v9298_v30  ;;  %15226 = vmatprep.subr.bf16.mxu1 %v15906_v24 }
 0x5ba   : > { %13145 = vmatmul.mubr.f32.gmra.mrb[50].mxu1 %v19227_v35  ;;  %13088 = vmatprep.mubr.msk.f32.mxu0 %vm15907_vm3, %v15908_v54 }
 0x5bb   : > { %13147 = vmatprep.mubr.msk.f32.mxu1 %vm15907_vm3, %v15908_v54  ;;  %15204 = vmatpush3.bf16.msra.mxu0 %v15203_v39 }
 0x5bc   : > { %15228 = vmatpush3.bf16.msra.mxu1 %v15227_v17  ;;  %15229 = vmatprep.subr.bf16.mxu0 %v15906_v24 }
 0x5bd   : > { %13089 = vmatmul.mubr.f32.gmra.mrb[52].mxu0 %v9299_v48  ;;  %15733 = vmatprep.subr.bf16.mxu1 %v15906_v24 }
 0x5be   : > { %13148 = vmatmul.mubr.f32.gmra.mrb[52].mxu1 %v19238_v49  ;;  %13182 = vmatprep.mubr.msk.f32.mxu0 %vm15907_vm3, %v15908_v54 }
 0x5bf   : > { %13241 = vmatprep.mubr.msk.f32.mxu1 %vm15907_vm3, %v15908_v54 }
 0x5c1   : > { %13183 = vmatmul.mubr.f32.vlgmr.msra.gmra.mrb[54].mxu0 %v19112_v41  ;;  %v9409_v41 = vld [vmem:[%s21073_s1 + $0x448] sm:$0xff] }
 0x5c2   : > { %13242 = vmatmul.mubr.f32.vlgmr.msra.gmra.mrb[54].mxu1 %v9366_v34  ;;  %15231 = vmatpush3.bf16.msra.mxu0 %v15230_v51  ;;  %v15242_v11 = vpack.c.bf16 %v9409_v41, %v9408_v53 }
 0x5c3   : > { %13185 = vmatprep.mubr.msk.f32.mxu0 %vm15907_vm3, %v15908_v54  ;;  %13244 = vmatprep.mubr.msk.f32.mxu1 %vm15907_vm3, %v15908_v54 }
 0x5c4   : > { %15741 = vmatpush3.bf16.msra.mxu1 %v15230_v51  ;;  %15232 = vmatprep.subr.bf16.mxu0 %v15906_v24 }
 0x5c5   : > { %13186 = vmatmul.mubr.f32.gmra.mrb[56].mxu0 %v19135_v2  ;;  %15734 = vmatprep.subr.bf16.mxu1 %v15906_v24  ;;  %v9412_v2 = vld [vmem:[%s21073_s1 + $0x460] sm:$0xff] }
 0x5c6   : > { %13245 = vmatmul.mubr.f32.gmra.mrb[56].mxu1 %v9367_v38  ;;  %15234 = vmatpush3.bf16.msra.mxu0 %v15233_v45  ;;  %v15248_v61 = vpack.c.bf16 %v9413_v14, %v9412_v2 }
 0x5c7   : > { %13188 = vmatprep.mubr.msk.f32.mxu0 %vm15907_vm3, %v15908_v54  ;;  %13247 = vmatprep.mubr.msk.f32.mxu1 %vm15907_vm3, %v15908_v54 }
 0x5c8   : > { %15742 = vmatpush3.bf16.msra.mxu1 %v15233_v45  ;;  %15235 = vmatprep.subr.bf16.mxu0 %v15906_v24 }
 0x5c9   : > { %13189 = vmatmul.mubr.f32.gmra.mrb[58].mxu0 %v19158_v20  ;;  %15735 = vmatprep.subr.bf16.mxu1 %v15906_v24  ;;  %v15251_v20 = vpack.c.bf16 %v9415_v4, %v9414_v15 }
 0x5ca   : > { %13248 = vmatmul.mubr.f32.gmra.mrb[58].mxu1 %v9368_v57  ;;  %15237 = vmatpush3.bf16.msra.mxu0 %v15236_v58 }
 0x5cb   : > { %13191 = vmatprep.mubr.msk.f32.mxu0 %vm15907_vm3, %v15908_v54  ;;  %13250 = vmatprep.mubr.msk.f32.mxu1 %vm15907_vm3, %v15908_v54 }
 0x5cc   : > { %15743 = vmatpush3.bf16.msra.mxu1 %v15236_v58  ;;  %15238 = vmatprep.subr.bf16.mxu0 %v15906_v24 }
 0x5cd   : > { %13192 = vmatmul.mubr.f32.gmra.mrb[60].mxu0 %v19181_v29  ;;  %15736 = vmatprep.subr.bf16.mxu1 %v15906_v24  ;;  %v9394_v29 = vld [vmem:[%s18743_s10 + $0x43] sm:$0xff] }
 0x5ce   : > { %13251 = vmatmul.mubr.f32.gmra.mrb[60].mxu1 %v9369_v52  ;;  %13194 = vmatprep.mubr.msk.f32.mxu0 %vm15907_vm3, %v15908_v54 }
 0x5cf   : > { %13253 = vmatprep.mubr.msk.f32.mxu1 %vm15907_vm3, %v15908_v54  ;;  %15240 = vmatpush3.bf16.msra.mxu0 %v15239_v22 }
 0x5d0   : > { %15744 = vmatpush3.bf16.msra.mxu1 %v15239_v22  ;;  %15241 = vmatprep.subr.bf16.mxu0 %v15906_v24 }
 0x5d1   : > { %13195 = vmatmul.mubr.f32.gmra.mrb[62].mxu0 %v19204_v37  ;;  %15737 = vmatprep.subr.bf16.mxu1 %v15906_v24 }
 0x5d2   : > { %13254 = vmatmul.mubr.f32.gmra.mrb[62].mxu1 %v9370_v63  ;;  %13197 = vmatprep.mubr.msk.f32.mxu0 %vm15907_vm3, %v15908_v54 }
 0x5d3   : > { %13256 = vmatprep.mubr.msk.f32.mxu1 %vm15907_vm3, %v15908_v54  ;;  %15243 = vmatpush3.bf16.msra.mxu0 %v15242_v11 }
 0x5d4   : > { %15745 = vmatpush3.bf16.msra.mxu1 %v15242_v11  ;;  %15244 = vmatprep.subr.bf16.mxu0 %v15906_v24 }
 0x5d5   : > { %13198 = vmatmul.mubr.f32.gmra.mrb[64].mxu0 %v19227_v35  ;;  %15738 = vmatprep.subr.bf16.mxu1 %v15906_v24 }
 0x5d6   : > { %13257 = vmatmul.mubr.f32.gmra.mrb[64].mxu1 %v9371_v13  ;;  %13200 = vmatprep.mubr.msk.f32.mxu0 %vm15907_vm3, %v15908_v54 }
 0x5d7   : > { %13259 = vmatprep.mubr.msk.f32.mxu1 %vm15907_vm3, %v15908_v54  ;;  %15246 = vmatpush3.bf16.msra.mxu0 %v15245_v0 }
 0x5d8   : > { %15746 = vmatpush3.bf16.msra.mxu1 %v15245_v0  ;;  %15247 = vmatprep.subr.bf16.mxu0 %v15906_v24 }
 0x5d9   : > { %13201 = vmatmul.mubr.f32.gmra.mrb[66].mxu0 %v19238_v49  ;;  %15739 = vmatprep.subr.bf16.mxu1 %v15906_v24 }
 0x5da   : > { %13260 = vmatmul.mubr.f32.gmra.mrb[66].mxu1 %v9372_v55  ;;  %13203 = vmatprep.mubr.msk.f32.mxu0 %vm15907_vm3, %v15908_v54 }
 0x5db   : > { %13262 = vmatprep.mubr.msk.f32.mxu1 %vm15907_vm3, %v15908_v54  ;;  %15249 = vmatpush3.bf16.msra.mxu0 %v15248_v61 }
 0x5dc   : > { %15747 = vmatpush3.bf16.msra.mxu1 %v15248_v61  ;;  %15250 = vmatprep.subr.bf16.mxu0 %v15906_v24 }
 0x5dd   : > { %13204 = vmatmul.mubr.f32.gmra.mrb[68].mxu0 %v9348_v6  ;;  %15740 = vmatprep.subr.bf16.mxu1 %v15906_v24  ;;  %v9391_v24 = vld [vmem:[%s18743_s10 + $0x2b] sm:$0xff] }
 0x5de   : > { %13263 = vmatmul.mubr.f32.gmra.mrb[68].mxu1 %v9373_v8  ;;  %13206 = vmatprep.mubr.msk.f32.mxu0 %vm15907_vm3, %v15908_v54 }
 0x5df   : > { %13265 = vmatprep.mubr.msk.f32.mxu1 %vm15907_vm3, %v15908_v54  ;;  %15252 = vmatpush3.bf16.msra.mxu0 %v15251_v20 }
 0x5e0   : > { %15748 = vmatpush3.bf16.msra.mxu1 %v15251_v20 }
 0x5e1   : > { %13207 = vmatmul.mubr.f32.gmra.mrb[70].mxu0 %v9349_v10 }
 0x5e2   : > { %13266 = vmatmul.mubr.f32.gmra.mrb[70].mxu1 %v9374_v25  ;;  %13300 = vmatprep.mubr.msk.f32.mxu0 %vm15907_vm3, %v15908_v54 }
 0x5e3   : > { %13315 = vmatprep.mubr.msk.f32.mxu1 %vm15907_vm3, %v15908_v54 }
 0x5e5   : > { %13301 = vmatmul.mubr.f32.vlgmr.msra.gmra.mrb[72].mxu0 %v9391_v24 }
 0x5e6   : > { %13316 = vmatmul.mubr.f32.vlgmr.msra.gmra.mrb[72].mxu1 %v9396_v19  ;;  %13303 = vmatprep.mubr.msk.f32.mxu0 %vm15907_vm3, %v15908_v54 }
 0x5e7   : > { %13318 = vmatprep.mubr.msk.f32.mxu1 %vm15907_vm3, %v15908_v54 }
 0x5e9   : > { %13304 = vmatmul.mubr.f32.gmra.mrb[74].mxu0 %v9392_v16 }
 0x5ea   : > { %13319 = vmatmul.mubr.f32.gmra.mrb[74].mxu1 %v9397_v12  ;;  %13306 = vmatprep.mubr.msk.f32.mxu0 %vm15907_vm3, %v15908_v54 }
 0x5eb   : > { %13321 = vmatprep.mubr.msk.f32.mxu1 %vm15907_vm3, %v15908_v54 }
 0x5ed   : > { %13307 = vmatmul.mubr.f32.gmra.mrb[76].mxu0 %v9393_v26 }
 0x5ee   : > { %13322 = vmatmul.mubr.f32.gmra.mrb[76].mxu1 %v9398_v47  ;;  %13309 = vmatprep.mubr.msk.f32.mxu0 %vm15907_vm3, %v15908_v54 }
 0x5ef   : > { %13324 = vmatprep.mubr.msk.f32.mxu1 %vm15907_vm3, %v15908_v54 }
 0x5f1   : > { %13310 = vmatmul.mubr.f32.gmra.mrb[78].mxu0 %v9394_v29 }
 0x5f2   : > { %13325 = vmatmul.mubr.f32.gmra.mrb[78].mxu1 %v9399_v31  ;;  %13312 = vmatprep.mubr.msk.f32.mxu0 %vm15907_vm3, %v15908_v54 }
 0x5f5   : > { %13313 = vmatmul.mubr.f32.gmra.mrb[80].mxu0 %v9395_v3 }
 0x628   : > { %v4403_v33 = vpop.f32.mrb[0].mxu0 }
 0x629   : > { %v12830_v27 = vpop.f32.mrb[1].mxu0  ;;  %v4513_v7 = vpop.f32.mrb[0].mxu1 }
 0x62a   : > { %v4514_v28 = vadd.f32 %v4513_v7, %v4403_v33  ;;  %v12889_v21 = vpop.f32.mrb[1].mxu1 }
 0x62c   : > { %v4408_v37 = vpop.f32.mrb[2].mxu0 }
 0x62d   : > { %v12833_v59 = vpop.f32.mrb[3].mxu0  ;;  %v4518_v5 = vpop.f32.mrb[2].mxu1 }
 0x62e   : > { %v4519_v32 = vadd.f32 %v4518_v5, %v4408_v37  ;;  %v12892_v42 = vpop.f32.mrb[3].mxu1 }
 0x630   : > { %v4413_v36 = vpop.f32.mrb[4].mxu0 }
 0x631   : > { %v12836_v43 = vpop.f32.mrb[5].mxu0  ;;  %v4523_v30 = vpop.f32.mrb[4].mxu1 }
 0x632   : > { %v4524_v35 = vadd.f32 %v4523_v30, %v4413_v36  ;;  %v12895_v39 = vpop.f32.mrb[5].mxu1 }
 0x634   : > { %v4418_v17 = vpop.f32.mrb[6].mxu0 }
 0x635   : > { %v12839_v48 = vpop.f32.mrb[7].mxu0  ;;  %v4528_v54 = vpop.f32.mrb[6].mxu1 }
 0x636   : > { %v4529_v49 = vadd.f32 %v4528_v54, %v4418_v17  ;;  %v12898_v40 = vpop.f32.mrb[7].mxu1 }
 0x638   : > { %v4423_v18 = vpop.f32.mrb[8].mxu0 }
 0x639   : > { %v12842_v51 = vpop.f32.mrb[9].mxu0  ;;  %v4533_v34 = vpop.f32.mrb[8].mxu1 }
 0x63a   : > { %v4534_v44 = vadd.f32 %v4533_v34, %v4423_v18  ;;  %v12901_v9 = vpop.f32.mrb[9].mxu1 }
 0x63c   : > { %v4428_v45 = vpop.f32.mrb[10].mxu0 }
 0x63d   : > { %v12845_v38 = vpop.f32.mrb[11].mxu0  ;;  %v4538_v56 = vpop.f32.mrb[10].mxu1 }
 0x63e   : > { %v4539_v46 = vadd.f32 %v4538_v56, %v4428_v45  ;;  %v12904_v58 = vpop.f32.mrb[11].mxu1 }
 0x640   : > { %v4433_v57 = vpop.f32.mrb[12].mxu0 }
 0x641   : > { %v12848_v23 = vpop.f32.mrb[13].mxu0  ;;  %v4543_v50 = vpop.f32.mrb[12].mxu1 }
 0x642   : > { %v4544_v52 = vadd.f32 %v4543_v50, %v4433_v57  ;;  %v12907_v22 = vpop.f32.mrb[13].mxu1 }
 0x644   : > { %v4438_v53 = vpop.f32.mrb[14].mxu0 }
 0x645   : > { %v12851_v41 = vpop.f32.mrb[15].mxu0  ;;  %v4548_v63 = vpop.f32.mrb[14].mxu1 }
 0x646   : > { %v4549_v11 = vadd.f32 %v4548_v63, %v4438_v53  ;;  %v12910_v62 = vpop.f32.mrb[15].mxu1 }
 0x648   : > { %v4443_v60 = vpop.f32.mrb[16].mxu0 }
 0x649   : > { %v12854_v13 = vpop.f32.mrb[17].mxu0  ;;  %v4553_v0 = vpop.f32.mrb[16].mxu1 }
 0x64a   : > { %v4554_v2 = vadd.f32 %v4553_v0, %v4443_v60  ;;  %v12913_v14 = vpop.f32.mrb[17].mxu1 }
 0x64c   : > { %v4651_v55 = vpop.f32.mrb[18].mxu0 }
 0x64d   : > { %v4695_v61 = vadd.f32 %v4651_v55, %v4514_v28  ;;  %v12948_v15 = vpop.f32.mrb[19].mxu0  ;;  %v4798_v4 = vpop.f32.mrb[18].mxu1 }
 0x64e   : > { %v13007_v6 = vpop.f32.mrb[19].mxu1 }
 0x64f   : > { %v4842_v8 = vadd.f32 %v4798_v4, %v4695_v61 }
 0x650   : > { %v4656_v20 = vpop.f32.mrb[20].mxu0 }
 0x651   : > { %v4696_v10 = vadd.f32 %v4656_v20, %v4519_v32  ;;  %v12951_v25 = vpop.f32.mrb[21].mxu0  ;;  %v4803_v24 = vpop.f32.mrb[20].mxu1 }
 0x652   : > { %v13010_v19 = vpop.f32.mrb[21].mxu1 }
 0x653   : > { %v4843_v16 = vadd.f32 %v4803_v24, %v4696_v10 }
 0x654   : > { %v4661_v12 = vpop.f32.mrb[22].mxu0 }
 0x655   : > { %v4697_v26 = vadd.f32 %v4661_v12, %v4524_v35  ;;  %v12954_v47 = vpop.f32.mrb[23].mxu0  ;;  %v4808_v29 = vpop.f32.mrb[22].mxu1 }
 0x656   : > { %v13013_v31 = vpop.f32.mrb[23].mxu1 }
 0x657   : > { %v4844_v3 = vadd.f32 %v4808_v29, %v4697_v26 }
 0x658   : > { %v4666_v33 = vpop.f32.mrb[24].mxu0 }
 0x659   : > { %v4698_v27 = vadd.f32 %v4666_v33, %v4529_v49  ;;  %v12957_v7 = vpop.f32.mrb[25].mxu0  ;;  %v4813_v28 = vpop.f32.mrb[24].mxu1 }
 0x65a   : > { %v13016_v21 = vpop.f32.mrb[25].mxu1 }
 0x65b   : > { %v4845_v37 = vadd.f32 %v4813_v28, %v4698_v27 }
 0x65c   : > { %v4671_v59 = vpop.f32.mrb[26].mxu0 }
 0x65d   : > { %v4699_v5 = vadd.f32 %v4671_v59, %v4534_v44  ;;  %v12960_v42 = vpop.f32.mrb[27].mxu0  ;;  %v4818_v32 = vpop.f32.mrb[26].mxu1 }
 0x65e   : > { %v13019_v36 = vpop.f32.mrb[27].mxu1 }
 0x65f   : > { %v4846_v43 = vadd.f32 %v4818_v32, %v4699_v5 }
 0x660   : > { %v4676_v30 = vpop.f32.mrb[28].mxu0 }
 0x661   : > { %v4700_v39 = vadd.f32 %v4676_v30, %v4539_v46  ;;  %v12963_v17 = vpop.f32.mrb[29].mxu0  ;;  %v4823_v35 = vpop.f32.mrb[28].mxu1 }
 0x662   : > { %v13022_v48 = vpop.f32.mrb[29].mxu1 }
 0x663   : > { %v4847_v54 = vadd.f32 %v4823_v35, %v4700_v39 }
 0x664   : > { %v4681_v40 = vpop.f32.mrb[30].mxu0 }
 0x665   : > { %v4701_v18 = vadd.f32 %v4681_v40, %v4544_v52  ;;  %v12966_v51 = vpop.f32.mrb[31].mxu0  ;;  %v4828_v49 = vpop.f32.mrb[30].mxu1 }
 0x666   : > { %v13025_v34 = vpop.f32.mrb[31].mxu1 }
 0x667   : > { %v4848_v9 = vadd.f32 %v4828_v49, %v4701_v18 }
 0x668   : > { %v4686_v45 = vpop.f32.mrb[32].mxu0 }
 0x669   : > { %v4702_v38 = vadd.f32 %v4686_v45, %v4549_v11  ;;  %v12969_v56 = vpop.f32.mrb[33].mxu0  ;;  %v4833_v44 = vpop.f32.mrb[32].mxu1 }
 0x66a   : > { %v13028_v58 = vpop.f32.mrb[33].mxu1 }
 0x66b   : > { %v4849_v57 = vadd.f32 %v4833_v44, %v4702_v38 }
 0x66c   : > { %v4691_v23 = vpop.f32.mrb[34].mxu0 }
 0x66d   : > { %v4703_v50 = vadd.f32 %v4691_v23, %v4554_v2  ;;  %v12972_v22 = vpop.f32.mrb[35].mxu0  ;;  %v4838_v46 = vpop.f32.mrb[34].mxu1 }
 0x66e   : > { %v13031_v53 = vpop.f32.mrb[35].mxu1 }
 0x66f   : > { %v4850_v41 = vadd.f32 %v4838_v46, %v4703_v50 }
 0x670   : > { %v4945_v63 = vpop.f32.mrb[36].mxu0 }
 0x671   : > { %v4989_v62 = vadd.f32 %v4945_v63, %v4842_v8  ;;  %v13066_v60 = vpop.f32.mrb[37].mxu0  ;;  %v5092_v52 = vpop.f32.mrb[36].mxu1 }
 0x672   : > { %v13125_v13 = vpop.f32.mrb[37].mxu1 }
 0x673   : > { %v5136_v0 = vadd.f32 %v5092_v52, %v4989_v62 }
 0x674   : > { %v4950_v14 = vpop.f32.mrb[38].mxu0 }
 0x675   : > { %v4990_v55 = vadd.f32 %v4950_v14, %v4843_v16  ;;  %v13069_v61 = vpop.f32.mrb[39].mxu0  ;;  %v5097_v11 = vpop.f32.mrb[38].mxu1 }
 0x676   : > { %v13128_v15 = vpop.f32.mrb[39].mxu1 }
 0x677   : > { %v5137_v4 = vadd.f32 %v5097_v11, %v4990_v55 }
 0x678   : > { %v4955_v6 = vpop.f32.mrb[40].mxu0 }
 0x679   : > { %v4991_v20 = vadd.f32 %v4955_v6, %v4844_v3  ;;  %v13072_v10 = vpop.f32.mrb[41].mxu0  ;;  %v5102_v2 = vpop.f32.mrb[40].mxu1 }
 0x67a   : > { %v13131_v25 = vpop.f32.mrb[41].mxu1 }
 0x67b   : > { %v5138_v24 = vadd.f32 %v5102_v2, %v4991_v20 }
 0x67c   : > { %v4960_v19 = vpop.f32.mrb[42].mxu0 }
 0x67d   : > { %v4992_v12 = vadd.f32 %v4960_v19, %v4845_v37  ;;  %v13075_v26 = vpop.f32.mrb[43].mxu0  ;;  %v5107_v8 = vpop.f32.mrb[42].mxu1 }
 0x67e   : > { %v13134_v47 = vpop.f32.mrb[43].mxu1 }
 0x67f   : > { %v5139_v29 = vadd.f32 %v5107_v8, %v4992_v12 }
 0x680   : > { %v4965_v31 = vpop.f32.mrb[44].mxu0 }
 0x681   : > { %v4993_v33 = vadd.f32 %v4965_v31, %v4846_v43  ;;  %v13078_v27 = vpop.f32.mrb[45].mxu0  ;;  %v5112_v16 = vpop.f32.mrb[44].mxu1 }
 0x682   : > { %v13137_v7 = vpop.f32.mrb[45].mxu1 }
 0x683   : > { %v5140_v28 = vadd.f32 %v5112_v16, %v4993_v33 }
 0x684   : > { %v4970_v21 = vpop.f32.mrb[46].mxu0 }
 0x685   : > { %v4994_v59 = vadd.f32 %v4970_v21, %v4847_v54  ;;  %v13081_v5 = vpop.f32.mrb[47].mxu0  ;;  %v5117_v3 = vpop.f32.mrb[46].mxu1 }
 0x686   : > { %v13140_v42 = vpop.f32.mrb[47].mxu1 }
 0x687   : > { %v5141_v32 = vadd.f32 %v5117_v3, %v4994_v59 }
 0x688   : > { %v4975_v36 = vpop.f32.mrb[48].mxu0 }
 0x689   : > { %v4995_v30 = vadd.f32 %v4975_v36, %v4848_v9  ;;  %v13084_v39 = vpop.f32.mrb[49].mxu0  ;;  %v5122_v37 = vpop.f32.mrb[48].mxu1 }
 0x68a   : > { %v13143_v17 = vpop.f32.mrb[49].mxu1 }
 0x68b   : > { %v5142_v35 = vadd.f32 %v5122_v37, %v4995_v30 }
 0x68c   : > { %v4980_v48 = vpop.f32.mrb[50].mxu0 }
 0x68d   : > { %v4996_v40 = vadd.f32 %v4980_v48, %v4849_v57  ;;  %v13087_v18 = vpop.f32.mrb[51].mxu0  ;;  %v5127_v43 = vpop.f32.mrb[50].mxu1 }
 0x68e   : > { %v13146_v51 = vpop.f32.mrb[51].mxu1 }
 0x68f   : > { %v5143_v49 = vadd.f32 %v5127_v43, %v4996_v40 }
 0x690   : > { %v4985_v34 = vpop.f32.mrb[52].mxu0 }
 0x691   : > { %v4997_v45 = vadd.f32 %v4985_v34, %v4850_v41  ;;  %v13090_v38 = vpop.f32.mrb[53].mxu0  ;;  %v5132_v54 = vpop.f32.mrb[52].mxu1 }
 0x692   : > { %v13149_v56 = vpop.f32.mrb[53].mxu1 }
 0x693   : > { %v5144_v44 = vadd.f32 %v5132_v54, %v4997_v45  ;;  %v5602_v45 = vld [vmem:[%s19396_s27] sm:$0xff] }
 0x694   : > { %v5239_v58 = vpop.f32.mrb[54].mxu0 }
 0x695   : > { %v5283_v23 = vadd.f32 %v5239_v58, %v5136_v0  ;;  %v13184_v50 = vpop.f32.mrb[55].mxu0  ;;  %v5386_v9 = vpop.f32.mrb[54].mxu1 }
 0x696   : > { %v13243_v22 = vpop.f32.mrb[55].mxu1 }
 0x697   : > { %v5430_v46 = vadd.f32 %v5386_v9, %v5283_v23 }
 0x698   : > { %v5244_v53 = vpop.f32.mrb[56].mxu0 }
 0x699   : > { %v5284_v63 = vadd.f32 %v5244_v53, %v5137_v4  ;;  %v13187_v62 = vpop.f32.mrb[57].mxu0  ;;  %v5391_v57 = vpop.f32.mrb[56].mxu1 }
 0x69a   : > { %v13246_v60 = vpop.f32.mrb[57].mxu1 }
 0x69b   : > { %v5431_v52 = vadd.f32 %v5391_v57, %v5284_v63 }
 0x69c   : > { %v5249_v13 = vpop.f32.mrb[58].mxu0 }
 0x69d   : > { %v5285_v14 = vadd.f32 %v5249_v13, %v5138_v24  ;;  %v13190_v55 = vpop.f32.mrb[59].mxu0  ;;  %v5396_v41 = vpop.f32.mrb[58].mxu1  ;;  %v5608_v13 = vld [vmem:[%s19396_s27 + $0x30] sm:$0xff] }
 0x69e   : > { %v13249_v61 = vpop.f32.mrb[59].mxu1 }
 0x69f   : > { %v19386_v11 = vadd.f32 %v5396_v41, %v5285_v14 }
 0x6a0   : > { %v5254_v15 = vpop.f32.mrb[60].mxu0 }
 0x6a1   : > { %v5286_v6 = vadd.f32 %v5254_v15, %v5139_v29  ;;  %v13193_v0 = vpop.f32.mrb[61].mxu0  ;;  %v5401_v20 = vpop.f32.mrb[60].mxu1 }
 0x6a2   : > { %v13252_v10 = vpop.f32.mrb[61].mxu1  ;;  %v5604_v0 = vld [vmem:[%s19396_s27 + $0x10] sm:$0xff] }
 0x6a3   : > { %v19388_v2 = vadd.f32 %v5401_v20, %v5286_v6 }
 0x6a4   : > { %v5259_v25 = vpop.f32.mrb[62].mxu0 }
 0x6a5   : > { %v5287_v4 = vadd.f32 %v5259_v25, %v5140_v28  ;;  %v13196_v19 = vpop.f32.mrb[63].mxu0  ;;  %v5406_v12 = vpop.f32.mrb[62].mxu1 }
 0x6a6   : > { %v13255_v26 = vpop.f32.mrb[63].mxu1 }
 0x6a7   : > { %v19390_v8 = vadd.f32 %v5406_v12, %v5287_v4  ;;  %v5609_v4 = vld [vmem:[%s19396_s27 + $0x38] sm:$0xff] }
 0x6a8   : > { %v5264_v24 = vpop.f32.mrb[64].mxu0 }
 0x6a9   : > { %v5288_v47 = vadd.f32 %v5264_v24, %v5141_v32  ;;  %v13199_v31 = vpop.f32.mrb[65].mxu0  ;;  %v5411_v33 = vpop.f32.mrb[64].mxu1 }
 0x6aa   : > { %v13258_v27 = vpop.f32.mrb[65].mxu1 }
 0x6ab   : > { %v5435_v16 = vadd.f32 %v5411_v33, %v5288_v47  ;;  %v5605_v33 = vld [vmem:[%s19396_s27 + $0x18] sm:$0xff] }
 0x6ac   : > { %v5269_v7 = vpop.f32.mrb[66].mxu0 }
 0x6ad   : > { %v5289_v29 = vadd.f32 %v5269_v7, %v5142_v35  ;;  %v13202_v21 = vpop.f32.mrb[67].mxu0  ;;  %v5416_v59 = vpop.f32.mrb[66].mxu1 }
 0x6ae   : > { %v13261_v5 = vpop.f32.mrb[67].mxu1 }
 0x6af   : > { %v5436_v3 = vadd.f32 %v5416_v59, %v5289_v29  ;;  %v5610_v29 = vld [vmem:[%s19396_s27 + $0x40] sm:$0xff] }
 0x6b0   : > { %v5274_v42 = vpop.f32.mrb[68].mxu0 }
 0x6b1   : > { %v5290_v28 = vadd.f32 %v5274_v42, %v5143_v49  ;;  %v13205_v36 = vpop.f32.mrb[69].mxu0  ;;  %v5421_v30 = vpop.f32.mrb[68].mxu1 }
 0x6b2   : > { %v13264_v39 = vpop.f32.mrb[69].mxu1 }
 0x6b3   : > { %v5437_v37 = vadd.f32 %v5421_v30, %v5290_v28  ;;  %v5606_v28 = vld [vmem:[%s19396_s27 + $0x20] sm:$0xff] }
 0x6b4   : > { %v5279_v17 = vpop.f32.mrb[70].mxu0 }
 0x6b5   : > { %v5291_v48 = vadd.f32 %v5279_v17, %v5144_v44  ;;  %v13208_v32 = vpop.f32.mrb[71].mxu0  ;;  %v5426_v40 = vpop.f32.mrb[70].mxu1  ;;  %v5607_v44 = vld [vmem:[%s19396_s27 + $0x28] sm:$0xff] }
 0x6b6   : > { %v13267_v18 = vpop.f32.mrb[71].mxu1 }
 0x6b7   : > { %v5438_v43 = vadd.f32 %v5426_v40, %v5291_v48 }
 0x6b8   : > { %v5533_v35 = vpop.f32.mrb[72].mxu0 }
 0x6b9   : > { %v5577_v51 = vadd.f32 %v5533_v35, %v5430_v46  ;;  %v5558_v49 = vpop.f32.mrb[72].mxu1  ;;  %v13302_v34 = vpop.f32.mrb[73].mxu0  ;;  %v5603_v46 = vld [vmem:[%s19396_s27 + $0x8] sm:$0xff] }
 0x6ba   : > { %v5582_v38 = vadd.f32 %v5558_v49, %v5435_v16  ;;  %v13317_v54 = vpop.f32.mrb[73].mxu1 }
 0x6bb   : > { %v5592_v56 = vadd.f32 %v16117_v1, %v5577_v51 }
 0x6bc   : > { %v5597_v58 = vadd.f32 %v16117_v1, %v5582_v38  ;;  %v5538_v23 = vpop.f32.mrb[74].mxu0 }
 0x6bd   : > { %v5611_v50 = vmul.f32 %v5602_v45, %v5592_v56  ;;  %v5578_v9 = vadd.f32 %v5538_v23, %v5431_v52  ;;  %v5563_v22 = vpop.f32.mrb[74].mxu1  ;;  %v13305_v53 = vpop.f32.mrb[75].mxu0 }
 0x6be   : > { %v5616_v63 = vmul.f32 %v5607_v44, %v5597_v58  ;;  %v5583_v62 = vadd.f32 %v5563_v22, %v5436_v3  ;;  %v13320_v57 = vpop.f32.mrb[75].mxu1 }
 0x6bf   : > { %9416 = vst [vmem:[%s19404_s28 + $0x18] sm:$0xff] %v5611_v50  ;;  %v5593_v60 = vadd.f32 %v16117_v1, %v5578_v9 }
 0x6c0   : > { %9421 = vst [vmem:[%s19404_s28 + $0x40] sm:$0xff] %v5616_v63  ;;  %v5598_v52 = vadd.f32 %v16117_v1, %v5583_v62  ;;  %v5543_v14 = vpop.f32.mrb[76].mxu0 }
 0x6c1   : > { %v5612_v55 = vmul.f32 %v5603_v46, %v5593_v60  ;;  %v5579_v41 = vadd.f32 %v5543_v14, %v19386_v11  ;;  %v5568_v61 = vpop.f32.mrb[76].mxu1  ;;  %v13308_v15 = vpop.f32.mrb[77].mxu0 }
 0x6c2   : > { %v5617_v6 = vmul.f32 %v5608_v13, %v5598_v52  ;;  %v5584_v20 = vadd.f32 %v5568_v61, %v5437_v37  ;;  %v13323_v10 = vpop.f32.mrb[77].mxu1 }
 0x6c3   : > { %9417 = vst [vmem:[%s19404_s28 + $0x20] sm:$0xff] %v5612_v55  ;;  %v5594_v25 = vadd.f32 %v16117_v1, %v5579_v41 }
 0x6c4   : > { %9422 = vst [vmem:[%s19404_s28 + $0x48] sm:$0xff] %v5617_v6  ;;  %v5599_v19 = vadd.f32 %v16117_v1, %v5584_v20  ;;  %v5548_v12 = vpop.f32.mrb[78].mxu0 }
 0x6c5   : > { %v5613_v26 = vmul.f32 %v5604_v0, %v5594_v25  ;;  %v5580_v11 = vadd.f32 %v5548_v12, %v19388_v2  ;;  %v5573_v24 = vpop.f32.mrb[78].mxu1  ;;  %v13311_v47 = vpop.f32.mrb[79].mxu0 }
 0x6c6   : > { %v5618_v31 = vmul.f32 %v5609_v4, %v5599_v19  ;;  %v5585_v27 = vadd.f32 %v5573_v24, %v5438_v43  ;;  %v13326_v16 = vpop.f32.mrb[79].mxu1 }
 0x6c7   : > { %9418 = vst [vmem:[%s19404_s28 + $0x28] sm:$0xff] %v5613_v26  ;;  %v5595_v7 = vadd.f32 %v16117_v1, %v5580_v11 }
 0x6c8   : > { %9423 = vst [vmem:[%s19404_s28 + $0x50] sm:$0xff] %v5618_v31  ;;  %v5600_v21 = vadd.f32 %v16117_v1, %v5585_v27  ;;  %v5553_v59 = vpop.f32.mrb[80].mxu0 }
 0x6c9   : > { %v5614_v5 = vmul.f32 %v5605_v33, %v5595_v7  ;;  %v5581_v2 = vadd.f32 %v5553_v59, %v19390_v8  ;;  %v13314_v3 = vpop.f32.mrb[81].mxu0  ;;  %4279 = sbr.rel (!%p4277_p3) target bundleno = 1331 (0x533), region = 224 }
 0x6ca   : > { %v5619_v42 = vmul.f32 %v5610_v29, %v5600_v21 }
 0x6cb   : > { %9419 = vst [vmem:[%s19404_s28 + $0x30] sm:$0xff] %v5614_v5  ;;  %v5596_v36 = vadd.f32 %v16117_v1, %v5581_v2 }
 0x6cc   : > { %9424 = vst [vmem:[%s19404_s28 + $0x58] sm:$0xff] %v5619_v42 }
 0x6cd   : > { %v5615_v30 = vmul.f32 %v5606_v28, %v5596_v36 }
 0x6cf   : > { %9420 = vst [vmem:[%s19404_s28 + $0x38] sm:$0xff] %v5615_v30 }
 0x6d0 LB: > { %v9443_v8 = vld [vmem:[%s21073_s1 + $0x80] sm:$0xff]  ;;  %v9444_v39 = vld [vmem:[%s21073_s1 + $0x88] sm:$0xff]  ;;  %v15909_v17 = vmov 0.0|0.0   ;;  %v9445_v40 = vld [vmem:[%s21073_s1 + $0x90] sm:$0xff]  ;;  %vm15910_vm4 = vmmov 0   ;;  %v15911_v49 = vmov 0.0   ;;  %s15890_s0 = sphi %s19434_s0, %s5635_s0  }
 0x6d1   : > { %v5648_v37 = vld [vmem:[%s21073_s1] sm:$0xff]  ;;  %15253 = vmatprep.subr.bf16.mxu0 %v15909_v17  ;;  %15277 = vmatprep.subr.bf16.mxu1 %v15909_v17  ;;  %v15254_v48 = vpack.c.bf16 %v9444_v39, %v9443_v8  ;;  %v5649_v32 = vld [vmem:[%s21073_s1 + $0x8] sm:$0xff]  ;;  %v9446_v18 = vld [vmem:[%s21073_s1 + $0x98] sm:$0xff]  ;;  %s19547_s25 = smul.u32 72, %s15890_s0  ;;  %s5635_s0 = sadd.s32 1, %s15890_s0  }
 0x6d2   : > { %v15278_v43 = vpack.c.bf16 %v5649_v32, %v5648_v37  ;;  %v5650_v35 = vld [vmem:[%s21073_s1 + $0x10] sm:$0xff]  ;;  %v5651_v51 = vld [vmem:[%s21073_s1 + $0x18] sm:$0xff]  ;;  %13359 = vmatprep.mubr.msk.f32.mxu0 %vm15910_vm4, %v15911_v49  ;;  %13418 = vmatprep.mubr.msk.f32.mxu1 %vm15910_vm4, %v15911_v49  ;;  %v15257_v34 = vpack.c.bf16 %v9446_v18, %v9445_v40  ;;  %v9447_v38 = vld [vmem:[%s21073_s1 + $0xa0] sm:$0xff]  ;;  %p5632_p4 = scmp.ge.s32.totalorder %s5635_s0, 9  }
 0x6d3   : > { %15255 = vmatpush3.bf16.msra.mxu0 %v15254_v48  ;;  %v15281_v45 = vpack.c.bf16 %v5651_v51, %v5650_v35  ;;  %v9448_v54 = vld [vmem:[%s21073_s1 + $0xa8] sm:$0xff]  ;;  %v5652_v56 = vld [vmem:[%s21073_s1 + $0x20] sm:$0xff]  ;;  %v9449_v50 = vld [vmem:[%s21073_s1 + $0xb0] sm:$0xff]  ;;  %s19571_s23 = scalar_lea.vmem [#allocation3], %s19547_s25  ;;  %s20224_s6 = scalar_lea.vmem %s21075_s3, %s19547_s25 }
 0x6d4   : > { %15279 = vmatpush3.bf16.msra.mxu1 %v15278_v43  ;;  %15256 = vmatprep.subr.bf16.mxu0 %v15909_v17  ;;  %v5653_v44 = vld [vmem:[%s21073_s1 + $0x28] sm:$0xff]  ;;  %v15260_v58 = vpack.c.bf16 %v9448_v54, %v9447_v38  ;;  %v9450_v9 = vld [vmem:[%s21073_s1 + $0xb8] sm:$0xff]  ;;  %v5654_v22 = vld [vmem:[%s21073_s1 + $0x30] sm:$0xff]  ;;  %s20234_s15 = scalar_lea.vmem [#allocation2], %s19547_s25  ;;  %s20262_s25 = smov (%p5632_p4), 0  }
 0x6d5   : > { %15280 = vmatprep.subr.bf16.mxu1 %v15909_v17  ;;  %v15284_v23 = vpack.c.bf16 %v5653_v44, %v5652_v56  ;;  %v5655_v53 = vld [vmem:[%s21073_s1 + $0x38] sm:$0xff]  ;;  %v15263_v63 = vpack.c.bf16 %v9450_v9, %v9449_v50  ;;  %v9451_v62 = vld [vmem:[%s21073_s1 + $0xc0] sm:$0xff]  ;;  %v9452_v57 = vld [vmem:[%s21073_s1 + $0xc8] sm:$0xff] }
 0x6d6   : > { %v15287_v46 = vpack.c.bf16 %v5655_v53, %v5654_v22  ;;  %v5656_v60 = vld [vmem:[%s21073_s1 + $0x40] sm:$0xff]  ;;  %v5657_v13 = vld [vmem:[%s21073_s1 + $0x48] sm:$0xff]  ;;  %v15266_v52 = vpack.c.bf16 %v9452_v57, %v9451_v62  ;;  %v9453_v55 = vld [vmem:[%s21073_s1 + $0xd0] sm:$0xff] }
 0x6d7   : > { %15258 = vmatpush3.bf16.msra.mxu0 %v15257_v34  ;;  %v15290_v14 = vpack.c.bf16 %v5657_v13, %v5656_v60  ;;  %v9454_v41 = vld [vmem:[%s21073_s1 + $0xd8] sm:$0xff]  ;;  %v5658_v61 = vld [vmem:[%s21073_s1 + $0x50] sm:$0xff]  ;;  %v9455_v20 = vld [vmem:[%s21073_s1 + $0xe0] sm:$0xff] }
 0x6d8   : > { %15282 = vmatpush3.bf16.msra.mxu1 %v15281_v45  ;;  %15259 = vmatprep.subr.bf16.mxu0 %v15909_v17  ;;  %v5659_v15 = vld [vmem:[%s21073_s1 + $0x58] sm:$0xff]  ;;  %v15269_v6 = vpack.c.bf16 %v9454_v41, %v9453_v55  ;;  %v9456_v10 = vld [vmem:[%s21073_s1 + $0xe8] sm:$0xff]  ;;  %v5660_v25 = vld [vmem:[%s21073_s1 + $0x60] sm:$0xff] }
 0x6d9   : > { %15283 = vmatprep.subr.bf16.mxu1 %v15909_v17  ;;  %v15293_v0 = vpack.c.bf16 %v5659_v15, %v5658_v61  ;;  %v5661_v4 = vld [vmem:[%s21073_s1 + $0x68] sm:$0xff]  ;;  %v15272_v19 = vpack.c.bf16 %v9456_v10, %v9455_v20  ;;  %v9457_v26 = vld [vmem:[%s21073_s1 + $0xf0] sm:$0xff]  ;;  %v9458_v11 = vld [vmem:[%s21073_s1 + $0xf8] sm:$0xff] }
 0x6da   : > { %v15296_v12 = vpack.c.bf16 %v5661_v4, %v5660_v25  ;;  %v5662_v24 = vld [vmem:[%s21073_s1 + $0x70] sm:$0xff]  ;;  %v5663_v47 = vld [vmem:[%s21073_s1 + $0x78] sm:$0xff]  ;;  %v15275_v31 = vpack.c.bf16 %v9458_v11, %v9457_v26  ;;  %v9468_v27 = vld [vmem:[%s21073_s1 + $0x100] sm:$0xff] }
 0x6db   : > { %15261 = vmatpush3.bf16.msra.mxu0 %v15260_v58  ;;  %v15299_v33 = vpack.c.bf16 %v5663_v47, %v5662_v24  ;;  %v9469_v16 = vld [vmem:[%s21073_s1 + $0x108] sm:$0xff]  ;;  %v9493_v7 = vld [vmem:[%s21073_s1 + $0x180] sm:$0xff]  ;;  %v9470_v2 = vld [vmem:[%s21073_s1 + $0x110] sm:$0xff] }
 0x6dc   : > { %15285 = vmatpush3.bf16.msra.mxu1 %v15284_v23  ;;  %15262 = vmatprep.subr.bf16.mxu0 %v15909_v17  ;;  %v9494_v29 = vld [vmem:[%s21073_s1 + $0x188] sm:$0xff]  ;;  %v15302_v59 = vpack.c.bf16 %v9469_v16, %v9468_v27  ;;  %v9471_v3 = vld [vmem:[%s21073_s1 + $0x118] sm:$0xff]  ;;  %v9495_v28 = vld [vmem:[%s21073_s1 + $0x190] sm:$0xff] }
 0x6dd   : > { %15286 = vmatprep.subr.bf16.mxu1 %v15909_v17  ;;  %v9434_v21 = vld [vmem:[%s19571_s23 + $0x6] sm:$0xff]  ;;  %v15326_v42 = vpack.c.bf16 %v9494_v29, %v9493_v7  ;;  %v9496_v36 = vld [vmem:[%s21073_s1 + $0x198] sm:$0xff]  ;;  %v9435_v30 = vld [vmem:[%s19571_s23 + $0xe] sm:$0xff]  ;;  %v15305_v8 = vpack.c.bf16 %v9471_v3, %v9470_v2 }
 0x6de   : > { %v9425_v5 = vld [vmem:[%s19571_s23 + $0x5] sm:$0xff]  ;;  %v9426_v39 = vld [vmem:[%s19571_s23 + $0xd] sm:$0xff]  ;;  %v15329_v32 = vpack.c.bf16 %v9496_v36, %v9495_v28  ;;  %v9436_v43 = vld [vmem:[%s19571_s23 + $0x16] sm:$0xff] }
 0x6df   : > { %15264 = vmatpush3.bf16.msra.mxu0 %v15263_v63  ;;  %v9472_v37 = vld [vmem:[%s21073_s1 + $0x120] sm:$0xff]  ;;  %v9473_v48 = vld [vmem:[%s21073_s1 + $0x128] sm:$0xff]  ;;  %v9427_v51 = vld [vmem:[%s19571_s23 + $0x15] sm:$0xff] }
 0x6e0   : > { %15288 = vmatpush3.bf16.msra.mxu1 %v15287_v46  ;;  %15265 = vmatprep.subr.bf16.mxu0 %v15909_v17  ;;  %v9497_v40 = vld [vmem:[%s21073_s1 + $0x1a0] sm:$0xff]  ;;  %v9498_v18 = vld [vmem:[%s21073_s1 + $0x1a8] sm:$0xff]  ;;  %v15308_v35 = vpack.c.bf16 %v9473_v48, %v9472_v37  ;;  %v9474_v45 = vld [vmem:[%s21073_s1 + $0x130] sm:$0xff] }
 0x6e1   : > { %15289 = vmatprep.subr.bf16.mxu1 %v15909_v17  ;;  %v15332_v34 = vpack.c.bf16 %v9498_v18, %v9497_v40  ;;  %v9475_v38 = vld [vmem:[%s21073_s1 + $0x138] sm:$0xff]  ;;  %v9499_v54 = vld [vmem:[%s21073_s1 + $0x1b0] sm:$0xff]  ;;  %v9476_v9 = vld [vmem:[%s21073_s1 + $0x140] sm:$0xff] }
 0x6e2   : > { %v9500_v56 = vld [vmem:[%s21073_s1 + $0x1b8] sm:$0xff]  ;;  %v15311_v23 = vpack.c.bf16 %v9475_v38, %v9474_v45  ;;  %v9477_v22 = vld [vmem:[%s21073_s1 + $0x148] sm:$0xff]  ;;  %v9501_v53 = vld [vmem:[%s21073_s1 + $0x1c0] sm:$0xff] }
 0x6e3   : > { %15267 = vmatpush3.bf16.msra.mxu0 %v15266_v52  ;;  %v9437_v44 = vld [vmem:[%s19571_s23 + $0x1e] sm:$0xff]  ;;  %v15335_v50 = vpack.c.bf16 %v9500_v56, %v9499_v54  ;;  %v9502_v63 = vld [vmem:[%s21073_s1 + $0x1c8] sm:$0xff]  ;;  %v15314_v57 = vpack.c.bf16 %v9477_v22, %v9476_v9  ;;  %v9478_v13 = vld [vmem:[%s21073_s1 + $0x150] sm:$0xff] }
 0x6e4   : > { %15291 = vmatpush3.bf16.msra.mxu1 %v15290_v14  ;;  %15268 = vmatprep.subr.bf16.mxu0 %v15909_v17  ;;  %v9428_v58 = vld [vmem:[%s19571_s23 + $0x1d] sm:$0xff]  ;;  %v9438_v46 = vld [vmem:[%s19571_s23 + $0x26] sm:$0xff]  ;;  %v15338_v60 = vpack.c.bf16 %v9502_v63, %v9501_v53  ;;  %v9503_v14 = vld [vmem:[%s21073_s1 + $0x1d0] sm:$0xff] }
 0x6e5   : > { %15292 = vmatprep.subr.bf16.mxu1 %v15909_v17  ;;  %v9429_v62 = vld [vmem:[%s19571_s23 + $0x25] sm:$0xff]  ;;  %v9479_v52 = vld [vmem:[%s21073_s1 + $0x158] sm:$0xff]  ;;  %v9439_v41 = vld [vmem:[%s19571_s23 + $0x2e] sm:$0xff] }
 0x6e6   : > { %v9504_v55 = vld [vmem:[%s21073_s1 + $0x1d8] sm:$0xff]  ;;  %v9430_v61 = vld [vmem:[%s19571_s23 + $0x2d] sm:$0xff]  ;;  %v15317_v15 = vpack.c.bf16 %v9479_v52, %v9478_v13  ;;  %v9505_v10 = vld [vmem:[%s21073_s1 + $0x1e0] sm:$0xff] }
 0x6e7   : > { %15270 = vmatpush3.bf16.msra.mxu0 %v15269_v6  ;;  %v15341_v6 = vpack.c.bf16 %v9504_v55, %v9503_v14  ;;  %v9481_v20 = vld [vmem:[%s21073_s1 + $0x168] sm:$0xff]  ;;  %v9440_v4 = vld [vmem:[%s19571_s23 + $0x36] sm:$0xff]  ;;  %v9543_v2 = vld [vmem:[%s21073_s1 + $0x280] sm:$0xff] }
 0x6e8   : > { %15294 = vmatpush3.bf16.msra.mxu1 %v15293_v0  ;;  %15271 = vmatprep.subr.bf16.mxu0 %v15909_v17  ;;  %v9480_v0 = vld [vmem:[%s21073_s1 + $0x160] sm:$0xff]  ;;  %v9506_v25 = vld [vmem:[%s21073_s1 + $0x1e8] sm:$0xff]  ;;  %v9482_v11 = vld [vmem:[%s21073_s1 + $0x170] sm:$0xff] }
 0x6e9   : > { %15295 = vmatprep.subr.bf16.mxu1 %v15909_v17  ;;  %v15344_v26 = vpack.c.bf16 %v9506_v25, %v9505_v10  ;;  %v9483_v24 = vld [vmem:[%s21073_s1 + $0x178] sm:$0xff]  ;;  %v9507_v47 = vld [vmem:[%s21073_s1 + $0x1f0] sm:$0xff]  ;;  %v9442_v29 = vld [vmem:[%s19571_s23 + $0x46] sm:$0xff] }
 0x6ea   : > { %v9432_v27 = vld [vmem:[%s19571_s23 + $0x3d] sm:$0xff]  ;;  %v15323_v16 = vpack.c.bf16 %v9483_v24, %v9482_v11  ;;  %v9544_v3 = vld [vmem:[%s21073_s1 + $0x288] sm:$0xff]  ;;  %v9545_v37 = vld [vmem:[%s21073_s1 + $0x290] sm:$0xff] }
 0x6eb   : > { %15273 = vmatpush3.bf16.msra.mxu0 %v15272_v19  ;;  %v9431_v19 = vld [vmem:[%s19571_s23 + $0x35] sm:$0xff]  ;;  %v9485_v18 = vld [vmem:[%s19571_s23 + $0x1f] sm:$0xff]  ;;  %v9548_v45 = vld [vmem:[%s21073_s1 + $0x2a8] sm:$0xff] }
 0x6ec   : > { %15297 = vmatpush3.bf16.msra.mxu1 %v15296_v12  ;;  %15274 = vmatprep.subr.bf16.mxu0 %v15909_v17  ;;  %v15320_v12 = vpack.c.bf16 %v9481_v20, %v9480_v0  ;;  %v9484_v36 = vld [vmem:[%s19571_s23 + $0x17] sm:$0xff]  ;;  %v9486_v54 = vld [vmem:[%s19571_s23 + $0x27] sm:$0xff]  ;;  %v9487_v9 = vld [vmem:[%s19571_s23 + $0x2f] sm:$0xff] }
 0x6ed   : > { %15298 = vmatprep.subr.bf16.mxu1 %v15909_v17  ;;  %v9546_v48 = vld [vmem:[%s21073_s1 + $0x298] sm:$0xff]  ;;  %v9526_v63 = vld [vmem:[%s21073_s1 + $0x240] sm:$0xff]  ;;  %v9528_v14 = vld [vmem:[%s21073_s1 + $0x250] sm:$0xff] }
 0x6ee   : > { %v9529_v55 = vld [vmem:[%s21073_s1 + $0x258] sm:$0xff]  ;;  %v9530_v20 = vld [vmem:[%s21073_s1 + $0x260] sm:$0xff]  ;;  %v9531_v10 = vld [vmem:[%s21073_s1 + $0x268] sm:$0xff] }
 0x6ef   : > { %15276 = vmatpush3.bf16.msra.mxu0 %v15275_v31  ;;  %v9508_v31 = vld [vmem:[%s21073_s1 + $0x1f8] sm:$0xff]  ;;  %v9555_v25 = vld [vmem:[%s21073_s1 + $0x2e0] sm:$0xff]  ;;  %v9532_v11 = vld [vmem:[%s21073_s1 + $0x270] sm:$0xff] }
 0x6f0   : > { %15300 = vmatpush3.bf16.msra.mxu1 %v15299_v33  ;;  %15301 = vmatprep.subr.bf16.mxu0 %v15909_v17  ;;  %v9441_v33 = vld [vmem:[%s19571_s23 + $0x3e] sm:$0xff]  ;;  %v15347_v7 = vpack.c.bf16 %v9508_v31, %v9507_v47  ;;  %v9557_v47 = vld [vmem:[%s21073_s1 + $0x2f0] sm:$0xff] }
 0x6f1   : > { %15325 = vmatprep.subr.bf16.mxu1 %v15909_v17  ;;  %v9533_v24 = vld [vmem:[%s21073_s1 + $0x278] sm:$0xff] }
 0x6f2   : > { %13360 = vmatmul.mubr.f32.vlgmr.msra.gmra.mrb[0].mxu0 %v9434_v21  ;;  %v9433_v21 = vld [vmem:[%s19571_s23 + $0x45] sm:$0xff]  ;;  %v9558_v31 = vld [vmem:[%s21073_s1 + $0x2f8] sm:$0xff] }
 0x6f3   : > { %13419 = vmatmul.mubr.f32.vlgmr.msra.gmra.mrb[0].mxu1 %v9425_v5  ;;  %15303 = vmatpush3.bf16.msra.mxu0 %v15302_v59  ;;  %v9518_v59 = vld [vmem:[%s21073_s1 + $0x200] sm:$0xff]  ;;  %v9519_v5 = vld [vmem:[%s21073_s1 + $0x208] sm:$0xff] }
 0x6f4   : > { %13362 = vmatprep.mubr.msk.f32.mxu0 %vm15910_vm4, %v15911_v49  ;;  %13421 = vmatprep.mubr.msk.f32.mxu1 %vm15910_vm4, %v15911_v49  ;;  %v15350_v28 = vpack.c.bf16 %v9519_v5, %v9518_v59  ;;  %v9593_v59 = vld [vmem:[%s21073_s1 + $0x380] sm:$0xff]  ;;  %v9594_v5 = vld [vmem:[%s21073_s1 + $0x388] sm:$0xff] }
 0x6f5   : > { %15304 = vmatprep.subr.bf16.mxu0 %v15909_v17  ;;  %15327 = vmatpush3.bf16.msra.mxu1 %v15326_v42  ;;  %v9459_v42 = vld [vmem:[%s19571_s23 + $0x7] sm:$0xff] }
 0x6f6   : > { %13363 = vmatmul.mubr.f32.gmra.mrb[2].mxu0 %v9435_v30  ;;  %15328 = vmatprep.subr.bf16.mxu1 %v15909_v17  ;;  %v9520_v30 = vld [vmem:[%s21073_s1 + $0x210] sm:$0xff] }
 0x6f7   : > { %13422 = vmatmul.mubr.f32.gmra.mrb[2].mxu1 %v9426_v39  ;;  %15306 = vmatpush3.bf16.msra.mxu0 %v15305_v8  ;;  %v9521_v8 = vld [vmem:[%s21073_s1 + $0x218] sm:$0xff]  ;;  %v15374_v39 = vpack.c.bf16 %v9544_v3, %v9543_v2 }
 0x6f8   : > { %13365 = vmatprep.mubr.msk.f32.mxu0 %vm15910_vm4, %v15911_v49  ;;  %13424 = vmatprep.mubr.msk.f32.mxu1 %vm15910_vm4, %v15911_v49  ;;  %v15353_v40 = vpack.c.bf16 %v9521_v8, %v9520_v30  ;;  %v9509_v2 = vld [vmem:[%s19571_s23 + $0x18] sm:$0xff]  ;;  %v15422_v30 = vpack.c.bf16 %v9594_v5, %v9593_v59  ;;  %v9595_v8 = vld [vmem:[%s21073_s1 + $0x390] sm:$0xff] }
 0x6f9   : > { %15307 = vmatprep.subr.bf16.mxu0 %v15909_v17  ;;  %15330 = vmatpush3.bf16.msra.mxu1 %v15329_v32  ;;  %v9460_v32 = vld [vmem:[%s19571_s23 + $0xf] sm:$0xff]  ;;  %v9517_v5 = vld [vmem:[%s19571_s23 + $0x58] sm:$0xff] }
 0x6fa   : > { %13366 = vmatmul.mubr.f32.gmra.mrb[4].mxu0 %v9436_v43  ;;  %15331 = vmatprep.subr.bf16.mxu1 %v15909_v17  ;;  %v9522_v43 = vld [vmem:[%s21073_s1 + $0x220] sm:$0xff] }
 0x6fb   : > { %13425 = vmatmul.mubr.f32.gmra.mrb[4].mxu1 %v9427_v51  ;;  %15309 = vmatpush3.bf16.msra.mxu0 %v15308_v35  ;;  %v9523_v35 = vld [vmem:[%s21073_s1 + $0x228] sm:$0xff]  ;;  %v15377_v51 = vpack.c.bf16 %v9546_v48, %v9545_v37  ;;  %v9510_v37 = vld [vmem:[%s19571_s23 + $0x20] sm:$0xff] }
 0x6fc   : > { %13368 = vmatprep.mubr.msk.f32.mxu0 %vm15910_vm4, %v15911_v49  ;;  %13427 = vmatprep.mubr.msk.f32.mxu1 %vm15910_vm4, %v15911_v49  ;;  %v15356_v38 = vpack.c.bf16 %v9523_v35, %v9522_v43  ;;  %v9597_v35 = vld [vmem:[%s21073_s1 + $0x3a0] sm:$0xff] }
 0x6fd   : > { %15333 = vmatpush3.bf16.msra.mxu1 %v15332_v34  ;;  %15310 = vmatprep.subr.bf16.mxu0 %v15909_v17  ;;  %v9547_v34 = vld [vmem:[%s21073_s1 + $0x2a0] sm:$0xff] }
 0x6fe   : > { %13369 = vmatmul.mubr.f32.gmra.mrb[6].mxu0 %v9437_v44  ;;  %15334 = vmatprep.subr.bf16.mxu1 %v15909_v17  ;;  %v15380_v56 = vpack.c.bf16 %v9548_v45, %v9547_v34  ;;  %v9524_v44 = vld [vmem:[%s21073_s1 + $0x230] sm:$0xff]  ;;  %v9511_v34 = vld [vmem:[%s19571_s23 + $0x28] sm:$0xff] }
 0x6ff   : > { %13428 = vmatmul.mubr.f32.gmra.mrb[6].mxu1 %v9428_v58  ;;  %13371 = vmatprep.mubr.msk.f32.mxu0 %vm15910_vm4, %v15911_v49  ;;  %v9525_v58 = vld [vmem:[%s21073_s1 + $0x238] sm:$0xff] }
 0x700   : > { %13430 = vmatprep.mubr.msk.f32.mxu1 %vm15910_vm4, %v15911_v49  ;;  %15312 = vmatpush3.bf16.msra.mxu0 %v15311_v23  ;;  %v9549_v23 = vld [vmem:[%s21073_s1 + $0x2b0] sm:$0xff]  ;;  %v15359_v22 = vpack.c.bf16 %v9525_v58, %v9524_v44  ;;  %v9575_v44 = vld [vmem:[%s21073_s1 + $0x338] sm:$0xff] }
 0x701   : > { %15336 = vmatpush3.bf16.msra.mxu1 %v15335_v50  ;;  %15313 = vmatprep.subr.bf16.mxu0 %v15909_v17  ;;  %v9550_v50 = vld [vmem:[%s21073_s1 + $0x2b8] sm:$0xff]  ;;  %v9599_v58 = vld [vmem:[%s21073_s1 + $0x3b0] sm:$0xff] }
 0x702   : > { %13372 = vmatmul.mubr.f32.gmra.mrb[8].mxu0 %v9438_v46  ;;  %15337 = vmatprep.subr.bf16.mxu1 %v15909_v17  ;;  %v15383_v53 = vpack.c.bf16 %v9550_v50, %v9549_v23  ;;  %v9527_v46 = vld [vmem:[%s21073_s1 + $0x248] sm:$0xff]  ;;  %v9600_v23 = vld [vmem:[%s21073_s1 + $0x3b8] sm:$0xff]  ;;  %v9512_v50 = vld [vmem:[%s19571_s23 + $0x30] sm:$0xff] }
 0x703   : > { %13431 = vmatmul.mubr.f32.gmra.mrb[8].mxu1 %v9429_v62  ;;  %13374 = vmatprep.mubr.msk.f32.mxu0 %vm15910_vm4, %v15911_v49  ;;  %v9551_v62 = vld [vmem:[%s21073_s1 + $0x2c0] sm:$0xff]  ;;  %v15362_v13 = vpack.c.bf16 %v9527_v46, %v9526_v63  ;;  %v9577_v46 = vld [vmem:[%s21073_s1 + $0x348] sm:$0xff] }
 0x704   : > { %13433 = vmatprep.mubr.msk.f32.mxu1 %vm15910_vm4, %v15911_v49  ;;  %15315 = vmatpush3.bf16.msra.mxu0 %v15314_v57  ;;  %v9552_v57 = vld [vmem:[%s21073_s1 + $0x2c8] sm:$0xff]  ;;  %v9576_v63 = vld [vmem:[%s21073_s1 + $0x340] sm:$0xff] }
 0x705   : > { %15339 = vmatpush3.bf16.msra.mxu1 %v15338_v60  ;;  %15316 = vmatprep.subr.bf16.mxu0 %v15909_v17  ;;  %v9488_v60 = vld [vmem:[%s19571_s23 + $0x37] sm:$0xff]  ;;  %v15386_v52 = vpack.c.bf16 %v9552_v57, %v9551_v62  ;;  %v9601_v62 = vld [vmem:[%s21073_s1 + $0x3c0] sm:$0xff]  ;;  %v9602_v57 = vld [vmem:[%s21073_s1 + $0x3c8] sm:$0xff] }
 0x706   : > { %13375 = vmatmul.mubr.f32.gmra.mrb[10].mxu0 %v9439_v41  ;;  %15340 = vmatprep.subr.bf16.mxu1 %v15909_v17  ;;  %v9553_v41 = vld [vmem:[%s21073_s1 + $0x2d0] sm:$0xff] }
 0x707   : > { %13434 = vmatmul.mubr.f32.gmra.mrb[10].mxu1 %v9430_v61  ;;  %13377 = vmatprep.mubr.msk.f32.mxu0 %vm15910_vm4, %v15911_v49  ;;  %v9554_v61 = vld [vmem:[%s21073_s1 + $0x2d8] sm:$0xff] }
 0x708   : > { %13436 = vmatprep.mubr.msk.f32.mxu1 %vm15910_vm4, %v15911_v49  ;;  %15318 = vmatpush3.bf16.msra.mxu0 %v15317_v15  ;;  %v9489_v15 = vld [vmem:[%s19571_s23 + $0x3f] sm:$0xff]  ;;  %v15389_v0 = vpack.c.bf16 %v9554_v61, %v9553_v41  ;;  %v9603_v61 = vld [vmem:[%s21073_s1 + $0x3d0] sm:$0xff] }
 0x709   : > { %15342 = vmatpush3.bf16.msra.mxu1 %v15341_v6  ;;  %15319 = vmatprep.subr.bf16.mxu0 %v15909_v17  ;;  %v15365_v6 = vpack.c.bf16 %v9529_v55, %v9528_v14  ;;  %v15434_v14 = vpack.c.bf16 %v9602_v57, %v9601_v62  ;;  %v9578_v55 = vld [vmem:[%s21073_s1 + $0x350] sm:$0xff]  ;;  %v9579_v41 = vld [vmem:[%s21073_s1 + $0x358] sm:$0xff]  ;;  %v9566_v57 = vld [vmem:[%s19571_s23 + $0x61] sm:$0xff] }
 0x70a   : > { %13378 = vmatmul.mubr.f32.gmra.mrb[12].mxu0 %v9440_v4  ;;  %15343 = vmatprep.subr.bf16.mxu1 %v15909_v17  ;;  %v9556_v4 = vld [vmem:[%s21073_s1 + $0x2e8] sm:$0xff]  ;;  %v9633_v62 = vld [vmem:[%s21073_s1 + $0x478] sm:$0xff] }
 0x70b   : > { %13437 = vmatmul.mubr.f32.gmra.mrb[12].mxu1 %v9431_v19  ;;  %13380 = vmatprep.mubr.msk.f32.mxu0 %vm15910_vm4, %v15911_v49  ;;  %v9490_v19 = vld [vmem:[%s19571_s23 + $0x47] sm:$0xff] }
 0x70c   : > { %13439 = vmatprep.mubr.msk.f32.mxu1 %vm15910_vm4, %v15911_v49  ;;  %15321 = vmatpush3.bf16.msra.mxu0 %v15320_v12  ;;  %v15368_v12 = vpack.c.bf16 %v9531_v10, %v9530_v20  ;;  %v15413_v20 = vpack.c.bf16 %v9579_v41, %v9578_v55  ;;  %v9614_v55 = vld [vmem:[%s19571_s23 + $0x53] sm:$0xff] }
 0x70d   : > { %15345 = vmatpush3.bf16.msra.mxu1 %v15344_v26  ;;  %15322 = vmatprep.subr.bf16.mxu0 %v15909_v17  ;;  %v15392_v26 = vpack.c.bf16 %v9556_v4, %v9555_v25  ;;  %v9580_v25 = vld [vmem:[%s21073_s1 + $0x360] sm:$0xff]  ;;  %v9581_v4 = vld [vmem:[%s21073_s1 + $0x368] sm:$0xff]  ;;  %v9610_v41 = vld [vmem:[%s19571_s23 + $0x33] sm:$0xff] }
 0x70e   : > { %13381 = vmatmul.mubr.f32.gmra.mrb[14].mxu0 %v9441_v33  ;;  %15346 = vmatprep.subr.bf16.mxu1 %v15909_v17  ;;  %v9491_v33 = vld [vmem:[%s19571_s23 + $0x4f] sm:$0xff] }
 0x70f   : > { %13440 = vmatmul.mubr.f32.gmra.mrb[14].mxu1 %v9432_v27  ;;  %13383 = vmatprep.mubr.msk.f32.mxu0 %vm15910_vm4, %v15911_v49  ;;  %v15371_v27 = vpack.c.bf16 %v9533_v24, %v9532_v11  ;;  %v20032_v11 = vld [vmem:[%s19571_s23 + $0x49] sm:$0xff]  ;;  %v15416_v24 = vpack.c.bf16 %v9581_v4, %v9580_v25 }
 0x710   : > { %13442 = vmatprep.mubr.msk.f32.mxu1 %vm15910_vm4, %v15911_v49  ;;  %15324 = vmatpush3.bf16.msra.mxu0 %v15323_v16  ;;  %v15395_v16 = vpack.c.bf16 %v9558_v31, %v9557_v47  ;;  %v9582_v31 = vld [vmem:[%s21073_s1 + $0x370] sm:$0xff] }
 0x711   : > { %15348 = vmatpush3.bf16.msra.mxu1 %v15347_v7  ;;  %15349 = vmatprep.subr.bf16.mxu0 %v15909_v17  ;;  %v9492_v7 = vld [vmem:[%s19571_s23 + $0x57] sm:$0xff] }
 0x712   : > { %13384 = vmatmul.mubr.f32.gmra.mrb[16].mxu0 %v9442_v29  ;;  %15373 = vmatprep.subr.bf16.mxu1 %v15909_v17  ;;  %v9568_v29 = vld [vmem:[%s21073_s1 + $0x300] sm:$0xff] }
 0x713   : > { %13443 = vmatmul.mubr.f32.gmra.mrb[16].mxu1 %v9433_v21  ;;  %13477 = vmatprep.mubr.msk.f32.mxu0 %vm15910_vm4, %v15911_v49  ;;  %v9569_v21 = vld [vmem:[%s21073_s1 + $0x308] sm:$0xff] }
 0x714   : > { %13536 = vmatprep.mubr.msk.f32.mxu1 %vm15910_vm4, %v15911_v49  ;;  %v15398_v3 = vpack.c.bf16 %v9569_v21, %v9568_v29  ;;  %v20055_v29 = vld [vmem:[%s19571_s23 + $0x51] sm:$0xff] }
 0x716   : > { %13478 = vmatmul.mubr.f32.vlgmr.msra.gmra.mrb[18].mxu0 %v9459_v42  ;;  %v9534_v42 = vld [vmem:[%s19571_s23 + $0x19] sm:$0xff] }
 0x717   : > { %13537 = vmatmul.mubr.f32.vlgmr.msra.gmra.mrb[18].mxu1 %v9484_v36  ;;  %15351 = vmatpush3.bf16.msra.mxu0 %v15350_v28  ;;  %v9570_v28 = vld [vmem:[%s21073_s1 + $0x310] sm:$0xff] }
 0x718   : > { %13480 = vmatprep.mubr.msk.f32.mxu0 %vm15910_vm4, %v15911_v49  ;;  %13539 = vmatprep.mubr.msk.f32.mxu1 %vm15910_vm4, %v15911_v49 }
 0x719   : > { %15352 = vmatprep.subr.bf16.mxu0 %v15909_v17  ;;  %15375 = vmatpush3.bf16.msra.mxu1 %v15374_v39  ;;  %v9596_v39 = vld [vmem:[%s21073_s1 + $0x398] sm:$0xff] }
 0x71a   : > { %13481 = vmatmul.mubr.f32.gmra.mrb[20].mxu0 %v9460_v32  ;;  %15376 = vmatprep.subr.bf16.mxu1 %v15909_v17  ;;  %v9535_v32 = vld [vmem:[%s19571_s23 + $0x21] sm:$0xff]  ;;  %v15425_v43 = vpack.c.bf16 %v9596_v39, %v9595_v8  ;;  %v9621_v8 = vld [vmem:[%s21073_s1 + $0x418] sm:$0xff] }
 0x71b   : > { %13540 = vmatmul.mubr.f32.gmra.mrb[20].mxu1 %v9485_v18  ;;  %15354 = vmatpush3.bf16.msra.mxu0 %v15353_v40  ;;  %v9572_v40 = vld [vmem:[%s21073_s1 + $0x320] sm:$0xff] }
 0x71c   : > { %13483 = vmatprep.mubr.msk.f32.mxu0 %vm15910_vm4, %v15911_v49  ;;  %13542 = vmatprep.mubr.msk.f32.mxu1 %vm15910_vm4, %v15911_v49 }
 0x71d   : > { %15355 = vmatprep.subr.bf16.mxu0 %v15909_v17  ;;  %15378 = vmatpush3.bf16.msra.mxu1 %v15377_v51  ;;  %v9598_v51 = vld [vmem:[%s21073_s1 + $0x3a8] sm:$0xff] }
 0x71e   : > { %13484 = vmatmul.mubr.f32.gmra.mrb[22].mxu0 %v9484_v36  ;;  %15379 = vmatprep.subr.bf16.mxu1 %v15909_v17  ;;  %v9571_v36 = vld [vmem:[%s21073_s1 + $0x318] sm:$0xff] }
 0x71f   : > { %13543 = vmatmul.mubr.f32.gmra.mrb[22].mxu1 %v9486_v54  ;;  %15357 = vmatpush3.bf16.msra.mxu0 %v15356_v38  ;;  %v15401_v48 = vpack.c.bf16 %v9571_v36, %v9570_v28  ;;  %v19940_v38 = vld [vmem:[%s19571_s23 + $0x29] sm:$0xff] }
 0x720   : > { %13486 = vmatprep.mubr.msk.f32.mxu0 %vm15910_vm4, %v15911_v49  ;;  %13545 = vmatprep.mubr.msk.f32.mxu1 %vm15910_vm4, %v15911_v49  ;;  %v9584_v36 = vld [vmem:[%s19571_s23 + $0x2a] sm:$0xff] }
 0x721   : > { %15381 = vmatpush3.bf16.msra.mxu1 %v15380_v56  ;;  %15358 = vmatprep.subr.bf16.mxu0 %v15909_v17  ;;  %v9574_v56 = vld [vmem:[%s21073_s1 + $0x330] sm:$0xff] }
 0x722   : > { %13487 = vmatmul.mubr.f32.gmra.mrb[24].mxu0 %v9485_v18  ;;  %15382 = vmatprep.subr.bf16.mxu1 %v15909_v17  ;;  %v9573_v18 = vld [vmem:[%s21073_s1 + $0x328] sm:$0xff] }
 0x723   : > { %13546 = vmatmul.mubr.f32.gmra.mrb[24].mxu1 %v9487_v9  ;;  %13489 = vmatprep.mubr.msk.f32.mxu0 %vm15910_vm4, %v15911_v49  ;;  %v15404_v45 = vpack.c.bf16 %v9573_v18, %v9572_v40  ;;  %v9586_v18 = vld [vmem:[%s19571_s23 + $0x3a] sm:$0xff] }
 0x724   : > { %13548 = vmatprep.mubr.msk.f32.mxu1 %vm15910_vm4, %v15911_v49  ;;  %15360 = vmatpush3.bf16.msra.mxu0 %v15359_v22  ;;  %v15407_v22 = vpack.c.bf16 %v9575_v44, %v9574_v56  ;;  %v9628_v44 = vld [vmem:[%s21073_s1 + $0x450] sm:$0xff] }
 0x725   : > { %15384 = vmatpush3.bf16.msra.mxu1 %v15383_v53  ;;  %15361 = vmatprep.subr.bf16.mxu0 %v15909_v17  ;;  %v15431_v53 = vpack.c.bf16 %v9600_v23, %v9599_v58  ;;  %v9629_v58 = vld [vmem:[%s21073_s1 + $0x458] sm:$0xff] }
 0x726   : > { %13490 = vmatmul.mubr.f32.gmra.mrb[26].mxu0 %v9486_v54  ;;  %15385 = vmatprep.subr.bf16.mxu1 %v15909_v17  ;;  %v15428_v54 = vpack.c.bf16 %v9598_v51, %v9597_v35  ;;  %v9625_v35 = vld [vmem:[%s21073_s1 + $0x438] sm:$0xff]  ;;  %v9587_v51 = vld [vmem:[%s19571_s23 + $0x42] sm:$0xff] }
 0x727   : > { %13549 = vmatmul.mubr.f32.gmra.mrb[26].mxu1 %v9488_v60  ;;  %13492 = vmatprep.mubr.msk.f32.mxu0 %vm15910_vm4, %v15911_v49  ;;  %v9589_v23 = vld [vmem:[%s19571_s23 + $0x52] sm:$0xff] }
 0x728   : > { %13551 = vmatprep.mubr.msk.f32.mxu1 %vm15910_vm4, %v15911_v49  ;;  %15363 = vmatpush3.bf16.msra.mxu0 %v15362_v13  ;;  %v19986_v13 = vld [vmem:[%s19571_s23 + $0x39] sm:$0xff] }
 0x729   : > { %15387 = vmatpush3.bf16.msra.mxu1 %v15386_v52  ;;  %15364 = vmatprep.subr.bf16.mxu0 %v15909_v17  ;;  %v15410_v52 = vpack.c.bf16 %v9577_v46, %v9576_v63  ;;  %v9632_v46 = vld [vmem:[%s21073_s1 + $0x470] sm:$0xff] }
 0x72a   : > { %13493 = vmatmul.mubr.f32.gmra.mrb[28].mxu0 %v9487_v9  ;;  %15388 = vmatprep.subr.bf16.mxu1 %v15909_v17  ;;  %v19963_v9 = vld [vmem:[%s19571_s23 + $0x31] sm:$0xff] }
 0x72b   : > { %13552 = vmatmul.mubr.f32.gmra.mrb[28].mxu1 %v9489_v15  ;;  %13495 = vmatprep.mubr.msk.f32.mxu0 %vm15910_vm4, %v15911_v49 }
 0x72c   : > { %13554 = vmatprep.mubr.msk.f32.mxu1 %vm15910_vm4, %v15911_v49  ;;  %15366 = vmatpush3.bf16.msra.mxu0 %v15365_v6  ;;  %v9514_v6 = vld [vmem:[%s19571_s23 + $0x40] sm:$0xff] }
 0x72d   : > { %15390 = vmatpush3.bf16.msra.mxu1 %v15389_v0  ;;  %15367 = vmatprep.subr.bf16.mxu0 %v15909_v17  ;;  %v20009_v0 = vld [vmem:[%s19571_s23 + $0x41] sm:$0xff] }
 0x72e   : > { %13496 = vmatmul.mubr.f32.gmra.mrb[30].mxu0 %v9488_v60  ;;  %15391 = vmatprep.subr.bf16.mxu1 %v15909_v17  ;;  %v9513_v60 = vld [vmem:[%s19571_s23 + $0x38] sm:$0xff] }
 0x72f   : > { %13555 = vmatmul.mubr.f32.gmra.mrb[30].mxu1 %v9490_v19  ;;  %13498 = vmatprep.mubr.msk.f32.mxu0 %vm15910_vm4, %v15911_v49 }
 0x730   : > { %13557 = vmatprep.mubr.msk.f32.mxu1 %vm15910_vm4, %v15911_v49  ;;  %15369 = vmatpush3.bf16.msra.mxu0 %v15368_v12  ;;  %v9606_v12 = vld [vmem:[%s21073_s1 + $0x3e8] sm:$0xff] }
 0x731   : > { %15393 = vmatpush3.bf16.msra.mxu1 %v15392_v26  ;;  %15370 = vmatprep.subr.bf16.mxu0 %v15909_v17  ;;  %v9515_v26 = vld [vmem:[%s19571_s23 + $0x48] sm:$0xff] }
 0x732   : > { %13499 = vmatmul.mubr.f32.gmra.mrb[32].mxu0 %v9489_v15  ;;  %15394 = vmatprep.subr.bf16.mxu1 %v15909_v17  ;;  %v9604_v15 = vld [vmem:[%s21073_s1 + $0x3d8] sm:$0xff] }
 0x733   : > { %13558 = vmatmul.mubr.f32.gmra.mrb[32].mxu1 %v9491_v33  ;;  %13501 = vmatprep.mubr.msk.f32.mxu0 %vm15910_vm4, %v15911_v49  ;;  %v15437_v10 = vpack.c.bf16 %v9604_v15, %v9603_v61  ;;  %v9583_v33 = vld [vmem:[%s21073_s1 + $0x378] sm:$0xff] }
 0x734   : > { %13560 = vmatprep.mubr.msk.f32.mxu1 %vm15910_vm4, %v15911_v49  ;;  %15372 = vmatpush3.bf16.msra.mxu0 %v15371_v27  ;;  %v9607_v27 = vld [vmem:[%s21073_s1 + $0x3f0] sm:$0xff]  ;;  %v15419_v21 = vpack.c.bf16 %v9583_v33, %v9582_v31  ;;  %v9615_v61 = vld [vmem:[%s19571_s23 + $0x5b] sm:$0xff] }
 0x735   : > { %15396 = vmatpush3.bf16.msra.mxu1 %v15395_v16  ;;  %15397 = vmatprep.subr.bf16.mxu0 %v15909_v17  ;;  %v9608_v16 = vld [vmem:[%s21073_s1 + $0x3f8] sm:$0xff] }
 0x736   : > { %13502 = vmatmul.mubr.f32.gmra.mrb[34].mxu0 %v9490_v19  ;;  %15421 = vmatprep.subr.bf16.mxu1 %v15909_v17  ;;  %v9605_v19 = vld [vmem:[%s21073_s1 + $0x3e0] sm:$0xff]  ;;  %v15443_v59 = vpack.c.bf16 %v9608_v16, %v9607_v27 }
 0x737   : > { %13561 = vmatmul.mubr.f32.gmra.mrb[34].mxu1 %v9492_v7  ;;  %13595 = vmatprep.mubr.msk.f32.mxu0 %vm15910_vm4, %v15911_v49  ;;  %v15440_v47 = vpack.c.bf16 %v9606_v12, %v9605_v19  ;;  %v9516_v7 = vld [vmem:[%s19571_s23 + $0x50] sm:$0xff]  ;;  %v9611_v15 = vld [vmem:[%s19571_s23 + $0x3b] sm:$0xff] }
 0x738   : > { %13654 = vmatprep.mubr.msk.f32.mxu1 %vm15910_vm4, %v15911_v49 }
 0x73a   : > { %13596 = vmatmul.mubr.f32.vlgmr.msra.gmra.mrb[36].mxu0 %v9509_v2  ;;  %v20066_v2 = vld [vmem:[%s19571_s23 + $0x59] sm:$0xff] }
 0x73b   : > { %13655 = vmatmul.mubr.f32.vlgmr.msra.gmra.mrb[36].mxu1 %v9534_v42  ;;  %15399 = vmatpush3.bf16.msra.mxu0 %v15398_v3  ;;  %v9618_v3 = vld [vmem:[%s21073_s1 + $0x400] sm:$0xff]  ;;  %v9619_v42 = vld [vmem:[%s21073_s1 + $0x408] sm:$0xff] }
 0x73c   : > { %13598 = vmatprep.mubr.msk.f32.mxu0 %vm15910_vm4, %v15911_v49  ;;  %13657 = vmatprep.mubr.msk.f32.mxu1 %vm15910_vm4, %v15911_v49  ;;  %v15446_v28 = vpack.c.bf16 %v9619_v42, %v9618_v3 }
 0x73d   : > { %15400 = vmatprep.subr.bf16.mxu0 %v15909_v17  ;;  %15423 = vmatpush3.bf16.msra.mxu1 %v15422_v30  ;;  %v9620_v30 = vld [vmem:[%s21073_s1 + $0x410] sm:$0xff] }
 0x73e   : > { %13599 = vmatmul.mubr.f32.gmra.mrb[38].mxu0 %v9510_v37  ;;  %15424 = vmatprep.subr.bf16.mxu1 %v15909_v17  ;;  %v15449_v39 = vpack.c.bf16 %v9621_v8, %v9620_v30  ;;  %v9585_v37 = vld [vmem:[%s19571_s23 + $0x32] sm:$0xff] }
 0x73f   : > { %13658 = vmatmul.mubr.f32.gmra.mrb[38].mxu1 %v9535_v32  ;;  %15402 = vmatpush3.bf16.msra.mxu0 %v15401_v48  ;;  %v9622_v48 = vld [vmem:[%s21073_s1 + $0x420] sm:$0xff]  ;;  %v9623_v32 = vld [vmem:[%s21073_s1 + $0x428] sm:$0xff] }
 0x740   : > { %13601 = vmatprep.mubr.msk.f32.mxu0 %vm15910_vm4, %v15911_v49  ;;  %13660 = vmatprep.mubr.msk.f32.mxu1 %vm15910_vm4, %v15911_v49  ;;  %v15452_v40 = vpack.c.bf16 %v9623_v32, %v9622_v48 }
 0x741   : > { %15403 = vmatprep.subr.bf16.mxu0 %v15909_v17  ;;  %15426 = vmatpush3.bf16.msra.mxu1 %v15425_v43  ;;  %v9624_v43 = vld [vmem:[%s21073_s1 + $0x430] sm:$0xff] }
 0x742   : > { %13602 = vmatmul.mubr.f32.gmra.mrb[40].mxu0 %v9511_v34  ;;  %15427 = vmatprep.subr.bf16.mxu1 %v15909_v17  ;;  %v15455_v34 = vpack.c.bf16 %v9625_v35, %v9624_v43 }
 0x743   : > { %13661 = vmatmul.mubr.f32.gmra.mrb[40].mxu1 %v19940_v38  ;;  %15405 = vmatpush3.bf16.msra.mxu0 %v15404_v45  ;;  %v9626_v45 = vld [vmem:[%s21073_s1 + $0x440] sm:$0xff] }
 0x744   : > { %13604 = vmatprep.mubr.msk.f32.mxu0 %vm15910_vm4, %v15911_v49  ;;  %13663 = vmatprep.mubr.msk.f32.mxu1 %vm15910_vm4, %v15911_v49 }
 0x745   : > { %15429 = vmatpush3.bf16.msra.mxu1 %v15428_v54  ;;  %15406 = vmatprep.subr.bf16.mxu0 %v15909_v17  ;;  %v9588_v54 = vld [vmem:[%s19571_s23 + $0x4a] sm:$0xff] }
 0x746   : > { %13605 = vmatmul.mubr.f32.gmra.mrb[42].mxu0 %v9512_v50  ;;  %15430 = vmatprep.subr.bf16.mxu1 %v15909_v17  ;;  %v15461_v50 = vpack.c.bf16 %v9629_v58, %v9628_v44 }
 0x747   : > { %13664 = vmatmul.mubr.f32.gmra.mrb[42].mxu1 %v19963_v9  ;;  %13607 = vmatprep.mubr.msk.f32.mxu0 %vm15910_vm4, %v15911_v49 }
 0x748   : > { %13666 = vmatprep.mubr.msk.f32.mxu1 %vm15910_vm4, %v15911_v49  ;;  %15408 = vmatpush3.bf16.msra.mxu0 %v15407_v22  ;;  %v9631_v22 = vld [vmem:[%s21073_s1 + $0x468] sm:$0xff] }
 0x749   : > { %15432 = vmatpush3.bf16.msra.mxu1 %v15431_v53  ;;  %15409 = vmatprep.subr.bf16.mxu0 %v15909_v17  ;;  %v9590_v53 = vld [vmem:[%s19571_s23 + $0x5a] sm:$0xff] }
 0x74a   : > { %13608 = vmatmul.mubr.f32.gmra.mrb[44].mxu0 %v9513_v60  ;;  %15433 = vmatprep.subr.bf16.mxu1 %v15909_v17  ;;  %v9591_v60 = vld [vmem:[%s19571_s23 + $0x62] sm:$0xff] }
 0x74b   : > { %13667 = vmatmul.mubr.f32.gmra.mrb[44].mxu1 %v19986_v13  ;;  %13610 = vmatprep.mubr.msk.f32.mxu0 %vm15910_vm4, %v15911_v49 }
 0x74c   : > { %13669 = vmatprep.mubr.msk.f32.mxu1 %vm15910_vm4, %v15911_v49  ;;  %15411 = vmatpush3.bf16.msra.mxu0 %v15410_v52  ;;  %v9567_v52 = vld [vmem:[%s19571_s23 + $0x69] sm:$0xff] }
 0x74d   : > { %15435 = vmatpush3.bf16.msra.mxu1 %v15434_v14  ;;  %15412 = vmatprep.subr.bf16.mxu0 %v15909_v17  ;;  %v9592_v14 = vld [vmem:[%s19571_s23 + $0x6a] sm:$0xff] }
 0x74e   : > { %13611 = vmatmul.mubr.f32.gmra.mrb[46].mxu0 %v9514_v6  ;;  %15436 = vmatprep.subr.bf16.mxu1 %v15909_v17  ;;  %v9616_v6 = vld [vmem:[%s19571_s23 + $0x63] sm:$0xff] }
 0x74f   : > { %13670 = vmatmul.mubr.f32.gmra.mrb[46].mxu1 %v20009_v0  ;;  %13613 = vmatprep.mubr.msk.f32.mxu0 %vm15910_vm4, %v15911_v49 }
 0x750   : > { %13672 = vmatprep.mubr.msk.f32.mxu1 %vm15910_vm4, %v15911_v49  ;;  %15414 = vmatpush3.bf16.msra.mxu0 %v15413_v20  ;;  %v9617_v20 = vld [vmem:[%s19571_s23 + $0x6b] sm:$0xff] }
 0x751   : > { %15438 = vmatpush3.bf16.msra.mxu1 %v15437_v10  ;;  %15415 = vmatprep.subr.bf16.mxu0 %v15909_v17  ;;  %v9613_v10 = vld [vmem:[%s19571_s23 + $0x4b] sm:$0xff] }
 0x752   : > { %13614 = vmatmul.mubr.f32.gmra.mrb[48].mxu0 %v9515_v26  ;;  %15439 = vmatprep.subr.bf16.mxu1 %v15909_v17 }
 0x753   : > { %13673 = vmatmul.mubr.f32.gmra.mrb[48].mxu1 %v20032_v11  ;;  %13616 = vmatprep.mubr.msk.f32.mxu0 %vm15910_vm4, %v15911_v49 }
 0x754   : > { %13675 = vmatprep.mubr.msk.f32.mxu1 %vm15910_vm4, %v15911_v49  ;;  %15417 = vmatpush3.bf16.msra.mxu0 %v15416_v24 }
 0x755   : > { %15441 = vmatpush3.bf16.msra.mxu1 %v15440_v47  ;;  %15418 = vmatprep.subr.bf16.mxu0 %v15909_v17 }
 0x756   : > { %13617 = vmatmul.mubr.f32.gmra.mrb[50].mxu0 %v9516_v7  ;;  %15442 = vmatprep.subr.bf16.mxu1 %v15909_v17 }
 0x757   : > { %13676 = vmatmul.mubr.f32.gmra.mrb[50].mxu1 %v20055_v29  ;;  %13619 = vmatprep.mubr.msk.f32.mxu0 %vm15910_vm4, %v15911_v49 }
 0x758   : > { %13678 = vmatprep.mubr.msk.f32.mxu1 %vm15910_vm4, %v15911_v49  ;;  %15420 = vmatpush3.bf16.msra.mxu0 %v15419_v21 }
 0x759   : > { %15444 = vmatpush3.bf16.msra.mxu1 %v15443_v59  ;;  %15445 = vmatprep.subr.bf16.mxu0 %v15909_v17 }
 0x75a   : > { %13620 = vmatmul.mubr.f32.gmra.mrb[52].mxu0 %v9517_v5  ;;  %15749 = vmatprep.subr.bf16.mxu1 %v15909_v17 }
 0x75b   : > { %13679 = vmatmul.mubr.f32.gmra.mrb[52].mxu1 %v20066_v2  ;;  %13713 = vmatprep.mubr.msk.f32.mxu0 %vm15910_vm4, %v15911_v49 }
 0x75c   : > { %13772 = vmatprep.mubr.msk.f32.mxu1 %vm15910_vm4, %v15911_v49 }
 0x75e   : > { %13714 = vmatmul.mubr.f32.vlgmr.msra.gmra.mrb[54].mxu0 %v19940_v38  ;;  %v9627_v38 = vld [vmem:[%s21073_s1 + $0x448] sm:$0xff] }
 0x75f   : > { %13773 = vmatmul.mubr.f32.vlgmr.msra.gmra.mrb[54].mxu1 %v9584_v36  ;;  %15447 = vmatpush3.bf16.msra.mxu0 %v15446_v28  ;;  %v15458_v56 = vpack.c.bf16 %v9627_v38, %v9626_v45 }
 0x760   : > { %13716 = vmatprep.mubr.msk.f32.mxu0 %vm15910_vm4, %v15911_v49  ;;  %13775 = vmatprep.mubr.msk.f32.mxu1 %vm15910_vm4, %v15911_v49 }
 0x761   : > { %15757 = vmatpush3.bf16.msra.mxu1 %v15446_v28  ;;  %15448 = vmatprep.subr.bf16.mxu0 %v15909_v17 }
 0x762   : > { %13717 = vmatmul.mubr.f32.gmra.mrb[56].mxu0 %v19963_v9  ;;  %15750 = vmatprep.subr.bf16.mxu1 %v15909_v17  ;;  %v9630_v9 = vld [vmem:[%s21073_s1 + $0x460] sm:$0xff] }
 0x763   : > { %13776 = vmatmul.mubr.f32.gmra.mrb[56].mxu1 %v9585_v37  ;;  %15450 = vmatpush3.bf16.msra.mxu0 %v15449_v39  ;;  %v15464_v63 = vpack.c.bf16 %v9631_v22, %v9630_v9 }
 0x764   : > { %13719 = vmatprep.mubr.msk.f32.mxu0 %vm15910_vm4, %v15911_v49  ;;  %13778 = vmatprep.mubr.msk.f32.mxu1 %vm15910_vm4, %v15911_v49 }
 0x765   : > { %15758 = vmatpush3.bf16.msra.mxu1 %v15449_v39  ;;  %15451 = vmatprep.subr.bf16.mxu0 %v15909_v17 }
 0x766   : > { %13720 = vmatmul.mubr.f32.gmra.mrb[58].mxu0 %v19986_v13  ;;  %15751 = vmatprep.subr.bf16.mxu1 %v15909_v17  ;;  %v15467_v13 = vpack.c.bf16 %v9633_v62, %v9632_v46 }
 0x767   : > { %13779 = vmatmul.mubr.f32.gmra.mrb[58].mxu1 %v9586_v18  ;;  %15453 = vmatpush3.bf16.msra.mxu0 %v15452_v40 }
 0x768   : > { %13722 = vmatprep.mubr.msk.f32.mxu0 %vm15910_vm4, %v15911_v49  ;;  %13781 = vmatprep.mubr.msk.f32.mxu1 %vm15910_vm4, %v15911_v49 }
 0x769   : > { %15759 = vmatpush3.bf16.msra.mxu1 %v15452_v40  ;;  %15454 = vmatprep.subr.bf16.mxu0 %v15909_v17 }
 0x76a   : > { %13723 = vmatmul.mubr.f32.gmra.mrb[60].mxu0 %v20009_v0  ;;  %15752 = vmatprep.subr.bf16.mxu1 %v15909_v17  ;;  %v9612_v0 = vld [vmem:[%s19571_s23 + $0x43] sm:$0xff] }
 0x76b   : > { %13782 = vmatmul.mubr.f32.gmra.mrb[60].mxu1 %v9587_v51  ;;  %13725 = vmatprep.mubr.msk.f32.mxu0 %vm15910_vm4, %v15911_v49 }
 0x76c   : > { %13784 = vmatprep.mubr.msk.f32.mxu1 %vm15910_vm4, %v15911_v49  ;;  %15456 = vmatpush3.bf16.msra.mxu0 %v15455_v34 }
 0x76d   : > { %15760 = vmatpush3.bf16.msra.mxu1 %v15455_v34  ;;  %15457 = vmatprep.subr.bf16.mxu0 %v15909_v17 }
 0x76e   : > { %13726 = vmatmul.mubr.f32.gmra.mrb[62].mxu0 %v20032_v11  ;;  %15753 = vmatprep.subr.bf16.mxu1 %v15909_v17 }
 0x76f   : > { %13785 = vmatmul.mubr.f32.gmra.mrb[62].mxu1 %v9588_v54  ;;  %13728 = vmatprep.mubr.msk.f32.mxu0 %vm15910_vm4, %v15911_v49 }
 0x770   : > { %13787 = vmatprep.mubr.msk.f32.mxu1 %vm15910_vm4, %v15911_v49  ;;  %15459 = vmatpush3.bf16.msra.mxu0 %v15458_v56 }
 0x771   : > { %15761 = vmatpush3.bf16.msra.mxu1 %v15458_v56  ;;  %15460 = vmatprep.subr.bf16.mxu0 %v15909_v17 }
 0x772   : > { %13729 = vmatmul.mubr.f32.gmra.mrb[64].mxu0 %v20055_v29  ;;  %15754 = vmatprep.subr.bf16.mxu1 %v15909_v17 }
 0x773   : > { %13788 = vmatmul.mubr.f32.gmra.mrb[64].mxu1 %v9589_v23  ;;  %13731 = vmatprep.mubr.msk.f32.mxu0 %vm15910_vm4, %v15911_v49 }
 0x774   : > { %13790 = vmatprep.mubr.msk.f32.mxu1 %vm15910_vm4, %v15911_v49  ;;  %15462 = vmatpush3.bf16.msra.mxu0 %v15461_v50 }
 0x775   : > { %15762 = vmatpush3.bf16.msra.mxu1 %v15461_v50  ;;  %15463 = vmatprep.subr.bf16.mxu0 %v15909_v17 }
 0x776   : > { %13732 = vmatmul.mubr.f32.gmra.mrb[66].mxu0 %v20066_v2  ;;  %15755 = vmatprep.subr.bf16.mxu1 %v15909_v17 }
 0x777   : > { %13791 = vmatmul.mubr.f32.gmra.mrb[66].mxu1 %v9590_v53  ;;  %13734 = vmatprep.mubr.msk.f32.mxu0 %vm15910_vm4, %v15911_v49 }
 0x778   : > { %13793 = vmatprep.mubr.msk.f32.mxu1 %vm15910_vm4, %v15911_v49  ;;  %15465 = vmatpush3.bf16.msra.mxu0 %v15464_v63 }
 0x779   : > { %15763 = vmatpush3.bf16.msra.mxu1 %v15464_v63  ;;  %15466 = vmatprep.subr.bf16.mxu0 %v15909_v17 }
 0x77a   : > { %13735 = vmatmul.mubr.f32.gmra.mrb[68].mxu0 %v9566_v57  ;;  %15756 = vmatprep.subr.bf16.mxu1 %v15909_v17  ;;  %v9609_v17 = vld [vmem:[%s19571_s23 + $0x2b] sm:$0xff] }
 0x77b   : > { %13794 = vmatmul.mubr.f32.gmra.mrb[68].mxu1 %v9591_v60  ;;  %13737 = vmatprep.mubr.msk.f32.mxu0 %vm15910_vm4, %v15911_v49 }
 0x77c   : > { %13796 = vmatprep.mubr.msk.f32.mxu1 %vm15910_vm4, %v15911_v49  ;;  %15468 = vmatpush3.bf16.msra.mxu0 %v15467_v13 }
 0x77d   : > { %15764 = vmatpush3.bf16.msra.mxu1 %v15467_v13 }
 0x77e   : > { %13738 = vmatmul.mubr.f32.gmra.mrb[70].mxu0 %v9567_v52 }
 0x77f   : > { %13797 = vmatmul.mubr.f32.gmra.mrb[70].mxu1 %v9592_v14  ;;  %13831 = vmatprep.mubr.msk.f32.mxu0 %vm15910_vm4, %v15911_v49 }
 0x780   : > { %13846 = vmatprep.mubr.msk.f32.mxu1 %vm15910_vm4, %v15911_v49 }
 0x782   : > { %13832 = vmatmul.mubr.f32.vlgmr.msra.gmra.mrb[72].mxu0 %v9609_v17 }
 0x783   : > { %13847 = vmatmul.mubr.f32.vlgmr.msra.gmra.mrb[72].mxu1 %v9614_v55  ;;  %13834 = vmatprep.mubr.msk.f32.mxu0 %vm15910_vm4, %v15911_v49 }
 0x784   : > { %13849 = vmatprep.mubr.msk.f32.mxu1 %vm15910_vm4, %v15911_v49 }
 0x786   : > { %13835 = vmatmul.mubr.f32.gmra.mrb[74].mxu0 %v9610_v41 }
 0x787   : > { %13850 = vmatmul.mubr.f32.gmra.mrb[74].mxu1 %v9615_v61  ;;  %13837 = vmatprep.mubr.msk.f32.mxu0 %vm15910_vm4, %v15911_v49 }
 0x788   : > { %13852 = vmatprep.mubr.msk.f32.mxu1 %vm15910_vm4, %v15911_v49 }
 0x78a   : > { %13838 = vmatmul.mubr.f32.gmra.mrb[76].mxu0 %v9611_v15 }
 0x78b   : > { %13853 = vmatmul.mubr.f32.gmra.mrb[76].mxu1 %v9616_v6  ;;  %13840 = vmatprep.mubr.msk.f32.mxu0 %vm15910_vm4, %v15911_v49 }
 0x78c   : > { %13855 = vmatprep.mubr.msk.f32.mxu1 %vm15910_vm4, %v15911_v49 }
 0x78e   : > { %13841 = vmatmul.mubr.f32.gmra.mrb[78].mxu0 %v9612_v0 }
 0x78f   : > { %13856 = vmatmul.mubr.f32.gmra.mrb[78].mxu1 %v9617_v20  ;;  %13843 = vmatprep.mubr.msk.f32.mxu0 %vm15910_vm4, %v15911_v49 }
 0x792   : > { %13844 = vmatmul.mubr.f32.gmra.mrb[80].mxu0 %v9613_v10 }
 0x7c5   : > { %v5758_v25 = vpop.f32.mrb[0].mxu0 }
 0x7c6   : > { %v13361_v4 = vpop.f32.mrb[1].mxu0  ;;  %v5868_v19 = vpop.f32.mrb[0].mxu1 }
 0x7c7   : > { %v5869_v12 = vadd.f32 %v5868_v19, %v5758_v25  ;;  %v13420_v26 = vpop.f32.mrb[1].mxu1 }
 0x7c9   : > { %v5763_v11 = vpop.f32.mrb[2].mxu0 }
 0x7ca   : > { %v13364_v24 = vpop.f32.mrb[3].mxu0  ;;  %v5873_v47 = vpop.f32.mrb[2].mxu1 }
 0x7cb   : > { %v5874_v31 = vadd.f32 %v5873_v47, %v5763_v11  ;;  %v13423_v33 = vpop.f32.mrb[3].mxu1 }
 0x7cd   : > { %v5768_v27 = vpop.f32.mrb[4].mxu0 }
 0x7ce   : > { %v13367_v16 = vpop.f32.mrb[5].mxu0  ;;  %v5878_v7 = vpop.f32.mrb[4].mxu1 }
 0x7cf   : > { %v5879_v29 = vadd.f32 %v5878_v7, %v5768_v27  ;;  %v13426_v21 = vpop.f32.mrb[5].mxu1 }
 0x7d1   : > { %v5773_v59 = vpop.f32.mrb[6].mxu0 }
 0x7d2   : > { %v13370_v5 = vpop.f32.mrb[7].mxu0  ;;  %v5883_v49 = vpop.f32.mrb[6].mxu1 }
 0x7d3   : > { %v5884_v2 = vadd.f32 %v5883_v49, %v5773_v59  ;;  %v13429_v3 = vpop.f32.mrb[7].mxu1 }
 0x7d5   : > { %v5778_v42 = vpop.f32.mrb[8].mxu0 }
 0x7d6   : > { %v13373_v28 = vpop.f32.mrb[9].mxu0  ;;  %v5888_v36 = vpop.f32.mrb[8].mxu1 }
 0x7d7   : > { %v5889_v30 = vadd.f32 %v5888_v36, %v5778_v42  ;;  %v13432_v8 = vpop.f32.mrb[9].mxu1 }
 0x7d9   : > { %v5783_v39 = vpop.f32.mrb[10].mxu0 }
 0x7da   : > { %v13376_v37 = vpop.f32.mrb[11].mxu0  ;;  %v5893_v48 = vpop.f32.mrb[10].mxu1 }
 0x7db   : > { %v5894_v32 = vadd.f32 %v5893_v48, %v5783_v39  ;;  %v13435_v40 = vpop.f32.mrb[11].mxu1 }
 0x7dd   : > { %v5788_v18 = vpop.f32.mrb[12].mxu0 }
 0x7de   : > { %v13379_v43 = vpop.f32.mrb[13].mxu0  ;;  %v5898_v35 = vpop.f32.mrb[12].mxu1 }
 0x7df   : > { %v5899_v51 = vadd.f32 %v5898_v35, %v5788_v18  ;;  %v13438_v34 = vpop.f32.mrb[13].mxu1 }
 0x7e1   : > { %v5793_v45 = vpop.f32.mrb[14].mxu0 }
 0x7e2   : > { %v13382_v38 = vpop.f32.mrb[15].mxu0  ;;  %v5903_v54 = vpop.f32.mrb[14].mxu1 }
 0x7e3   : > { %v5904_v56 = vadd.f32 %v5903_v54, %v5793_v45  ;;  %v13441_v44 = vpop.f32.mrb[15].mxu1 }
 0x7e5   : > { %v5798_v58 = vpop.f32.mrb[16].mxu0 }
 0x7e6   : > { %v13385_v23 = vpop.f32.mrb[17].mxu0  ;;  %v5908_v50 = vpop.f32.mrb[16].mxu1 }
 0x7e7   : > { %v5909_v9 = vadd.f32 %v5908_v50, %v5798_v58  ;;  %v13444_v22 = vpop.f32.mrb[17].mxu1 }
 0x7e9   : > { %v6006_v53 = vpop.f32.mrb[18].mxu0 }
 0x7ea   : > { %v6050_v63 = vadd.f32 %v6006_v53, %v5869_v12  ;;  %v13479_v46 = vpop.f32.mrb[19].mxu0  ;;  %v6153_v62 = vpop.f32.mrb[18].mxu1 }
 0x7eb   : > { %v13538_v57 = vpop.f32.mrb[19].mxu1 }
 0x7ec   : > { %v6197_v60 = vadd.f32 %v6153_v62, %v6050_v63 }
 0x7ed   : > { %v6011_v13 = vpop.f32.mrb[20].mxu0 }
 0x7ee   : > { %v6051_v52 = vadd.f32 %v6011_v13, %v5874_v31  ;;  %v13482_v14 = vpop.f32.mrb[21].mxu0  ;;  %v6158_v17 = vpop.f32.mrb[20].mxu1 }
 0x7ef   : > { %v13541_v55 = vpop.f32.mrb[21].mxu1 }
 0x7f0   : > { %v6198_v41 = vadd.f32 %v6158_v17, %v6051_v52 }
 0x7f1   : > { %v6016_v61 = vpop.f32.mrb[22].mxu0 }
 0x7f2   : > { %v6052_v15 = vadd.f32 %v6016_v61, %v5879_v29  ;;  %v13485_v6 = vpop.f32.mrb[23].mxu0  ;;  %v6163_v0 = vpop.f32.mrb[22].mxu1 }
 0x7f3   : > { %v13544_v20 = vpop.f32.mrb[23].mxu1 }
 0x7f4   : > { %v6199_v10 = vadd.f32 %v6163_v0, %v6052_v15 }
 0x7f5   : > { %v6021_v25 = vpop.f32.mrb[24].mxu0 }
 0x7f6   : > { %v6053_v4 = vadd.f32 %v6021_v25, %v5884_v2  ;;  %v13488_v19 = vpop.f32.mrb[25].mxu0  ;;  %v6168_v12 = vpop.f32.mrb[24].mxu1 }
 0x7f7   : > { %v13547_v26 = vpop.f32.mrb[25].mxu1 }
 0x7f8   : > { %v6200_v11 = vadd.f32 %v6168_v12, %v6053_v4 }
 0x7f9   : > { %v6026_v24 = vpop.f32.mrb[26].mxu0 }
 0x7fa   : > { %v6054_v47 = vadd.f32 %v6026_v24, %v5889_v30  ;;  %v13491_v33 = vpop.f32.mrb[27].mxu0  ;;  %v6173_v31 = vpop.f32.mrb[26].mxu1 }
 0x7fb   : > { %v13550_v27 = vpop.f32.mrb[27].mxu1 }
 0x7fc   : > { %v6201_v16 = vadd.f32 %v6173_v31, %v6054_v47 }
 0x7fd   : > { %v6031_v7 = vpop.f32.mrb[28].mxu0 }
 0x7fe   : > { %v6055_v21 = vadd.f32 %v6031_v7, %v5894_v32  ;;  %v13494_v59 = vpop.f32.mrb[29].mxu0  ;;  %v6178_v29 = vpop.f32.mrb[28].mxu1 }
 0x7ff   : > { %v13553_v5 = vpop.f32.mrb[29].mxu1 }
 0x800   : > { %v6202_v49 = vadd.f32 %v6178_v29, %v6055_v21 }
 0x801   : > { %v6036_v3 = vpop.f32.mrb[30].mxu0 }
 0x802   : > { %v6056_v42 = vadd.f32 %v6036_v3, %v5899_v51  ;;  %v13497_v28 = vpop.f32.mrb[31].mxu0  ;;  %v6183_v2 = vpop.f32.mrb[30].mxu1 }
 0x803   : > { %v13556_v36 = vpop.f32.mrb[31].mxu1 }
 0x804   : > { %v6203_v8 = vadd.f32 %v6183_v2, %v6056_v42 }
 0x805   : > { %v6041_v39 = vpop.f32.mrb[32].mxu0 }
 0x806   : > { %v6057_v37 = vadd.f32 %v6041_v39, %v5904_v56  ;;  %v13500_v48 = vpop.f32.mrb[33].mxu0  ;;  %v6188_v30 = vpop.f32.mrb[32].mxu1 }
 0x807   : > { %v13559_v40 = vpop.f32.mrb[33].mxu1 }
 0x808   : > { %v6204_v18 = vadd.f32 %v6188_v30, %v6057_v37 }
 0x809   : > { %v6046_v43 = vpop.f32.mrb[34].mxu0 }
 0x80a   : > { %v6058_v35 = vadd.f32 %v6046_v43, %v5909_v9  ;;  %v13503_v34 = vpop.f32.mrb[35].mxu0  ;;  %v6193_v32 = vpop.f32.mrb[34].mxu1 }
 0x80b   : > { %v13562_v45 = vpop.f32.mrb[35].mxu1 }
 0x80c   : > { %v6205_v38 = vadd.f32 %v6193_v32, %v6058_v35 }
 0x80d   : > { %v6300_v54 = vpop.f32.mrb[36].mxu0 }
 0x80e   : > { %v6344_v44 = vadd.f32 %v6300_v54, %v6197_v60  ;;  %v13597_v58 = vpop.f32.mrb[37].mxu0  ;;  %v6447_v51 = vpop.f32.mrb[36].mxu1 }
 0x80f   : > { %v13656_v23 = vpop.f32.mrb[37].mxu1 }
 0x810   : > { %v6491_v50 = vadd.f32 %v6447_v51, %v6344_v44 }
 0x811   : > { %v6305_v22 = vpop.f32.mrb[38].mxu0 }
 0x812   : > { %v6345_v53 = vadd.f32 %v6305_v22, %v6198_v41  ;;  %v13600_v63 = vpop.f32.mrb[39].mxu0  ;;  %v6452_v56 = vpop.f32.mrb[38].mxu1 }
 0x813   : > { %v13659_v46 = vpop.f32.mrb[39].mxu1 }
 0x814   : > { %v6492_v62 = vadd.f32 %v6452_v56, %v6345_v53 }
 0x815   : > { %v6310_v57 = vpop.f32.mrb[40].mxu0 }
 0x816   : > { %v6346_v13 = vadd.f32 %v6310_v57, %v6199_v10  ;;  %v13603_v52 = vpop.f32.mrb[41].mxu0  ;;  %v6457_v9 = vpop.f32.mrb[40].mxu1 }
 0x817   : > { %v13662_v14 = vpop.f32.mrb[41].mxu1 }
 0x818   : > { %v6493_v17 = vadd.f32 %v6457_v9, %v6346_v13 }
 0x819   : > { %v6315_v55 = vpop.f32.mrb[42].mxu0 }
 0x81a   : > { %v6347_v61 = vadd.f32 %v6315_v55, %v6200_v11  ;;  %v13606_v15 = vpop.f32.mrb[43].mxu0  ;;  %v6462_v60 = vpop.f32.mrb[42].mxu1 }
 0x81b   : > { %v13665_v6 = vpop.f32.mrb[43].mxu1 }
 0x81c   : > { %v6494_v0 = vadd.f32 %v6462_v60, %v6347_v61 }
 0x81d   : > { %v6320_v20 = vpop.f32.mrb[44].mxu0 }
 0x81e   : > { %v6348_v25 = vadd.f32 %v6320_v20, %v6201_v16  ;;  %v13609_v4 = vpop.f32.mrb[45].mxu0  ;;  %v6467_v41 = vpop.f32.mrb[44].mxu1 }
 0x81f   : > { %v13668_v19 = vpop.f32.mrb[45].mxu1 }
 0x820   : > { %v6495_v12 = vadd.f32 %v6467_v41, %v6348_v25 }
 0x821   : > { %v6325_v26 = vpop.f32.mrb[46].mxu0 }
 0x822   : > { %v6349_v24 = vadd.f32 %v6325_v26, %v6202_v49  ;;  %v13612_v47 = vpop.f32.mrb[47].mxu0  ;;  %v6472_v10 = vpop.f32.mrb[46].mxu1 }
 0x823   : > { %v13671_v33 = vpop.f32.mrb[47].mxu1 }
 0x824   : > { %v6496_v31 = vadd.f32 %v6472_v10, %v6349_v24 }
 0x825   : > { %v6330_v27 = vpop.f32.mrb[48].mxu0 }
 0x826   : > { %v6350_v7 = vadd.f32 %v6330_v27, %v6203_v8  ;;  %v13615_v21 = vpop.f32.mrb[49].mxu0  ;;  %v6477_v11 = vpop.f32.mrb[48].mxu1 }
 0x827   : > { %v13674_v59 = vpop.f32.mrb[49].mxu1 }
 0x828   : > { %v6497_v29 = vadd.f32 %v6477_v11, %v6350_v7 }
 0x829   : > { %v6335_v5 = vpop.f32.mrb[50].mxu0 }
 0x82a   : > { %v6351_v3 = vadd.f32 %v6335_v5, %v6204_v18  ;;  %v13618_v42 = vpop.f32.mrb[51].mxu0  ;;  %v6482_v16 = vpop.f32.mrb[50].mxu1 }
 0x82b   : > { %v13677_v28 = vpop.f32.mrb[51].mxu1 }
 0x82c   : > { %v6498_v2 = vadd.f32 %v6482_v16, %v6351_v3 }
 0x82d   : > { %v6340_v36 = vpop.f32.mrb[52].mxu0 }
 0x82e   : > { %v6352_v39 = vadd.f32 %v6340_v36, %v6205_v38  ;;  %v13621_v37 = vpop.f32.mrb[53].mxu0  ;;  %v6487_v49 = vpop.f32.mrb[52].mxu1 }
 0x82f   : > { %v13680_v48 = vpop.f32.mrb[53].mxu1 }
 0x830   : > { %v6499_v30 = vadd.f32 %v6487_v49, %v6352_v39  ;;  %v6966_v48 = vld [vmem:[%s20224_s6] sm:$0xff] }
 0x831   : > { %v6594_v40 = vpop.f32.mrb[54].mxu0 }
 0x832   : > { %v6638_v43 = vadd.f32 %v6594_v40, %v6491_v50  ;;  %v13715_v35 = vpop.f32.mrb[55].mxu0  ;;  %v6741_v8 = vpop.f32.mrb[54].mxu1 }
 0x833   : > { %v13774_v34 = vpop.f32.mrb[55].mxu1  ;;  %v6971_v35 = vld [vmem:[%s20224_s6 + $0x28] sm:$0xff] }
 0x834   : > { %v6785_v32 = vadd.f32 %v6741_v8, %v6638_v43 }
 0x835   : > { %v6599_v45 = vpop.f32.mrb[56].mxu0 }
 0x836   : > { %v6639_v54 = vadd.f32 %v6599_v45, %v6492_v62  ;;  %v13718_v44 = vpop.f32.mrb[57].mxu0  ;;  %v6746_v18 = vpop.f32.mrb[56].mxu1 }
 0x837   : > { %v13777_v58 = vpop.f32.mrb[57].mxu1 }
 0x838   : > { %v6786_v51 = vadd.f32 %v6746_v18, %v6639_v54 }
 0x839   : > { %v6604_v23 = vpop.f32.mrb[58].mxu0 }
 0x83a   : > { %v6640_v22 = vadd.f32 %v6604_v23, %v6493_v17  ;;  %v13721_v53 = vpop.f32.mrb[59].mxu0  ;;  %v6751_v38 = vpop.f32.mrb[58].mxu1 }
 0x83b   : > { %v13780_v63 = vpop.f32.mrb[59].mxu1 }
 0x83c   : > { %v20214_v56 = vadd.f32 %v6751_v38, %v6640_v22  ;;  %v6967_v22 = vld [vmem:[%s20224_s6 + $0x8] sm:$0xff]  ;;  %v6972_v63 = vld [vmem:[%s20224_s6 + $0x30] sm:$0xff] }
 0x83d   : > { %v6609_v46 = vpop.f32.mrb[60].mxu0 }
 0x83e   : > { %v6641_v57 = vadd.f32 %v6609_v46, %v6494_v0  ;;  %v13724_v50 = vpop.f32.mrb[61].mxu0  ;;  %v6756_v13 = vpop.f32.mrb[60].mxu1 }
 0x83f   : > { %v13783_v52 = vpop.f32.mrb[61].mxu1 }
 0x840   : > { %v20216_v9 = vadd.f32 %v6756_v13, %v6641_v57 }
 0x841   : > { %v6614_v14 = vpop.f32.mrb[62].mxu0 }
 0x842   : > { %v6642_v62 = vadd.f32 %v6614_v14, %v6495_v12  ;;  %v13727_v55 = vpop.f32.mrb[63].mxu0  ;;  %v6761_v61 = vpop.f32.mrb[62].mxu1 }
 0x843   : > { %v13786_v15 = vpop.f32.mrb[63].mxu1 }
 0x844   : > { %v20218_v60 = vadd.f32 %v6761_v61, %v6642_v62  ;;  %v6968_v15 = vld [vmem:[%s20224_s6 + $0x10] sm:$0xff] }
 0x845   : > { %v6619_v17 = vpop.f32.mrb[64].mxu0 }
 0x846   : > { %v6643_v6 = vadd.f32 %v6619_v17, %v6496_v31  ;;  %v13730_v20 = vpop.f32.mrb[65].mxu0  ;;  %v6766_v25 = vpop.f32.mrb[64].mxu1 }
 0x847   : > { %v13789_v4 = vpop.f32.mrb[65].mxu1 }
 0x848   : > { %v6790_v41 = vadd.f32 %v6766_v25, %v6643_v6 }
 0x849   : > { %v6624_v19 = vpop.f32.mrb[66].mxu0 }
 0x84a   : > { %v6644_v0 = vadd.f32 %v6624_v19, %v6497_v29  ;;  %v13733_v26 = vpop.f32.mrb[67].mxu0  ;;  %v6771_v24 = vpop.f32.mrb[66].mxu1 }
 0x84b   : > { %v13792_v47 = vpop.f32.mrb[67].mxu1 }
 0x84c   : > { %v6791_v10 = vadd.f32 %v6771_v24, %v6644_v0 }
 0x84d   : > { %v6629_v33 = vpop.f32.mrb[68].mxu0 }
 0x84e   : > { %v6645_v12 = vadd.f32 %v6629_v33, %v6498_v2  ;;  %v13736_v27 = vpop.f32.mrb[69].mxu0  ;;  %v6776_v7 = vpop.f32.mrb[68].mxu1  ;;  %v6969_v33 = vld [vmem:[%s20224_s6 + $0x18] sm:$0xff] }
 0x84f   : > { %v13795_v21 = vpop.f32.mrb[69].mxu1 }
 0x850   : > { %v6792_v11 = vadd.f32 %v6776_v7, %v6645_v12  ;;  %v6974_v7 = vld [vmem:[%s20224_s6 + $0x40] sm:$0xff] }
 0x851   : > { %v6634_v59 = vpop.f32.mrb[70].mxu0 }
 0x852   : > { %v6646_v5 = vadd.f32 %v6634_v59, %v6499_v30  ;;  %v13739_v31 = vpop.f32.mrb[71].mxu0  ;;  %v6781_v3 = vpop.f32.mrb[70].mxu1 }
 0x853   : > { %v13798_v42 = vpop.f32.mrb[71].mxu1 }
 0x854   : > { %v6793_v16 = vadd.f32 %v6781_v3, %v6646_v5  ;;  %v6970_v42 = vld [vmem:[%s20224_s6 + $0x20] sm:$0xff] }
 0x855   : > { %v6888_v28 = vpop.f32.mrb[72].mxu0 }
 0x856   : > { %v6932_v36 = vadd.f32 %v6888_v28, %v6785_v32  ;;  %v6913_v29 = vpop.f32.mrb[72].mxu1  ;;  %v13833_v2 = vpop.f32.mrb[73].mxu0 }
 0x857   : > { %v6937_v39 = vadd.f32 %v6913_v29, %v6790_v41  ;;  %v13848_v37 = vpop.f32.mrb[73].mxu1 }
 0x858   : > { %v6947_v49 = vadd.f32 %v16117_v1, %v6932_v36 }
 0x859   : > { %v6952_v30 = vadd.f32 %v16117_v1, %v6937_v39  ;;  %v6893_v40 = vpop.f32.mrb[74].mxu0 }
 0x85a   : > { %v6956_v43 = vmax.f32 %v6947_v49, 0.0  ;;  %v6933_v8 = vadd.f32 %v6893_v40, %v6786_v51  ;;  %v6918_v34 = vpop.f32.mrb[74].mxu1  ;;  %v13836_v32 = vpop.f32.mrb[75].mxu0 }
 0x85b   : > { %v6961_v45 = vmax.f32 %v6952_v30, 0.0  ;;  %v6938_v54 = vadd.f32 %v6918_v34, %v6791_v10  ;;  %v13851_v44 = vpop.f32.mrb[75].mxu1 }
 0x85c   : > { %v6975_v18 = vmul.f32 %v6966_v48, %v6956_v43  ;;  %v6948_v58 = vadd.f32 %v16117_v1, %v6933_v8 }
 0x85d   : > { %v6980_v23 = vmul.f32 %v6971_v35, %v6961_v45  ;;  %v6953_v53 = vadd.f32 %v16117_v1, %v6938_v54  ;;  %v6898_v38 = vpop.f32.mrb[76].mxu0 }
 0x85e   : > { %9634 = vst [vmem:[%s20234_s15 + $0x18] sm:$0xff] %v6975_v18  ;;  %v6957_v51 = vmax.f32 %v6948_v58, 0.0  ;;  %v6934_v46 = vadd.f32 %v6898_v38, %v20214_v56  ;;  %v6923_v57 = vpop.f32.mrb[76].mxu1  ;;  %v13839_v50 = vpop.f32.mrb[77].mxu0  ;;  %v6973_v56 = vld [vmem:[%s20224_s6 + $0x38] sm:$0xff] }
 0x85f   : > { %9639 = vst [vmem:[%s20234_s15 + $0x40] sm:$0xff] %v6980_v23  ;;  %v6962_v13 = vmax.f32 %v6953_v53, 0.0  ;;  %v6939_v52 = vadd.f32 %v6923_v57, %v6792_v11  ;;  %v13854_v14 = vpop.f32.mrb[77].mxu1 }
 0x860   : > { %v6976_v62 = vmul.f32 %v6967_v22, %v6957_v51  ;;  %v6949_v55 = vadd.f32 %v16117_v1, %v6934_v46 }
 0x861   : > { %v6981_v61 = vmul.f32 %v6972_v63, %v6962_v13  ;;  %v6954_v17 = vadd.f32 %v16117_v1, %v6939_v52  ;;  %v6903_v6 = vpop.f32.mrb[78].mxu0 }
 0x862   : > { %9635 = vst [vmem:[%s20234_s15 + $0x20] sm:$0xff] %v6976_v62  ;;  %v6958_v20 = vmax.f32 %v6949_v55, 0.0  ;;  %v6935_v25 = vadd.f32 %v6903_v6, %v20216_v9  ;;  %v6928_v4 = vpop.f32.mrb[78].mxu1  ;;  %v13842_v41 = vpop.f32.mrb[79].mxu0 }
 0x863   : > { %9640 = vst [vmem:[%s20234_s15 + $0x48] sm:$0xff] %v6981_v61  ;;  %v6963_v19 = vmax.f32 %v6954_v17, 0.0  ;;  %v6940_v0 = vadd.f32 %v6928_v4, %v6793_v16  ;;  %v13857_v26 = vpop.f32.mrb[79].mxu1 }
 0x864   : > { %v6977_v24 = vmul.f32 %v6968_v15, %v6958_v20  ;;  %v6950_v47 = vadd.f32 %v16117_v1, %v6935_v25 }
 0x865   : > { %v6982_v10 = vmul.f32 %v6973_v56, %v6963_v19  ;;  %v6955_v12 = vadd.f32 %v16117_v1, %v6940_v0  ;;  %v6908_v27 = vpop.f32.mrb[80].mxu0 }
 0x866   : > { %9636 = vst [vmem:[%s20234_s15 + $0x28] sm:$0xff] %v6977_v24  ;;  %v6959_v9 = vmax.f32 %v6950_v47, 0.0  ;;  %v6936_v21 = vadd.f32 %v6908_v27, %v20218_v60  ;;  %v13845_v11 = vpop.f32.mrb[81].mxu0 }
 0x867   : > { %9641 = vst [vmem:[%s20234_s15 + $0x50] sm:$0xff] %v6982_v10  ;;  %v6964_v59 = vmax.f32 %v6955_v12, 0.0 }
 0x868   : > { %v6978_v5 = vmul.f32 %v6969_v33, %v6959_v9  ;;  %v6951_v31 = vadd.f32 %v16117_v1, %v6936_v21  ;;  %5634 = sbr.rel (!%p5632_p4) target bundleno = 1744 (0x6d0), region = 235 }
 0x869   : > { %v6983_v3 = vmul.f32 %v6974_v7, %v6964_v59 }
 0x86a   : > { %9637 = vst [vmem:[%s20234_s15 + $0x30] sm:$0xff] %v6978_v5  ;;  %v6960_v16 = vmax.f32 %v6951_v31, 0.0 }
 0x86b   : > { %9642 = vst [vmem:[%s20234_s15 + $0x58] sm:$0xff] %v6983_v3 }
 0x86c   : > { %v6979_v28 = vmul.f32 %v6970_v42, %v6960_v16 }
 0x86e   : > { %9638 = vst [vmem:[%s20234_s15 + $0x38] sm:$0xff] %v6979_v28 }
 0x86f LB: > { %v9661_v60 = vld [vmem:[%s21073_s1 + $0x80] sm:$0xff]  ;;  %v9662_v36 = vld [vmem:[%s21073_s1 + $0x88] sm:$0xff]  ;;  %v15912_v2 = vmov 0.0|0.0   ;;  %v9663_v49 = vld [vmem:[%s21073_s1 + $0x90] sm:$0xff]  ;;  %vm15913_vm5 = vmmov 0   ;;  %v15914_v35 = vmov 0.0   ;;  %s15894_s25 = sphi %s20262_s25, %s6999_s25  }
 0x870   : > { %v7012_v29 = vld [vmem:[%s21073_s1] sm:$0xff]  ;;  %15469 = vmatprep.subr.bf16.mxu0 %v15912_v2  ;;  %15493 = vmatprep.subr.bf16.mxu1 %v15912_v2  ;;  %v15470_v39 = vpack.c.bf16 %v9662_v36, %v9661_v60  ;;  %v7013_v37 = vld [vmem:[%s21073_s1 + $0x8] sm:$0xff]  ;;  %v9664_v48 = vld [vmem:[%s21073_s1 + $0x98] sm:$0xff]  ;;  %s7000_s21 = smul.u32 72, %s15894_s25  ;;  %s6999_s25 = sadd.s32 1, %s15894_s25  }
 0x871   : > { %v15494_v30 = vpack.c.bf16 %v7013_v37, %v7012_v29  ;;  %v7014_v40 = vld [vmem:[%s21073_s1 + $0x10] sm:$0xff]  ;;  %v7015_v43 = vld [vmem:[%s21073_s1 + $0x18] sm:$0xff]  ;;  %13890 = vmatprep.mubr.msk.f32.mxu0 %vm15913_vm5, %v15914_v35  ;;  %13949 = vmatprep.mubr.msk.f32.mxu1 %vm15913_vm5, %v15914_v35  ;;  %v15473_v8 = vpack.c.bf16 %v9664_v48, %v9663_v49  ;;  %v9665_v32 = vld [vmem:[%s21073_s1 + $0xa0] sm:$0xff]  ;;  %p6996_p5 = scmp.ge.s32.totalorder %s6999_s25, 9  }
 0x872   : > { %15471 = vmatpush3.bf16.msra.mxu0 %v15470_v39  ;;  %v15497_v34 = vpack.c.bf16 %v7015_v43, %v7014_v40  ;;  %v9666_v45 = vld [vmem:[%s21073_s1 + $0xa8] sm:$0xff]  ;;  %v7016_v54 = vld [vmem:[%s21073_s1 + $0x20] sm:$0xff]  ;;  %v9667_v23 = vld [vmem:[%s21073_s1 + $0xb0] sm:$0xff]  ;;  %s20398_s5 = scalar_lea.vmem [#allocation2], %s7000_s21  ;;  %s21048_s15 = scalar_lea.vmem %s21076_s4, %s7000_s21 }
 0x873   : > { %15495 = vmatpush3.bf16.msra.mxu1 %v15494_v30  ;;  %15472 = vmatprep.subr.bf16.mxu0 %v15912_v2  ;;  %v7017_v44 = vld [vmem:[%s21073_s1 + $0x28] sm:$0xff]  ;;  %v15476_v18 = vpack.c.bf16 %v9666_v45, %v9665_v32  ;;  %v9668_v22 = vld [vmem:[%s21073_s1 + $0xb8] sm:$0xff]  ;;  %v7018_v53 = vld [vmem:[%s21073_s1 + $0x30] sm:$0xff] }
 0x874   : > { %15496 = vmatprep.subr.bf16.mxu1 %v15912_v2  ;;  %v15500_v58 = vpack.c.bf16 %v7017_v44, %v7016_v54  ;;  %v7019_v38 = vld [vmem:[%s21073_s1 + $0x38] sm:$0xff]  ;;  %v15479_v51 = vpack.c.bf16 %v9668_v22, %v9667_v23  ;;  %v9669_v46 = vld [vmem:[%s21073_s1 + $0xc0] sm:$0xff]  ;;  %v9670_v57 = vld [vmem:[%s21073_s1 + $0xc8] sm:$0xff] }
 0x875   : > { %v15503_v63 = vpack.c.bf16 %v7019_v38, %v7018_v53  ;;  %v7020_v50 = vld [vmem:[%s21073_s1 + $0x40] sm:$0xff]  ;;  %v7021_v13 = vld [vmem:[%s21073_s1 + $0x48] sm:$0xff]  ;;  %v15482_v52 = vpack.c.bf16 %v9670_v57, %v9669_v46  ;;  %v9671_v62 = vld [vmem:[%s21073_s1 + $0xd0] sm:$0xff] }
 0x876   : > { %15474 = vmatpush3.bf16.msra.mxu0 %v15473_v8  ;;  %v15506_v14 = vpack.c.bf16 %v7021_v13, %v7020_v50  ;;  %v9672_v55 = vld [vmem:[%s21073_s1 + $0xd8] sm:$0xff]  ;;  %v7022_v61 = vld [vmem:[%s21073_s1 + $0x50] sm:$0xff]  ;;  %v9673_v20 = vld [vmem:[%s21073_s1 + $0xe0] sm:$0xff] }
 0x877   : > { %15498 = vmatpush3.bf16.msra.mxu1 %v15497_v34  ;;  %15475 = vmatprep.subr.bf16.mxu0 %v15912_v2  ;;  %v7023_v15 = vld [vmem:[%s21073_s1 + $0x58] sm:$0xff]  ;;  %v15485_v17 = vpack.c.bf16 %v9672_v55, %v9671_v62  ;;  %v9674_v56 = vld [vmem:[%s21073_s1 + $0xe8] sm:$0xff]  ;;  %v7024_v25 = vld [vmem:[%s21073_s1 + $0x60] sm:$0xff] }
 0x878   : > { %15499 = vmatprep.subr.bf16.mxu1 %v15912_v2  ;;  %v15509_v6 = vpack.c.bf16 %v7023_v15, %v7022_v61  ;;  %v7025_v4 = vld [vmem:[%s21073_s1 + $0x68] sm:$0xff]  ;;  %v15488_v41 = vpack.c.bf16 %v9674_v56, %v9673_v20  ;;  %v9675_v0 = vld [vmem:[%s21073_s1 + $0xf0] sm:$0xff]  ;;  %v9676_v26 = vld [vmem:[%s21073_s1 + $0xf8] sm:$0xff] }
 0x879   : > { %v15512_v19 = vpack.c.bf16 %v7025_v4, %v7024_v25  ;;  %v7026_v24 = vld [vmem:[%s21073_s1 + $0x70] sm:$0xff]  ;;  %v7027_v47 = vld [vmem:[%s21073_s1 + $0x78] sm:$0xff]  ;;  %v15491_v10 = vpack.c.bf16 %v9676_v26, %v9675_v0  ;;  %v9686_v12 = vld [vmem:[%s21073_s1 + $0x100] sm:$0xff] }
 0x87a   : > { %15477 = vmatpush3.bf16.msra.mxu0 %v15476_v18  ;;  %v15515_v33 = vpack.c.bf16 %v7027_v47, %v7026_v24  ;;  %v9687_v27 = vld [vmem:[%s21073_s1 + $0x108] sm:$0xff]  ;;  %v9711_v9 = vld [vmem:[%s21073_s1 + $0x180] sm:$0xff]  ;;  %v9688_v5 = vld [vmem:[%s21073_s1 + $0x110] sm:$0xff] }
 0x87b   : > { %15501 = vmatpush3.bf16.msra.mxu1 %v15500_v58  ;;  %15478 = vmatprep.subr.bf16.mxu0 %v15912_v2  ;;  %v9712_v7 = vld [vmem:[%s21073_s1 + $0x188] sm:$0xff]  ;;  %v15518_v11 = vpack.c.bf16 %v9687_v27, %v9686_v12  ;;  %v9689_v31 = vld [vmem:[%s21073_s1 + $0x118] sm:$0xff]  ;;  %v9713_v42 = vld [vmem:[%s21073_s1 + $0x190] sm:$0xff] }
 0x87c   : > { %15502 = vmatprep.subr.bf16.mxu1 %v15912_v2  ;;  %v9652_v21 = vld [vmem:[%s20398_s5 + $0x6] sm:$0xff]  ;;  %v15542_v3 = vpack.c.bf16 %v9712_v7, %v9711_v9  ;;  %v9714_v16 = vld [vmem:[%s21073_s1 + $0x198] sm:$0xff]  ;;  %v9653_v28 = vld [vmem:[%s20398_s5 + $0xe] sm:$0xff]  ;;  %v15521_v60 = vpack.c.bf16 %v9689_v31, %v9688_v5 }
 0x87d   : > { %v9643_v59 = vld [vmem:[%s20398_s5 + $0x5] sm:$0xff]  ;;  %v9644_v36 = vld [vmem:[%s20398_s5 + $0xd] sm:$0xff]  ;;  %v15545_v37 = vpack.c.bf16 %v9714_v16, %v9713_v42  ;;  %v9654_v30 = vld [vmem:[%s20398_s5 + $0x16] sm:$0xff] }
 0x87e   : > { %15480 = vmatpush3.bf16.msra.mxu0 %v15479_v51  ;;  %v9690_v29 = vld [vmem:[%s21073_s1 + $0x120] sm:$0xff]  ;;  %v9691_v39 = vld [vmem:[%s21073_s1 + $0x128] sm:$0xff]  ;;  %v9645_v43 = vld [vmem:[%s20398_s5 + $0x15] sm:$0xff] }
 0x87f   : > { %15504 = vmatpush3.bf16.msra.mxu1 %v15503_v63  ;;  %15481 = vmatprep.subr.bf16.mxu0 %v15912_v2  ;;  %v9715_v49 = vld [vmem:[%s21073_s1 + $0x1a0] sm:$0xff]  ;;  %v9716_v48 = vld [vmem:[%s21073_s1 + $0x1a8] sm:$0xff]  ;;  %v15524_v40 = vpack.c.bf16 %v9691_v39, %v9690_v29  ;;  %v9692_v34 = vld [vmem:[%s21073_s1 + $0x130] sm:$0xff] }
 0x880   : > { %15505 = vmatprep.subr.bf16.mxu1 %v15912_v2  ;;  %v15548_v8 = vpack.c.bf16 %v9716_v48, %v9715_v49  ;;  %v9693_v32 = vld [vmem:[%s21073_s1 + $0x138] sm:$0xff]  ;;  %v9717_v45 = vld [vmem:[%s21073_s1 + $0x1b0] sm:$0xff]  ;;  %v9694_v22 = vld [vmem:[%s21073_s1 + $0x140] sm:$0xff] }
 0x881   : > { %v9718_v54 = vld [vmem:[%s21073_s1 + $0x1b8] sm:$0xff]  ;;  %v15527_v58 = vpack.c.bf16 %v9693_v32, %v9692_v34  ;;  %v9695_v53 = vld [vmem:[%s21073_s1 + $0x148] sm:$0xff]  ;;  %v9719_v38 = vld [vmem:[%s21073_s1 + $0x1c0] sm:$0xff] }
 0x882   : > { %15483 = vmatpush3.bf16.msra.mxu0 %v15482_v52  ;;  %v9655_v44 = vld [vmem:[%s20398_s5 + $0x1e] sm:$0xff]  ;;  %v15551_v23 = vpack.c.bf16 %v9718_v54, %v9717_v45  ;;  %v9720_v51 = vld [vmem:[%s21073_s1 + $0x1c8] sm:$0xff]  ;;  %v15530_v57 = vpack.c.bf16 %v9695_v53, %v9694_v22  ;;  %v9696_v13 = vld [vmem:[%s21073_s1 + $0x150] sm:$0xff] }
 0x883   : > { %15507 = vmatpush3.bf16.msra.mxu1 %v15506_v14  ;;  %15484 = vmatprep.subr.bf16.mxu0 %v15912_v2  ;;  %v9646_v18 = vld [vmem:[%s20398_s5 + $0x1d] sm:$0xff]  ;;  %v9656_v63 = vld [vmem:[%s20398_s5 + $0x26] sm:$0xff]  ;;  %v15554_v50 = vpack.c.bf16 %v9720_v51, %v9719_v38  ;;  %v9721_v14 = vld [vmem:[%s21073_s1 + $0x1d0] sm:$0xff] }
 0x884   : > { %15508 = vmatprep.subr.bf16.mxu1 %v15912_v2  ;;  %v9647_v46 = vld [vmem:[%s20398_s5 + $0x25] sm:$0xff]  ;;  %v9697_v52 = vld [vmem:[%s21073_s1 + $0x158] sm:$0xff]  ;;  %v9657_v55 = vld [vmem:[%s20398_s5 + $0x2e] sm:$0xff] }
 0x885   : > { %v9722_v62 = vld [vmem:[%s21073_s1 + $0x1d8] sm:$0xff]  ;;  %v9648_v61 = vld [vmem:[%s20398_s5 + $0x2d] sm:$0xff]  ;;  %v15533_v15 = vpack.c.bf16 %v9697_v52, %v9696_v13  ;;  %v9723_v56 = vld [vmem:[%s21073_s1 + $0x1e0] sm:$0xff] }
 0x886   : > { %15486 = vmatpush3.bf16.msra.mxu0 %v15485_v17  ;;  %v15557_v17 = vpack.c.bf16 %v9722_v62, %v9721_v14  ;;  %v9699_v20 = vld [vmem:[%s21073_s1 + $0x168] sm:$0xff]  ;;  %v9658_v4 = vld [vmem:[%s20398_s5 + $0x36] sm:$0xff]  ;;  %v9761_v5 = vld [vmem:[%s21073_s1 + $0x280] sm:$0xff] }
 0x887   : > { %15510 = vmatpush3.bf16.msra.mxu1 %v15509_v6  ;;  %15487 = vmatprep.subr.bf16.mxu0 %v15912_v2  ;;  %v9698_v6 = vld [vmem:[%s21073_s1 + $0x160] sm:$0xff]  ;;  %v9724_v25 = vld [vmem:[%s21073_s1 + $0x1e8] sm:$0xff]  ;;  %v9700_v26 = vld [vmem:[%s21073_s1 + $0x170] sm:$0xff] }
 0x888   : > { %15511 = vmatprep.subr.bf16.mxu1 %v15912_v2  ;;  %v15560_v0 = vpack.c.bf16 %v9724_v25, %v9723_v56  ;;  %v9701_v24 = vld [vmem:[%s21073_s1 + $0x178] sm:$0xff]  ;;  %v9725_v47 = vld [vmem:[%s21073_s1 + $0x1f0] sm:$0xff]  ;;  %v9660_v7 = vld [vmem:[%s20398_s5 + $0x46] sm:$0xff] }
 0x889   : > { %v9650_v12 = vld [vmem:[%s20398_s5 + $0x3d] sm:$0xff]  ;;  %v15539_v27 = vpack.c.bf16 %v9701_v24, %v9700_v26  ;;  %v9762_v31 = vld [vmem:[%s21073_s1 + $0x288] sm:$0xff]  ;;  %v9763_v29 = vld [vmem:[%s21073_s1 + $0x290] sm:$0xff] }
 0x88a   : > { %15489 = vmatpush3.bf16.msra.mxu0 %v15488_v41  ;;  %v9649_v41 = vld [vmem:[%s20398_s5 + $0x35] sm:$0xff]  ;;  %v9703_v48 = vld [vmem:[%s20398_s5 + $0x1f] sm:$0xff]  ;;  %v9766_v34 = vld [vmem:[%s21073_s1 + $0x2a8] sm:$0xff] }
 0x88b   : > { %15513 = vmatpush3.bf16.msra.mxu1 %v15512_v19  ;;  %15490 = vmatprep.subr.bf16.mxu0 %v15912_v2  ;;  %v15536_v19 = vpack.c.bf16 %v9699_v20, %v9698_v6  ;;  %v9702_v16 = vld [vmem:[%s20398_s5 + $0x17] sm:$0xff]  ;;  %v9704_v45 = vld [vmem:[%s20398_s5 + $0x27] sm:$0xff]  ;;  %v9705_v22 = vld [vmem:[%s20398_s5 + $0x2f] sm:$0xff] }
 0x88c   : > { %15514 = vmatprep.subr.bf16.mxu1 %v15912_v2  ;;  %v9764_v39 = vld [vmem:[%s21073_s1 + $0x298] sm:$0xff]  ;;  %v9744_v51 = vld [vmem:[%s21073_s1 + $0x240] sm:$0xff]  ;;  %v9746_v14 = vld [vmem:[%s21073_s1 + $0x250] sm:$0xff] }
 0x88d   : > { %v9747_v62 = vld [vmem:[%s21073_s1 + $0x258] sm:$0xff]  ;;  %v9748_v20 = vld [vmem:[%s21073_s1 + $0x260] sm:$0xff]  ;;  %v9749_v56 = vld [vmem:[%s21073_s1 + $0x268] sm:$0xff] }
 0x88e   : > { %15492 = vmatpush3.bf16.msra.mxu0 %v15491_v10  ;;  %v9726_v10 = vld [vmem:[%s21073_s1 + $0x1f8] sm:$0xff]  ;;  %v9773_v25 = vld [vmem:[%s21073_s1 + $0x2e0] sm:$0xff]  ;;  %v9750_v26 = vld [vmem:[%s21073_s1 + $0x270] sm:$0xff] }
 0x88f   : > { %15516 = vmatpush3.bf16.msra.mxu1 %v15515_v33  ;;  %15517 = vmatprep.subr.bf16.mxu0 %v15912_v2  ;;  %v9659_v33 = vld [vmem:[%s20398_s5 + $0x3e] sm:$0xff]  ;;  %v15563_v9 = vpack.c.bf16 %v9726_v10, %v9725_v47  ;;  %v9775_v47 = vld [vmem:[%s21073_s1 + $0x2f0] sm:$0xff] }
 0x890   : > { %15541 = vmatprep.subr.bf16.mxu1 %v15912_v2  ;;  %v9751_v24 = vld [vmem:[%s21073_s1 + $0x278] sm:$0xff] }
 0x891   : > { %13891 = vmatmul.mubr.f32.vlgmr.msra.gmra.mrb[0].mxu0 %v9652_v21  ;;  %v9651_v21 = vld [vmem:[%s20398_s5 + $0x45] sm:$0xff]  ;;  %v9776_v10 = vld [vmem:[%s21073_s1 + $0x2f8] sm:$0xff] }
 0x892   : > { %13950 = vmatmul.mubr.f32.vlgmr.msra.gmra.mrb[0].mxu1 %v9643_v59  ;;  %15519 = vmatpush3.bf16.msra.mxu0 %v15518_v11  ;;  %v9736_v11 = vld [vmem:[%s21073_s1 + $0x200] sm:$0xff]  ;;  %v9737_v59 = vld [vmem:[%s21073_s1 + $0x208] sm:$0xff] }
 0x893   : > { %13893 = vmatprep.mubr.msk.f32.mxu0 %vm15913_vm5, %v15914_v35  ;;  %13952 = vmatprep.mubr.msk.f32.mxu1 %vm15913_vm5, %v15914_v35  ;;  %v15566_v42 = vpack.c.bf16 %v9737_v59, %v9736_v11  ;;  %v9811_v11 = vld [vmem:[%s21073_s1 + $0x380] sm:$0xff]  ;;  %v9812_v59 = vld [vmem:[%s21073_s1 + $0x388] sm:$0xff] }
 0x894   : > { %15520 = vmatprep.subr.bf16.mxu0 %v15912_v2  ;;  %15543 = vmatpush3.bf16.msra.mxu1 %v15542_v3  ;;  %v9677_v3 = vld [vmem:[%s20398_s5 + $0x7] sm:$0xff] }
 0x895   : > { %13894 = vmatmul.mubr.f32.gmra.mrb[2].mxu0 %v9653_v28  ;;  %15544 = vmatprep.subr.bf16.mxu1 %v15912_v2  ;;  %v9738_v28 = vld [vmem:[%s21073_s1 + $0x210] sm:$0xff] }
 0x896   : > { %13953 = vmatmul.mubr.f32.gmra.mrb[2].mxu1 %v9644_v36  ;;  %15522 = vmatpush3.bf16.msra.mxu0 %v15521_v60  ;;  %v9739_v60 = vld [vmem:[%s21073_s1 + $0x218] sm:$0xff]  ;;  %v15590_v36 = vpack.c.bf16 %v9762_v31, %v9761_v5 }
 0x897   : > { %13896 = vmatprep.mubr.msk.f32.mxu0 %vm15913_vm5, %v15914_v35  ;;  %13955 = vmatprep.mubr.msk.f32.mxu1 %vm15913_vm5, %v15914_v35  ;;  %v15569_v49 = vpack.c.bf16 %v9739_v60, %v9738_v28  ;;  %v9727_v5 = vld [vmem:[%s20398_s5 + $0x18] sm:$0xff]  ;;  %v15638_v28 = vpack.c.bf16 %v9812_v59, %v9811_v11  ;;  %v9813_v60 = vld [vmem:[%s21073_s1 + $0x390] sm:$0xff] }
 0x898   : > { %15523 = vmatprep.subr.bf16.mxu0 %v15912_v2  ;;  %15546 = vmatpush3.bf16.msra.mxu1 %v15545_v37  ;;  %v9678_v37 = vld [vmem:[%s20398_s5 + $0xf] sm:$0xff]  ;;  %v9735_v59 = vld [vmem:[%s20398_s5 + $0x58] sm:$0xff] }
 0x899   : > { %13897 = vmatmul.mubr.f32.gmra.mrb[4].mxu0 %v9654_v30  ;;  %15547 = vmatprep.subr.bf16.mxu1 %v15912_v2  ;;  %v9740_v30 = vld [vmem:[%s21073_s1 + $0x220] sm:$0xff] }
 0x89a   : > { %13956 = vmatmul.mubr.f32.gmra.mrb[4].mxu1 %v9645_v43  ;;  %15525 = vmatpush3.bf16.msra.mxu0 %v15524_v40  ;;  %v9741_v40 = vld [vmem:[%s21073_s1 + $0x228] sm:$0xff]  ;;  %v15593_v43 = vpack.c.bf16 %v9764_v39, %v9763_v29  ;;  %v9728_v29 = vld [vmem:[%s20398_s5 + $0x20] sm:$0xff] }
 0x89b   : > { %13899 = vmatprep.mubr.msk.f32.mxu0 %vm15913_vm5, %v15914_v35  ;;  %13958 = vmatprep.mubr.msk.f32.mxu1 %vm15913_vm5, %v15914_v35  ;;  %v15572_v32 = vpack.c.bf16 %v9741_v40, %v9740_v30  ;;  %v9815_v40 = vld [vmem:[%s21073_s1 + $0x3a0] sm:$0xff] }
 0x89c   : > { %15549 = vmatpush3.bf16.msra.mxu1 %v15548_v8  ;;  %15526 = vmatprep.subr.bf16.mxu0 %v15912_v2  ;;  %v9765_v8 = vld [vmem:[%s21073_s1 + $0x2a0] sm:$0xff] }
 0x89d   : > { %13900 = vmatmul.mubr.f32.gmra.mrb[6].mxu0 %v9655_v44  ;;  %15550 = vmatprep.subr.bf16.mxu1 %v15912_v2  ;;  %v15596_v54 = vpack.c.bf16 %v9766_v34, %v9765_v8  ;;  %v9742_v44 = vld [vmem:[%s21073_s1 + $0x230] sm:$0xff]  ;;  %v9729_v8 = vld [vmem:[%s20398_s5 + $0x28] sm:$0xff] }
 0x89e   : > { %13959 = vmatmul.mubr.f32.gmra.mrb[6].mxu1 %v9646_v18  ;;  %13902 = vmatprep.mubr.msk.f32.mxu0 %vm15913_vm5, %v15914_v35  ;;  %v9743_v18 = vld [vmem:[%s21073_s1 + $0x238] sm:$0xff] }
 0x89f   : > { %13961 = vmatprep.mubr.msk.f32.mxu1 %vm15913_vm5, %v15914_v35  ;;  %15528 = vmatpush3.bf16.msra.mxu0 %v15527_v58  ;;  %v9767_v58 = vld [vmem:[%s21073_s1 + $0x2b0] sm:$0xff]  ;;  %v15575_v53 = vpack.c.bf16 %v9743_v18, %v9742_v44  ;;  %v9793_v44 = vld [vmem:[%s21073_s1 + $0x338] sm:$0xff] }
 0x8a0   : > { %15552 = vmatpush3.bf16.msra.mxu1 %v15551_v23  ;;  %15529 = vmatprep.subr.bf16.mxu0 %v15912_v2  ;;  %v9768_v23 = vld [vmem:[%s21073_s1 + $0x2b8] sm:$0xff]  ;;  %v9817_v18 = vld [vmem:[%s21073_s1 + $0x3b0] sm:$0xff] }
 0x8a1   : > { %13903 = vmatmul.mubr.f32.gmra.mrb[8].mxu0 %v9656_v63  ;;  %15553 = vmatprep.subr.bf16.mxu1 %v15912_v2  ;;  %v15599_v38 = vpack.c.bf16 %v9768_v23, %v9767_v58  ;;  %v9745_v63 = vld [vmem:[%s21073_s1 + $0x248] sm:$0xff]  ;;  %v9818_v58 = vld [vmem:[%s21073_s1 + $0x3b8] sm:$0xff]  ;;  %v9730_v23 = vld [vmem:[%s20398_s5 + $0x30] sm:$0xff] }
 0x8a2   : > { %13962 = vmatmul.mubr.f32.gmra.mrb[8].mxu1 %v9647_v46  ;;  %13905 = vmatprep.mubr.msk.f32.mxu0 %vm15913_vm5, %v15914_v35  ;;  %v9769_v46 = vld [vmem:[%s21073_s1 + $0x2c0] sm:$0xff]  ;;  %v15578_v13 = vpack.c.bf16 %v9745_v63, %v9744_v51  ;;  %v9795_v63 = vld [vmem:[%s21073_s1 + $0x348] sm:$0xff] }
 0x8a3   : > { %13964 = vmatprep.mubr.msk.f32.mxu1 %vm15913_vm5, %v15914_v35  ;;  %15531 = vmatpush3.bf16.msra.mxu0 %v15530_v57  ;;  %v9770_v57 = vld [vmem:[%s21073_s1 + $0x2c8] sm:$0xff]  ;;  %v9794_v51 = vld [vmem:[%s21073_s1 + $0x340] sm:$0xff] }
 0x8a4   : > { %15555 = vmatpush3.bf16.msra.mxu1 %v15554_v50  ;;  %15532 = vmatprep.subr.bf16.mxu0 %v15912_v2  ;;  %v9706_v50 = vld [vmem:[%s20398_s5 + $0x37] sm:$0xff]  ;;  %v15602_v52 = vpack.c.bf16 %v9770_v57, %v9769_v46  ;;  %v9819_v46 = vld [vmem:[%s21073_s1 + $0x3c0] sm:$0xff]  ;;  %v9820_v57 = vld [vmem:[%s21073_s1 + $0x3c8] sm:$0xff] }
 0x8a5   : > { %13906 = vmatmul.mubr.f32.gmra.mrb[10].mxu0 %v9657_v55  ;;  %15556 = vmatprep.subr.bf16.mxu1 %v15912_v2  ;;  %v9771_v55 = vld [vmem:[%s21073_s1 + $0x2d0] sm:$0xff] }
 0x8a6   : > { %13965 = vmatmul.mubr.f32.gmra.mrb[10].mxu1 %v9648_v61  ;;  %13908 = vmatprep.mubr.msk.f32.mxu0 %vm15913_vm5, %v15914_v35  ;;  %v9772_v61 = vld [vmem:[%s21073_s1 + $0x2d8] sm:$0xff] }
 0x8a7   : > { %13967 = vmatprep.mubr.msk.f32.mxu1 %vm15913_vm5, %v15914_v35  ;;  %15534 = vmatpush3.bf16.msra.mxu0 %v15533_v15  ;;  %v9707_v15 = vld [vmem:[%s20398_s5 + $0x3f] sm:$0xff]  ;;  %v15605_v6 = vpack.c.bf16 %v9772_v61, %v9771_v55  ;;  %v9821_v61 = vld [vmem:[%s21073_s1 + $0x3d0] sm:$0xff] }
 0x8a8   : > { %15558 = vmatpush3.bf16.msra.mxu1 %v15557_v17  ;;  %15535 = vmatprep.subr.bf16.mxu0 %v15912_v2  ;;  %v15581_v17 = vpack.c.bf16 %v9747_v62, %v9746_v14  ;;  %v15650_v14 = vpack.c.bf16 %v9820_v57, %v9819_v46  ;;  %v9796_v62 = vld [vmem:[%s21073_s1 + $0x350] sm:$0xff]  ;;  %v9797_v55 = vld [vmem:[%s21073_s1 + $0x358] sm:$0xff]  ;;  %v9784_v57 = vld [vmem:[%s20398_s5 + $0x61] sm:$0xff] }
 0x8a9   : > { %13909 = vmatmul.mubr.f32.gmra.mrb[12].mxu0 %v9658_v4  ;;  %15559 = vmatprep.subr.bf16.mxu1 %v15912_v2  ;;  %v9774_v4 = vld [vmem:[%s21073_s1 + $0x2e8] sm:$0xff]  ;;  %v9851_v46 = vld [vmem:[%s21073_s1 + $0x478] sm:$0xff] }
 0x8aa   : > { %13968 = vmatmul.mubr.f32.gmra.mrb[12].mxu1 %v9649_v41  ;;  %13911 = vmatprep.mubr.msk.f32.mxu0 %vm15913_vm5, %v15914_v35  ;;  %v9708_v41 = vld [vmem:[%s20398_s5 + $0x47] sm:$0xff] }
 0x8ab   : > { %13970 = vmatprep.mubr.msk.f32.mxu1 %vm15913_vm5, %v15914_v35  ;;  %15537 = vmatpush3.bf16.msra.mxu0 %v15536_v19  ;;  %v15584_v19 = vpack.c.bf16 %v9749_v56, %v9748_v20  ;;  %v15629_v20 = vpack.c.bf16 %v9797_v55, %v9796_v62  ;;  %v9832_v62 = vld [vmem:[%s20398_s5 + $0x53] sm:$0xff] }
 0x8ac   : > { %15561 = vmatpush3.bf16.msra.mxu1 %v15560_v0  ;;  %15538 = vmatprep.subr.bf16.mxu0 %v15912_v2  ;;  %v15608_v0 = vpack.c.bf16 %v9774_v4, %v9773_v25  ;;  %v9798_v25 = vld [vmem:[%s21073_s1 + $0x360] sm:$0xff]  ;;  %v9799_v4 = vld [vmem:[%s21073_s1 + $0x368] sm:$0xff]  ;;  %v9828_v55 = vld [vmem:[%s20398_s5 + $0x33] sm:$0xff] }
 0x8ad   : > { %13912 = vmatmul.mubr.f32.gmra.mrb[14].mxu0 %v9659_v33  ;;  %15562 = vmatprep.subr.bf16.mxu1 %v15912_v2  ;;  %v9709_v33 = vld [vmem:[%s20398_s5 + $0x4f] sm:$0xff] }
 0x8ae   : > { %13971 = vmatmul.mubr.f32.gmra.mrb[14].mxu1 %v9650_v12  ;;  %13914 = vmatprep.mubr.msk.f32.mxu0 %vm15913_vm5, %v15914_v35  ;;  %v15587_v12 = vpack.c.bf16 %v9751_v24, %v9750_v26  ;;  %v20859_v26 = vld [vmem:[%s20398_s5 + $0x49] sm:$0xff]  ;;  %v15632_v24 = vpack.c.bf16 %v9799_v4, %v9798_v25 }
 0x8af   : > { %13973 = vmatprep.mubr.msk.f32.mxu1 %vm15913_vm5, %v15914_v35  ;;  %15540 = vmatpush3.bf16.msra.mxu0 %v15539_v27  ;;  %v15611_v27 = vpack.c.bf16 %v9776_v10, %v9775_v47  ;;  %v9800_v10 = vld [vmem:[%s21073_s1 + $0x370] sm:$0xff] }
 0x8b0   : > { %15564 = vmatpush3.bf16.msra.mxu1 %v15563_v9  ;;  %15565 = vmatprep.subr.bf16.mxu0 %v15912_v2  ;;  %v9710_v9 = vld [vmem:[%s20398_s5 + $0x57] sm:$0xff] }
 0x8b1   : > { %13915 = vmatmul.mubr.f32.gmra.mrb[16].mxu0 %v9660_v7  ;;  %15589 = vmatprep.subr.bf16.mxu1 %v15912_v2  ;;  %v9786_v7 = vld [vmem:[%s21073_s1 + $0x300] sm:$0xff] }
 0x8b2   : > { %13974 = vmatmul.mubr.f32.gmra.mrb[16].mxu1 %v9651_v21  ;;  %14008 = vmatprep.mubr.msk.f32.mxu0 %vm15913_vm5, %v15914_v35  ;;  %v9787_v21 = vld [vmem:[%s21073_s1 + $0x308] sm:$0xff] }
 0x8b3   : > { %14067 = vmatprep.mubr.msk.f32.mxu1 %vm15913_vm5, %v15914_v35  ;;  %v15614_v31 = vpack.c.bf16 %v9787_v21, %v9786_v7  ;;  %v20882_v7 = vld [vmem:[%s20398_s5 + $0x51] sm:$0xff] }
 0x8b5   : > { %14009 = vmatmul.mubr.f32.vlgmr.msra.gmra.mrb[18].mxu0 %v9677_v3  ;;  %v9752_v3 = vld [vmem:[%s20398_s5 + $0x19] sm:$0xff] }
 0x8b6   : > { %14068 = vmatmul.mubr.f32.vlgmr.msra.gmra.mrb[18].mxu1 %v9702_v16  ;;  %15567 = vmatpush3.bf16.msra.mxu0 %v15566_v42  ;;  %v9788_v42 = vld [vmem:[%s21073_s1 + $0x310] sm:$0xff] }
 0x8b7   : > { %14011 = vmatprep.mubr.msk.f32.mxu0 %vm15913_vm5, %v15914_v35  ;;  %14070 = vmatprep.mubr.msk.f32.mxu1 %vm15913_vm5, %v15914_v35 }
 0x8b8   : > { %15568 = vmatprep.subr.bf16.mxu0 %v15912_v2  ;;  %15591 = vmatpush3.bf16.msra.mxu1 %v15590_v36  ;;  %v9814_v36 = vld [vmem:[%s21073_s1 + $0x398] sm:$0xff] }
 0x8b9   : > { %14012 = vmatmul.mubr.f32.gmra.mrb[20].mxu0 %v9678_v37  ;;  %15592 = vmatprep.subr.bf16.mxu1 %v15912_v2  ;;  %v9753_v37 = vld [vmem:[%s20398_s5 + $0x21] sm:$0xff]  ;;  %v15641_v30 = vpack.c.bf16 %v9814_v36, %v9813_v60  ;;  %v9839_v60 = vld [vmem:[%s21073_s1 + $0x418] sm:$0xff] }
 0x8ba   : > { %14071 = vmatmul.mubr.f32.gmra.mrb[20].mxu1 %v9703_v48  ;;  %15570 = vmatpush3.bf16.msra.mxu0 %v15569_v49  ;;  %v9790_v49 = vld [vmem:[%s21073_s1 + $0x320] sm:$0xff] }
 0x8bb   : > { %14014 = vmatprep.mubr.msk.f32.mxu0 %vm15913_vm5, %v15914_v35  ;;  %14073 = vmatprep.mubr.msk.f32.mxu1 %vm15913_vm5, %v15914_v35 }
 0x8bc   : > { %15571 = vmatprep.subr.bf16.mxu0 %v15912_v2  ;;  %15594 = vmatpush3.bf16.msra.mxu1 %v15593_v43  ;;  %v9816_v43 = vld [vmem:[%s21073_s1 + $0x3a8] sm:$0xff] }
 0x8bd   : > { %14015 = vmatmul.mubr.f32.gmra.mrb[22].mxu0 %v9702_v16  ;;  %15595 = vmatprep.subr.bf16.mxu1 %v15912_v2  ;;  %v9789_v16 = vld [vmem:[%s21073_s1 + $0x318] sm:$0xff] }
 0x8be   : > { %14074 = vmatmul.mubr.f32.gmra.mrb[22].mxu1 %v9704_v45  ;;  %15573 = vmatpush3.bf16.msra.mxu0 %v15572_v32  ;;  %v15617_v39 = vpack.c.bf16 %v9789_v16, %v9788_v42  ;;  %v20767_v32 = vld [vmem:[%s20398_s5 + $0x29] sm:$0xff] }
 0x8bf   : > { %14017 = vmatprep.mubr.msk.f32.mxu0 %vm15913_vm5, %v15914_v35  ;;  %14076 = vmatprep.mubr.msk.f32.mxu1 %vm15913_vm5, %v15914_v35  ;;  %v9802_v16 = vld [vmem:[%s20398_s5 + $0x2a] sm:$0xff] }
 0x8c0   : > { %15597 = vmatpush3.bf16.msra.mxu1 %v15596_v54  ;;  %15574 = vmatprep.subr.bf16.mxu0 %v15912_v2  ;;  %v9792_v54 = vld [vmem:[%s21073_s1 + $0x330] sm:$0xff] }
 0x8c1   : > { %14018 = vmatmul.mubr.f32.gmra.mrb[24].mxu0 %v9703_v48  ;;  %15598 = vmatprep.subr.bf16.mxu1 %v15912_v2  ;;  %v9791_v48 = vld [vmem:[%s21073_s1 + $0x328] sm:$0xff] }
 0x8c2   : > { %14077 = vmatmul.mubr.f32.gmra.mrb[24].mxu1 %v9705_v22  ;;  %14020 = vmatprep.mubr.msk.f32.mxu0 %vm15913_vm5, %v15914_v35  ;;  %v15620_v34 = vpack.c.bf16 %v9791_v48, %v9790_v49  ;;  %v9804_v48 = vld [vmem:[%s20398_s5 + $0x3a] sm:$0xff] }
 0x8c3   : > { %14079 = vmatprep.mubr.msk.f32.mxu1 %vm15913_vm5, %v15914_v35  ;;  %15576 = vmatpush3.bf16.msra.mxu0 %v15575_v53  ;;  %v15623_v53 = vpack.c.bf16 %v9793_v44, %v9792_v54  ;;  %v9846_v44 = vld [vmem:[%s21073_s1 + $0x450] sm:$0xff] }
 0x8c4   : > { %15600 = vmatpush3.bf16.msra.mxu1 %v15599_v38  ;;  %15577 = vmatprep.subr.bf16.mxu0 %v15912_v2  ;;  %v15647_v38 = vpack.c.bf16 %v9818_v58, %v9817_v18  ;;  %v9847_v18 = vld [vmem:[%s21073_s1 + $0x458] sm:$0xff] }
 0x8c5   : > { %14021 = vmatmul.mubr.f32.gmra.mrb[26].mxu0 %v9704_v45  ;;  %15601 = vmatprep.subr.bf16.mxu1 %v15912_v2  ;;  %v15644_v45 = vpack.c.bf16 %v9816_v43, %v9815_v40  ;;  %v9843_v40 = vld [vmem:[%s21073_s1 + $0x438] sm:$0xff]  ;;  %v9805_v43 = vld [vmem:[%s20398_s5 + $0x42] sm:$0xff] }
 0x8c6   : > { %14080 = vmatmul.mubr.f32.gmra.mrb[26].mxu1 %v9706_v50  ;;  %14023 = vmatprep.mubr.msk.f32.mxu0 %vm15913_vm5, %v15914_v35  ;;  %v9807_v58 = vld [vmem:[%s20398_s5 + $0x52] sm:$0xff] }
 0x8c7   : > { %14082 = vmatprep.mubr.msk.f32.mxu1 %vm15913_vm5, %v15914_v35  ;;  %15579 = vmatpush3.bf16.msra.mxu0 %v15578_v13  ;;  %v20813_v13 = vld [vmem:[%s20398_s5 + $0x39] sm:$0xff] }
 0x8c8   : > { %15603 = vmatpush3.bf16.msra.mxu1 %v15602_v52  ;;  %15580 = vmatprep.subr.bf16.mxu0 %v15912_v2  ;;  %v15626_v52 = vpack.c.bf16 %v9795_v63, %v9794_v51  ;;  %v9850_v63 = vld [vmem:[%s21073_s1 + $0x470] sm:$0xff] }
 0x8c9   : > { %14024 = vmatmul.mubr.f32.gmra.mrb[28].mxu0 %v9705_v22  ;;  %15604 = vmatprep.subr.bf16.mxu1 %v15912_v2  ;;  %v20790_v22 = vld [vmem:[%s20398_s5 + $0x31] sm:$0xff] }
 0x8ca   : > { %14083 = vmatmul.mubr.f32.gmra.mrb[28].mxu1 %v9707_v15  ;;  %14026 = vmatprep.mubr.msk.f32.mxu0 %vm15913_vm5, %v15914_v35 }
 0x8cb   : > { %14085 = vmatprep.mubr.msk.f32.mxu1 %vm15913_vm5, %v15914_v35  ;;  %15582 = vmatpush3.bf16.msra.mxu0 %v15581_v17  ;;  %v9732_v17 = vld [vmem:[%s20398_s5 + $0x40] sm:$0xff] }
 0x8cc   : > { %15606 = vmatpush3.bf16.msra.mxu1 %v15605_v6  ;;  %15583 = vmatprep.subr.bf16.mxu0 %v15912_v2  ;;  %v20836_v6 = vld [vmem:[%s20398_s5 + $0x41] sm:$0xff] }
 0x8cd   : > { %14027 = vmatmul.mubr.f32.gmra.mrb[30].mxu0 %v9706_v50  ;;  %15607 = vmatprep.subr.bf16.mxu1 %v15912_v2  ;;  %v9731_v50 = vld [vmem:[%s20398_s5 + $0x38] sm:$0xff] }
 0x8ce   : > { %14086 = vmatmul.mubr.f32.gmra.mrb[30].mxu1 %v9708_v41  ;;  %14029 = vmatprep.mubr.msk.f32.mxu0 %vm15913_vm5, %v15914_v35 }
 0x8cf   : > { %14088 = vmatprep.mubr.msk.f32.mxu1 %vm15913_vm5, %v15914_v35  ;;  %15585 = vmatpush3.bf16.msra.mxu0 %v15584_v19  ;;  %v9824_v19 = vld [vmem:[%s21073_s1 + $0x3e8] sm:$0xff] }
 0x8d0   : > { %15609 = vmatpush3.bf16.msra.mxu1 %v15608_v0  ;;  %15586 = vmatprep.subr.bf16.mxu0 %v15912_v2  ;;  %v9733_v0 = vld [vmem:[%s20398_s5 + $0x48] sm:$0xff] }
 0x8d1   : > { %14030 = vmatmul.mubr.f32.gmra.mrb[32].mxu0 %v9707_v15  ;;  %15610 = vmatprep.subr.bf16.mxu1 %v15912_v2  ;;  %v9822_v15 = vld [vmem:[%s21073_s1 + $0x3d8] sm:$0xff] }
 0x8d2   : > { %14089 = vmatmul.mubr.f32.gmra.mrb[32].mxu1 %v9709_v33  ;;  %14032 = vmatprep.mubr.msk.f32.mxu0 %vm15913_vm5, %v15914_v35  ;;  %v15653_v56 = vpack.c.bf16 %v9822_v15, %v9821_v61  ;;  %v9801_v33 = vld [vmem:[%s21073_s1 + $0x378] sm:$0xff] }
 0x8d3   : > { %14091 = vmatprep.mubr.msk.f32.mxu1 %vm15913_vm5, %v15914_v35  ;;  %15588 = vmatpush3.bf16.msra.mxu0 %v15587_v12  ;;  %v9825_v12 = vld [vmem:[%s21073_s1 + $0x3f0] sm:$0xff]  ;;  %v15635_v21 = vpack.c.bf16 %v9801_v33, %v9800_v10  ;;  %v9833_v61 = vld [vmem:[%s20398_s5 + $0x5b] sm:$0xff] }
 0x8d4   : > { %15612 = vmatpush3.bf16.msra.mxu1 %v15611_v27  ;;  %15613 = vmatprep.subr.bf16.mxu0 %v15912_v2  ;;  %v9826_v27 = vld [vmem:[%s21073_s1 + $0x3f8] sm:$0xff] }
 0x8d5   : > { %14033 = vmatmul.mubr.f32.gmra.mrb[34].mxu0 %v9708_v41  ;;  %15637 = vmatprep.subr.bf16.mxu1 %v15912_v2  ;;  %v9823_v41 = vld [vmem:[%s21073_s1 + $0x3e0] sm:$0xff]  ;;  %v15659_v11 = vpack.c.bf16 %v9826_v27, %v9825_v12 }
 0x8d6   : > { %14092 = vmatmul.mubr.f32.gmra.mrb[34].mxu1 %v9710_v9  ;;  %14126 = vmatprep.mubr.msk.f32.mxu0 %vm15913_vm5, %v15914_v35  ;;  %v15656_v47 = vpack.c.bf16 %v9824_v19, %v9823_v41  ;;  %v9734_v9 = vld [vmem:[%s20398_s5 + $0x50] sm:$0xff]  ;;  %v9829_v15 = vld [vmem:[%s20398_s5 + $0x3b] sm:$0xff] }
 0x8d7   : > { %14185 = vmatprep.mubr.msk.f32.mxu1 %vm15913_vm5, %v15914_v35 }
 0x8d9   : > { %14127 = vmatmul.mubr.f32.vlgmr.msra.gmra.mrb[36].mxu0 %v9727_v5  ;;  %v20893_v5 = vld [vmem:[%s20398_s5 + $0x59] sm:$0xff] }
 0x8da   : > { %14186 = vmatmul.mubr.f32.vlgmr.msra.gmra.mrb[36].mxu1 %v9752_v3  ;;  %15615 = vmatpush3.bf16.msra.mxu0 %v15614_v31  ;;  %v9836_v31 = vld [vmem:[%s21073_s1 + $0x400] sm:$0xff]  ;;  %v9837_v3 = vld [vmem:[%s21073_s1 + $0x408] sm:$0xff] }
 0x8db   : > { %14129 = vmatprep.mubr.msk.f32.mxu0 %vm15913_vm5, %v15914_v35  ;;  %14188 = vmatprep.mubr.msk.f32.mxu1 %vm15913_vm5, %v15914_v35  ;;  %v15662_v42 = vpack.c.bf16 %v9837_v3, %v9836_v31 }
 0x8dc   : > { %15616 = vmatprep.subr.bf16.mxu0 %v15912_v2  ;;  %15639 = vmatpush3.bf16.msra.mxu1 %v15638_v28  ;;  %v9838_v28 = vld [vmem:[%s21073_s1 + $0x410] sm:$0xff] }
 0x8dd   : > { %14130 = vmatmul.mubr.f32.gmra.mrb[38].mxu0 %v9728_v29  ;;  %15640 = vmatprep.subr.bf16.mxu1 %v15912_v2  ;;  %v15665_v36 = vpack.c.bf16 %v9839_v60, %v9838_v28  ;;  %v9803_v29 = vld [vmem:[%s20398_s5 + $0x32] sm:$0xff] }
 0x8de   : > { %14189 = vmatmul.mubr.f32.gmra.mrb[38].mxu1 %v9753_v37  ;;  %15618 = vmatpush3.bf16.msra.mxu0 %v15617_v39  ;;  %v9840_v39 = vld [vmem:[%s21073_s1 + $0x420] sm:$0xff]  ;;  %v9841_v37 = vld [vmem:[%s21073_s1 + $0x428] sm:$0xff] }
 0x8df   : > { %14132 = vmatprep.mubr.msk.f32.mxu0 %vm15913_vm5, %v15914_v35  ;;  %14191 = vmatprep.mubr.msk.f32.mxu1 %vm15913_vm5, %v15914_v35  ;;  %v15668_v49 = vpack.c.bf16 %v9841_v37, %v9840_v39 }
 0x8e0   : > { %15619 = vmatprep.subr.bf16.mxu0 %v15912_v2  ;;  %15642 = vmatpush3.bf16.msra.mxu1 %v15641_v30  ;;  %v9842_v30 = vld [vmem:[%s21073_s1 + $0x430] sm:$0xff] }
 0x8e1   : > { %14133 = vmatmul.mubr.f32.gmra.mrb[40].mxu0 %v9729_v8  ;;  %15643 = vmatprep.subr.bf16.mxu1 %v15912_v2  ;;  %v15671_v8 = vpack.c.bf16 %v9843_v40, %v9842_v30 }
 0x8e2   : > { %14192 = vmatmul.mubr.f32.gmra.mrb[40].mxu1 %v20767_v32  ;;  %15621 = vmatpush3.bf16.msra.mxu0 %v15620_v34  ;;  %v9844_v34 = vld [vmem:[%s21073_s1 + $0x440] sm:$0xff] }
 0x8e3   : > { %14135 = vmatprep.mubr.msk.f32.mxu0 %vm15913_vm5, %v15914_v35  ;;  %14194 = vmatprep.mubr.msk.f32.mxu1 %vm15913_vm5, %v15914_v35 }
 0x8e4   : > { %15645 = vmatpush3.bf16.msra.mxu1 %v15644_v45  ;;  %15622 = vmatprep.subr.bf16.mxu0 %v15912_v2  ;;  %v9806_v45 = vld [vmem:[%s20398_s5 + $0x4a] sm:$0xff] }
 0x8e5   : > { %14136 = vmatmul.mubr.f32.gmra.mrb[42].mxu0 %v9730_v23  ;;  %15646 = vmatprep.subr.bf16.mxu1 %v15912_v2  ;;  %v15677_v23 = vpack.c.bf16 %v9847_v18, %v9846_v44 }
 0x8e6   : > { %14195 = vmatmul.mubr.f32.gmra.mrb[42].mxu1 %v20790_v22  ;;  %14138 = vmatprep.mubr.msk.f32.mxu0 %vm15913_vm5, %v15914_v35 }
 0x8e7   : > { %14197 = vmatprep.mubr.msk.f32.mxu1 %vm15913_vm5, %v15914_v35  ;;  %15624 = vmatpush3.bf16.msra.mxu0 %v15623_v53  ;;  %v9849_v53 = vld [vmem:[%s21073_s1 + $0x468] sm:$0xff] }
 0x8e8   : > { %15648 = vmatpush3.bf16.msra.mxu1 %v15647_v38  ;;  %15625 = vmatprep.subr.bf16.mxu0 %v15912_v2  ;;  %v9808_v38 = vld [vmem:[%s20398_s5 + $0x5a] sm:$0xff] }
 0x8e9   : > { %14139 = vmatmul.mubr.f32.gmra.mrb[44].mxu0 %v9731_v50  ;;  %15649 = vmatprep.subr.bf16.mxu1 %v15912_v2  ;;  %v9809_v50 = vld [vmem:[%s20398_s5 + $0x62] sm:$0xff] }
 0x8ea   : > { %14198 = vmatmul.mubr.f32.gmra.mrb[44].mxu1 %v20813_v13  ;;  %14141 = vmatprep.mubr.msk.f32.mxu0 %vm15913_vm5, %v15914_v35 }
 0x8eb   : > { %14200 = vmatprep.mubr.msk.f32.mxu1 %vm15913_vm5, %v15914_v35  ;;  %15627 = vmatpush3.bf16.msra.mxu0 %v15626_v52  ;;  %v9785_v52 = vld [vmem:[%s20398_s5 + $0x69] sm:$0xff] }
 0x8ec   : > { %15651 = vmatpush3.bf16.msra.mxu1 %v15650_v14  ;;  %15628 = vmatprep.subr.bf16.mxu0 %v15912_v2  ;;  %v9810_v14 = vld [vmem:[%s20398_s5 + $0x6a] sm:$0xff] }
 0x8ed   : > { %14142 = vmatmul.mubr.f32.gmra.mrb[46].mxu0 %v9732_v17  ;;  %15652 = vmatprep.subr.bf16.mxu1 %v15912_v2  ;;  %v9834_v17 = vld [vmem:[%s20398_s5 + $0x63] sm:$0xff] }
 0x8ee   : > { %14201 = vmatmul.mubr.f32.gmra.mrb[46].mxu1 %v20836_v6  ;;  %14144 = vmatprep.mubr.msk.f32.mxu0 %vm15913_vm5, %v15914_v35 }
 0x8ef   : > { %14203 = vmatprep.mubr.msk.f32.mxu1 %vm15913_vm5, %v15914_v35  ;;  %15630 = vmatpush3.bf16.msra.mxu0 %v15629_v20  ;;  %v9835_v20 = vld [vmem:[%s20398_s5 + $0x6b] sm:$0xff] }
 0x8f0   : > { %15654 = vmatpush3.bf16.msra.mxu1 %v15653_v56  ;;  %15631 = vmatprep.subr.bf16.mxu0 %v15912_v2  ;;  %v9831_v56 = vld [vmem:[%s20398_s5 + $0x4b] sm:$0xff] }
 0x8f1   : > { %14145 = vmatmul.mubr.f32.gmra.mrb[48].mxu0 %v9733_v0  ;;  %15655 = vmatprep.subr.bf16.mxu1 %v15912_v2 }
 0x8f2   : > { %14204 = vmatmul.mubr.f32.gmra.mrb[48].mxu1 %v20859_v26  ;;  %14147 = vmatprep.mubr.msk.f32.mxu0 %vm15913_vm5, %v15914_v35 }
 0x8f3   : > { %14206 = vmatprep.mubr.msk.f32.mxu1 %vm15913_vm5, %v15914_v35  ;;  %15633 = vmatpush3.bf16.msra.mxu0 %v15632_v24 }
 0x8f4   : > { %15657 = vmatpush3.bf16.msra.mxu1 %v15656_v47  ;;  %15634 = vmatprep.subr.bf16.mxu0 %v15912_v2 }
 0x8f5   : > { %14148 = vmatmul.mubr.f32.gmra.mrb[50].mxu0 %v9734_v9  ;;  %15658 = vmatprep.subr.bf16.mxu1 %v15912_v2 }
 0x8f6   : > { %14207 = vmatmul.mubr.f32.gmra.mrb[50].mxu1 %v20882_v7  ;;  %14150 = vmatprep.mubr.msk.f32.mxu0 %vm15913_vm5, %v15914_v35 }
 0x8f7   : > { %14209 = vmatprep.mubr.msk.f32.mxu1 %vm15913_vm5, %v15914_v35  ;;  %15636 = vmatpush3.bf16.msra.mxu0 %v15635_v21 }
 0x8f8   : > { %15660 = vmatpush3.bf16.msra.mxu1 %v15659_v11  ;;  %15661 = vmatprep.subr.bf16.mxu0 %v15912_v2 }
 0x8f9   : > { %14151 = vmatmul.mubr.f32.gmra.mrb[52].mxu0 %v9735_v59  ;;  %15765 = vmatprep.subr.bf16.mxu1 %v15912_v2 }
 0x8fa   : > { %14210 = vmatmul.mubr.f32.gmra.mrb[52].mxu1 %v20893_v5  ;;  %14244 = vmatprep.mubr.msk.f32.mxu0 %vm15913_vm5, %v15914_v35 }
 0x8fb   : > { %14303 = vmatprep.mubr.msk.f32.mxu1 %vm15913_vm5, %v15914_v35 }
 0x8fd   : > { %14245 = vmatmul.mubr.f32.vlgmr.msra.gmra.mrb[54].mxu0 %v20767_v32  ;;  %v9845_v32 = vld [vmem:[%s21073_s1 + $0x448] sm:$0xff] }
 0x8fe   : > { %14304 = vmatmul.mubr.f32.vlgmr.msra.gmra.mrb[54].mxu1 %v9802_v16  ;;  %15663 = vmatpush3.bf16.msra.mxu0 %v15662_v42  ;;  %v15674_v54 = vpack.c.bf16 %v9845_v32, %v9844_v34 }
 0x8ff   : > { %14247 = vmatprep.mubr.msk.f32.mxu0 %vm15913_vm5, %v15914_v35  ;;  %14306 = vmatprep.mubr.msk.f32.mxu1 %vm15913_vm5, %v15914_v35 }
 0x900   : > { %15773 = vmatpush3.bf16.msra.mxu1 %v15662_v42  ;;  %15664 = vmatprep.subr.bf16.mxu0 %v15912_v2 }
 0x901   : > { %14248 = vmatmul.mubr.f32.gmra.mrb[56].mxu0 %v20790_v22  ;;  %15766 = vmatprep.subr.bf16.mxu1 %v15912_v2  ;;  %v9848_v22 = vld [vmem:[%s21073_s1 + $0x460] sm:$0xff] }
 0x902   : > { %14307 = vmatmul.mubr.f32.gmra.mrb[56].mxu1 %v9803_v29  ;;  %15666 = vmatpush3.bf16.msra.mxu0 %v15665_v36  ;;  %v15680_v51 = vpack.c.bf16 %v9849_v53, %v9848_v22 }
 0x903   : > { %14250 = vmatprep.mubr.msk.f32.mxu0 %vm15913_vm5, %v15914_v35  ;;  %14309 = vmatprep.mubr.msk.f32.mxu1 %vm15913_vm5, %v15914_v35 }
 0x904   : > { %15774 = vmatpush3.bf16.msra.mxu1 %v15665_v36  ;;  %15667 = vmatprep.subr.bf16.mxu0 %v15912_v2 }
 0x905   : > { %14251 = vmatmul.mubr.f32.gmra.mrb[58].mxu0 %v20813_v13  ;;  %15767 = vmatprep.subr.bf16.mxu1 %v15912_v2  ;;  %v15683_v13 = vpack.c.bf16 %v9851_v46, %v9850_v63 }
 0x906   : > { %14310 = vmatmul.mubr.f32.gmra.mrb[58].mxu1 %v9804_v48  ;;  %15669 = vmatpush3.bf16.msra.mxu0 %v15668_v49 }
 0x907   : > { %14253 = vmatprep.mubr.msk.f32.mxu0 %vm15913_vm5, %v15914_v35  ;;  %14312 = vmatprep.mubr.msk.f32.mxu1 %vm15913_vm5, %v15914_v35 }
 0x908   : > { %15775 = vmatpush3.bf16.msra.mxu1 %v15668_v49  ;;  %15670 = vmatprep.subr.bf16.mxu0 %v15912_v2 }
 0x909   : > { %14254 = vmatmul.mubr.f32.gmra.mrb[60].mxu0 %v20836_v6  ;;  %15768 = vmatprep.subr.bf16.mxu1 %v15912_v2  ;;  %v9830_v6 = vld [vmem:[%s20398_s5 + $0x43] sm:$0xff] }
 0x90a   : > { %14313 = vmatmul.mubr.f32.gmra.mrb[60].mxu1 %v9805_v43  ;;  %14256 = vmatprep.mubr.msk.f32.mxu0 %vm15913_vm5, %v15914_v35 }
 0x90b   : > { %14315 = vmatprep.mubr.msk.f32.mxu1 %vm15913_vm5, %v15914_v35  ;;  %15672 = vmatpush3.bf16.msra.mxu0 %v15671_v8 }
 0x90c   : > { %15776 = vmatpush3.bf16.msra.mxu1 %v15671_v8  ;;  %15673 = vmatprep.subr.bf16.mxu0 %v15912_v2 }
 0x90d   : > { %14257 = vmatmul.mubr.f32.gmra.mrb[62].mxu0 %v20859_v26  ;;  %15769 = vmatprep.subr.bf16.mxu1 %v15912_v2 }
 0x90e   : > { %14316 = vmatmul.mubr.f32.gmra.mrb[62].mxu1 %v9806_v45  ;;  %14259 = vmatprep.mubr.msk.f32.mxu0 %vm15913_vm5, %v15914_v35 }
 0x90f   : > { %14318 = vmatprep.mubr.msk.f32.mxu1 %vm15913_vm5, %v15914_v35  ;;  %15675 = vmatpush3.bf16.msra.mxu0 %v15674_v54 }
 0x910   : > { %15777 = vmatpush3.bf16.msra.mxu1 %v15674_v54  ;;  %15676 = vmatprep.subr.bf16.mxu0 %v15912_v2 }
 0x911   : > { %14260 = vmatmul.mubr.f32.gmra.mrb[64].mxu0 %v20882_v7  ;;  %15770 = vmatprep.subr.bf16.mxu1 %v15912_v2 }
 0x912   : > { %14319 = vmatmul.mubr.f32.gmra.mrb[64].mxu1 %v9807_v58  ;;  %14262 = vmatprep.mubr.msk.f32.mxu0 %vm15913_vm5, %v15914_v35 }
 0x913   : > { %14321 = vmatprep.mubr.msk.f32.mxu1 %vm15913_vm5, %v15914_v35  ;;  %15678 = vmatpush3.bf16.msra.mxu0 %v15677_v23 }
 0x914   : > { %15778 = vmatpush3.bf16.msra.mxu1 %v15677_v23  ;;  %15679 = vmatprep.subr.bf16.mxu0 %v15912_v2 }
 0x915   : > { %14263 = vmatmul.mubr.f32.gmra.mrb[66].mxu0 %v20893_v5  ;;  %15771 = vmatprep.subr.bf16.mxu1 %v15912_v2 }
 0x916   : > { %14322 = vmatmul.mubr.f32.gmra.mrb[66].mxu1 %v9808_v38  ;;  %14265 = vmatprep.mubr.msk.f32.mxu0 %vm15913_vm5, %v15914_v35 }
 0x917   : > { %14324 = vmatprep.mubr.msk.f32.mxu1 %vm15913_vm5, %v15914_v35  ;;  %15681 = vmatpush3.bf16.msra.mxu0 %v15680_v51 }
 0x918   : > { %15779 = vmatpush3.bf16.msra.mxu1 %v15680_v51  ;;  %15682 = vmatprep.subr.bf16.mxu0 %v15912_v2 }
 0x919   : > { %14266 = vmatmul.mubr.f32.gmra.mrb[68].mxu0 %v9784_v57  ;;  %15772 = vmatprep.subr.bf16.mxu1 %v15912_v2  ;;  %v9827_v2 = vld [vmem:[%s20398_s5 + $0x2b] sm:$0xff] }
 0x91a   : > { %14325 = vmatmul.mubr.f32.gmra.mrb[68].mxu1 %v9809_v50  ;;  %14268 = vmatprep.mubr.msk.f32.mxu0 %vm15913_vm5, %v15914_v35 }
 0x91b   : > { %14327 = vmatprep.mubr.msk.f32.mxu1 %vm15913_vm5, %v15914_v35  ;;  %15684 = vmatpush3.bf16.msra.mxu0 %v15683_v13 }
 0x91c   : > { %15780 = vmatpush3.bf16.msra.mxu1 %v15683_v13 }
 0x91d   : > { %14269 = vmatmul.mubr.f32.gmra.mrb[70].mxu0 %v9785_v52 }
 0x91e   : > { %14328 = vmatmul.mubr.f32.gmra.mrb[70].mxu1 %v9810_v14  ;;  %14362 = vmatprep.mubr.msk.f32.mxu0 %vm15913_vm5, %v15914_v35 }
 0x91f   : > { %14377 = vmatprep.mubr.msk.f32.mxu1 %vm15913_vm5, %v15914_v35 }
 0x921   : > { %14363 = vmatmul.mubr.f32.vlgmr.msra.gmra.mrb[72].mxu0 %v9827_v2 }
 0x922   : > { %14378 = vmatmul.mubr.f32.vlgmr.msra.gmra.mrb[72].mxu1 %v9832_v62  ;;  %14365 = vmatprep.mubr.msk.f32.mxu0 %vm15913_vm5, %v15914_v35 }
 0x923   : > { %14380 = vmatprep.mubr.msk.f32.mxu1 %vm15913_vm5, %v15914_v35 }
 0x925   : > { %14366 = vmatmul.mubr.f32.gmra.mrb[74].mxu0 %v9828_v55 }
 0x926   : > { %14381 = vmatmul.mubr.f32.gmra.mrb[74].mxu1 %v9833_v61  ;;  %14368 = vmatprep.mubr.msk.f32.mxu0 %vm15913_vm5, %v15914_v35 }
 0x927   : > { %14383 = vmatprep.mubr.msk.f32.mxu1 %vm15913_vm5, %v15914_v35 }
 0x929   : > { %14369 = vmatmul.mubr.f32.gmra.mrb[76].mxu0 %v9829_v15 }
 0x92a   : > { %14384 = vmatmul.mubr.f32.gmra.mrb[76].mxu1 %v9834_v17  ;;  %14371 = vmatprep.mubr.msk.f32.mxu0 %vm15913_vm5, %v15914_v35 }
 0x92b   : > { %14386 = vmatprep.mubr.msk.f32.mxu1 %vm15913_vm5, %v15914_v35 }
 0x92d   : > { %14372 = vmatmul.mubr.f32.gmra.mrb[78].mxu0 %v9830_v6 }
 0x92e   : > { %14387 = vmatmul.mubr.f32.gmra.mrb[78].mxu1 %v9835_v20  ;;  %14374 = vmatprep.mubr.msk.f32.mxu0 %vm15913_vm5, %v15914_v35 }
 0x931   : > { %14375 = vmatmul.mubr.f32.gmra.mrb[80].mxu0 %v9831_v56 }
 0x964   : > { %v7122_v25 = vpop.f32.mrb[0].mxu0 }
 0x965   : > { %v13892_v4 = vpop.f32.mrb[1].mxu0  ;;  %v7232_v41 = vpop.f32.mrb[0].mxu1 }
 0x966   : > { %v7233_v19 = vadd.f32 %v7232_v41, %v7122_v25  ;;  %v13951_v0 = vpop.f32.mrb[1].mxu1 }
 0x968   : > { %v7127_v26 = vpop.f32.mrb[2].mxu0 }
 0x969   : > { %v13895_v24 = vpop.f32.mrb[3].mxu0  ;;  %v7237_v47 = vpop.f32.mrb[2].mxu1 }
 0x96a   : > { %v7238_v10 = vadd.f32 %v7237_v47, %v7127_v26  ;;  %v13954_v33 = vpop.f32.mrb[3].mxu1 }
 0x96c   : > { %v7132_v12 = vpop.f32.mrb[4].mxu0 }
 0x96d   : > { %v13898_v27 = vpop.f32.mrb[5].mxu0  ;;  %v7242_v9 = vpop.f32.mrb[4].mxu1 }
 0x96e   : > { %v7243_v7 = vadd.f32 %v7242_v9, %v7132_v12  ;;  %v13957_v21 = vpop.f32.mrb[5].mxu1 }
 0x970   : > { %v7137_v11 = vpop.f32.mrb[6].mxu0 }
 0x971   : > { %v13901_v59 = vpop.f32.mrb[7].mxu0  ;;  %v7247_v35 = vpop.f32.mrb[6].mxu1 }
 0x972   : > { %v7248_v5 = vadd.f32 %v7247_v35, %v7137_v11  ;;  %v13960_v31 = vpop.f32.mrb[7].mxu1 }
 0x974   : > { %v7142_v3 = vpop.f32.mrb[8].mxu0 }
 0x975   : > { %v13904_v42 = vpop.f32.mrb[9].mxu0  ;;  %v7252_v16 = vpop.f32.mrb[8].mxu1 }
 0x976   : > { %v7253_v28 = vadd.f32 %v7252_v16, %v7142_v3  ;;  %v13963_v60 = vpop.f32.mrb[9].mxu1 }
 0x978   : > { %v7147_v36 = vpop.f32.mrb[10].mxu0 }
 0x979   : > { %v13907_v29 = vpop.f32.mrb[11].mxu0  ;;  %v7257_v39 = vpop.f32.mrb[10].mxu1 }
 0x97a   : > { %v7258_v37 = vadd.f32 %v7257_v39, %v7147_v36  ;;  %v13966_v49 = vpop.f32.mrb[11].mxu1 }
 0x97c   : > { %v7152_v48 = vpop.f32.mrb[12].mxu0 }
 0x97d   : > { %v13910_v30 = vpop.f32.mrb[13].mxu0  ;;  %v7262_v40 = vpop.f32.mrb[12].mxu1 }
 0x97e   : > { %v7263_v43 = vadd.f32 %v7262_v40, %v7152_v48  ;;  %v13969_v8 = vpop.f32.mrb[13].mxu1 }
 0x980   : > { %v7157_v34 = vpop.f32.mrb[14].mxu0 }
 0x981   : > { %v13913_v32 = vpop.f32.mrb[15].mxu0  ;;  %v7267_v45 = vpop.f32.mrb[14].mxu1 }
 0x982   : > { %v7268_v54 = vadd.f32 %v7267_v45, %v7157_v34  ;;  %v13972_v44 = vpop.f32.mrb[15].mxu1 }
 0x984   : > { %v7162_v18 = vpop.f32.mrb[16].mxu0 }
 0x985   : > { %v13916_v58 = vpop.f32.mrb[17].mxu0  ;;  %v7272_v23 = vpop.f32.mrb[16].mxu1 }
 0x986   : > { %v7273_v22 = vadd.f32 %v7272_v23, %v7162_v18  ;;  %v13975_v53 = vpop.f32.mrb[17].mxu1 }
 0x988   : > { %v7370_v38 = vpop.f32.mrb[18].mxu0 }
 0x989   : > { %v7414_v51 = vadd.f32 %v7370_v38, %v7233_v19  ;;  %v14010_v63 = vpop.f32.mrb[19].mxu0  ;;  %v7517_v46 = vpop.f32.mrb[18].mxu1 }
 0x98a   : > { %v14069_v57 = vpop.f32.mrb[19].mxu1 }
 0x98b   : > { %v7561_v50 = vadd.f32 %v7517_v46, %v7414_v51 }
 0x98c   : > { %v7375_v13 = vpop.f32.mrb[20].mxu0 }
 0x98d   : > { %v7415_v52 = vadd.f32 %v7375_v13, %v7238_v10  ;;  %v14013_v14 = vpop.f32.mrb[21].mxu0  ;;  %v7522_v2 = vpop.f32.mrb[20].mxu1 }
 0x98e   : > { %v14072_v62 = vpop.f32.mrb[21].mxu1 }
 0x98f   : > { %v7562_v55 = vadd.f32 %v7522_v2, %v7415_v52 }
 0x990   : > { %v7380_v61 = vpop.f32.mrb[22].mxu0 }
 0x991   : > { %v7416_v15 = vadd.f32 %v7380_v61, %v7243_v7  ;;  %v14016_v17 = vpop.f32.mrb[23].mxu0  ;;  %v7527_v6 = vpop.f32.mrb[22].mxu1 }
 0x992   : > { %v14075_v20 = vpop.f32.mrb[23].mxu1 }
 0x993   : > { %v7563_v56 = vadd.f32 %v7527_v6, %v7416_v15 }
 0x994   : > { %v7385_v25 = vpop.f32.mrb[24].mxu0 }
 0x995   : > { %v7417_v4 = vadd.f32 %v7385_v25, %v7248_v5  ;;  %v14019_v41 = vpop.f32.mrb[25].mxu0  ;;  %v7532_v19 = vpop.f32.mrb[24].mxu1 }
 0x996   : > { %v14078_v0 = vpop.f32.mrb[25].mxu1 }
 0x997   : > { %v7564_v26 = vadd.f32 %v7532_v19, %v7417_v4 }
 0x998   : > { %v7390_v24 = vpop.f32.mrb[26].mxu0 }
 0x999   : > { %v7418_v47 = vadd.f32 %v7390_v24, %v7253_v28  ;;  %v14022_v33 = vpop.f32.mrb[27].mxu0  ;;  %v7537_v10 = vpop.f32.mrb[26].mxu1 }
 0x99a   : > { %v14081_v12 = vpop.f32.mrb[27].mxu1 }
 0x99b   : > { %v7565_v27 = vadd.f32 %v7537_v10, %v7418_v47 }
 0x99c   : > { %v7395_v9 = vpop.f32.mrb[28].mxu0 }
 0x99d   : > { %v7419_v21 = vadd.f32 %v7395_v9, %v7258_v37  ;;  %v14025_v11 = vpop.f32.mrb[29].mxu0  ;;  %v7542_v7 = vpop.f32.mrb[28].mxu1 }
 0x99e   : > { %v14084_v59 = vpop.f32.mrb[29].mxu1 }
 0x99f   : > { %v7566_v35 = vadd.f32 %v7542_v7, %v7419_v21 }
 0x9a0   : > { %v7400_v31 = vpop.f32.mrb[30].mxu0 }
 0x9a1   : > { %v7420_v3 = vadd.f32 %v7400_v31, %v7263_v43  ;;  %v14028_v42 = vpop.f32.mrb[31].mxu0  ;;  %v7547_v5 = vpop.f32.mrb[30].mxu1 }
 0x9a2   : > { %v14087_v16 = vpop.f32.mrb[31].mxu1 }
 0x9a3   : > { %v7567_v60 = vadd.f32 %v7547_v5, %v7420_v3 }
 0x9a4   : > { %v7405_v36 = vpop.f32.mrb[32].mxu0 }
 0x9a5   : > { %v7421_v29 = vadd.f32 %v7405_v36, %v7268_v54  ;;  %v14031_v39 = vpop.f32.mrb[33].mxu0  ;;  %v7552_v28 = vpop.f32.mrb[32].mxu1 }
 0x9a6   : > { %v14090_v49 = vpop.f32.mrb[33].mxu1 }
 0x9a7   : > { %v7568_v48 = vadd.f32 %v7552_v28, %v7421_v29 }
 0x9a8   : > { %v7410_v30 = vpop.f32.mrb[34].mxu0 }
 0x9a9   : > { %v7422_v40 = vadd.f32 %v7410_v30, %v7273_v22  ;;  %v14034_v8 = vpop.f32.mrb[35].mxu0  ;;  %v7557_v37 = vpop.f32.mrb[34].mxu1 }
 0x9aa   : > { %v14093_v34 = vpop.f32.mrb[35].mxu1 }
 0x9ab   : > { %v7569_v32 = vadd.f32 %v7557_v37, %v7422_v40 }
 0x9ac   : > { %v7664_v45 = vpop.f32.mrb[36].mxu0 }
 0x9ad   : > { %v7708_v44 = vadd.f32 %v7664_v45, %v7561_v50  ;;  %v14128_v18 = vpop.f32.mrb[37].mxu0  ;;  %v7811_v43 = vpop.f32.mrb[36].mxu1 }
 0x9ae   : > { %v14187_v58 = vpop.f32.mrb[37].mxu1 }
 0x9af   : > { %v7855_v23 = vadd.f32 %v7811_v43, %v7708_v44 }
 0x9b0   : > { %v7669_v53 = vpop.f32.mrb[38].mxu0 }
 0x9b1   : > { %v7709_v38 = vadd.f32 %v7669_v53, %v7562_v55  ;;  %v14131_v51 = vpop.f32.mrb[39].mxu0  ;;  %v7816_v54 = vpop.f32.mrb[38].mxu1 }
 0x9b2   : > { %v14190_v63 = vpop.f32.mrb[39].mxu1 }
 0x9b3   : > { %v7856_v46 = vadd.f32 %v7816_v54, %v7709_v38 }
 0x9b4   : > { %v7674_v57 = vpop.f32.mrb[40].mxu0 }
 0x9b5   : > { %v7710_v13 = vadd.f32 %v7674_v57, %v7563_v56  ;;  %v14134_v52 = vpop.f32.mrb[41].mxu0  ;;  %v7821_v22 = vpop.f32.mrb[40].mxu1 }
 0x9b6   : > { %v14193_v14 = vpop.f32.mrb[41].mxu1 }
 0x9b7   : > { %v7857_v2 = vadd.f32 %v7821_v22, %v7710_v13 }
 0x9b8   : > { %v7679_v62 = vpop.f32.mrb[42].mxu0 }
 0x9b9   : > { %v7711_v61 = vadd.f32 %v7679_v62, %v7564_v26  ;;  %v14137_v15 = vpop.f32.mrb[43].mxu0  ;;  %v7826_v50 = vpop.f32.mrb[42].mxu1 }
 0x9ba   : > { %v14196_v17 = vpop.f32.mrb[43].mxu1 }
 0x9bb   : > { %v7858_v6 = vadd.f32 %v7826_v50, %v7711_v61 }
 0x9bc   : > { %v7684_v20 = vpop.f32.mrb[44].mxu0 }
 0x9bd   : > { %v7712_v25 = vadd.f32 %v7684_v20, %v7565_v27  ;;  %v14140_v4 = vpop.f32.mrb[45].mxu0  ;;  %v7831_v55 = vpop.f32.mrb[44].mxu1 }
 0x9be   : > { %v14199_v41 = vpop.f32.mrb[45].mxu1 }
 0x9bf   : > { %v7859_v19 = vadd.f32 %v7831_v55, %v7712_v25 }
 0x9c0   : > { %v7689_v0 = vpop.f32.mrb[46].mxu0 }
 0x9c1   : > { %v7713_v24 = vadd.f32 %v7689_v0, %v7566_v35  ;;  %v14143_v47 = vpop.f32.mrb[47].mxu0  ;;  %v7836_v56 = vpop.f32.mrb[46].mxu1 }
 0x9c2   : > { %v14202_v33 = vpop.f32.mrb[47].mxu1 }
 0x9c3   : > { %v7860_v10 = vadd.f32 %v7836_v56, %v7713_v24 }
 0x9c4   : > { %v7694_v12 = vpop.f32.mrb[48].mxu0 }
 0x9c5   : > { %v7714_v9 = vadd.f32 %v7694_v12, %v7567_v60  ;;  %v14146_v21 = vpop.f32.mrb[49].mxu0  ;;  %v7841_v26 = vpop.f32.mrb[48].mxu1 }
 0x9c6   : > { %v14205_v11 = vpop.f32.mrb[49].mxu1 }
 0x9c7   : > { %v7861_v7 = vadd.f32 %v7841_v26, %v7714_v9 }
 0x9c8   : > { %v7699_v59 = vpop.f32.mrb[50].mxu0 }
 0x9c9   : > { %v7715_v31 = vadd.f32 %v7699_v59, %v7568_v48  ;;  %v14149_v3 = vpop.f32.mrb[51].mxu0  ;;  %v7846_v27 = vpop.f32.mrb[50].mxu1 }
 0x9ca   : > { %v14208_v42 = vpop.f32.mrb[51].mxu1 }
 0x9cb   : > { %v7862_v5 = vadd.f32 %v7846_v27, %v7715_v31 }
 0x9cc   : > { %v7704_v16 = vpop.f32.mrb[52].mxu0 }
 0x9cd   : > { %v7716_v36 = vadd.f32 %v7704_v16, %v7569_v32  ;;  %v14152_v29 = vpop.f32.mrb[53].mxu0  ;;  %v7851_v35 = vpop.f32.mrb[52].mxu1 }
 0x9ce   : > { %v14211_v39 = vpop.f32.mrb[53].mxu1 }
 0x9cf   : > { %v7863_v28 = vadd.f32 %v7851_v35, %v7716_v36 }
 0x9d0   : > { %v7958_v49 = vpop.f32.mrb[54].mxu0 }
 0x9d1   : > { %v8002_v30 = vadd.f32 %v7958_v49, %v7855_v23  ;;  %v14246_v40 = vpop.f32.mrb[55].mxu0  ;;  %v8105_v60 = vpop.f32.mrb[54].mxu1 }
 0x9d2   : > { %v14305_v8 = vpop.f32.mrb[55].mxu1 }
 0x9d3   : > { %v8149_v37 = vadd.f32 %v8105_v60, %v8002_v30 }
 0x9d4   : > { %v7963_v34 = vpop.f32.mrb[56].mxu0 }
 0x9d5   : > { %v8003_v45 = vadd.f32 %v7963_v34, %v7856_v46  ;;  %v14249_v44 = vpop.f32.mrb[57].mxu0  ;;  %v8110_v48 = vpop.f32.mrb[56].mxu1 }
 0x9d6   : > { %v14308_v18 = vpop.f32.mrb[57].mxu1 }
 0x9d7   : > { %v8150_v43 = vadd.f32 %v8110_v48, %v8003_v45 }
 0x9d8   : > { %v7968_v58 = vpop.f32.mrb[58].mxu0 }
 0x9d9   : > { %v8004_v53 = vadd.f32 %v7968_v58, %v7857_v2  ;;  %v14252_v38 = vpop.f32.mrb[59].mxu0  ;;  %v8115_v32 = vpop.f32.mrb[58].mxu1 }
 0x9da   : > { %v14311_v51 = vpop.f32.mrb[59].mxu1 }
 0x9db   : > { %v8151_v54 = vadd.f32 %v8115_v32, %v8004_v53 }
 0x9dc   : > { %v7973_v63 = vpop.f32.mrb[60].mxu0 }
 0x9dd   : > { %v8005_v57 = vadd.f32 %v7973_v63, %v7858_v6  ;;  %v14255_v13 = vpop.f32.mrb[61].mxu0  ;;  %v8120_v23 = vpop.f32.mrb[60].mxu1 }
 0x9de   : > { %v14314_v52 = vpop.f32.mrb[61].mxu1 }
 0x9df   : > { %v8152_v22 = vadd.f32 %v8120_v23, %v8005_v57 }
 0x9e0   : > { %v7978_v14 = vpop.f32.mrb[62].mxu0 }
 0x9e1   : > { %v8006_v62 = vadd.f32 %v7978_v14, %v7859_v19  ;;  %v14258_v61 = vpop.f32.mrb[63].mxu0  ;;  %v8125_v46 = vpop.f32.mrb[62].mxu1 }
 0x9e2   : > { %v14317_v15 = vpop.f32.mrb[63].mxu1 }
 0x9e3   : > { %v21041_v50 = vadd.f32 %v8125_v46, %v8006_v62 }
 0x9e4   : > { %v7983_v17 = vpop.f32.mrb[64].mxu0 }
 0x9e5   : > { %v8007_v20 = vadd.f32 %v7983_v17, %v7860_v10  ;;  %v14261_v2 = vpop.f32.mrb[65].mxu0  ;;  %v8130_v25 = vpop.f32.mrb[64].mxu1 }
 0x9e6   : > { %v14320_v4 = vpop.f32.mrb[65].mxu1 }
 0x9e7   : > { %v8154_v55 = vadd.f32 %v8130_v25, %v8007_v20 }
 0x9e8   : > { %v7988_v41 = vpop.f32.mrb[66].mxu0 }
 0x9e9   : > { %v8008_v0 = vadd.f32 %v7988_v41, %v7861_v7  ;;  %v14264_v6 = vpop.f32.mrb[67].mxu0  ;;  %v8135_v24 = vpop.f32.mrb[66].mxu1 }
 0x9ea   : > { %v14323_v47 = vpop.f32.mrb[67].mxu1 }
 0x9eb   : > { %v8155_v56 = vadd.f32 %v8135_v24, %v8008_v0 }
 0x9ec   : > { %v7993_v33 = vpop.f32.mrb[68].mxu0 }
 0x9ed   : > { %v8009_v19 = vadd.f32 %v7993_v33, %v7862_v5  ;;  %v14267_v12 = vpop.f32.mrb[69].mxu0  ;;  %v8140_v9 = vpop.f32.mrb[68].mxu1 }
 0x9ee   : > { %v14326_v21 = vpop.f32.mrb[69].mxu1 }
 0x9ef   : > { %v8156_v26 = vadd.f32 %v8140_v9, %v8009_v19 }
 0x9f0   : > { %v7998_v11 = vpop.f32.mrb[70].mxu0 }
 0x9f1   : > { %v8010_v59 = vadd.f32 %v7998_v11, %v7863_v28  ;;  %v14270_v10 = vpop.f32.mrb[71].mxu0  ;;  %v8145_v31 = vpop.f32.mrb[70].mxu1 }
 0x9f2   : > { %v14329_v3 = vpop.f32.mrb[71].mxu1 }
 0x9f3   : > { %v8157_v27 = vadd.f32 %v8145_v31, %v8010_v59 }
 0x9f4   : > { %v8252_v42 = vpop.f32.mrb[72].mxu0 }
 0x9f5   : > { %v8296_v16 = vadd.f32 %v8252_v42, %v8149_v37  ;;  %v8277_v7 = vpop.f32.mrb[72].mxu1  ;;  %v14364_v36 = vpop.f32.mrb[73].mxu0 }
 0x9f6   : > { %v8301_v5 = vadd.f32 %v8277_v7, %v8154_v55  ;;  %v14379_v29 = vpop.f32.mrb[73].mxu1 }
 0x9f7   : > { %v8311_v35 = vadd.f32 %v16117_v1, %v8296_v16 }
 0x9f8   : > { %v8316_v39 = vadd.f32 %v16117_v1, %v8301_v5  ;;  %v8257_v28 = vpop.f32.mrb[74].mxu0 }
 0x9f9   : > { %8321 = vst [vmem:[%s21048_s15] sm:$0xff] %v8311_v35  ;;  %v8297_v49 = vadd.f32 %v8257_v28, %v8150_v43  ;;  %v8282_v30 = vpop.f32.mrb[74].mxu1  ;;  %v14367_v40 = vpop.f32.mrb[75].mxu0 }
 0x9fa   : > { %8326 = vst [vmem:[%s21048_s15 + $0x28] sm:$0xff] %v8316_v39  ;;  %v8302_v60 = vadd.f32 %v8282_v30, %v8155_v56  ;;  %v14382_v8 = vpop.f32.mrb[75].mxu1 }
 0x9fb   : > { %v8312_v37 = vadd.f32 %v16117_v1, %v8297_v49 }
 0x9fc   : > { %v8317_v34 = vadd.f32 %v16117_v1, %v8302_v60  ;;  %v8262_v45 = vpop.f32.mrb[76].mxu0 }
 0x9fd   : > { %8322 = vst [vmem:[%s21048_s15 + $0x8] sm:$0xff] %v8312_v37  ;;  %v8298_v44 = vadd.f32 %v8262_v45, %v8151_v54  ;;  %v8287_v48 = vpop.f32.mrb[76].mxu1  ;;  %v14370_v18 = vpop.f32.mrb[77].mxu0 }
 0x9fe   : > { %8327 = vst [vmem:[%s21048_s15 + $0x30] sm:$0xff] %v8317_v34  ;;  %v8303_v58 = vadd.f32 %v8287_v48, %v8156_v26  ;;  %v14385_v43 = vpop.f32.mrb[77].mxu1 }
 0x9ff   : > { %v8313_v53 = vadd.f32 %v16117_v1, %v8298_v44 }
 0xa00   : > { %v8318_v38 = vadd.f32 %v16117_v1, %v8303_v58  ;;  %v8267_v32 = vpop.f32.mrb[78].mxu0 }
 0xa01   : > { %8323 = vst [vmem:[%s21048_s15 + $0x10] sm:$0xff] %v8313_v53  ;;  %v8299_v51 = vadd.f32 %v8267_v32, %v8152_v22  ;;  %v8292_v63 = vpop.f32.mrb[78].mxu1  ;;  %v14373_v57 = vpop.f32.mrb[79].mxu0 }
 0xa02   : > { %8328 = vst [vmem:[%s21048_s15 + $0x38] sm:$0xff] %v8318_v38  ;;  %v8304_v13 = vadd.f32 %v8292_v63, %v8157_v27  ;;  %v14388_v54 = vpop.f32.mrb[79].mxu1 }
 0xa03   : > { %v8314_v23 = vadd.f32 %v16117_v1, %v8299_v51  ;;  %6998 = sbr.rel (!%p6996_p5) target bundleno = 2159 (0x86f), region = 246 }
 0xa04   : > { %v8319_v52 = vadd.f32 %v16117_v1, %v8304_v13  ;;  %v8272_v14 = vpop.f32.mrb[80].mxu0 }
 0xa05   : > { %8324 = vst [vmem:[%s21048_s15 + $0x18] sm:$0xff] %v8314_v23  ;;  %v8300_v62 = vadd.f32 %v8272_v14, %v21041_v50  ;;  %v14376_v61 = vpop.f32.mrb[81].mxu0 }
 0xa06   : > { %8329 = vst [vmem:[%s21048_s15 + $0x40] sm:$0xff] %v8319_v52 }
 0xa07   : > { %v8315_v46 = vadd.f32 %v16117_v1, %v8300_v62 }
 0xa09   : > { %8325 = vst [vmem:[%s21048_s15 + $0x20] sm:$0xff] %v8315_v46 }

</bundles_post_ra>
